<compile_context>
chip_gen: v5e
topology: v5e:2x2
jax: 0.10.0
libtpu: 0.0.40
codegen_flags: <defaults>
</compile_context>

<pallas_src>
import functools
import math

import jax
import jax.numpy as jnp
from jax.experimental import pallas as pl
from jax.experimental.pallas import tpu as pltpu


def _gelu_tanh(y):
    c = 0.7978845608028654  # sqrt(2/pi)
    return 0.5 * y * (1.0 + jnp.tanh(c * (y + 0.044715 * y * y * y)))


# -----------------------------------------------------------------------------
# The single fused kernel: whole FNO2dDEQ forward in one launch.
# Data layout: rows = batch*channel (b-major), lanes = flattened spatial.
# -----------------------------------------------------------------------------
def _fno2d_deq_kernel(xg_ref, fcw_ref, fcb_ref, ppad_ref, pcrop_ref,
                      dfwd_ref, dinv_ref,
                      wa_blk_ref, wb_blk_ref, bw_blk_ref, bb_blk_ref,
                      wa_top_ref, wb_top_ref, w0w_ref, w0b_ref,
                      q1w_ref, q1b_ref, q2w_ref, q2b_ref,
                      o_ref, *, n_iters, batch, width, n_modes):
    f32 = jnp.float32
    B, C, M = batch, width, n_modes

    dfwd = dfwd_ref[...]          # (Nsp, 2M)  truncated rfft2 as a matmul
    dinv = dinv_ref[...]          # (2M, Nsp)  zero-filled irfft2 as a matmul

    def spectral(z, wa, wb):
        # z: (B*C, Nsp).  Truncated 2-D DFT -> per-mode complex channel mix
        # (VPU broadcast-multiply-reduce, no per-mode MXU reloads) -> inverse.
        xf = jnp.dot(z, dfwd, preferred_element_type=f32)        # (B*C, 2M) [re|im]
        xs = jnp.concatenate([xf[:, M:], xf[:, :M]], axis=1)     # [im|re]
        x4 = xf.reshape(B, C, 1, 2 * M)
        s4 = xs.reshape(B, C, 1, 2 * M)
        o3 = jnp.sum(x4 * wa[None] + s4 * wb[None], axis=1)      # (B, C, 2M)
        return jnp.dot(o3.reshape(B * C, 2 * M), dinv,
                       preferred_element_type=f32)               # (B*C, Nsp)

    # fc (nn.Linear as a batch-block-diagonal channel mix) + F.pad via matmul.
    h_fc = jnp.dot(fcw_ref[...], xg_ref[...],
                   preferred_element_type=f32) + fcb_ref[...]    # (B*C, S*S)
    x_inj = jnp.dot(h_fc, ppad_ref[...],
                    preferred_element_type=f32)                  # (B*C, Nsp)

    wa_blk = wa_blk_ref[...]
    wb_blk = wb_blk_ref[...]
    bw_blk = bw_blk_ref[...]
    bb_blk = bb_blk_ref[...]

    # DEQ fixed point (Picard iterations stand in for get_deq); all 8
    # iterations stay inside the kernel -- no HBM round trips.
    def body(_, z):
        s = spectral(z, wa_blk, wb_blk)
        p = jnp.dot(bw_blk, z, preferred_element_type=f32) + bb_blk
        return _gelu_tanh(s + p + x_inj)

    z = jax.lax.fori_loop(0, n_iters, body, jnp.zeros_like(x_inj))

    # Head: x1 = conv(z); x2 = w0(z); crop padding; q = MLP2d (fused).
    x1 = spectral(z, wa_top_ref[...], wb_top_ref[...])
    x2 = jnp.dot(w0w_ref[...], z, preferred_element_type=f32) + w0b_ref[...]
    xc = jnp.dot(x1 + x2, pcrop_ref[...],
                 preferred_element_type=f32)                     # (B*C, S*S)
    hq = _gelu_tanh(jnp.dot(q1w_ref[...], xc,
                            preferred_element_type=f32) + q1b_ref[...])
    o_ref[...] = jnp.dot(q2w_ref[...], hq,
                         preferred_element_type=f32) + q2b_ref[...]


# -----------------------------------------------------------------------------
# One-time preprocessing (hoisted out of the jitted forward).
# -----------------------------------------------------------------------------
def prepare(params, *, batch, s, padding, width, modes1, modes2):
    B = batch
    Hp = Wp = s + padding
    nsp = Hp * Wp
    M = 2 * modes1 * modes2

    def bdiag(w):
        co, ci = w.shape
        out = jnp.zeros((B * co, B * ci), jnp.float32)
        for b in range(B):
            out = out.at[b * co:(b + 1) * co, b * ci:(b + 1) * ci].set(w)
        return out

    def btile(bvec):
        return jnp.tile(bvec, B).reshape(B * bvec.shape[0], 1).astype(jnp.float32)

    # Truncated rfft2 / zero-filled irfft2 as dense matrices over the padded
    # grid.  Mode order m = r*modes2 + c, rows r: [0..m1-1, Hp-m1..Hp-1].
    k1 = jnp.concatenate([jnp.arange(modes1),
                          jnp.arange(Hp - modes1, Hp)]).astype(jnp.float32)
    k2 = jnp.arange(modes2, dtype=jnp.float32)
    hh = jnp.arange(Hp, dtype=jnp.float32)
    ww = jnp.arange(Wp, dtype=jnp.float32)
    ph = (2.0 * math.pi) * (hh[:, None, None, None] * k1[None, None, :, None] / Hp
                            + ww[None, :, None, None] * k2[None, None, None, :] / Wp)
    phase = ph.reshape(nsp, M)                                   # p = h*Wp + w
    dfwd = jnp.concatenate([jnp.cos(phase), -jnp.sin(phase)], axis=1)   # (nsp, 2M)

    # irfft2 of a spectrum that is zero outside the kept modes:
    #   x[h,w] = (1/(Hp*Wp)) * Re{ sum_m cfac(k2) * O[m] * e^{+i*phase} }
    cfac = jnp.where(k2 == 0, 1.0, 2.0)
    if Wp % 2 == 0:
        cfac = jnp.where(k2 == (Wp // 2), 1.0, cfac)
    coef = jnp.broadcast_to(cfac[None, :], (2 * modes1, modes2)).reshape(M)
    coef = coef / float(Hp * Wp)
    dinv = jnp.concatenate([coef[:, None] * jnp.cos(phase.T),
                            -coef[:, None] * jnp.sin(phase.T)], axis=0)  # (2M, nsp)

    # F.pad (right/bottom zero padding) and the final crop as selection matmuls.
    q = jnp.arange(s * s)
    p = (q // s) * Wp + (q % s)
    ppad = jnp.zeros((s * s, nsp), jnp.float32).at[q, p].set(1.0)  # (s*s, nsp)
    pcrop = ppad.T                                                  # (nsp, s*s)

    def spec_vpu(w1r, w1i, w2r, w2i):
        wr = jnp.concatenate([w1r, w2r], axis=2).reshape(width, width, M)
        wi = jnp.concatenate([w1i, w2i], axis=2).reshape(width, width, M)
        wa = jnp.concatenate([wr, wr], axis=2).astype(jnp.float32)   # pairs with [xr|xi]
        wb = jnp.concatenate([-wi, wi], axis=2).astype(jnp.float32)  # pairs with [xi|xr]
        return wa, wb

    wa_blk, wb_blk = spec_vpu(params['blk_conv_w1r'], params['blk_conv_w1i'],
                              params['blk_conv_w2r'], params['blk_conv_w2i'])
    wa_top, wb_top = spec_vpu(params['conv_w1r'], params['conv_w1i'],
                              params['conv_w2r'], params['conv_w2i'])

    return {
        'fcw': bdiag(params['fc_w']), 'fcb': btile(params['fc_b']),
        'ppad': ppad, 'pcrop': pcrop, 'dfwd': dfwd, 'dinv': dinv,
        'wa_blk': wa_blk, 'wb_blk': wb_blk,
        'bw_blk': bdiag(params['blk_w_w']), 'bb_blk': btile(params['blk_w_b']),
        'wa_top': wa_top, 'wb_top': wb_top,
        'w0w': bdiag(params['w0_w']), 'w0b': btile(params['w0_b']),
        'q1w': bdiag(params['q1_w']), 'q1b': btile(params['q1_b']),
        'q2w': bdiag(params['q2_w']), 'q2b': btile(params['q2_b']),
    }


# -----------------------------------------------------------------------------
# Jitted forward: cheap NHWC->rows glue outside, one pallas_call inside.
# -----------------------------------------------------------------------------
def fno2d_deq_apply(prep, x, *, width, out_channels, n_modes, n_iters):
    B, Sx, Sy, Cin = x.shape
    gx = jnp.broadcast_to(
        jnp.linspace(0.0, 1.0, Sx, dtype=jnp.float32).reshape(1, 1, Sx, 1),
        (B, 1, Sx, Sy))
    gy = jnp.broadcast_to(
        jnp.linspace(0.0, 1.0, Sy, dtype=jnp.float32).reshape(1, 1, 1, Sy),
        (B, 1, Sx, Sy))
    x_cf = jnp.transpose(x, (0, 3, 1, 2)).astype(jnp.float32)
    xg = jnp.concatenate([x_cf, gx, gy], axis=1).reshape(B * (Cin + 2), Sx * Sy)

    out = pl.pallas_call(
        functools.partial(_fno2d_deq_kernel, n_iters=n_iters, batch=B,
                          width=width, n_modes=n_modes),
        out_shape=jax.ShapeDtypeStruct((B * out_channels, Sx * Sy), jnp.float32),
        compiler_params=pltpu.CompilerParams(vmem_limit_bytes=32 * 1024 * 1024),
    )(xg, prep['fcw'], prep['fcb'], prep['ppad'], prep['pcrop'],
      prep['dfwd'], prep['dinv'],
      prep['wa_blk'], prep['wb_blk'], prep['bw_blk'], prep['bb_blk'],
      prep['wa_top'], prep['wb_top'], prep['w0w'], prep['w0b'],
      prep['q1w'], prep['q1b'], prep['q2w'], prep['q2b'])

    out = out.reshape(B, out_channels, Sx, Sy)
    return jnp.transpose(out, (0, 2, 3, 1))                      # permute(0,2,3,1)


# -----------------------------------------------------------------------------
# Deterministic parameter init (shapes from the module __init__),
# weights stored as (Cout, Cin) for the (C, N)-oriented kernels.
# -----------------------------------------------------------------------------
def init_params(key, in_channels, width, modes1, modes2, out_channels):
    keys = jax.random.split(key, 16)

    def uni(k, shape, scale):
        return jax.random.uniform(k, shape, jnp.float32, minval=-scale, maxval=scale)

    def pos(k, shape, scale):
        return jax.random.uniform(k, shape, jnp.float32, minval=0.0, maxval=scale)

    cin_fc = in_channels + 2
    sp_scale = 1.0 / (width * width)   # SpectralConv2d: scale * rand (cfloat)
    w_scale = 1.0 / width              # small so the Picard iteration contracts

    return {
        'fc_w': uni(keys[0], (width, cin_fc), 1.0 / (cin_fc ** 0.5)),
        'fc_b': uni(keys[1], (width,), 1.0 / (cin_fc ** 0.5)),
        'conv_w1r': pos(keys[2], (width, width, modes1, modes2), sp_scale),
        'conv_w1i': pos(keys[3], (width, width, modes1, modes2), sp_scale),
        'conv_w2r': pos(keys[4], (width, width, modes1, modes2), sp_scale),
        'conv_w2i': pos(keys[5], (width, width, modes1, modes2), sp_scale),
        'w0_w': uni(keys[6], (width, width), w_scale),
        'w0_b': uni(keys[7], (width,), w_scale),
        'blk_conv_w1r': pos(keys[8], (width, width, modes1, modes2), sp_scale),
        'blk_conv_w1i': pos(keys[9], (width, width, modes1, modes2), sp_scale),
        'blk_conv_w2r': pos(keys[10], (width, width, modes1, modes2), sp_scale),
        'blk_conv_w2i': pos(keys[11], (width, width, modes1, modes2), sp_scale),
        'blk_w_w': uni(keys[12], (width, width), w_scale),
        'blk_w_b': uni(keys[13], (width,), w_scale),
        'q1_w': uni(keys[14], (4 * width, width), 1.0 / (width ** 0.5)),
        'q1_b': jnp.zeros((4 * width,), jnp.float32),
        'q2_w': uni(keys[15], (out_channels, 4 * width), 1.0 / ((4 * width) ** 0.5)),
        'q2_b': jnp.zeros((out_channels,), jnp.float32),
    }


if __name__ == "__main__":
    B, S = 2, 16
    in_channels, out_channels = 2, 1
    width, modes1, modes2, padding = 16, 4, 4, 9
    deq_iters = 8

    key = jax.random.PRNGKey(0)
    k_x, k_p = jax.random.split(key)
    x = jax.random.normal(k_x, (B, S, S, in_channels), jnp.float32)
    params = init_params(k_p, in_channels, width, modes1, modes2, out_channels)

    # All parameter-dependent preprocessing happens once, outside jit.
    prep = prepare(params, batch=B, s=S, padding=padding, width=width,
                   modes1=modes1, modes2=modes2)

    fwd = jax.jit(functools.partial(
        fno2d_deq_apply, width=width, out_channels=out_channels,
        n_modes=2 * modes1 * modes2, n_iters=deq_iters))

    y = fwd(prep, x)
    jax.block_until_ready(y)
    assert y.shape == (B, S, S, out_channels), y.shape
    assert bool(jnp.all(jnp.isfinite(y)))
    print("KERNEL_OK")
</pallas_src>

<mosaic_0001>
module attributes {stable_mosaic.version = 11 : i64} {
  func.func @_fno2d_deq_kernel(%arg0: memref<8x256xf32, #tpu.memory_space<vmem>>, %arg1: memref<32x8xf32, #tpu.memory_space<vmem>>, %arg2: memref<32x1xf32, #tpu.memory_space<vmem>>, %arg3: memref<256x625xf32, #tpu.memory_space<vmem>>, %arg4: memref<625x256xf32, #tpu.memory_space<vmem>>, %arg5: memref<625x64xf32, #tpu.memory_space<vmem>>, %arg6: memref<64x625xf32, #tpu.memory_space<vmem>>, %arg7: memref<16x16x64xf32, #tpu.memory_space<vmem>>, %arg8: memref<16x16x64xf32, #tpu.memory_space<vmem>>, %arg9: memref<32x32xf32, #tpu.memory_space<vmem>>, %arg10: memref<32x1xf32, #tpu.memory_space<vmem>>, %arg11: memref<16x16x64xf32, #tpu.memory_space<vmem>>, %arg12: memref<16x16x64xf32, #tpu.memory_space<vmem>>, %arg13: memref<32x32xf32, #tpu.memory_space<vmem>>, %arg14: memref<32x1xf32, #tpu.memory_space<vmem>>, %arg15: memref<128x32xf32, #tpu.memory_space<vmem>>, %arg16: memref<128x1xf32, #tpu.memory_space<vmem>>, %arg17: memref<2x128xf32, #tpu.memory_space<vmem>>, %arg18: memref<2x1xf32, #tpu.memory_space<vmem>>, %arg19: memref<2x256xf32, #tpu.memory_space<vmem>>) attributes {dimension_semantics = [], scalar_prefetch = 0 : i64, scratch_operands = 0 : i64, tpu.core_type = #tpu.core_type<tc>} {
    %c0 = arith.constant 0 : index
    %c0_0 = arith.constant 0 : index
    %0 = vector.load %arg5[%c0, %c0_0] : memref<625x64xf32, #tpu.memory_space<vmem>>, vector<625x64xf32>
    %c0_1 = arith.constant 0 : index
    %c0_2 = arith.constant 0 : index
    %1 = vector.load %arg6[%c0_1, %c0_2] : memref<64x625xf32, #tpu.memory_space<vmem>>, vector<64x625xf32>
    %c0_3 = arith.constant 0 : index
    %c0_4 = arith.constant 0 : index
    %2 = vector.load %arg1[%c0_3, %c0_4] : memref<32x8xf32, #tpu.memory_space<vmem>>, vector<32x8xf32>
    %c0_5 = arith.constant 0 : index
    %c0_6 = arith.constant 0 : index
    %3 = vector.load %arg0[%c0_5, %c0_6] : memref<8x256xf32, #tpu.memory_space<vmem>>, vector<8x256xf32>
    %cst = arith.constant dense<0.000000e+00> : vector<32x256xf32>
    %4 = tpu.matmul %2, %3, %cst {dimension_numbers = #tpu.dot_dimension_numbers<[1], [0], [0], [1], [0, 0, 1, 1], [], []>} : vector<32x8xf32>, vector<8x256xf32>, vector<32x256xf32> -> vector<32x256xf32>
    %c0_7 = arith.constant 0 : index
    %c0_8 = arith.constant 0 : index
    %5 = vector.load %arg2[%c0_7, %c0_8] : memref<32x1xf32, #tpu.memory_space<vmem>>, vector<32x1xf32>
    %6 = vector.broadcast %5 : vector<32x1xf32> to vector<32x256xf32>
    %7 = arith.addf %4, %6 : vector<32x256xf32>
    %c0_9 = arith.constant 0 : index
    %c0_10 = arith.constant 0 : index
    %8 = vector.load %arg3[%c0_9, %c0_10] : memref<256x625xf32, #tpu.memory_space<vmem>>, vector<256x625xf32>
    %cst_11 = arith.constant dense<0.000000e+00> : vector<32x625xf32>
    %9 = tpu.matmul %7, %8, %cst_11 {dimension_numbers = #tpu.dot_dimension_numbers<[1], [0], [0], [1], [0, 0, 1, 1], [], []>} : vector<32x256xf32>, vector<256x625xf32>, vector<32x625xf32> -> vector<32x625xf32>
    %c0_12 = arith.constant 0 : index
    %c0_13 = arith.constant 0 : index
    %c0_14 = arith.constant 0 : index
    %10 = vector.load %arg7[%c0_12, %c0_13, %c0_14] : memref<16x16x64xf32, #tpu.memory_space<vmem>>, vector<16x16x64xf32>
    %c0_15 = arith.constant 0 : index
    %c0_16 = arith.constant 0 : index
    %c0_17 = arith.constant 0 : index
    %11 = vector.load %arg8[%c0_15, %c0_16, %c0_17] : memref<16x16x64xf32, #tpu.memory_space<vmem>>, vector<16x16x64xf32>
    %c0_18 = arith.constant 0 : index
    %c0_19 = arith.constant 0 : index
    %12 = vector.load %arg9[%c0_18, %c0_19] : memref<32x32xf32, #tpu.memory_space<vmem>>, vector<32x32xf32>
    %c0_20 = arith.constant 0 : index
    %c0_21 = arith.constant 0 : index
    %13 = vector.load %arg10[%c0_20, %c0_21] : memref<32x1xf32, #tpu.memory_space<vmem>>, vector<32x1xf32>
    %cst_22 = arith.constant 0.000000e+00 : f32
    %14 = vector.broadcast %cst_22 : f32 to vector<32x625xf32>
    %c0_i32 = arith.constant 0 : i32
    %c8_i32 = arith.constant 8 : i32
    %15 = arith.addi %c0_i32, %c8_i32 : i32
    %c1_i32 = arith.constant 1 : i32
    %16 = scf.for %arg20 = %c0_i32 to %15 step %c1_i32 iter_args(%arg21 = %14) -> (vector<32x625xf32>)  : i32 {
      %cst_56 = arith.constant dense<0.000000e+00> : vector<32x64xf32>
      %69 = tpu.matmul %arg21, %0, %cst_56 {dimension_numbers = #tpu.dot_dimension_numbers<[1], [0], [0], [1], [0, 0, 1, 1], [], []>} : vector<32x625xf32>, vector<625x64xf32>, vector<32x64xf32> -> vector<32x64xf32>
      %70 = vector.extract_strided_slice %69 {offsets = [0, 32], sizes = [32, 32], strides = [1, 1]} : vector<32x64xf32> to vector<32x32xf32>
      %71 = vector.extract_strided_slice %69 {offsets = [0, 0], sizes = [32, 32], strides = [1, 1]} : vector<32x64xf32> to vector<32x32xf32>
      %72 = tpu.concatenate %70, %71 in 1 : vector<32x32xf32>, vector<32x32xf32> -> vector<32x64xf32>
      %73 = vector.shape_cast %69 : vector<32x64xf32> to vector<2x16x1x64xf32>
      %74 = vector.shape_cast %72 : vector<32x64xf32> to vector<2x16x1x64xf32>
      %75 = vector.shape_cast %10 : vector<16x16x64xf32> to vector<1x16x16x64xf32>
      %76 = vector.broadcast %73 : vector<2x16x1x64xf32> to vector<2x16x16x64xf32>
      %77 = vector.broadcast %75 : vector<1x16x16x64xf32> to vector<2x16x16x64xf32>
      %78 = arith.mulf %76, %77 : vector<2x16x16x64xf32>
      %79 = vector.shape_cast %11 : vector<16x16x64xf32> to vector<1x16x16x64xf32>
      %80 = vector.broadcast %74 : vector<2x16x1x64xf32> to vector<2x16x16x64xf32>
      %81 = vector.broadcast %79 : vector<1x16x16x64xf32> to vector<2x16x16x64xf32>
      %82 = arith.mulf %80, %81 : vector<2x16x16x64xf32>
      %83 = arith.addf %78, %82 : vector<2x16x16x64xf32>
      %cst_57 = arith.constant dense<0.000000e+00> : vector<2x16x64xf32>
      %84 = vector.multi_reduction <add>, %83, %cst_57 [1] : vector<2x16x16x64xf32> to vector<2x16x64xf32>
      %85 = vector.shape_cast %84 : vector<2x16x64xf32> to vector<32x64xf32>
      %cst_58 = arith.constant dense<0.000000e+00> : vector<32x625xf32>
      %86 = tpu.matmul %85, %1, %cst_58 {dimension_numbers = #tpu.dot_dimension_numbers<[1], [0], [0], [1], [0, 0, 1, 1], [], []>} : vector<32x64xf32>, vector<64x625xf32>, vector<32x625xf32> -> vector<32x625xf32>
      %cst_59 = arith.constant dense<0.000000e+00> : vector<32x625xf32>
      %87 = tpu.matmul %12, %arg21, %cst_59 {dimension_numbers = #tpu.dot_dimension_numbers<[1], [0], [0], [1], [0, 0, 1, 1], [], []>} : vector<32x32xf32>, vector<32x625xf32>, vector<32x625xf32> -> vector<32x625xf32>
      %88 = vector.broadcast %13 : vector<32x1xf32> to vector<32x625xf32>
      %89 = arith.addf %87, %88 : vector<32x625xf32>
      %90 = arith.addf %86, %89 : vector<32x625xf32>
      %91 = arith.addf %90, %9 : vector<32x625xf32>
      %cst_60 = arith.constant 5.000000e-01 : f32
      %92 = vector.broadcast %cst_60 : f32 to vector<32x625xf32>
      %93 = arith.mulf %92, %91 : vector<32x625xf32>
      %cst_61 = arith.constant 4.471500e-02 : f32
      %94 = vector.broadcast %cst_61 : f32 to vector<32x625xf32>
      %95 = arith.mulf %94, %91 : vector<32x625xf32>
      %96 = arith.mulf %95, %91 : vector<32x625xf32>
      %97 = arith.mulf %96, %91 : vector<32x625xf32>
      %98 = arith.addf %91, %97 : vector<32x625xf32>
      %cst_62 = arith.constant 0.797884583 : f32
      %99 = vector.broadcast %cst_62 : f32 to vector<32x625xf32>
      %100 = arith.mulf %99, %98 : vector<32x625xf32>
      %101 = math.tanh %100 : vector<32x625xf32>
      %cst_63 = arith.constant 1.000000e+00 : f32
      %102 = vector.broadcast %cst_63 : f32 to vector<32x625xf32>
      %103 = arith.addf %102, %101 : vector<32x625xf32>
      %104 = arith.mulf %93, %103 : vector<32x625xf32>
      scf.yield %104 : vector<32x625xf32>
    }
    %c0_23 = arith.constant 0 : index
    %c0_24 = arith.constant 0 : index
    %c0_25 = arith.constant 0 : index
    %17 = vector.load %arg11[%c0_23, %c0_24, %c0_25] : memref<16x16x64xf32, #tpu.memory_space<vmem>>, vector<16x16x64xf32>
    %c0_26 = arith.constant 0 : index
    %c0_27 = arith.constant 0 : index
    %c0_28 = arith.constant 0 : index
    %18 = vector.load %arg12[%c0_26, %c0_27, %c0_28] : memref<16x16x64xf32, #tpu.memory_space<vmem>>, vector<16x16x64xf32>
    %cst_29 = arith.constant dense<0.000000e+00> : vector<32x64xf32>
    %19 = tpu.matmul %16, %0, %cst_29 {dimension_numbers = #tpu.dot_dimension_numbers<[1], [0], [0], [1], [0, 0, 1, 1], [], []>} : vector<32x625xf32>, vector<625x64xf32>, vector<32x64xf32> -> vector<32x64xf32>
    %20 = vector.extract_strided_slice %19 {offsets = [0, 32], sizes = [32, 32], strides = [1, 1]} : vector<32x64xf32> to vector<32x32xf32>
    %21 = vector.extract_strided_slice %19 {offsets = [0, 0], sizes = [32, 32], strides = [1, 1]} : vector<32x64xf32> to vector<32x32xf32>
    %22 = tpu.concatenate %20, %21 in 1 : vector<32x32xf32>, vector<32x32xf32> -> vector<32x64xf32>
    %23 = vector.shape_cast %19 : vector<32x64xf32> to vector<2x16x1x64xf32>
    %24 = vector.shape_cast %22 : vector<32x64xf32> to vector<2x16x1x64xf32>
    %25 = vector.shape_cast %17 : vector<16x16x64xf32> to vector<1x16x16x64xf32>
    %26 = vector.broadcast %23 : vector<2x16x1x64xf32> to vector<2x16x16x64xf32>
    %27 = vector.broadcast %25 : vector<1x16x16x64xf32> to vector<2x16x16x64xf32>
    %28 = arith.mulf %26, %27 : vector<2x16x16x64xf32>
    %29 = vector.shape_cast %18 : vector<16x16x64xf32> to vector<1x16x16x64xf32>
    %30 = vector.broadcast %24 : vector<2x16x1x64xf32> to vector<2x16x16x64xf32>
    %31 = vector.broadcast %29 : vector<1x16x16x64xf32> to vector<2x16x16x64xf32>
    %32 = arith.mulf %30, %31 : vector<2x16x16x64xf32>
    %33 = arith.addf %28, %32 : vector<2x16x16x64xf32>
    %cst_30 = arith.constant dense<0.000000e+00> : vector<2x16x64xf32>
    %34 = vector.multi_reduction <add>, %33, %cst_30 [1] : vector<2x16x16x64xf32> to vector<2x16x64xf32>
    %35 = vector.shape_cast %34 : vector<2x16x64xf32> to vector<32x64xf32>
    %cst_31 = arith.constant dense<0.000000e+00> : vector<32x625xf32>
    %36 = tpu.matmul %35, %1, %cst_31 {dimension_numbers = #tpu.dot_dimension_numbers<[1], [0], [0], [1], [0, 0, 1, 1], [], []>} : vector<32x64xf32>, vector<64x625xf32>, vector<32x625xf32> -> vector<32x625xf32>
    %c0_32 = arith.constant 0 : index
    %c0_33 = arith.constant 0 : index
    %37 = vector.load %arg13[%c0_32, %c0_33] : memref<32x32xf32, #tpu.memory_space<vmem>>, vector<32x32xf32>
    %cst_34 = arith.constant dense<0.000000e+00> : vector<32x625xf32>
    %38 = tpu.matmul %37, %16, %cst_34 {dimension_numbers = #tpu.dot_dimension_numbers<[1], [0], [0], [1], [0, 0, 1, 1], [], []>} : vector<32x32xf32>, vector<32x625xf32>, vector<32x625xf32> -> vector<32x625xf32>
    %c0_35 = arith.constant 0 : index
    %c0_36 = arith.constant 0 : index
    %39 = vector.load %arg14[%c0_35, %c0_36] : memref<32x1xf32, #tpu.memory_space<vmem>>, vector<32x1xf32>
    %40 = vector.broadcast %39 : vector<32x1xf32> to vector<32x625xf32>
    %41 = arith.addf %38, %40 : vector<32x625xf32>
    %42 = arith.addf %36, %41 : vector<32x625xf32>
    %c0_37 = arith.constant 0 : index
    %c0_38 = arith.constant 0 : index
    %43 = vector.load %arg4[%c0_37, %c0_38] : memref<625x256xf32, #tpu.memory_space<vmem>>, vector<625x256xf32>
    %cst_39 = arith.constant dense<0.000000e+00> : vector<32x256xf32>
    %44 = tpu.matmul %42, %43, %cst_39 {dimension_numbers = #tpu.dot_dimension_numbers<[1], [0], [0], [1], [0, 0, 1, 1], [], []>} : vector<32x625xf32>, vector<625x256xf32>, vector<32x256xf32> -> vector<32x256xf32>
    %c0_40 = arith.constant 0 : index
    %c0_41 = arith.constant 0 : index
    %45 = vector.load %arg15[%c0_40, %c0_41] : memref<128x32xf32, #tpu.memory_space<vmem>>, vector<128x32xf32>
    %cst_42 = arith.constant dense<0.000000e+00> : vector<128x256xf32>
    %46 = tpu.matmul %45, %44, %cst_42 {dimension_numbers = #tpu.dot_dimension_numbers<[1], [0], [0], [1], [0, 0, 1, 1], [], []>} : vector<128x32xf32>, vector<32x256xf32>, vector<128x256xf32> -> vector<128x256xf32>
    %c0_43 = arith.constant 0 : index
    %c0_44 = arith.constant 0 : index
    %47 = vector.load %arg16[%c0_43, %c0_44] : memref<128x1xf32, #tpu.memory_space<vmem>>, vector<128x1xf32>
    %48 = vector.broadcast %47 : vector<128x1xf32> to vector<128x256xf32>
    %49 = arith.addf %46, %48 : vector<128x256xf32>
    %cst_45 = arith.constant 5.000000e-01 : f32
    %50 = vector.broadcast %cst_45 : f32 to vector<128x256xf32>
    %51 = arith.mulf %50, %49 : vector<128x256xf32>
    %cst_46 = arith.constant 4.471500e-02 : f32
    %52 = vector.broadcast %cst_46 : f32 to vector<128x256xf32>
    %53 = arith.mulf %52, %49 : vector<128x256xf32>
    %54 = arith.mulf %53, %49 : vector<128x256xf32>
    %55 = arith.mulf %54, %49 : vector<128x256xf32>
    %56 = arith.addf %49, %55 : vector<128x256xf32>
    %cst_47 = arith.constant 0.797884583 : f32
    %57 = vector.broadcast %cst_47 : f32 to vector<128x256xf32>
    %58 = arith.mulf %57, %56 : vector<128x256xf32>
    %59 = math.tanh %58 : vector<128x256xf32>
    %cst_48 = arith.constant 1.000000e+00 : f32
    %60 = vector.broadcast %cst_48 : f32 to vector<128x256xf32>
    %61 = arith.addf %60, %59 : vector<128x256xf32>
    %62 = arith.mulf %51, %61 : vector<128x256xf32>
    %c0_49 = arith.constant 0 : index
    %c0_50 = arith.constant 0 : index
    %63 = vector.load %arg17[%c0_49, %c0_50] : memref<2x128xf32, #tpu.memory_space<vmem>>, vector<2x128xf32>
    %cst_51 = arith.constant dense<0.000000e+00> : vector<2x256xf32>
    %64 = tpu.matmul %63, %62, %cst_51 {dimension_numbers = #tpu.dot_dimension_numbers<[1], [0], [0], [1], [0, 0, 1, 1], [], []>} : vector<2x128xf32>, vector<128x256xf32>, vector<2x256xf32> -> vector<2x256xf32>
    %c0_52 = arith.constant 0 : index
    %c0_53 = arith.constant 0 : index
    %65 = vector.load %arg18[%c0_52, %c0_53] : memref<2x1xf32, #tpu.memory_space<vmem>>, vector<2x1xf32>
    %66 = vector.broadcast %65 : vector<2x1xf32> to vector<2x256xf32>
    %67 = arith.addf %64, %66 : vector<2x256xf32>
    %c0_54 = arith.constant 0 : index
    %c0_55 = arith.constant 0 : index
    %68 = vector.load %arg19[%c0_54, %c0_55] : memref<2x256xf32, #tpu.memory_space<vmem>>, vector<2x256xf32>
    tpu.vector_store %arg19[%c0_54, %c0_55], %67 {strides = array<i32>} : memref<2x256xf32, #tpu.memory_space<vmem>>, vector<2x256xf32>,
    return
  }
}

</mosaic_0001>

<bundles_post_ra>
// kernel: fno2d_deq_apply.1
= control target key start
LH: loop header
LB: loop body
LE: loop exit
PB: predicated region body
PF: predicated region fallthrough
CT: control target
= control target key end

     0   :  { %v10062_v36 = vmov 0   ;;  %vm211_vm0 = vcmask 64512   ;;  %s10038_s4 = inlined_call_operand.vmem [shape: f32[625,256], index: 4, kind: input, shape index: {}]   ;;  %s10039_s5 = inlined_call_operand.vmem [shape: f32[625,64], index: 5, kind: input, shape index: {}]   ;;  %s10040_s11 = inlined_call_operand.vmem [shape: f32[16,16,64], index: 11, kind: input, shape index: {}]   ;;  %s10041_s12 = inlined_call_operand.vmem [shape: f32[16,16,64], index: 12, kind: input, shape index: {}]   ;;  %s10042_s13 = inlined_call_operand.vmem [shape: f32[32,32], index: 13, kind: input, shape index: {}]   ;;  %s10043_s14 = inlined_call_operand.vmem [shape: f32[32,1], index: 14, kind: input, shape index: {}]   ;;  %s10044_s15 = inlined_call_operand.vmem [shape: f32[128,32], index: 15, kind: input, shape index: {}]   ;;  %s10045_s16 = inlined_call_operand.vmem [shape: f32[128,1], index: 16, kind: input, shape index: {}]   ;;  %s10046_s17 = inlined_call_operand.vmem [shape: f32[2,128], index: 17, kind: input, shape index: {}]   ;;  %s10047_s18 = inlined_call_operand.vmem [shape: f32[2,1], index: 18, kind: input, shape index: {}]   ;;  %s10048_s19 = inlined_call_operand.vmem [shape: f32[2,256], index: 19, kind: output, shape index: {}]   ;;  %s10049_s6 = inlined_call_operand.vmem [shape: f32[64,625], index: 6, kind: input, shape index: {}]   ;;  %s10050_s0 = inlined_call_operand.vmem [shape: f32[8,256], index: 0, kind: input, shape index: {}]   ;;  %s10051_s1 = inlined_call_operand.vmem [shape: f32[32,8], index: 1, kind: input, shape index: {}]   ;;  %s10052_s2 = inlined_call_operand.vmem [shape: f32[32,1], index: 2, kind: input, shape index: {}]   ;;  %s10053_s3 = inlined_call_operand.vmem [shape: f32[256,625], index: 3, kind: input, shape index: {}]   ;;  %s10054_s7 = inlined_call_operand.vmem [shape: f32[16,16,64], index: 7, kind: input, shape index: {}]   ;;  %s10055_s8 = inlined_call_operand.vmem [shape: f32[16,16,64], index: 8, kind: input, shape index: {}]   ;;  %s10056_s9 = inlined_call_operand.vmem [shape: f32[32,32], index: 9, kind: input, shape index: {}]   ;;  %s10057_s10 = inlined_call_operand.vmem [shape: f32[32,1], index: 10, kind: input, shape index: {}]  }
   0x1   :  { %10192 = sst [smem:[#allocation265_spill]] %s10038_s4  ;;  %4707 = vset.pattern.permute.xlu0 %v10062_v36  ;;  %4708 = vset.pattern.permute.xlu1 %v10062_v36 }
   0x2   :  { %10193 = sst [smem:[#allocation266_spill]] %s10039_s5 }
   0x3   :  { %10194 = sst [smem:[#allocation267_spill]] %s10040_s11 }
   0x4   :  { %10195 = sst [smem:[#allocation268_spill]] %s10041_s12 }
   0x5   :  { %s10196_s20 = sld [smem:[#allocation266_spill]] }
   0xb   :  { %v5096_v0 = vld [vmem:[%s10196_s20] sm:$0xff]  ;;  %v5101_v1 = vld [vmem:[%s10196_s20 + $0x8] sm:$0xff]  ;;  %v5106_v2 = vld [vmem:[%s10196_s20 + $0x10] sm:$0xff] }
   0xc   :  { %10197 = vst [vmem:[#allocation2_spill] sm:$0xff] %v5096_v0  ;;  %v5111_v3 = vld [vmem:[%s10196_s20 + $0x18] sm:$0xff]  ;;  %v5116_v4 = vld [vmem:[%s10196_s20 + $0x20] sm:$0xff]  ;;  %v5121_v5 = vld [vmem:[%s10196_s20 + $0x28] sm:$0xff] }
   0xd   :  { %10198 = vst [vmem:[#allocation3_spill] sm:$0xff] %v5101_v1  ;;  %v5126_v6 = vld [vmem:[%s10196_s20 + $0x30] sm:$0xff]  ;;  %v5131_v7 = vld [vmem:[%s10196_s20 + $0x38] sm:$0xff]  ;;  %v5136_v8 = vld [vmem:[%s10196_s20 + $0x40] sm:$0xff] }
   0xe   :  { %10199 = vst [vmem:[#allocation4_spill] sm:$0xff] %v5106_v2  ;;  %v5141_v9 = vld [vmem:[%s10196_s20 + $0x48] sm:$0xff]  ;;  %v5146_v10 = vld [vmem:[%s10196_s20 + $0x50] sm:$0xff]  ;;  %v5151_v11 = vld [vmem:[%s10196_s20 + $0x58] sm:$0xff] }
   0xf   :  { %10200 = vst [vmem:[#allocation5_spill] sm:$0xff] %v5111_v3  ;;  %v5156_v12 = vld [vmem:[%s10196_s20 + $0x60] sm:$0xff]  ;;  %v5161_v13 = vld [vmem:[%s10196_s20 + $0x68] sm:$0xff]  ;;  %v5166_v14 = vld [vmem:[%s10196_s20 + $0x70] sm:$0xff] }
  0x10   :  { %10201 = vst [vmem:[#allocation6_spill] sm:$0xff] %v5116_v4  ;;  %v5171_v15 = vld [vmem:[%s10196_s20 + $0x78] sm:$0xff]  ;;  %v5176_v16 = vld [vmem:[%s10196_s20 + $0x80] sm:$0xff]  ;;  %v5181_v17 = vld [vmem:[%s10196_s20 + $0x88] sm:$0xff]  ;;  %v6702_v4 = vmov 0.0  }
  0x11   :  { %10202 = vst [vmem:[#allocation7_spill] sm:$0xff] %v5121_v5  ;;  %v5186_v18 = vld [vmem:[%s10196_s20 + $0x90] sm:$0xff]  ;;  %v5191_v19 = vld [vmem:[%s10196_s20 + $0x98] sm:$0xff]  ;;  %v5196_v20 = vld [vmem:[%s10196_s20 + $0xa0] sm:$0xff] }
  0x12   :  { %10203 = vst [vmem:[#allocation8_spill] sm:$0xff] %v5126_v6  ;;  %v5201_v21 = vld [vmem:[%s10196_s20 + $0xa8] sm:$0xff]  ;;  %v5206_v22 = vld [vmem:[%s10196_s20 + $0xb0] sm:$0xff]  ;;  %v5211_v23 = vld [vmem:[%s10196_s20 + $0xb8] sm:$0xff] }
  0x13   :  { %10204 = vst [vmem:[#allocation9_spill] sm:$0xff] %v5131_v7  ;;  %v5216_v24 = vld [vmem:[%s10196_s20 + $0xc0] sm:$0xff]  ;;  %v5221_v25 = vld [vmem:[%s10196_s20 + $0xc8] sm:$0xff]  ;;  %v5226_v26 = vld [vmem:[%s10196_s20 + $0xd0] sm:$0xff] }
  0x14   :  { %10205 = vst [vmem:[#allocation10_spill] sm:$0xff] %v5136_v8  ;;  %v5231_v27 = vld [vmem:[%s10196_s20 + $0xd8] sm:$0xff]  ;;  %v5236_v28 = vld [vmem:[%s10196_s20 + $0xe0] sm:$0xff]  ;;  %v5241_v29 = vld [vmem:[%s10196_s20 + $0xe8] sm:$0xff] }
  0x15   :  { %10206 = vst [vmem:[#allocation11_spill] sm:$0xff] %v5141_v9  ;;  %v5246_v30 = vld [vmem:[%s10196_s20 + $0xf0] sm:$0xff]  ;;  %v5251_v31 = vld [vmem:[%s10196_s20 + $0xf8] sm:$0xff]  ;;  %v5256_v32 = vld [vmem:[%s10196_s20 + $0x100] sm:$0xff] }
  0x16   :  { %10207 = vst [vmem:[#allocation12_spill] sm:$0xff] %v5146_v10  ;;  %v5261_v33 = vld [vmem:[%s10196_s20 + $0x108] sm:$0xff]  ;;  %v5266_v34 = vld [vmem:[%s10196_s20 + $0x110] sm:$0xff]  ;;  %v5271_v35 = vld [vmem:[%s10196_s20 + $0x118] sm:$0xff] }
  0x17   :  { %10208 = vst [vmem:[#allocation13_spill] sm:$0xff] %v5151_v11  ;;  %v5278_v37 = vld [vmem:[%s10196_s20 + $0x120] sm:$0xff]  ;;  %v5283_v38 = vld [vmem:[%s10196_s20 + $0x128] sm:$0xff]  ;;  %v5288_v39 = vld [vmem:[%s10196_s20 + $0x130] sm:$0xff] }
  0x18   :  { %10209 = vst [vmem:[#allocation14_spill] sm:$0xff] %v5156_v12  ;;  %v5293_v40 = vld [vmem:[%s10196_s20 + $0x138] sm:$0xff]  ;;  %v5298_v41 = vld [vmem:[%s10196_s20 + $0x140] sm:$0xff]  ;;  %v5303_v42 = vld [vmem:[%s10196_s20 + $0x148] sm:$0xff] }
  0x19   :  { %10210 = vst [vmem:[#allocation15_spill] sm:$0xff] %v5161_v13  ;;  %v5308_v43 = vld [vmem:[%s10196_s20 + $0x150] sm:$0xff]  ;;  %v5313_v44 = vld [vmem:[%s10196_s20 + $0x158] sm:$0xff]  ;;  %v5318_v45 = vld [vmem:[%s10196_s20 + $0x160] sm:$0xff] }
  0x1a   :  { %10211 = vst [vmem:[#allocation16_spill] sm:$0xff] %v5166_v14  ;;  %v5323_v46 = vld [vmem:[%s10196_s20 + $0x168] sm:$0xff]  ;;  %v5328_v47 = vld [vmem:[%s10196_s20 + $0x170] sm:$0xff]  ;;  %v5333_v48 = vld [vmem:[%s10196_s20 + $0x178] sm:$0xff] }
  0x1b   :  { %10212 = vst [vmem:[#allocation17_spill] sm:$0xff] %v5171_v15  ;;  %v5338_v49 = vld [vmem:[%s10196_s20 + $0x180] sm:$0xff]  ;;  %v5343_v50 = vld [vmem:[%s10196_s20 + $0x188] sm:$0xff]  ;;  %v5348_v51 = vld [vmem:[%s10196_s20 + $0x190] sm:$0xff] }
  0x1c   :  { %10213 = vst [vmem:[#allocation18_spill] sm:$0xff] %v5176_v16  ;;  %v5353_v52 = vld [vmem:[%s10196_s20 + $0x198] sm:$0xff]  ;;  %v5358_v53 = vld [vmem:[%s10196_s20 + $0x1a0] sm:$0xff]  ;;  %v5363_v54 = vld [vmem:[%s10196_s20 + $0x1a8] sm:$0xff] }
  0x1d   :  { %10214 = vst [vmem:[#allocation19_spill] sm:$0xff] %v5181_v17  ;;  %v5368_v55 = vld [vmem:[%s10196_s20 + $0x1b0] sm:$0xff]  ;;  %v5373_v56 = vld [vmem:[%s10196_s20 + $0x1b8] sm:$0xff]  ;;  %v5378_v57 = vld [vmem:[%s10196_s20 + $0x1c0] sm:$0xff] }
  0x1e   :  { %10215 = vst [vmem:[#allocation20_spill] sm:$0xff] %v5186_v18  ;;  %v5383_v58 = vld [vmem:[%s10196_s20 + $0x1c8] sm:$0xff]  ;;  %v5388_v59 = vld [vmem:[%s10196_s20 + $0x1d0] sm:$0xff]  ;;  %v5393_v60 = vld [vmem:[%s10196_s20 + $0x1d8] sm:$0xff] }
  0x1f   :  { %10216 = vst [vmem:[#allocation21_spill] sm:$0xff] %v5191_v19  ;;  %v5398_v61 = vld [vmem:[%s10196_s20 + $0x1e0] sm:$0xff]  ;;  %v5403_v62 = vld [vmem:[%s10196_s20 + $0x1e8] sm:$0xff]  ;;  %v5408_v63 = vld [vmem:[%s10196_s20 + $0x1f0] sm:$0xff] }
  0x20   :  { %10217 = vst [vmem:[#allocation22_spill] sm:$0xff] %v5196_v20  ;;  %v5413_v36 = vld [vmem:[%s10196_s20 + $0x1f8] sm:$0xff]  ;;  %v5428_v16 = vld [vmem:[%s10196_s20 + $0x210] sm:$0xff]  ;;  %v182_v1 = vld [vmem:[%s10051_s1 + $0x8] sm:$0xff]  ;;  %v6700_v20 = vmov 0.0  }
  0x21   :  { %10218 = vst [vmem:[#allocation23_spill] sm:$0xff] %v5201_v21  ;;  %v5433_v0 = vld [vmem:[%s10196_s20 + $0x218] sm:$0xff]  ;;  %v416_v19 = vld [vmem:[%s10053_s3 + $0x430] sm:$0xff] }
  0x22   :  { %10219 = vst [vmem:[#allocation24_spill] sm:$0xff] %v5206_v22  ;;  %v353_v17 = vld [vmem:[%s10053_s3 + $0x238] sm:$0xff] }
  0x23   :  { %10220 = vst [vmem:[#allocation25_spill] sm:$0xff] %v5211_v23 }
  0x24   :  { %10221 = vst [vmem:[#allocation26_spill] sm:$0xff] %v5216_v24 }
  0x25   :  { %10222 = vst [vmem:[#allocation27_spill] sm:$0xff] %v5221_v25 }
  0x26   :  { %10223 = vst [vmem:[#allocation28_spill] sm:$0xff] %v5226_v26 }
  0x27   :  { %10224 = vst [vmem:[#allocation29_spill] sm:$0xff] %v5231_v27 }
  0x28   :  { %10225 = vst [vmem:[#allocation30_spill] sm:$0xff] %v5236_v28 }
  0x29   :  { %10226 = vst [vmem:[#allocation31_spill] sm:$0xff] %v5241_v29 }
  0x2a   :  { %10227 = vst [vmem:[#allocation32_spill] sm:$0xff] %v5246_v30 }
  0x2b   :  { %10228 = vst [vmem:[#allocation33_spill] sm:$0xff] %v5251_v31 }
  0x2c   :  { %10229 = vst [vmem:[#allocation34_spill] sm:$0xff] %v5256_v32  ;;  %v5423_v32 = vld [vmem:[%s10196_s20 + $0x208] sm:$0xff] }
  0x2d   :  { %10230 = vst [vmem:[#allocation35_spill] sm:$0xff] %v5261_v33  ;;  %v437_v33 = vld [vmem:[%s10053_s3 + $0x4d8] sm:$0xff] }
  0x2e   :  { %10231 = vst [vmem:[#allocation36_spill] sm:$0xff] %v5266_v34  ;;  %471 = vmatpush.msra.mxu3 %v437_v33  ;;  %v347_v33 = vld [vmem:[%s10053_s3 + $0x208] sm:$0xff]  ;;  %v190_v34 = vld [vmem:[%s10052_s2 + $0x18] sm:$0xff] }
  0x2f   :  { %10232 = vst [vmem:[#allocation37_spill] sm:$0xff] %v5271_v35 }
  0x30   :  { %10233 = vst [vmem:[#allocation38_spill] sm:$0xff] %v5278_v37  ;;  %v6698_v37 = vmov 0.0  }
  0x31   :  { %10234 = vst [vmem:[#allocation39_spill] sm:$0xff] %v5283_v38 }
  0x32   :  { %10235 = vst [vmem:[#allocation40_spill] sm:$0xff] %v5288_v39 }
  0x33   :  { %10236 = vst [vmem:[#allocation41_spill] sm:$0xff] %v5293_v40 }
  0x34   :  { %10237 = vst [vmem:[#allocation42_spill] sm:$0xff] %v5298_v41 }
  0x35   :  { %10238 = vst [vmem:[#allocation43_spill] sm:$0xff] %v5303_v42 }
  0x36   :  { %10239 = vst [vmem:[#allocation44_spill] sm:$0xff] %v5308_v43 }
  0x37   :  { %10240 = vst [vmem:[#allocation45_spill] sm:$0xff] %v5313_v44 }
  0x38   :  { %10241 = vst [vmem:[#allocation46_spill] sm:$0xff] %v5318_v45 }
  0x39   :  { %10242 = vst [vmem:[#allocation47_spill] sm:$0xff] %v5323_v46 }
  0x3a   :  { %10243 = vst [vmem:[#allocation48_spill] sm:$0xff] %v5328_v47 }
  0x3b   :  { %10244 = vst [vmem:[#allocation49_spill] sm:$0xff] %v5333_v48 }
  0x3c   :  { %10245 = vst [vmem:[#allocation50_spill] sm:$0xff] %v5338_v49  ;;  %v5418_v49 = vld [vmem:[%s10196_s20 + $0x200] sm:$0xff] }
  0x3d   :  { %10246 = vst [vmem:[#allocation51_spill] sm:$0xff] %v5343_v50  ;;  %v5438_v50 = vld [vmem:[%s10196_s20 + $0x220] sm:$0xff] }
  0x3e   :  { %10247 = vst [vmem:[#allocation52_spill] sm:$0xff] %v5348_v51  ;;  %v188_v51 = vld [vmem:[%s10052_s2 + $0x8] sm:$0xff] }
  0x3f   :  { %10248 = vst [vmem:[#allocation53_spill] sm:$0xff] %v5353_v52  ;;  %v364_v52 = vld [vmem:[%s10053_s3 + $0x290] sm:$0xff] }
  0x40   :  { %10249 = vst [vmem:[#allocation54_spill] sm:$0xff] %v5358_v53  ;;  %v401_v53 = vld [vmem:[%s10053_s3 + $0x3b8] sm:$0xff] }
  0x41   :  { %10250 = vst [vmem:[#allocation55_spill] sm:$0xff] %v5363_v54 }
  0x42   :  { %10251 = vst [vmem:[#allocation56_spill] sm:$0xff] %v5368_v55 }
  0x43   :  { %10252 = vst [vmem:[#allocation57_spill] sm:$0xff] %v5373_v56 }
  0x44   :  { %10253 = vst [vmem:[#allocation58_spill] sm:$0xff] %v5378_v57 }
  0x45   :  { %10254 = vst [vmem:[#allocation59_spill] sm:$0xff] %v5383_v58 }
  0x46   :  { %10255 = vst [vmem:[#allocation60_spill] sm:$0xff] %v5388_v59 }
  0x47   :  { %10256 = vst [vmem:[#allocation61_spill] sm:$0xff] %v5393_v60 }
  0x48   :  { %10257 = vst [vmem:[#allocation62_spill] sm:$0xff] %v5398_v61 }
  0x49   :  { %10258 = vst [vmem:[#allocation63_spill] sm:$0xff] %v5403_v62 }
  0x4a   :  { %10259 = vst [vmem:[#allocation64_spill] sm:$0xff] %v5408_v63 }
  0x4b   :  { %10260 = vst [vmem:[#allocation65_spill] sm:$0xff] %v5413_v36 }
  0x4c   :  { %10261 = vst [vmem:[#allocation66_spill] sm:$0xff] %v5418_v49  ;;  %v5443_v49 = vld [vmem:[%s10196_s20 + $0x228] sm:$0xff] }
  0x4d   :  { %10262 = vst [vmem:[#allocation67_spill] sm:$0xff] %v5423_v32  ;;  %v5448_v32 = vld [vmem:[%s10196_s20 + $0x230] sm:$0xff] }
  0x4e   :  { %10263 = vst [vmem:[#allocation68_spill] sm:$0xff] %v5428_v16  ;;  %v5453_v16 = vld [vmem:[%s10196_s20 + $0x238] sm:$0xff] }
  0x4f   :  { %10264 = vst [vmem:[#allocation69_spill] sm:$0xff] %v5433_v0  ;;  %v5458_v0 = vld [vmem:[%s10196_s20 + $0x240] sm:$0xff] }
  0x50   :  { %10265 = vst [vmem:[#allocation70_spill] sm:$0xff] %v5438_v50  ;;  %v5463_v50 = vld [vmem:[%s10196_s20 + $0x248] sm:$0xff] }
  0x51   :  { %10266 = vst [vmem:[#allocation71_spill] sm:$0xff] %v5443_v49  ;;  %v5468_v49 = vld [vmem:[%s10196_s20 + $0x250] sm:$0xff] }
  0x52   :  { %10267 = vst [vmem:[#allocation72_spill] sm:$0xff] %v5448_v32  ;;  %v5473_v32 = vld [vmem:[%s10196_s20 + $0x258] sm:$0xff] }
  0x53   :  { %10268 = vst [vmem:[#allocation73_spill] sm:$0xff] %v5453_v16  ;;  %v5478_v16 = vld [vmem:[%s10196_s20 + $0x260] sm:$0xff] }
  0x54   :  { %10269 = vst [vmem:[#allocation74_spill] sm:$0xff] %v5458_v0  ;;  %v5483_v0 = vld [vmem:[%s10196_s20 + $0x268] sm:$0xff] }
  0x55   :  { %10270 = vst [vmem:[#allocation75_spill] sm:$0xff] %v5463_v50  ;;  %v5488_v50 = vld [vmem:[%s10196_s20 + $0x270] sm:$0x1] }
  0x56   :  { %10271 = vst [vmem:[#allocation76_spill] sm:$0xff] %v5468_v49  ;;  %v5493_v49 = vld [vmem:[%s10049_s6] sm:$0xff] }
  0x57   :  { %10272 = vst [vmem:[#allocation77_spill] sm:$0xff] %v5473_v32  ;;  %v5498_v32 = vld [vmem:[%s10049_s6 + $0x8] sm:$0xff] }
  0x58   :  { %10273 = vst [vmem:[#allocation78_spill] sm:$0xff] %v5478_v16  ;;  %v5503_v16 = vld [vmem:[%s10049_s6 + $0x10] sm:$0xff] }
  0x59   :  { %10274 = vst [vmem:[#allocation79_spill] sm:$0xff] %v5483_v0  ;;  %v5508_v0 = vld [vmem:[%s10049_s6 + $0x18] sm:$0xff] }
  0x5a   :  { %10275 = vst [vmem:[#allocation80_spill] sm:$0xff] %v5488_v50  ;;  %v5513_v50 = vld [vmem:[%s10049_s6 + $0x20] sm:$0xff] }
  0x5b   :  { %10276 = vst [vmem:[#allocation81_spill] sm:$0xff] %v5493_v49  ;;  %v5518_v49 = vld [vmem:[%s10049_s6 + $0x28] sm:$0xff] }
  0x5c   :  { %10277 = vst [vmem:[#allocation82_spill] sm:$0xff] %v5498_v32  ;;  %v5523_v32 = vld [vmem:[%s10049_s6 + $0x30] sm:$0xff] }
  0x5d   :  { %10278 = vst [vmem:[#allocation83_spill] sm:$0xff] %v5503_v16  ;;  %v5528_v16 = vld [vmem:[%s10049_s6 + $0x38] sm:$0xff] }
  0x5e   :  { %10279 = vst [vmem:[#allocation84_spill] sm:$0xff] %v5508_v0  ;;  %v5533_v0 = vld [vmem:[%s10049_s6 + $0x40] sm:$0xff] }
  0x5f   :  { %10280 = vst [vmem:[#allocation85_spill] sm:$0xff] %v5513_v50  ;;  %v5538_v50 = vld [vmem:[%s10049_s6 + $0x48] sm:$0xff] }
  0x60   :  { %10281 = vst [vmem:[#allocation86_spill] sm:$0xff] %v5518_v49  ;;  %v5543_v49 = vld [vmem:[%s10049_s6 + $0x50] sm:$0xff] }
  0x61   :  { %10282 = vst [vmem:[#allocation87_spill] sm:$0xff] %v5523_v32  ;;  %v5548_v32 = vld [vmem:[%s10049_s6 + $0x58] sm:$0xff] }
  0x62   :  { %10283 = vst [vmem:[#allocation88_spill] sm:$0xff] %v5528_v16  ;;  %v5553_v16 = vld [vmem:[%s10049_s6 + $0x60] sm:$0xff] }
  0x63   :  { %10284 = vst [vmem:[#allocation89_spill] sm:$0xff] %v5533_v0  ;;  %v5558_v0 = vld [vmem:[%s10049_s6 + $0x68] sm:$0xff] }
  0x64   :  { %10285 = vst [vmem:[#allocation90_spill] sm:$0xff] %v5538_v50  ;;  %v5563_v50 = vld [vmem:[%s10049_s6 + $0x70] sm:$0xff] }
  0x65   :  { %10286 = vst [vmem:[#allocation91_spill] sm:$0xff] %v5543_v49  ;;  %v5568_v49 = vld [vmem:[%s10049_s6 + $0x78] sm:$0xff] }
  0x66   :  { %10287 = vst [vmem:[#allocation92_spill] sm:$0xff] %v5548_v32  ;;  %v5573_v32 = vld [vmem:[%s10049_s6 + $0x80] sm:$0xff] }
  0x67   :  { %10288 = vst [vmem:[#allocation93_spill] sm:$0xff] %v5553_v16  ;;  %v5578_v16 = vld [vmem:[%s10049_s6 + $0x88] sm:$0xff] }
  0x68   :  { %10289 = vst [vmem:[#allocation94_spill] sm:$0xff] %v5558_v0  ;;  %v5583_v0 = vld [vmem:[%s10049_s6 + $0x90] sm:$0xff] }
  0x69   :  { %10290 = vst [vmem:[#allocation95_spill] sm:$0xff] %v5563_v50  ;;  %v5588_v50 = vld [vmem:[%s10049_s6 + $0x98] sm:$0xff] }
  0x6a   :  { %10291 = vst [vmem:[#allocation96_spill] sm:$0xff] %v5568_v49  ;;  %v5593_v49 = vld [vmem:[%s10049_s6 + $0xa0] sm:$0xff] }
  0x6b   :  { %10292 = vst [vmem:[#allocation97_spill] sm:$0xff] %v5573_v32  ;;  %v5598_v32 = vld [vmem:[%s10049_s6 + $0xa8] sm:$0xff] }
  0x6c   :  { %10293 = vst [vmem:[#allocation98_spill] sm:$0xff] %v5578_v16  ;;  %v5603_v16 = vld [vmem:[%s10049_s6 + $0xb0] sm:$0xff] }
  0x6d   :  { %10294 = vst [vmem:[#allocation99_spill] sm:$0xff] %v5583_v0  ;;  %v5608_v0 = vld [vmem:[%s10049_s6 + $0xb8] sm:$0xff] }
  0x6e   :  { %10295 = vst [vmem:[#allocation100_spill] sm:$0xff] %v5588_v50  ;;  %v5613_v50 = vld [vmem:[%s10049_s6 + $0xc0] sm:$0xff] }
  0x6f   :  { %10296 = vst [vmem:[#allocation101_spill] sm:$0xff] %v5593_v49  ;;  %v5618_v49 = vld [vmem:[%s10049_s6 + $0xc8] sm:$0xff] }
  0x70   :  { %10297 = vst [vmem:[#allocation102_spill] sm:$0xff] %v5598_v32  ;;  %v5623_v32 = vld [vmem:[%s10049_s6 + $0xd0] sm:$0xff] }
  0x71   :  { %10298 = vst [vmem:[#allocation103_spill] sm:$0xff] %v5603_v16  ;;  %v5628_v16 = vld [vmem:[%s10049_s6 + $0xd8] sm:$0xff] }
  0x72   :  { %10299 = vst [vmem:[#allocation104_spill] sm:$0xff] %v5608_v0  ;;  %v5633_v0 = vld [vmem:[%s10049_s6 + $0xe0] sm:$0xff] }
  0x73   :  { %10300 = vst [vmem:[#allocation105_spill] sm:$0xff] %v5613_v50  ;;  %v5638_v50 = vld [vmem:[%s10049_s6 + $0xe8] sm:$0xff] }
  0x74   :  { %10301 = vst [vmem:[#allocation106_spill] sm:$0xff] %v5618_v49  ;;  %v5643_v49 = vld [vmem:[%s10049_s6 + $0xf0] sm:$0xff] }
  0x75   :  { %10302 = vst [vmem:[#allocation107_spill] sm:$0xff] %v5623_v32  ;;  %v5648_v32 = vld [vmem:[%s10049_s6 + $0xf8] sm:$0xff] }
  0x76   :  { %10303 = vst [vmem:[#allocation108_spill] sm:$0xff] %v5628_v16  ;;  %v5653_v16 = vld [vmem:[%s10049_s6 + $0x100] sm:$0xff] }
  0x77   :  { %10304 = vst [vmem:[#allocation109_spill] sm:$0xff] %v5633_v0  ;;  %v5658_v0 = vld [vmem:[%s10049_s6 + $0x108] sm:$0xff] }
  0x78   :  { %10305 = vst [vmem:[#allocation110_spill] sm:$0xff] %v5638_v50  ;;  %v5663_v50 = vld [vmem:[%s10049_s6 + $0x110] sm:$0xff] }
  0x79   :  { %10306 = vst [vmem:[#allocation111_spill] sm:$0xff] %v5643_v49  ;;  %v5668_v49 = vld [vmem:[%s10049_s6 + $0x118] sm:$0xff] }
  0x7a   :  { %10307 = vst [vmem:[#allocation112_spill] sm:$0xff] %v5648_v32  ;;  %v5673_v32 = vld [vmem:[%s10049_s6 + $0x120] sm:$0xff] }
  0x7b   :  { %10308 = vst [vmem:[#allocation113_spill] sm:$0xff] %v5653_v16  ;;  %v5678_v16 = vld [vmem:[%s10049_s6 + $0x128] sm:$0xff] }
  0x7c   :  { %10309 = vst [vmem:[#allocation114_spill] sm:$0xff] %v5658_v0  ;;  %v5688_v0 = vld [vmem:[%s10049_s6 + $0x138] sm:$0xff] }
  0x7d   :  { %10310 = vst [vmem:[#allocation115_spill] sm:$0xff] %v5663_v50  ;;  %v5683_v50 = vld [vmem:[%s10049_s6 + $0x130] sm:$0xff] }
  0x7e   :  { %10311 = vst [vmem:[#allocation116_spill] sm:$0xff] %v5668_v49  ;;  %v181_v49 = vld [vmem:[%s10051_s1] sm:$0xff] }
  0x7f   :  { %10312 = vst [vmem:[#allocation117_spill] sm:$0xff] %v5673_v32  ;;  %v185_v32 = vld [vmem:[%s10050_s0] sm:$0xff] }
  0x80   :  { %10313 = vst [vmem:[#allocation118_spill] sm:$0xff] %v5678_v16  ;;  %239 = vmatpush.msra.mxu0 %v185_v32  ;;  %v186_v16 = vld [vmem:[%s10050_s0 + $0x8] sm:$0xff]  ;;  %v189_v32 = vld [vmem:[%s10052_s2 + $0x10] sm:$0xff] }
  0x81   :  { %10314 = vst [vmem:[#allocation119_spill] sm:$0xff] %v5683_v50  ;;  %v187_v50 = vld [vmem:[%s10052_s2] sm:$0xff]  ;;  %268 = vmatpush.msra.mxu1 %v186_v16  ;;  %4337 = vmatmul.msk.f32.vlgmr.msra.gmra.mxu0 %vm211_vm0, %v181_v49 }
  0x82   :  { %10315 = vst [vmem:[#allocation120_spill] sm:$0xff] %v5688_v0  ;;  %4341 = vmatmul.msk.f32.vlgmr.msra.gmra.mxu1 %vm211_vm0, %v181_v49  ;;  %193 = vperm.xlu0 %4707, %v187_v50   ;;  %v357_v0 = vld [vmem:[%s10053_s3 + $0x258] sm:$0xff]  ;;  %v358_v16 = vld [vmem:[%s10053_s3 + $0x260] sm:$0xff]  ;;  %v352_v50 = vld [vmem:[%s10053_s3 + $0x230] sm:$0xff] }
  0x83   :  { %203 = vperm.xlu1 %4708, %v189_v32   ;;  %442 = vmatpush.msra.mxu2 %v357_v0  ;;  %v438_v49 = vld [vmem:[%s10053_s3 + $0x4e0] sm:$0xff]  ;;  %v432_v32 = vld [vmem:[%s10053_s3 + $0x4b0] sm:$0xff]  ;;  %v433_v0 = vld [vmem:[%s10053_s3 + $0x4b8] sm:$0xff] }
  0x84   :  { %500 = vmatpush.msrb.mxu0 %v358_v16  ;;  %529 = vmatpush.msrb.mxu1 %v438_v49  ;;  %v427_v16 = vld [vmem:[%s10053_s3 + $0x488] sm:$0xff]  ;;  %v428_v49 = vld [vmem:[%s10053_s3 + $0x490] sm:$0xff] }
  0x85   :  { %443 = vmatpush.msra.mxu2 %v352_v50  ;;  %472 = vmatpush.msra.mxu3 %v432_v32  ;;  %v348_v50 = vld [vmem:[%s10053_s3 + $0x210] sm:$0xff]  ;;  %v342_v32 = vld [vmem:[%s10053_s3 + $0x1e0] sm:$0xff] }
  0x86   :  { %501 = vmatpush.msrb.mxu0 %v353_v17  ;;  %530 = vmatpush.msrb.mxu1 %v433_v0  ;;  %v422_v17 = vld [vmem:[%s10053_s3 + $0x460] sm:$0xff]  ;;  %v343_v0 = vld [vmem:[%s10053_s3 + $0x1e8] sm:$0xff] }
  0x87   :  { %444 = vmatpush.msra.mxu2 %v347_v33  ;;  %473 = vmatpush.msra.mxu3 %v427_v16  ;;  %v423_v33 = vld [vmem:[%s10053_s3 + $0x468] sm:$0xff]  ;;  %v337_v16 = vld [vmem:[%s10053_s3 + $0x1b8] sm:$0xff] }
  0x88   :  { %531 = vmatpush.msrb.mxu1 %v428_v49  ;;  %502 = vmatpush.msrb.mxu0 %v348_v50  ;;  %v417_v49 = vld [vmem:[%s10053_s3 + $0x438] sm:$0xff]  ;;  %v412_v50 = vld [vmem:[%s10053_s3 + $0x410] sm:$0xff] }
  0x89   :  { %4338 = vmatmul.msk.f32.gmra.mxu0 %vm211_vm0, %v182_v1  ;;  %445 = vmatpush.msra.mxu2 %v342_v32  ;;  %v183_v32 = vld [vmem:[%s10051_s1 + $0x10] sm:$0xff] }
  0x8a   :  { %4342 = vmatmul.msk.f32.gmra.mxu1 %vm211_vm0, %v182_v1  ;;  %198 = vperm.xlu0 %4707, %v188_v51   ;;  %v338_v1 = vld [vmem:[%s10053_s3 + $0x1c0] sm:$0xff] }
  0x8b   :  { %208 = vperm.xlu1 %4708, %v190_v34   ;;  %474 = vmatpush.msra.mxu3 %v422_v17  ;;  %v418_v51 = vld [vmem:[%s10053_s3 + $0x440] sm:$0xff]  ;;  %v332_v34 = vld [vmem:[%s10053_s3 + $0x190] sm:$0xff]  ;;  %v413_v17 = vld [vmem:[%s10053_s3 + $0x418] sm:$0xff] }
  0x8c   :  { %503 = vmatpush.msrb.mxu0 %v343_v0  ;;  %532 = vmatpush.msrb.mxu1 %v423_v33  ;;  %v333_v0 = vld [vmem:[%s10053_s3 + $0x198] sm:$0xff]  ;;  %v327_v33 = vld [vmem:[%s10053_s3 + $0x168] sm:$0xff] }
  0x8d   :  { %446 = vmatpush.msra.mxu2 %v337_v16  ;;  %475 = vmatpush.msra.mxu3 %v417_v49  ;;  %v407_v16 = vld [vmem:[%s10053_s3 + $0x3e8] sm:$0xff]  ;;  %v328_v49 = vld [vmem:[%s10053_s3 + $0x170] sm:$0xff] }
  0x8e   :  { %504 = vmatpush.msrb.mxu0 %v338_v1  ;;  %533 = vmatpush.msrb.mxu1 %v418_v51  ;;  %v408_v1 = vld [vmem:[%s10053_s3 + $0x3f0] sm:$0xff]  ;;  %v322_v51 = vld [vmem:[%s10053_s3 + $0x140] sm:$0xff] }
  0x8f   :  { %447 = vmatpush.msra.mxu2 %v332_v34  ;;  %476 = vmatpush.msra.mxu3 %v412_v50  ;;  %v402_v34 = vld [vmem:[%s10053_s3 + $0x3c0] sm:$0xff]  ;;  %v323_v50 = vld [vmem:[%s10053_s3 + $0x148] sm:$0xff] }
  0x90   :  { %534 = vmatpush.msrb.mxu1 %v413_v17  ;;  %505 = vmatpush.msrb.mxu0 %v333_v0  ;;  %v403_v17 = vld [vmem:[%s10053_s3 + $0x3c8] sm:$0xff]  ;;  %v397_v0 = vld [vmem:[%s10053_s3 + $0x398] sm:$0xff] }
  0x91   :  { %4339 = vmatmul.msk.f32.gmra.mxu0 %vm211_vm0, %v183_v32  ;;  %448 = vmatpush.msra.mxu2 %v327_v33  ;;  %v318_v33 = vld [vmem:[%s10053_s3 + $0x120] sm:$0xff] }
  0x92   :  { %4343 = vmatmul.msk.f32.gmra.mxu1 %vm211_vm0, %v183_v32  ;;  %477 = vmatpush.msra.mxu3 %v407_v16  ;;  %v317_v32 = vld [vmem:[%s10053_s3 + $0x118] sm:$0xff]  ;;  %v398_v16 = vld [vmem:[%s10053_s3 + $0x3a0] sm:$0xff] }
  0x93   :  { %506 = vmatpush.msrb.mxu0 %v328_v49  ;;  %535 = vmatpush.msrb.mxu1 %v408_v1  ;;  %v184_v49 = vld [vmem:[%s10051_s1 + $0x18] sm:$0xff]  ;;  %v312_v1 = vld [vmem:[%s10053_s3 + $0xf0] sm:$0xff] }
  0x94   :  { %449 = vmatpush.msra.mxu2 %v322_v51  ;;  %478 = vmatpush.msra.mxu3 %v402_v34  ;;  %v392_v51 = vld [vmem:[%s10053_s3 + $0x370] sm:$0xff]  ;;  %v313_v34 = vld [vmem:[%s10053_s3 + $0xf8] sm:$0xff] }
  0x95   :  { %507 = vmatpush.msrb.mxu0 %v323_v50  ;;  %536 = vmatpush.msrb.mxu1 %v403_v17  ;;  %v393_v50 = vld [vmem:[%s10053_s3 + $0x378] sm:$0xff]  ;;  %v307_v17 = vld [vmem:[%s10053_s3 + $0xc8] sm:$0xff] }
  0x96   :  { %450 = vmatpush.msra.mxu2 %v317_v32  ;;  %479 = vmatpush.msra.mxu3 %v397_v0  ;;  %v387_v32 = vld [vmem:[%s10053_s3 + $0x348] sm:$0xff]  ;;  %v308_v0 = vld [vmem:[%s10053_s3 + $0xd0] sm:$0xff] }
  0x97   :  { %508 = vmatpush.msrb.mxu0 %v318_v33  ;;  %537 = vmatpush.msrb.mxu1 %v398_v16  ;;  %v388_v33 = vld [vmem:[%s10053_s3 + $0x350] sm:$0xff]  ;;  %v302_v16 = vld [vmem:[%s10053_s3 + $0xa0] sm:$0xff] }
  0x98   :  { %451 = vmatpush.msra.mxu2 %v312_v1  ;;  %480 = vmatpush.msra.mxu3 %v392_v51  ;;  %v303_v1 = vld [vmem:[%s10053_s3 + $0xa8] sm:$0xff] }
  0x99   :  { %4340 = vmatmul.msk.f32.gmra.mxu0 %vm211_vm0, %v184_v49  ;;  %538 = vmatpush.msrb.mxu1 %v393_v50  ;;  %v383_v51 = vld [vmem:[%s10053_s3 + $0x328] sm:$0xff]  ;;  %v377_v50 = vld [vmem:[%s10053_s3 + $0x2f8] sm:$0xff] }
  0x9a   :  { %4344 = vmatmul.msk.f32.gmra.mxu1 %vm211_vm0, %v184_v49  ;;  %509 = vmatpush.msrb.mxu0 %v313_v34  ;;  %v382_v49 = vld [vmem:[%s10053_s3 + $0x320] sm:$0xff]  ;;  %v297_v34 = vld [vmem:[%s10053_s3 + $0x78] sm:$0xff] }
  0x9b   :  { %452 = vmatpush.msra.mxu2 %v307_v17  ;;  %481 = vmatpush.msra.mxu3 %v387_v32  ;;  %v298_v17 = vld [vmem:[%s10053_s3 + $0x80] sm:$0xff] }
  0x9c   :  { %510 = vmatpush.msrb.mxu0 %v308_v0  ;;  %539 = vmatpush.msrb.mxu1 %v388_v33  ;;  %v378_v32 = vld [vmem:[%s10053_s3 + $0x300] sm:$0xff]  ;;  %v292_v0 = vld [vmem:[%s10053_s3 + $0x50] sm:$0xff] }
  0x9d   :  { %453 = vmatpush.msra.mxu2 %v302_v16  ;;  %482 = vmatpush.msra.mxu3 %v382_v49  ;;  %v372_v33 = vld [vmem:[%s10053_s3 + $0x2d0] sm:$0xff]  ;;  %v293_v16 = vld [vmem:[%s10053_s3 + $0x58] sm:$0xff] }
  0x9e   :  { %511 = vmatpush.msrb.mxu0 %v303_v1  ;;  %540 = vmatpush.msrb.mxu1 %v383_v51  ;;  %v373_v49 = vld [vmem:[%s10053_s3 + $0x2d8] sm:$0xff]  ;;  %v287_v1 = vld [vmem:[%s10053_s3 + $0x28] sm:$0xff] }
  0x9f   :  { %454 = vmatpush.msra.mxu2 %v297_v34  ;;  %483 = vmatpush.msra.mxu3 %v377_v50  ;;  %v367_v51 = vld [vmem:[%s10053_s3 + $0x2a8] sm:$0xff]  ;;  %v288_v34 = vld [vmem:[%s10053_s3 + $0x30] sm:$0xff] }
  0xa0   :  { %512 = vmatpush.msrb.mxu0 %v298_v17  ;;  %541 = vmatpush.msrb.mxu1 %v378_v32  ;;  %v368_v50 = vld [vmem:[%s10053_s3 + $0x2b0] sm:$0xff]  ;;  %v282_v17 = vld [vmem:[%s10053_s3] sm:$0xff] }
  0xa1   :  { %455 = vmatpush.msra.mxu2 %v292_v0  ;;  %484 = vmatpush.msra.mxu3 %v372_v33  ;;  %v362_v32 = vld [vmem:[%s10053_s3 + $0x280] sm:$0xff]  ;;  %v283_v0 = vld [vmem:[%s10053_s3 + $0x8] sm:$0xff] }
  0xa2   :  { %513 = vmatpush.msrb.mxu0 %v293_v16  ;;  %542 = vmatpush.msrb.mxu1 %v373_v49  ;;  %v363_v33 = vld [vmem:[%s10053_s3 + $0x288] sm:$0xff] }
  0xa3   :  { %456 = vmatpush.msra.mxu2 %v287_v1  ;;  %485 = vmatpush.msra.mxu3 %v367_v51  ;;  %v359_v16 = vld [vmem:[%s10053_s3 + $0x268] sm:$0xff]  ;;  %v360_v1 = vld [vmem:[%s10053_s3 + $0x270] sm:$0xff] }
  0xa4   :  { %514 = vmatpush.msrb.mxu0 %v288_v34  ;;  %543 = vmatpush.msrb.mxu1 %v368_v50  ;;  %v439_v49 = vld [vmem:[%s10053_s3 + $0x4e8] sm:$0xff]  ;;  %v440_v51 = vld [vmem:[%s10053_s3 + $0x4f0] sm:$0xff]  ;;  %v354_v34 = vld [vmem:[%s10053_s3 + $0x240] sm:$0xff] }
  0xa5   :  { %457 = vmatpush.msra.mxu2 %v282_v17  ;;  %486 = vmatpush.msra.mxu3 %v362_v32  ;;  %v434_v50 = vld [vmem:[%s10053_s3 + $0x4c0] sm:$0xff]  ;;  %v355_v17 = vld [vmem:[%s10053_s3 + $0x248] sm:$0xff] }
  0xa6   :  { %515 = vmatpush.msrb.mxu0 %v283_v0  ;;  %544 = vmatpush.msrb.mxu1 %v363_v33  ;;  %v435_v32 = vld [vmem:[%s10053_s3 + $0x4c8] sm:$0xff]  ;;  %v349_v0 = vld [vmem:[%s10053_s3 + $0x218] sm:$0xff] }
  0xa7   :  { %558 = vmatpush.msrb.mxu2 %v359_v16  ;;  %587 = vmatpush.msrb.mxu3 %v439_v49  ;;  %v429_v33 = vld [vmem:[%s10053_s3 + $0x498] sm:$0xff]  ;;  %v350_v16 = vld [vmem:[%s10053_s3 + $0x220] sm:$0xff] }
  0xa8   :  { %616 = vmatpush.msra.mxu0 %v360_v1  ;;  %645 = vmatpush.msra.mxu1 %v440_v51  ;;  %v430_v49 = vld [vmem:[%s10053_s3 + $0x4a0] sm:$0xff]  ;;  %v344_v1 = vld [vmem:[%s10053_s3 + $0x1f0] sm:$0xff] }
  0xa9   :  { %559 = vmatpush.msrb.mxu2 %v354_v34  ;;  %588 = vmatpush.msrb.mxu3 %v434_v50  ;;  %v424_v51 = vld [vmem:[%s10053_s3 + $0x470] sm:$0xff]  ;;  %v345_v34 = vld [vmem:[%s10053_s3 + $0x1f8] sm:$0xff] }
  0xaa   :  { %617 = vmatpush.msra.mxu0 %v355_v17  ;;  %646 = vmatpush.msra.mxu1 %v435_v32  ;;  %v425_v50 = vld [vmem:[%s10053_s3 + $0x478] sm:$0xff]  ;;  %v339_v17 = vld [vmem:[%s10053_s3 + $0x1c8] sm:$0xff] }
  0xab   :  { %560 = vmatpush.msrb.mxu2 %v349_v0  ;;  %589 = vmatpush.msrb.mxu3 %v429_v33  ;;  %v419_v32 = vld [vmem:[%s10053_s3 + $0x448] sm:$0xff]  ;;  %v340_v0 = vld [vmem:[%s10053_s3 + $0x1d0] sm:$0xff] }
  0xac   :  { %618 = vmatpush.msra.mxu0 %v350_v16  ;;  %647 = vmatpush.msra.mxu1 %v430_v49  ;;  %v420_v33 = vld [vmem:[%s10053_s3 + $0x450] sm:$0xff]  ;;  %v334_v16 = vld [vmem:[%s10053_s3 + $0x1a0] sm:$0xff] }
  0xad   :  { %561 = vmatpush.msrb.mxu2 %v344_v1  ;;  %590 = vmatpush.msrb.mxu3 %v424_v51  ;;  %v414_v49 = vld [vmem:[%s10053_s3 + $0x420] sm:$0xff]  ;;  %v335_v1 = vld [vmem:[%s10053_s3 + $0x1a8] sm:$0xff] }
  0xae   :  { %619 = vmatpush.msra.mxu0 %v345_v34  ;;  %648 = vmatpush.msra.mxu1 %v425_v50  ;;  %v415_v51 = vld [vmem:[%s10053_s3 + $0x428] sm:$0xff]  ;;  %v329_v34 = vld [vmem:[%s10053_s3 + $0x178] sm:$0xff] }
  0xaf   :  { %562 = vmatpush.msrb.mxu2 %v339_v17  ;;  %591 = vmatpush.msrb.mxu3 %v419_v32  ;;  %v409_v50 = vld [vmem:[%s10053_s3 + $0x3f8] sm:$0xff]  ;;  %v330_v17 = vld [vmem:[%s10053_s3 + $0x180] sm:$0xff] }
  0xb0   :  { %620 = vmatpush.msra.mxu0 %v340_v0  ;;  %649 = vmatpush.msra.mxu1 %v420_v33  ;;  %v410_v32 = vld [vmem:[%s10053_s3 + $0x400] sm:$0xff]  ;;  %v324_v0 = vld [vmem:[%s10053_s3 + $0x150] sm:$0xff] }
  0xb1   :  { %563 = vmatpush.msrb.mxu2 %v334_v16  ;;  %592 = vmatpush.msrb.mxu3 %v414_v49  ;;  %v404_v33 = vld [vmem:[%s10053_s3 + $0x3d0] sm:$0xff]  ;;  %v325_v16 = vld [vmem:[%s10053_s3 + $0x158] sm:$0xff] }
  0xb2   :  { %621 = vmatpush.msra.mxu0 %v335_v1  ;;  %650 = vmatpush.msra.mxu1 %v415_v51  ;;  %v405_v49 = vld [vmem:[%s10053_s3 + $0x3d8] sm:$0xff]  ;;  %v319_v1 = vld [vmem:[%s10053_s3 + $0x128] sm:$0xff] }
  0xb3   :  { %564 = vmatpush.msrb.mxu2 %v329_v34  ;;  %593 = vmatpush.msrb.mxu3 %v409_v50  ;;  %v399_v51 = vld [vmem:[%s10053_s3 + $0x3a8] sm:$0xff]  ;;  %v320_v34 = vld [vmem:[%s10053_s3 + $0x130] sm:$0xff] }
  0xb4   :  { %622 = vmatpush.msra.mxu0 %v330_v17  ;;  %651 = vmatpush.msra.mxu1 %v410_v32  ;;  %v400_v50 = vld [vmem:[%s10053_s3 + $0x3b0] sm:$0xff]  ;;  %v314_v17 = vld [vmem:[%s10053_s3 + $0x100] sm:$0xff] }
  0xb5   :  { %565 = vmatpush.msrb.mxu2 %v324_v0  ;;  %594 = vmatpush.msrb.mxu3 %v404_v33  ;;  %v394_v32 = vld [vmem:[%s10053_s3 + $0x380] sm:$0xff]  ;;  %v315_v0 = vld [vmem:[%s10053_s3 + $0x108] sm:$0xff] }
  0xb6   :  { %623 = vmatpush.msra.mxu0 %v325_v16  ;;  %652 = vmatpush.msra.mxu1 %v405_v49  ;;  %v395_v33 = vld [vmem:[%s10053_s3 + $0x388] sm:$0xff]  ;;  %v309_v16 = vld [vmem:[%s10053_s3 + $0xd8] sm:$0xff] }
  0xb7   :  { %566 = vmatpush.msrb.mxu2 %v319_v1  ;;  %595 = vmatpush.msrb.mxu3 %v399_v51  ;;  %v389_v49 = vld [vmem:[%s10053_s3 + $0x358] sm:$0xff]  ;;  %v310_v1 = vld [vmem:[%s10053_s3 + $0xe0] sm:$0xff] }
  0xb8   :  { %624 = vmatpush.msra.mxu0 %v320_v34  ;;  %653 = vmatpush.msra.mxu1 %v400_v50  ;;  %v390_v51 = vld [vmem:[%s10053_s3 + $0x360] sm:$0xff]  ;;  %v304_v34 = vld [vmem:[%s10053_s3 + $0xb0] sm:$0xff] }
  0xb9   :  { %567 = vmatpush.msrb.mxu2 %v314_v17  ;;  %596 = vmatpush.msrb.mxu3 %v394_v32  ;;  %v384_v50 = vld [vmem:[%s10053_s3 + $0x330] sm:$0xff]  ;;  %v305_v17 = vld [vmem:[%s10053_s3 + $0xb8] sm:$0xff] }
  0xba   :  { %625 = vmatpush.msra.mxu0 %v315_v0  ;;  %654 = vmatpush.msra.mxu1 %v395_v33  ;;  %v385_v32 = vld [vmem:[%s10053_s3 + $0x338] sm:$0xff]  ;;  %v299_v0 = vld [vmem:[%s10053_s3 + $0x88] sm:$0xff] }
  0xbb   :  { %568 = vmatpush.msrb.mxu2 %v309_v16  ;;  %597 = vmatpush.msrb.mxu3 %v389_v49  ;;  %v379_v33 = vld [vmem:[%s10053_s3 + $0x308] sm:$0xff]  ;;  %v300_v16 = vld [vmem:[%s10053_s3 + $0x90] sm:$0xff] }
  0xbc   :  { %626 = vmatpush.msra.mxu0 %v310_v1  ;;  %655 = vmatpush.msra.mxu1 %v390_v51  ;;  %v380_v49 = vld [vmem:[%s10053_s3 + $0x310] sm:$0xff]  ;;  %v294_v1 = vld [vmem:[%s10053_s3 + $0x60] sm:$0xff] }
  0xbd   :  { %569 = vmatpush.msrb.mxu2 %v304_v34  ;;  %598 = vmatpush.msrb.mxu3 %v384_v50  ;;  %v374_v51 = vld [vmem:[%s10053_s3 + $0x2e0] sm:$0xff]  ;;  %v295_v50 = vld [vmem:[%s10053_s3 + $0x68] sm:$0xff] }
  0xbe   :  { %627 = vmatpush.msra.mxu0 %v305_v17  ;;  %656 = vmatpush.msra.mxu1 %v385_v32  ;;  %v375_v17 = vld [vmem:[%s10053_s3 + $0x2e8] sm:$0xff]  ;;  %v289_v32 = vld [vmem:[%s10053_s3 + $0x38] sm:$0xff] }
  0xbf   :  { %570 = vmatpush.msrb.mxu2 %v299_v0  ;;  %599 = vmatpush.msrb.mxu3 %v379_v33  ;;  %v369_v0 = vld [vmem:[%s10053_s3 + $0x2b8] sm:$0xff]  ;;  %v290_v33 = vld [vmem:[%s10053_s3 + $0x40] sm:$0xff] }
  0xc0   :  { %628 = vmatpush.msra.mxu0 %v300_v16  ;;  %657 = vmatpush.msra.mxu1 %v380_v49  ;;  %v370_v16 = vld [vmem:[%s10053_s3 + $0x2c0] sm:$0xff] }
  0xc1   :  { %571 = vmatpush.msrb.mxu2 %v294_v1  ;;  %600 = vmatpush.msrb.mxu3 %v374_v51  ;;  %v284_v51 = vld [vmem:[%s10053_s3 + $0x10] sm:$0xff] }
  0xc2   :  { %629 = vmatpush.msra.mxu0 %v295_v50  ;;  %658 = vmatpush.msra.mxu1 %v375_v17  ;;  %v285_v50 = vld [vmem:[%s10053_s3 + $0x18] sm:$0xff] }
  0xc3   :  { %572 = vmatpush.msrb.mxu2 %v289_v32  ;;  %601 = vmatpush.msrb.mxu3 %v369_v0  ;;  %v441_v17 = vld [vmem:[%s10053_s3 + $0x4f8] sm:$0xff]  ;;  %v356_v32 = vld [vmem:[%s10053_s3 + $0x250] sm:$0xff] }
  0xc4   :  { %630 = vmatpush.msra.mxu0 %v290_v33  ;;  %659 = vmatpush.msra.mxu1 %v370_v16  ;;  %v436_v0 = vld [vmem:[%s10053_s3 + $0x4d0] sm:$0xff] }
  0xc5   :  { %573 = vmatpush.msrb.mxu2 %v284_v51  ;;  %602 = vmatpush.msrb.mxu3 %v364_v52 }
  0xc6   :  { %631 = vmatpush.msra.mxu0 %v285_v50  ;;  %v351_v50 = vld [vmem:[%s10053_s3 + $0x228] sm:$0xff] }
  0xf4   :  { %v194_v34 = vpop.permute.xlu0 %193 }
  0xfc   :  { %v199_v33 = vpop.permute.xlu0 %198 }
  0xfe   :  { %v241_v49 = vpop.f32.mrf.mxu0 }
  0xff   :  { %v6100_v18 = vadd.f32 %v241_v49, %v194_v34  ;;  %v270_v2 = vpop.f32.mrf.mxu1 }
 0x100   :  { %v6102_v1 = vadd.f32 %v270_v2, %v194_v34  ;;  %v365_v2 = vld [vmem:[%s10053_s3 + $0x298] sm:$0xff] }
 0x101   :  { %458 = vmatmul.f32.vlgmr.msra.gmra.mxu2 %v6100_v18  ;;  %516 = vmatmul.f32.vlgmr.msrb.gmra.mxu0 %v6100_v18  ;;  %v361_v34 = vld [vmem:[%s10053_s3 + $0x278] sm:$0xff] }
 0x102   :  { %487 = vmatmul.f32.vlgmr.msra.gmra.mxu3 %v6102_v1  ;;  %545 = vmatmul.f32.vlgmr.msrb.gmra.mxu1 %v6102_v1 }
 0x103   :  { %660 = vmatpush.msra.mxu1 %v365_v2  ;;  %4477 = vmatpush.msra.mxu2 %v361_v34  ;;  %v431_v2 = vld [vmem:[%s10053_s3 + $0x4a8] sm:$0xff] }
 0x104   :  { %4493 = vmatpush.msra.mxu3 %v441_v17  ;;  %674 = vmatpush.msrb.mxu0 %v361_v34  ;;  %v346_v34 = vld [vmem:[%s10053_s3 + $0x200] sm:$0xff] }
 0x105   :  { %703 = vmatpush.msrb.mxu1 %v441_v17  ;;  %4478 = vmatpush.msra.mxu2 %v356_v32  ;;  %v426_v17 = vld [vmem:[%s10053_s3 + $0x480] sm:$0xff] }
 0x106   :  { %v244_v16 = vpop.f32.mrf.mxu0  ;;  %4494 = vmatpush.msra.mxu3 %v436_v0  ;;  %675 = vmatpush.msrb.mxu0 %v356_v32  ;;  %v204_v32 = vpop.permute.xlu1 %203 }
 0x107   :  { %v6132_v49 = vadd.f32 %v244_v16, %v199_v33  ;;  %v273_v51 = vpop.f32.mrf.mxu1  ;;  %704 = vmatpush.msrb.mxu1 %v436_v0  ;;  %4479 = vmatpush.msra.mxu2 %v351_v50  ;;  %v341_v0 = vld [vmem:[%s10053_s3 + $0x1d8] sm:$0xff] }
 0x108   :  { %v6134_v52 = vadd.f32 %v273_v51, %v199_v33  ;;  %4495 = vmatpush.msra.mxu3 %v431_v2  ;;  %676 = vmatpush.msrb.mxu0 %v351_v50  ;;  %v421_v33 = vld [vmem:[%s10053_s3 + $0x458] sm:$0xff] }
 0x109   :  { %461 = vmatmul.f32.gmra.mxu2 %v6132_v49  ;;  %519 = vmatmul.f32.gmra.mxu0 %v6132_v49 }
 0x10a   :  { %490 = vmatmul.f32.gmra.mxu3 %v6134_v52  ;;  %548 = vmatmul.f32.gmra.mxu1 %v6134_v52 }
 0x10b   :  { %705 = vmatpush.msrb.mxu1 %v431_v2  ;;  %4480 = vmatpush.msra.mxu2 %v346_v34  ;;  %v336_v2 = vld [vmem:[%s10053_s3 + $0x1b0] sm:$0xff] }
 0x10c   :  { %4496 = vmatpush.msra.mxu3 %v426_v17  ;;  %677 = vmatpush.msrb.mxu0 %v346_v34  ;;  %v411_v34 = vld [vmem:[%s10053_s3 + $0x408] sm:$0xff] }
 0x10d   :  { %706 = vmatpush.msrb.mxu1 %v426_v17  ;;  %4481 = vmatpush.msra.mxu2 %v341_v0  ;;  %v326_v17 = vld [vmem:[%s10053_s3 + $0x160] sm:$0xff] }
 0x10e   :  { %v247_v16 = vpop.f32.mrf.mxu0  ;;  %4497 = vmatpush.msra.mxu3 %v421_v33  ;;  %678 = vmatpush.msrb.mxu0 %v341_v0  ;;  %v209_v0 = vpop.permute.xlu1 %208 }
 0x10f   :  { %v6158_v51 = vadd.f32 %v247_v16, %v204_v32  ;;  %v276_v35 = vpop.f32.mrf.mxu1  ;;  %707 = vmatpush.msrb.mxu1 %v421_v33  ;;  %4482 = vmatpush.msra.mxu2 %v336_v2 }
 0x110   :  { %v6160_v50 = vadd.f32 %v276_v35, %v204_v32  ;;  %v331_v35 = vld [vmem:[%s10053_s3 + $0x188] sm:$0xff]  ;;  %4498 = vmatpush.msra.mxu3 %v416_v19  ;;  %679 = vmatpush.msrb.mxu0 %v336_v2  ;;  %v406_v32 = vld [vmem:[%s10053_s3 + $0x3e0] sm:$0xff]  ;;  %v321_v2 = vld [vmem:[%s10053_s3 + $0x138] sm:$0xff] }
 0x111   :  { %464 = vmatmul.f32.gmra.mxu2 %v6158_v51  ;;  %522 = vmatmul.f32.gmra.mxu0 %v6158_v51 }
 0x112   :  { %493 = vmatmul.f32.gmra.mxu3 %v6160_v50  ;;  %551 = vmatmul.f32.gmra.mxu1 %v6160_v50 }
 0x113   :  { %708 = vmatpush.msrb.mxu1 %v416_v19  ;;  %4483 = vmatpush.msra.mxu2 %v331_v35 }
 0x114   :  { %4499 = vmatpush.msra.mxu3 %v411_v34  ;;  %680 = vmatpush.msrb.mxu0 %v331_v35  ;;  %v396_v35 = vld [vmem:[%s10053_s3 + $0x390] sm:$0xff] }
 0x115   :  { %709 = vmatpush.msrb.mxu1 %v411_v34  ;;  %4484 = vmatpush.msra.mxu2 %v326_v17  ;;  %v311_v34 = vld [vmem:[%s10053_s3 + $0xe8] sm:$0xff] }
 0x116   :  { %v250_v33 = vpop.f32.mrf.mxu0  ;;  %4500 = vmatpush.msra.mxu3 %v406_v32  ;;  %681 = vmatpush.msrb.mxu0 %v326_v17  ;;  %v391_v17 = vld [vmem:[%s10053_s3 + $0x368] sm:$0xff] }
 0x117   :  { %v6184_v16 = vadd.f32 %v250_v33, %v209_v0  ;;  %v279_v3 = vpop.f32.mrf.mxu1  ;;  %710 = vmatpush.msrb.mxu1 %v406_v32  ;;  %4485 = vmatpush.msra.mxu2 %v321_v2  ;;  %v386_v32 = vld [vmem:[%s10053_s3 + $0x340] sm:$0xff]  ;;  %v381_v33 = vld [vmem:[%s10053_s3 + $0x318] sm:$0xff] }
 0x118   :  { %v6186_v19 = vadd.f32 %v279_v3, %v209_v0  ;;  %v316_v3 = vld [vmem:[%s10053_s3 + $0x110] sm:$0xff]  ;;  %4501 = vmatpush.msra.mxu3 %v401_v53  ;;  %682 = vmatpush.msrb.mxu0 %v321_v2  ;;  %v301_v0 = vld [vmem:[%s10053_s3 + $0x98] sm:$0xff] }
 0x119   :  { %467 = vmatmul.f32.gmra.mxu2 %v6184_v16  ;;  %525 = vmatmul.f32.gmra.mxu0 %v6184_v16  ;;  %v296_v2 = vld [vmem:[%s10053_s3 + $0x70] sm:$0xff] }
 0x11a   :  { %496 = vmatmul.f32.gmra.mxu3 %v6186_v19  ;;  %554 = vmatmul.f32.gmra.mxu1 %v6186_v19 }
 0x11b   :  { %711 = vmatpush.msrb.mxu1 %v401_v53  ;;  %4486 = vmatpush.msra.mxu2 %v316_v3  ;;  %v306_v53 = vld [vmem:[%s10053_s3 + $0xc0] sm:$0xff] }
 0x11c   :  { %4502 = vmatpush.msra.mxu3 %v396_v35  ;;  %683 = vmatpush.msrb.mxu0 %v316_v3  ;;  %v376_v3 = vld [vmem:[%s10053_s3 + $0x2f0] sm:$0xff] }
 0x11d   :  { %712 = vmatpush.msrb.mxu1 %v396_v35  ;;  %4487 = vmatpush.msra.mxu2 %v311_v34  ;;  %v291_v35 = vld [vmem:[%s10053_s3 + $0x48] sm:$0xff] }
 0x11e   :  { %4503 = vmatpush.msra.mxu3 %v391_v17  ;;  %684 = vmatpush.msrb.mxu0 %v311_v34  ;;  %v371_v34 = vld [vmem:[%s10053_s3 + $0x2c8] sm:$0xff] }
 0x11f   :  { %713 = vmatpush.msrb.mxu1 %v391_v17  ;;  %4488 = vmatpush.msra.mxu2 %v306_v53  ;;  %v286_v17 = vld [vmem:[%s10053_s3 + $0x20] sm:$0xff] }
 0x120   :  { %4504 = vmatpush.msra.mxu3 %v386_v32  ;;  %685 = vmatpush.msrb.mxu0 %v306_v53  ;;  %v366_v53 = vld [vmem:[%s10053_s3 + $0x2a0] sm:$0xff] }
 0x121   :  { %574 = vmatmul.f32.vlgmr.msrb.gmra.mxu2 %v6100_v18  ;;  %632 = vmatmul.f32.vlgmr.msra.gmra.mxu0 %v6100_v18 }
 0x122   :  { %603 = vmatmul.f32.vlgmr.msrb.gmra.mxu3 %v6102_v1  ;;  %661 = vmatmul.f32.vlgmr.msra.gmra.mxu1 %v6102_v1 }
 0x123   :  { %714 = vmatpush.msrb.mxu1 %v386_v32  ;;  %4489 = vmatpush.msra.mxu2 %v301_v0 }
 0x124   :  { %4505 = vmatpush.msra.mxu3 %v381_v33  ;;  %686 = vmatpush.msrb.mxu0 %v301_v0 }
 0x125   :  { %715 = vmatpush.msrb.mxu1 %v381_v33  ;;  %4490 = vmatpush.msra.mxu2 %v296_v2 }
 0x126   :  { %4506 = vmatpush.msra.mxu3 %v376_v3  ;;  %687 = vmatpush.msrb.mxu0 %v296_v2 }
 0x127   :  { %716 = vmatpush.msrb.mxu1 %v376_v3  ;;  %4491 = vmatpush.msra.mxu2 %v291_v35 }
 0x128   :  { %4507 = vmatpush.msra.mxu3 %v371_v34  ;;  %688 = vmatpush.msrb.mxu0 %v291_v35 }
 0x129   :  { %577 = vmatmul.f32.gmra.mxu2 %v6132_v49  ;;  %635 = vmatmul.f32.gmra.mxu0 %v6132_v49 }
 0x12a   :  { %606 = vmatmul.f32.gmra.mxu3 %v6134_v52  ;;  %664 = vmatmul.f32.gmra.mxu1 %v6134_v52 }
 0x12b   :  { %717 = vmatpush.msrb.mxu1 %v371_v34  ;;  %4492 = vmatpush.msra.mxu2 %v286_v17 }
 0x12c   :  { %4508 = vmatpush.msra.mxu3 %v366_v53  ;;  %689 = vmatpush.msrb.mxu0 %v286_v17 }
 0x12d   :  { %718 = vmatpush.msrb.mxu1 %v366_v53 }
 0x131   :  { %580 = vmatmul.f32.gmra.mxu2 %v6158_v51  ;;  %638 = vmatmul.f32.gmra.mxu0 %v6158_v51 }
 0x132   :  { %609 = vmatmul.f32.gmra.mxu3 %v6160_v50  ;;  %667 = vmatmul.f32.gmra.mxu1 %v6160_v50 }
 0x139   :  { %583 = vmatmul.f32.gmra.mxu2 %v6184_v16  ;;  %641 = vmatmul.f32.gmra.mxu0 %v6184_v16 }
 0x13a   :  { %612 = vmatmul.f32.gmra.mxu3 %v6186_v19  ;;  %670 = vmatmul.f32.gmra.mxu1 %v6186_v19 }
 0x141   :  { %690 = vmatmul.f32.vlgmr.msrb.gmra.mxu0 %v6100_v18  ;;  %693 = vmatmul.f32.vlgmr.msra.gmra.mxu2 %v6132_v49 }
 0x142   :  { %719 = vmatmul.f32.vlgmr.msrb.gmra.mxu1 %v6102_v1  ;;  %722 = vmatmul.f32.vlgmr.msra.gmra.mxu3 %v6134_v52 }
 0x149   :  { %696 = vmatmul.f32.gmra.mxu2 %v6158_v51 }
 0x14a   :  { %725 = vmatmul.f32.gmra.mxu3 %v6160_v50 }
 0x151   :  { %699 = vmatmul.f32.gmra.mxu2 %v6184_v16 }
 0x152   :  { %728 = vmatmul.f32.gmra.mxu3 %v6186_v19 }
 0x17e   :  { %v517_v32 = vpop.f32.mrf.mxu0 }
 0x17f   :  { %v546_v0 = vpop.f32.mrf.mxu1 }
 0x180   :  { %v6264_v33 = vadd.f32 %v546_v0, %v517_v32 }
 0x182   :  { %10316 = vst [vmem:[#allocation121_spill] sm:$0xff] %v6264_v33 }
 0x184   :  { %v459_v2 = vpop.f32.mrf.mxu2 }
 0x185   :  { %v488_v18 = vpop.f32.mrf.mxu3 }
 0x186   :  { %v6266_v3 = vadd.f32 %v488_v18, %v459_v2  ;;  %v520_v49 = vpop.f32.mrf.mxu0 }
 0x187   :  { %v549_v1 = vpop.f32.mrf.mxu1 }
 0x188   :  { %10317 = vst [vmem:[#allocation122_spill] sm:$0xff] %v6266_v3  ;;  %v6268_v35 = vadd.f32 %v549_v1, %v520_v49 }
 0x18a   :  { %10318 = vst [vmem:[#allocation123_spill] sm:$0xff] %v6268_v35 }
 0x18c   :  { %v462_v52 = vpop.f32.mrf.mxu2 }
 0x18d   :  { %v491_v51 = vpop.f32.mrf.mxu3 }
 0x18e   :  { %v6270_v34 = vadd.f32 %v491_v51, %v462_v52  ;;  %v523_v50 = vpop.f32.mrf.mxu0 }
 0x18f   :  { %v552_v16 = vpop.f32.mrf.mxu1 }
 0x190   :  { %10319 = vst [vmem:[#allocation124_spill] sm:$0xff] %v6270_v34  ;;  %v6272_v17 = vadd.f32 %v552_v16, %v523_v50 }
 0x192   :  { %10320 = vst [vmem:[#allocation125_spill] sm:$0xff] %v6272_v17 }
 0x194   :  { %v465_v19 = vpop.f32.mrf.mxu2 }
 0x195   :  { %v494_v53 = vpop.f32.mrf.mxu3 }
 0x196   :  { %v6274_v32 = vadd.f32 %v494_v53, %v465_v19  ;;  %v526_v0 = vpop.f32.mrf.mxu0 }
 0x197   :  { %v555_v33 = vpop.f32.mrf.mxu1 }
 0x198   :  { %10321 = vst [vmem:[#allocation126_spill] sm:$0xff] %v6274_v32  ;;  %v6276_v2 = vadd.f32 %v555_v33, %v526_v0 }
 0x19a   :  { %10322 = vst [vmem:[#allocation127_spill] sm:$0xff] %v6276_v2 }
 0x19c   :  { %v468_v18 = vpop.f32.mrf.mxu2 }
 0x19d   :  { %v497_v3 = vpop.f32.mrf.mxu3 }
 0x19e   :  { %v6278_v49 = vadd.f32 %v497_v3, %v468_v18  ;;  %v633_v1 = vpop.f32.mrf.mxu0 }
 0x19f   :  { %v662_v35 = vpop.f32.mrf.mxu1 }
 0x1a0   :  { %10323 = vst [vmem:[#allocation128_spill] sm:$0xff] %v6278_v49  ;;  %v6280_v52 = vadd.f32 %v662_v35, %v633_v1 }
 0x1a2   :  { %10324 = vst [vmem:[#allocation129_spill] sm:$0xff] %v6280_v52  ;;  %v6372_v52 = vld [vmem:[%s10054_s7 + $0x78] sm:$0xff] }
 0x1a3   :  { %10346 = vst [vmem:[#allocation151_spill] sm:$0xff] %v6372_v52  ;;  %v6392_v52 = vld [vmem:[%s10054_s7 + $0x98] sm:$0xff] }
 0x1a4   :  { %v575_v51 = vpop.f32.mrf.mxu2  ;;  %10350 = vst [vmem:[#allocation155_spill] sm:$0xff] %v6392_v52  ;;  %v6412_v52 = vld [vmem:[%s10054_s7 + $0xb8] sm:$0xff] }
 0x1a5   :  { %v604_v34 = vpop.f32.mrf.mxu3  ;;  %10354 = vst [vmem:[#allocation159_spill] sm:$0xff] %v6412_v52  ;;  %v6653_v52 = vld [vmem:[%s10057_s10 + $0x10] sm:$0xff] }
 0x1a6   :  { %v6282_v50 = vadd.f32 %v604_v34, %v575_v51  ;;  %v636_v16 = vpop.f32.mrf.mxu0  ;;  %v6295_v34 = vld [vmem:[%s10054_s7] sm:$0xff]  ;;  %10404 = vst [vmem:[#allocation209_spill] sm:$0xff] %v6653_v52  ;;  %v6672_v52 = vmov 0.0  }
 0x1a7   :  { %v665_v17 = vpop.f32.mrf.mxu1  ;;  %10330 = vst [vmem:[#allocation135_spill] sm:$0xff] %v6295_v34  ;;  %v6315_v51 = vld [vmem:[%s10054_s7 + $0x20] sm:$0xff]  ;;  %v6674_v34 = vmov 0.0  }
 0x1a8   :  { %10325 = vst [vmem:[#allocation130_spill] sm:$0xff] %v6282_v50  ;;  %v6284_v19 = vadd.f32 %v665_v17, %v636_v16  ;;  %v6300_v17 = vld [vmem:[%s10054_s7 + $0x8] sm:$0xff]  ;;  %v6377_v50 = vld [vmem:[%s10054_s7 + $0x80] sm:$0xff] }
 0x1a9   :  { %10331 = vst [vmem:[#allocation136_spill] sm:$0xff] %v6300_v17  ;;  %v6320_v16 = vld [vmem:[%s10054_s7 + $0x28] sm:$0xff]  ;;  %v6670_v17 = vmov 0.0  }
 0x1aa   :  { %10326 = vst [vmem:[#allocation131_spill] sm:$0xff] %v6284_v19  ;;  %v6362_v19 = vld [vmem:[%s10054_s7 + $0x68] sm:$0xff] }
 0x1ab   :  { %10334 = vst [vmem:[#allocation139_spill] sm:$0xff] %v6315_v51 }
 0x1ac   :  { %v578_v53 = vpop.f32.mrf.mxu2  ;;  %10335 = vst [vmem:[#allocation140_spill] sm:$0xff] %v6320_v16 }
 0x1ad   :  { %v607_v32 = vpop.f32.mrf.mxu3  ;;  %10344 = vst [vmem:[#allocation149_spill] sm:$0xff] %v6362_v19 }
 0x1ae   :  { %v6286_v33 = vadd.f32 %v607_v32, %v578_v53  ;;  %v639_v0 = vpop.f32.mrf.mxu0  ;;  %v6305_v32 = vld [vmem:[%s10054_s7 + $0x10] sm:$0xff]  ;;  %10347 = vst [vmem:[#allocation152_spill] sm:$0xff] %v6377_v50  ;;  %v6397_v50 = vld [vmem:[%s10054_s7 + $0xa0] sm:$0xff] }
 0x1af   :  { %v668_v2 = vpop.f32.mrf.mxu1  ;;  %10332 = vst [vmem:[#allocation137_spill] sm:$0xff] %v6305_v32  ;;  %v6666_v32 = vmov 0.0  }
 0x1b0   :  { %10327 = vst [vmem:[#allocation132_spill] sm:$0xff] %v6286_v33  ;;  %v6288_v3 = vadd.f32 %v668_v2, %v639_v0  ;;  %v6327_v0 = vld [vmem:[%s10054_s7 + $0x30] sm:$0xff] }
 0x1b1   :  { %10337 = vst [vmem:[#allocation142_spill] sm:$0xff] %v6327_v0  ;;  %v6367_v33 = vld [vmem:[%s10054_s7 + $0x70] sm:$0xff] }
 0x1b2   :  { %10328 = vst [vmem:[#allocation133_spill] sm:$0xff] %v6288_v3  ;;  %v6337_v3 = vld [vmem:[%s10054_s7 + $0x40] sm:$0xff] }
 0x1b3   :  { %10339 = vst [vmem:[#allocation144_spill] sm:$0xff] %v6337_v3 }
 0x1b4   :  { %v581_v18 = vpop.f32.mrf.mxu2  ;;  %10345 = vst [vmem:[#allocation150_spill] sm:$0xff] %v6367_v33  ;;  %v6387_v33 = vld [vmem:[%s10054_s7 + $0x90] sm:$0xff] }
 0x1b5   :  { %v610_v49 = vpop.f32.mrf.mxu3  ;;  %10349 = vst [vmem:[#allocation154_spill] sm:$0xff] %v6387_v33  ;;  %v6407_v33 = vld [vmem:[%s10054_s7 + $0xb0] sm:$0xff] }
 0x1b6   :  { %v6290_v35 = vadd.f32 %v610_v49, %v581_v18  ;;  %v642_v1 = vpop.f32.mrf.mxu0  ;;  %v6310_v49 = vld [vmem:[%s10054_s7 + $0x18] sm:$0xff]  ;;  %10351 = vst [vmem:[#allocation156_spill] sm:$0xff] %v6397_v50  ;;  %v6419_v50 = vld [vmem:[%s10054_s7 + $0xc0] sm:$0xff] }
 0x1b7   :  { %v671_v2 = vpop.f32.mrf.mxu1  ;;  %10333 = vst [vmem:[#allocation138_spill] sm:$0xff] %v6310_v49  ;;  %v6332_v18 = vld [vmem:[%s10054_s7 + $0x38] sm:$0xff]  ;;  %v6664_v49 = vmov 0.0  }
 0x1b8   :  { %10329 = vst [vmem:[#allocation134_spill] sm:$0xff] %v6290_v35  ;;  %v6322_v53 = vadd.f32 %v671_v2, %v642_v1  ;;  %v6342_v1 = vld [vmem:[%s10054_s7 + $0x48] sm:$0xff]  ;;  %v6347_v2 = vld [vmem:[%s10054_s7 + $0x50] sm:$0xff]  ;;  %v6357_v35 = vld [vmem:[%s10054_s7 + $0x60] sm:$0xff] }
 0x1b9   :  { %10338 = vst [vmem:[#allocation143_spill] sm:$0xff] %v6332_v18  ;;  %v6658_v18 = vld [vmem:[%s10057_s10 + $0x18] sm:$0xff] }
 0x1ba   :  { %10336 = vst [vmem:[#allocation141_spill] sm:$0xff] %v6322_v53  ;;  %v6352_v53 = vld [vmem:[%s10054_s7 + $0x58] sm:$0xff] }
 0x1bb   :  { %10340 = vst [vmem:[#allocation145_spill] sm:$0xff] %v6342_v1 }
 0x1bc   :  { %10341 = vst [vmem:[#allocation146_spill] sm:$0xff] %v6347_v2  ;;  %v584_v19 = vpop.f32.mrf.mxu2 }
 0x1bd   :  { %10342 = vst [vmem:[#allocation147_spill] sm:$0xff] %v6352_v53  ;;  %v613_v53 = vpop.f32.mrf.mxu3 }
 0x1be   :  { %10343 = vst [vmem:[#allocation148_spill] sm:$0xff] %v6357_v35  ;;  %v6382_v35 = vld [vmem:[%s10054_s7 + $0x88] sm:$0xff]  ;;  %v6414_v2 = vadd.f32 %v613_v53, %v584_v19  ;;  %v691_v1 = vpop.f32.mrf.mxu0  ;;  %v6434_v19 = vld [vmem:[%s10054_s7 + $0xd8] sm:$0xff]  ;;  %v6439_v53 = vld [vmem:[%s10054_s7 + $0xe0] sm:$0xff] }
 0x1bf   :  { %10348 = vst [vmem:[#allocation153_spill] sm:$0xff] %v6382_v35  ;;  %v6402_v35 = vld [vmem:[%s10054_s7 + $0xa8] sm:$0xff]  ;;  %v720_v3 = vpop.f32.mrf.mxu1 }
 0x1c0   :  { %10352 = vst [vmem:[#allocation157_spill] sm:$0xff] %v6402_v35  ;;  %v6424_v35 = vld [vmem:[%s10054_s7 + $0xc8] sm:$0xff] }
 0x1c1   :  { %10353 = vst [vmem:[#allocation158_spill] sm:$0xff] %v6407_v33  ;;  %v6429_v33 = vld [vmem:[%s10054_s7 + $0xd0] sm:$0xff] }
 0x1c2   :  { %10355 = vst [vmem:[#allocation160_spill] sm:$0xff] %v6414_v2  ;;  %v6444_v2 = vld [vmem:[%s10054_s7 + $0xe8] sm:$0xff] }
 0x1c3   :  { %10356 = vst [vmem:[#allocation161_spill] sm:$0xff] %v6419_v50  ;;  %v6648_v50 = vld [vmem:[%s10057_s10 + $0x8] sm:$0xff] }
 0x1c4   :  { %10357 = vst [vmem:[#allocation162_spill] sm:$0xff] %v6424_v35  ;;  %v6446_v35 = vadd.f32 %v720_v3, %v691_v1  ;;  %v6466_v3 = vld [vmem:[%s10055_s8 + $0x8] sm:$0xff]  ;;  %v6471_v1 = vld [vmem:[%s10055_s8 + $0x10] sm:$0xff] }
 0x1c5   :  { %10358 = vst [vmem:[#allocation163_spill] sm:$0xff] %v6429_v33  ;;  %v6451_v33 = vld [vmem:[%s10054_s7 + $0xf0] sm:$0xff] }
 0x1c6   :  { %10359 = vst [vmem:[#allocation164_spill] sm:$0xff] %v6434_v19  ;;  %v6456_v19 = vld [vmem:[%s10054_s7 + $0xf8] sm:$0xff] }
 0x1c7   :  { %10360 = vst [vmem:[#allocation165_spill] sm:$0xff] %v6439_v53  ;;  %v6461_v53 = vld [vmem:[%s10055_s8] sm:$0xff] }
 0x1c8   :  { %10361 = vst [vmem:[#allocation166_spill] sm:$0xff] %v6444_v2  ;;  %v723_v2 = vpop.f32.mrf.mxu3 }
 0x1c9   :  { %10362 = vst [vmem:[#allocation167_spill] sm:$0xff] %v6446_v35  ;;  %v6476_v35 = vld [vmem:[%s10055_s8 + $0x18] sm:$0xff] }
 0x1ca   :  { %10363 = vst [vmem:[#allocation168_spill] sm:$0xff] %v6451_v33 }
 0x1cb   :  { %10364 = vst [vmem:[#allocation169_spill] sm:$0xff] %v6456_v19  ;;  %v6481_v19 = vld [vmem:[%s10055_s8 + $0x20] sm:$0xff] }
 0x1cc   :  { %10365 = vst [vmem:[#allocation170_spill] sm:$0xff] %v6461_v53  ;;  %v6486_v53 = vld [vmem:[%s10055_s8 + $0x28] sm:$0xff] }
 0x1cd   :  { %10366 = vst [vmem:[#allocation171_spill] sm:$0xff] %v6466_v3  ;;  %v6491_v3 = vld [vmem:[%s10055_s8 + $0x30] sm:$0xff] }
 0x1ce   :  { %10367 = vst [vmem:[#allocation172_spill] sm:$0xff] %v6471_v1  ;;  %v6496_v1 = vld [vmem:[%s10055_s8 + $0x38] sm:$0xff] }
 0x1cf   :  { %10368 = vst [vmem:[#allocation173_spill] sm:$0xff] %v6476_v35  ;;  %v6501_v35 = vld [vmem:[%s10055_s8 + $0x40] sm:$0xff] }
 0x1d0   :  { %10369 = vst [vmem:[#allocation174_spill] sm:$0xff] %v6481_v19  ;;  %v6506_v19 = vld [vmem:[%s10055_s8 + $0x48] sm:$0xff] }
 0x1d1   :  { %10370 = vst [vmem:[#allocation175_spill] sm:$0xff] %v6486_v53  ;;  %v694_v53 = vpop.f32.mrf.mxu2 }
 0x1d2   :  { %10371 = vst [vmem:[#allocation176_spill] sm:$0xff] %v6491_v3  ;;  %v6511_v3 = vld [vmem:[%s10055_s8 + $0x50] sm:$0xff]  ;;  %v6538_v33 = vadd.f32 %v723_v2, %v694_v53  ;;  %v6558_v2 = vld [vmem:[%s10055_s8 + $0x98] sm:$0xff]  ;;  %v6563_v53 = vld [vmem:[%s10055_s8 + $0xa0] sm:$0xff] }
 0x1d3   :  { %10372 = vst [vmem:[#allocation177_spill] sm:$0xff] %v6496_v1  ;;  %v6516_v1 = vld [vmem:[%s10055_s8 + $0x58] sm:$0xff] }
 0x1d4   :  { %10373 = vst [vmem:[#allocation178_spill] sm:$0xff] %v6501_v35  ;;  %v6521_v35 = vld [vmem:[%s10055_s8 + $0x60] sm:$0xff] }
 0x1d5   :  { %10374 = vst [vmem:[#allocation179_spill] sm:$0xff] %v6506_v19  ;;  %v6526_v19 = vld [vmem:[%s10055_s8 + $0x68] sm:$0xff] }
 0x1d6   :  { %10375 = vst [vmem:[#allocation180_spill] sm:$0xff] %v6511_v3  ;;  %v6531_v3 = vld [vmem:[%s10055_s8 + $0x70] sm:$0xff] }
 0x1d7   :  { %10376 = vst [vmem:[#allocation181_spill] sm:$0xff] %v6516_v1  ;;  %v6536_v1 = vld [vmem:[%s10055_s8 + $0x78] sm:$0xff] }
 0x1d8   :  { %10377 = vst [vmem:[#allocation182_spill] sm:$0xff] %v6521_v35  ;;  %v6543_v35 = vld [vmem:[%s10055_s8 + $0x80] sm:$0xff] }
 0x1d9   :  { %10378 = vst [vmem:[#allocation183_spill] sm:$0xff] %v6526_v19  ;;  %v6548_v19 = vld [vmem:[%s10055_s8 + $0x88] sm:$0xff] }
 0x1da   :  { %10379 = vst [vmem:[#allocation184_spill] sm:$0xff] %v6531_v3  ;;  %v6553_v3 = vld [vmem:[%s10055_s8 + $0x90] sm:$0xff] }
 0x1db   :  { %10380 = vst [vmem:[#allocation185_spill] sm:$0xff] %v6536_v1  ;;  %v6573_v1 = vld [vmem:[%s10055_s8 + $0xb0] sm:$0xff] }
 0x1dc   :  { %10381 = vst [vmem:[#allocation186_spill] sm:$0xff] %v6538_v33  ;;  %v6568_v33 = vld [vmem:[%s10055_s8 + $0xa8] sm:$0xff] }
 0x1dd   :  { %10382 = vst [vmem:[#allocation187_spill] sm:$0xff] %v6543_v35  ;;  %v726_v35 = vpop.f32.mrf.mxu3 }
 0x1de   :  { %10383 = vst [vmem:[#allocation188_spill] sm:$0xff] %v6548_v19  ;;  %v6643_v19 = vld [vmem:[%s10057_s10] sm:$0xff] }
 0x1df   :  { %10384 = vst [vmem:[#allocation189_spill] sm:$0xff] %v6553_v3  ;;  %v6578_v3 = vld [vmem:[%s10055_s8 + $0xb8] sm:$0xff] }
 0x1e0   :  { %10385 = vst [vmem:[#allocation190_spill] sm:$0xff] %v6558_v2  ;;  %v6583_v2 = vld [vmem:[%s10055_s8 + $0xc0] sm:$0xff] }
 0x1e1   :  { %10386 = vst [vmem:[#allocation191_spill] sm:$0xff] %v6563_v53  ;;  %v6588_v53 = vld [vmem:[%s10055_s8 + $0xc8] sm:$0xff] }
 0x1e2   :  { %10387 = vst [vmem:[#allocation192_spill] sm:$0xff] %v6568_v33  ;;  %v6593_v33 = vld [vmem:[%s10055_s8 + $0xd0] sm:$0xff] }
 0x1e3   :  { %10388 = vst [vmem:[#allocation193_spill] sm:$0xff] %v6573_v1  ;;  %v6598_v1 = vld [vmem:[%s10055_s8 + $0xd8] sm:$0xff] }
 0x1e4   :  { %10389 = vst [vmem:[#allocation194_spill] sm:$0xff] %v6578_v3  ;;  %v6603_v3 = vld [vmem:[%s10055_s8 + $0xe0] sm:$0xff] }
 0x1e5   :  { %10390 = vst [vmem:[#allocation195_spill] sm:$0xff] %v6583_v2  ;;  %v6608_v2 = vld [vmem:[%s10055_s8 + $0xe8] sm:$0xff] }
 0x1e6   :  { %10391 = vst [vmem:[#allocation196_spill] sm:$0xff] %v6588_v53  ;;  %v6613_v53 = vld [vmem:[%s10055_s8 + $0xf0] sm:$0xff] }
 0x1e7   :  { %10392 = vst [vmem:[#allocation197_spill] sm:$0xff] %v6593_v33  ;;  %v6618_v33 = vld [vmem:[%s10055_s8 + $0xf8] sm:$0xff] }
 0x1e8   :  { %10393 = vst [vmem:[#allocation198_spill] sm:$0xff] %v6598_v1  ;;  %v6623_v1 = vld [vmem:[%s10056_s9] sm:$0xff] }
 0x1e9   :  { %10394 = vst [vmem:[#allocation199_spill] sm:$0xff] %v6603_v3  ;;  %v6628_v3 = vld [vmem:[%s10056_s9 + $0x8] sm:$0xff] }
 0x1ea   :  { %10395 = vst [vmem:[#allocation200_spill] sm:$0xff] %v6608_v2  ;;  %v697_v2 = vpop.f32.mrf.mxu2 }
 0x1eb   :  { %10396 = vst [vmem:[#allocation201_spill] sm:$0xff] %v6613_v53  ;;  %v6633_v53 = vld [vmem:[%s10056_s9 + $0x10] sm:$0xff]  ;;  %v6660_v0 = vadd.f32 %v726_v35, %v697_v2  ;;  %v6678_v35 = vmov 0.0   ;;  %v6680_v2 = vmov 0.0  }
 0x1ec   :  { %10397 = vst [vmem:[#allocation202_spill] sm:$0xff] %v6618_v33  ;;  %v6638_v33 = vld [vmem:[%s10056_s9 + $0x18] sm:$0xff]  ;;  %s6704_s9 = smov 0  }
 0x1ed   :  { %10398 = vst [vmem:[#allocation203_spill] sm:$0xff] %v6623_v1  ;;  %v6692_v1 = vmov 0.0  }
 0x1ee   :  { %10399 = vst [vmem:[#allocation204_spill] sm:$0xff] %v6628_v3  ;;  %v6696_v3 = vmov 0.0  }
 0x1ef   :  { %10400 = vst [vmem:[#allocation205_spill] sm:$0xff] %v6633_v53  ;;  %v6676_v53 = vmov 0.0  }
 0x1f0   :  { %10401 = vst [vmem:[#allocation206_spill] sm:$0xff] %v6638_v33  ;;  %v6694_v33 = vmov 0.0  }
 0x1f1   :  { %10402 = vst [vmem:[#allocation207_spill] sm:$0xff] %v6643_v19  ;;  %v729_v19 = vpop.f32.mrf.mxu3 }
 0x1f2   :  { %10403 = vst [vmem:[#allocation208_spill] sm:$0xff] %v6648_v50  ;;  %v700_v16 = vpop.f32.mrf.mxu2  ;;  %v6668_v50 = vmov 0.0  }
 0x1f3   :  { %10405 = vst [vmem:[#allocation210_spill] sm:$0xff] %v6658_v18  ;;  %v6662_v51 = vadd.f32 %v729_v19, %v700_v16  ;;  %v6682_v16 = vmov 0.0   ;;  %v6684_v19 = vmov 0.0   ;;  %v6690_v18 = vmov 0.0  }
 0x1f4   :  { %10406 = vst [vmem:[#allocation211_spill] sm:$0xff] %v6660_v0  ;;  %v6688_v0 = vmov 0.0  }
 0x1f5   :  { %10407 = vst [vmem:[#allocation212_spill] sm:$0xff] %v6662_v51  ;;  %v6686_v51 = vmov 0.0  }
 0x1f6 LB: > { %v10408_v15 = vld [vmem:[#allocation17_spill] sm:$0xff]  ;;  %v10412_v14 = vld [vmem:[#allocation16_spill] sm:$0xff]  ;;  %v10416_v13 = vld [vmem:[#allocation15_spill] sm:$0xff]  ;;  %vm843_vm1 = vcmask 1040384   ;;  %vm830_vm2 = vcmask 924672   ;;  %s4988_s10 = smov 96   ;;  %s4985_s9 = sphi %s6704_s9, %s809_s9   ;;  %v4981_v4 = vphi %v6702_v4, %v10796_v4   ;;  %v4977_v20 = vphi %v6700_v20, %v10795_v20   ;;  %v4973_v37 = vphi %v6698_v37, %v10794_v37   ;;  %v4969_v3 = vphi %v6696_v3, %v10793_v3   ;;  %v4965_v33 = vphi %v6694_v33, %v10792_v33   ;;  %v4961_v1 = vphi %v6692_v1, %v10791_v1   ;;  %v4957_v18 = vphi %v6690_v18, %v10790_v18   ;;  %v4953_v0 = vphi %v6688_v0, %v10789_v0   ;;  %v4949_v51 = vphi %v6686_v51, %v10788_v51   ;;  %v4945_v19 = vphi %v6684_v19, %v10787_v19   ;;  %v4941_v16 = vphi %v6682_v16, %v10786_v16   ;;  %v4937_v2 = vphi %v6680_v2, %v10785_v2   ;;  %v4933_v35 = vphi %v6678_v35, %v10784_v35   ;;  %v4929_v53 = vphi %v6676_v53, %v10783_v53   ;;  %v4925_v34 = vphi %v6674_v34, %v10782_v34   ;;  %v4921_v52 = vphi %v6672_v52, %v10781_v52   ;;  %v4917_v17 = vphi %v6670_v17, %v10780_v17   ;;  %v4913_v50 = vphi %v6668_v50, %v10779_v50   ;;  %v4909_v32 = vphi %v6666_v32, %v10778_v32   ;;  %v4905_v49 = vphi %v6664_v49, %v10777_v49  }
 0x1f7   : > { %847 = vmatpush.msra.mxu0 %v10408_v15  ;;  %v10409_v31 = vld [vmem:[#allocation33_spill] sm:$0xff]  ;;  %v10413_v30 = vld [vmem:[#allocation32_spill] sm:$0xff]  ;;  %v10417_v29 = vld [vmem:[#allocation31_spill] sm:$0xff]  ;;  %s4989_s28 = smov 32   ;;  %vm1020_vm3 = vcmask 261120   ;;  %vm1405_vm4 = vcmask 523264  }
 0x1f8   : > { %876 = vmatpush.msra.mxu1 %v10409_v31  ;;  %v10410_v48 = vld [vmem:[#allocation49_spill] sm:$0xff]  ;;  %v10414_v47 = vld [vmem:[#allocation48_spill] sm:$0xff]  ;;  %v10418_v46 = vld [vmem:[#allocation47_spill] sm:$0xff]  ;;  %s809_s9 = sadd.s32 1, %s4985_s9  }
 0x1f9   : > { %905 = vmatpush.msra.mxu2 %v10410_v48  ;;  %v10411_v36 = vld [vmem:[#allocation65_spill] sm:$0xff]  ;;  %848 = vmatpush.msra.mxu0 %v10412_v14  ;;  %v10415_v63 = vld [vmem:[#allocation64_spill] sm:$0xff]  ;;  %v10419_v62 = vld [vmem:[#allocation63_spill] sm:$0xff]  ;;  %p7758_p0 = scmp.ge.s32.totalorder %s809_s9, 8  }
 0x1fa   : > { %934 = vmatpush.msra.mxu3 %v10411_v36  ;;  %877 = vmatpush.msra.mxu1 %v10413_v30  ;;  %v10420_v12 = vld [vmem:[#allocation14_spill] sm:$0xff]  ;;  %v10424_v11 = vld [vmem:[#allocation13_spill] sm:$0xff]  ;;  %v10428_v10 = vld [vmem:[#allocation12_spill] sm:$0xff]  ;;  %s4991_s29 = smov (%p7758_p0), 96   ;;  %s4992_s4 = smov (%p7758_p0), 32   ;;  %vm4264_vm5 = vcmask (%p7758_p0), 1041408  }
 0x1fb   : > { %906 = vmatpush.msra.mxu2 %v10414_v47  ;;  %849 = vmatpush.msra.mxu0 %v10416_v13  ;;  %v10421_v28 = vld [vmem:[#allocation30_spill] sm:$0xff]  ;;  %v10425_v27 = vld [vmem:[#allocation29_spill] sm:$0xff]  ;;  %v10429_v26 = vld [vmem:[#allocation28_spill] sm:$0xff]  ;;  %s10905_s7 = sld [smem:[#allocation267_spill]] (%p7758_p0) }
 0x1fc   : > { %935 = vmatpush.msra.mxu3 %v10415_v63  ;;  %878 = vmatpush.msra.mxu1 %v10417_v29  ;;  %v10422_v45 = vld [vmem:[#allocation46_spill] sm:$0xff]  ;;  %v10426_v44 = vld [vmem:[#allocation45_spill] sm:$0xff]  ;;  %v10430_v43 = vld [vmem:[#allocation44_spill] sm:$0xff]  ;;  %s10955_s6 = sld [smem:[#allocation268_spill]] (%p7758_p0) }
 0x1fd   : > { %907 = vmatpush.msra.mxu2 %v10418_v46  ;;  %850 = vmatpush.msra.mxu0 %v10420_v12  ;;  %v10423_v61 = vld [vmem:[#allocation62_spill] sm:$0xff]  ;;  %v10427_v60 = vld [vmem:[#allocation61_spill] sm:$0xff]  ;;  %v10431_v59 = vld [vmem:[#allocation60_spill] sm:$0xff]  ;;  %s11059_s22 = sld [smem:[#allocation265_spill]] (%p7758_p0) }
 0x1fe   : > { %936 = vmatpush.msra.mxu3 %v10419_v62  ;;  %879 = vmatpush.msra.mxu1 %v10421_v28  ;;  %v10432_v9 = vld [vmem:[#allocation11_spill] sm:$0xff]  ;;  %v10436_v8 = vld [vmem:[#allocation10_spill] sm:$0xff]  ;;  %v10440_v7 = vld [vmem:[#allocation9_spill] sm:$0xff] }
 0x1ff   : > { %908 = vmatpush.msra.mxu2 %v10422_v45  ;;  %851 = vmatpush.msra.mxu0 %v10424_v11  ;;  %v10433_v25 = vld [vmem:[#allocation27_spill] sm:$0xff]  ;;  %v10437_v24 = vld [vmem:[#allocation26_spill] sm:$0xff]  ;;  %v10441_v23 = vld [vmem:[#allocation25_spill] sm:$0xff] }
 0x200   : > { %937 = vmatpush.msra.mxu3 %v10423_v61  ;;  %880 = vmatpush.msra.mxu1 %v10425_v27  ;;  %v10434_v42 = vld [vmem:[#allocation43_spill] sm:$0xff]  ;;  %v10438_v41 = vld [vmem:[#allocation42_spill] sm:$0xff]  ;;  %v10442_v40 = vld [vmem:[#allocation41_spill] sm:$0xff] }
 0x201   : > { %909 = vmatpush.msra.mxu2 %v10426_v44  ;;  %852 = vmatpush.msra.mxu0 %v10428_v10  ;;  %v10435_v58 = vld [vmem:[#allocation59_spill] sm:$0xff]  ;;  %v10439_v57 = vld [vmem:[#allocation58_spill] sm:$0xff]  ;;  %v10443_v56 = vld [vmem:[#allocation57_spill] sm:$0xff] }
 0x202   : > { %938 = vmatpush.msra.mxu3 %v10427_v60  ;;  %881 = vmatpush.msra.mxu1 %v10429_v26  ;;  %v10444_v6 = vld [vmem:[#allocation8_spill] sm:$0xff]  ;;  %v10448_v5 = vld [vmem:[#allocation7_spill] sm:$0xff]  ;;  %v10551_v36 = vld [vmem:[#allocation145_spill] sm:$0xff] }
 0x203   : > { %910 = vmatpush.msra.mxu2 %v10430_v43  ;;  %853 = vmatpush.msra.mxu0 %v10432_v9  ;;  %v10445_v22 = vld [vmem:[#allocation24_spill] sm:$0xff]  ;;  %v10449_v21 = vld [vmem:[#allocation23_spill] sm:$0xff]  ;;  %v10553_v48 = vld [vmem:[#allocation146_spill] sm:$0xff] }
 0x204   : > { %939 = vmatpush.msra.mxu3 %v10431_v59  ;;  %882 = vmatpush.msra.mxu1 %v10433_v25  ;;  %v10446_v39 = vld [vmem:[#allocation40_spill] sm:$0xff]  ;;  %v10450_v38 = vld [vmem:[#allocation39_spill] sm:$0xff]  ;;  %v10578_v14 = vld [vmem:[#allocation157_spill] sm:$0xff] }
 0x205   : > { %911 = vmatpush.msra.mxu2 %v10434_v42  ;;  %854 = vmatpush.msra.mxu0 %v10436_v8  ;;  %v10447_v55 = vld [vmem:[#allocation56_spill] sm:$0xff]  ;;  %v10451_v54 = vld [vmem:[#allocation55_spill] sm:$0xff]  ;;  %v10459_v42 = vld [vmem:[#allocation53_spill] sm:$0xff] }
 0x206   : > { %940 = vmatpush.msra.mxu3 %v10435_v58  ;;  %883 = vmatpush.msra.mxu1 %v10437_v24  ;;  %v10456_v58 = vld [vmem:[#allocation5_spill] sm:$0xff]  ;;  %v10460_v59 = vld [vmem:[#allocation4_spill] sm:$0xff]  ;;  %v10567_v24 = vld [vmem:[#allocation151_spill] sm:$0xff] }
 0x207   : > { %912 = vmatpush.msra.mxu2 %v10438_v41  ;;  %855 = vmatpush.msra.mxu0 %v10440_v7  ;;  %v10455_v41 = vld [vmem:[#allocation54_spill] sm:$0xff]  ;;  %v10549_v63 = vld [vmem:[#allocation144_spill] sm:$0xff] }
 0x208   : > { %941 = vmatpush.msra.mxu3 %v10439_v57  ;;  %884 = vmatpush.msra.mxu1 %v10441_v23  ;;  %v10452_v57 = vld [vmem:[#allocation6_spill] sm:$0xff]  ;;  %v10569_v9 = vld [vmem:[#allocation152_spill] sm:$0xff] }
 0x209   : > { %913 = vmatpush.msra.mxu2 %v10442_v40  ;;  %856 = vmatpush.msra.mxu0 %v10444_v6  ;;  %v10453_v40 = vld [vmem:[#allocation22_spill] sm:$0xff] }
 0x20a   : > { %942 = vmatpush.msra.mxu3 %v10443_v56  ;;  %885 = vmatpush.msra.mxu1 %v10445_v22  ;;  %v10454_v56 = vld [vmem:[#allocation38_spill] sm:$0xff] }
 0x20b   : > { %914 = vmatpush.msra.mxu2 %v10446_v39  ;;  %857 = vmatpush.msra.mxu0 %v10448_v5  ;;  %v10457_v39 = vld [vmem:[#allocation21_spill] sm:$0xff]  ;;  %v10579_v15 = vld [vmem:[#allocation158_spill] sm:$0xff] }
 0x20c   : > { %943 = vmatpush.msra.mxu3 %v10447_v55  ;;  %886 = vmatpush.msra.mxu1 %v10449_v21  ;;  %v10458_v55 = vld [vmem:[#allocation37_spill] sm:$0xff] }
 0x20d   : > { %915 = vmatpush.msra.mxu2 %v10450_v38  ;;  %858 = vmatpush.msra.mxu0 %v10452_v57  ;;  %v10461_v38 = vld [vmem:[#allocation20_spill] sm:$0xff] }
 0x20e   : > { %944 = vmatpush.msra.mxu3 %v10451_v54  ;;  %887 = vmatpush.msra.mxu1 %v10453_v40  ;;  %v10462_v54 = vld [vmem:[#allocation36_spill] sm:$0xff]  ;;  %v10464_v40 = vld [vmem:[#allocation3_spill] sm:$0xff] }
 0x20f   : > { %916 = vmatpush.msra.mxu2 %v10454_v56  ;;  %859 = vmatpush.msra.mxu0 %v10456_v58  ;;  %v10463_v57 = vld [vmem:[#allocation52_spill] sm:$0xff]  ;;  %v10465_v56 = vld [vmem:[#allocation19_spill] sm:$0xff] }
 0x210   : > { %945 = vmatpush.msra.mxu3 %v10455_v41  ;;  %888 = vmatpush.msra.mxu1 %v10457_v39  ;;  %v10466_v41 = vld [vmem:[#allocation35_spill] sm:$0xff]  ;;  %v10468_v39 = vld [vmem:[#allocation2_spill] sm:$0xff] }
 0x211   : > { %917 = vmatpush.msra.mxu2 %v10458_v55  ;;  %860 = vmatpush.msra.mxu0 %v10460_v59  ;;  %v10467_v58 = vld [vmem:[#allocation51_spill] sm:$0xff]  ;;  %v10469_v55 = vld [vmem:[#allocation18_spill] sm:$0xff] }
 0x212   : > { %946 = vmatpush.msra.mxu3 %v10459_v42  ;;  %889 = vmatpush.msra.mxu1 %v10461_v38  ;;  %v10470_v42 = vld [vmem:[#allocation34_spill] sm:$0xff]  ;;  %v10471_v38 = vld [vmem:[#allocation80_spill] sm:$0xff]  ;;  %v10473_v59 = vld [vmem:[#allocation79_spill] sm:$0xff] }
 0x213   : > { %918 = vmatpush.msra.mxu2 %v10462_v54  ;;  %861 = vmatpush.msra.mxu0 %v10464_v40  ;;  %v10472_v54 = vld [vmem:[#allocation50_spill] sm:$0xff]  ;;  %v10475_v40 = vld [vmem:[#allocation77_spill] sm:$0xff] }
 0x214   : > { %947 = vmatpush.msra.mxu3 %v10463_v57  ;;  %890 = vmatpush.msra.mxu1 %v10465_v56  ;;  %v10474_v57 = vld [vmem:[#allocation78_spill] sm:$0xff]  ;;  %v10476_v56 = vld [vmem:[#allocation76_spill] sm:$0xff] }
 0x215   : > { %919 = vmatpush.msra.mxu2 %v10466_v41  ;;  %862 = vmatpush.msra.mxu0 %v10468_v39  ;;  %v10477_v41 = vld [vmem:[#allocation75_spill] sm:$0xff]  ;;  %v10479_v39 = vld [vmem:[#allocation73_spill] sm:$0xff] }
 0x216   : > { %948 = vmatpush.msra.mxu3 %v10467_v58  ;;  %891 = vmatpush.msra.mxu1 %v10469_v55  ;;  %v10478_v58 = vld [vmem:[#allocation74_spill] sm:$0xff]  ;;  %v10480_v55 = vld [vmem:[#allocation116_spill] sm:$0xff] }
 0x217   : > { %920 = vmatpush.msra.mxu2 %v10470_v42  ;;  %863 = vmatmul.f32.vlgmr.msra.gmra.mxu0 %v4981_v4  ;;  %v10481_v42 = vld [vmem:[#allocation72_spill] sm:$0xff] }
 0x218   : > { %892 = vmatmul.f32.vlgmr.msra.gmra.mxu1 %v4977_v20  ;;  %921 = vmatmul.f32.vlgmr.msra.gmra.mxu2 %v4973_v37 }
 0x219   : > { %4345 = vmatpush.msk.msrb.mxu0 %vm843_vm1, %v10471_v38  ;;  %949 = vmatpush.msra.mxu3 %v10472_v54  ;;  %v10484_v38 = vld [vmem:[#allocation70_spill] sm:$0xff]  ;;  %v10488_v54 = vld [vmem:[#allocation67_spill] sm:$0xff] }
 0x21a   : > { %950 = vmatmul.f32.vlgmr.msra.gmra.mxu3 %v4969_v3  ;;  %4509 = vmatpush.msrb.mxu1 %v4921_v52 }
 0x21b   : > { %965 = vmatpush.msrb.mxu0 %v10473_v59  ;;  %4513 = vmatpush.msrb.mxu3 %v4917_v17  ;;  %v10490_v59 = vld [vmem:[#allocation66_spill] sm:$0xff] }
 0x21c   : > { %4510 = vmatpush.msrb.mxu1 %v4941_v16  ;;  %1603 = vmatpush.msrb.mxu2 %v4917_v17 }
 0x21d   : > { %966 = vmatpush.msrb.mxu0 %v10474_v57  ;;  %4514 = vmatpush.msrb.mxu3 %v4937_v2  ;;  %v10491_v57 = vld [vmem:[#allocation96_spill] sm:$0xff] }
 0x21e   : > { %4511 = vmatpush.msrb.mxu1 %v4961_v1  ;;  %1604 = vmatpush.msrb.mxu2 %v4937_v2 }
 0x21f   : > { %967 = vmatpush.msrb.mxu0 %v10475_v40  ;;  %4515 = vmatpush.msrb.mxu3 %v4957_v18  ;;  %v10494_v40 = vld [vmem:[#allocation81_spill] sm:$0xff] }
 0x220   : > { %866 = vmatmul.f32.gmra.mxu0 %v4961_v1  ;;  %895 = vmatmul.f32.gmra.mxu1 %v4957_v18 }
 0x221   : > { %924 = vmatmul.f32.gmra.mxu2 %v4953_v0  ;;  %968 = vmatpush.msrb.mxu0 %v10476_v56 }
 0x222   : > { %953 = vmatmul.f32.gmra.mxu3 %v4949_v51  ;;  %4512 = vmatpush.msrb.mxu1 %v4981_v4 }
 0x223   : > { %969 = vmatpush.msrb.mxu0 %v10477_v41  ;;  %4516 = vmatpush.msrb.mxu3 %v4977_v20 }
 0x224   : > { %1605 = vmatpush.msrb.mxu2 %v4957_v18  ;;  %1690 = vmatpush.msra.mxu1 %v4905_v49  ;;  %v10482_v18 = vld [vmem:[#allocation71_spill] sm:$0xff] }
 0x225   : > { %1632 = vmatpush.msra.mxu3 %v4913_v50  ;;  %970 = vmatpush.msrb.mxu0 %v10478_v58 }
 0x226   : > { %1606 = vmatpush.msrb.mxu2 %v4977_v20  ;;  %1691 = vmatpush.msra.mxu1 %v4925_v34  ;;  %v10483_v20 = vld [vmem:[#allocation111_spill] sm:$0xff] }
 0x227   : > { %1633 = vmatpush.msra.mxu3 %v4933_v35  ;;  %971 = vmatpush.msrb.mxu0 %v10479_v39 }
 0x228   : > { %1727 = vmatpush.msra.mxu2 %v10480_v55  ;;  %869 = vmatmul.f32.gmra.mxu0 %v4941_v16 }
 0x229   : > { %898 = vmatmul.f32.gmra.mxu1 %v4937_v2  ;;  %927 = vmatmul.f32.gmra.mxu2 %v4933_v35  ;;  %v10485_v35 = vld [vmem:[#allocation106_spill] sm:$0xff]  ;;  %v10486_v2 = vld [vmem:[#allocation69_spill] sm:$0xff] }
 0x22a   : > { %972 = vmatpush.msrb.mxu0 %v10481_v42  ;;  %956 = vmatmul.f32.gmra.mxu3 %v4929_v53 }
 0x22b   : > { %1634 = vmatpush.msra.mxu3 %v4953_v0  ;;  %1728 = vmatpush.msra.mxu2 %v10483_v20  ;;  %v10487_v0 = vld [vmem:[#allocation68_spill] sm:$0xff] }
 0x22c   : > { %973 = vmatpush.msrb.mxu0 %v10482_v18  ;;  %1692 = vmatpush.msra.mxu1 %v4945_v19 }
 0x22d   : > { %1635 = vmatpush.msra.mxu3 %v4973_v37  ;;  %1729 = vmatpush.msra.mxu2 %v10485_v35  ;;  %v10489_v37 = vld [vmem:[#allocation101_spill] sm:$0xff] }
 0x22e   : > { %974 = vmatpush.msrb.mxu0 %v10484_v38  ;;  %1693 = vmatpush.msra.mxu1 %v4965_v33 }
 0x22f   : > { %1730 = vmatpush.msra.mxu2 %v10489_v37 }
 0x230   : > { %975 = vmatpush.msrb.mxu0 %v10486_v2 }
 0x231   : > { %872 = vmatmul.f32.gmra.mxu0 %v4921_v52  ;;  %901 = vmatmul.f32.gmra.mxu1 %v4917_v17  ;;  %v10492_v17 = vld [vmem:[#allocation91_spill] sm:$0xff] }
 0x232   : > { %930 = vmatmul.f32.gmra.mxu2 %v4913_v50  ;;  %976 = vmatpush.msrb.mxu0 %v10487_v0  ;;  %v10493_v50 = vld [vmem:[#allocation86_spill] sm:$0xff] }
 0x233   : > { %959 = vmatmul.f32.gmra.mxu3 %v4909_v32  ;;  %1731 = vmatpush.msra.mxu2 %v10491_v57 }
 0x234   : > { %977 = vmatpush.msrb.mxu0 %v10488_v54 }
 0x235   : > { %1732 = vmatpush.msra.mxu2 %v10492_v17 }
 0x236   : > { %978 = vmatpush.msrb.mxu0 %v10490_v59 }
 0x237   : > { %1733 = vmatpush.msra.mxu2 %v10493_v50 }
 0x238   : > { %1574 = vmatpush.msra.mxu0 %v4921_v52 }
 0x239   : > { %4346 = vmatmul.msk.f32.vlgmr.msrb.gmra.mxu0 %vm830_vm2, %v4965_v33  ;;  %1734 = vmatpush.msra.mxu2 %v10494_v40 }
 0x23a   : > { %1575 = vmatpush.msra.mxu0 %v4941_v16 }
 0x23c   : > { %1576 = vmatpush.msra.mxu0 %v4961_v1 }
 0x23e   : > { %1577 = vmatpush.msra.mxu0 %v4981_v4 }
 0x240   : > { %1661 = vmatpush.msrb.mxu0 %v4909_v32 }
 0x241   : > { %4347 = vmatmul.msk.f32.gmra.mxu0 %vm830_vm2, %v4945_v19 }
 0x242   : > { %1662 = vmatpush.msrb.mxu0 %v4929_v53 }
 0x244   : > { %1663 = vmatpush.msrb.mxu0 %v4949_v51 }
 0x246   : > { %1664 = vmatpush.msrb.mxu0 %v4969_v3 }
 0x249   : > { %4348 = vmatmul.msk.f32.gmra.mxu0 %vm830_vm2, %v4925_v34 }
 0x251   : > { %4349 = vmatmul.msk.f32.gmra.mxu0 %vm830_vm2, %v4905_v49 }
 0x294   : > { %v864_v52 = vpop.f32.mrf.mxu0 }
 0x295   : > { %v893_v4 = vpop.f32.mrf.mxu1 }
 0x296   : > { %v894_v19 = vadd.f32 %v893_v4, %v864_v52 }
 0x29b   : > { %v922_v16 = vpop.f32.mrf.mxu2 }
 0x29c   : > { %v923_v39 = vadd.f32 %v922_v16, %v894_v19 }
 0x29d   : > { %v867_v33 = vpop.f32.mrf.mxu0  ;;  %v951_v56 = vpop.f32.mrf.mxu3 }
 0x29e   : > { %v896_v58 = vpop.f32.mrf.mxu1  ;;  %v952_v42 = vadd.f32 %v951_v56, %v923_v39 }
 0x29f   : > { %v897_v38 = vadd.f32 %v896_v58, %v867_v33 }
 0x2a4   : > { %v925_v55 = vpop.f32.mrf.mxu2 }
 0x2a5   : > { %v870_v1 = vpop.f32.mrf.mxu0  ;;  %v954_v18 = vpop.f32.mrf.mxu3  ;;  %v926_v34 = vadd.f32 %v925_v55, %v897_v38  ;;  %v10495_v55 = vld [vmem:[#allocation204_spill] sm:$0xff] }
 0x2a6   : > { %v899_v49 = vpop.f32.mrf.mxu1  ;;  %4351 = vmatmul.msk.f32.vlgmr.msrb.gmra.mxu1 %vm1020_vm3, %v10495_v55  ;;  %v10500_v38 = vld [vmem:[#allocation120_spill] sm:$0xff] }
 0x2a7   : > { %v955_v0 = vadd.f32 %v954_v18, %v926_v34  ;;  %v900_v37 = vadd.f32 %v899_v49, %v870_v1  ;;  %v10498_v18 = vld [vmem:[#allocation118_spill] sm:$0xff]  ;;  %v10501_v34 = vld [vmem:[#allocation113_spill] sm:$0xff] }
 0x2a8   : > { %v10502_v49 = vld [vmem:[#allocation114_spill] sm:$0xff] }
 0x2ac   : > { %v928_v2 = vpop.f32.mrf.mxu2 }
 0x2ad   : > { %v957_v57 = vpop.f32.mrf.mxu3  ;;  %v929_v17 = vadd.f32 %v928_v2, %v900_v37  ;;  %v10503_v2 = vld [vmem:[#allocation115_spill] sm:$0xff]  ;;  %v10507_v37 = vld [vmem:[#allocation205_spill] sm:$0xff] }
 0x2ae   : > { %v873_v41 = vpop.f32.mrf.mxu0  ;;  %v902_v50 = vpop.f32.mrf.mxu1  ;;  %4352 = vmatmul.msk.f32.gmra.mxu1 %vm1020_vm3, %v10507_v37 }
 0x2af   : > { %v958_v40 = vadd.f32 %v957_v57, %v929_v17  ;;  %v903_v4 = vadd.f32 %v902_v50, %v873_v41  ;;  %v10496_v41 = vld [vmem:[#allocation206_spill] sm:$0xff]  ;;  %v10508_v57 = vmov %v10507_v37  ;;  %v10511_v17 = vld [vmem:[#allocation104_spill] sm:$0xff] }
 0x2b0   : > { %4357 = vmatmul.msk.f32.vlgmr.msrb.gmra.mxu3 %vm1020_vm3, %v10496_v41  ;;  %v10512_v50 = vld [vmem:[#allocation112_spill] sm:$0xff] }
 0x2b1   : > { %4517 = vmatpush.msrb.mxu3 %v4909_v32  ;;  %v10506_v32 = vld [vmem:[#allocation110_spill] sm:$0xff] }
 0x2b3   : > { %4518 = vmatpush.msrb.mxu3 %v4929_v53  ;;  %v10510_v53 = vld [vmem:[#allocation103_spill] sm:$0xff] }
 0x2b5   : > { %v931_v52 = vpop.f32.mrf.mxu2  ;;  %4519 = vmatpush.msrb.mxu3 %v4949_v51  ;;  %v10509_v51 = vld [vmem:[#allocation117_spill] sm:$0xff] }
 0x2b6   : > { %v980_v20 = vpop.f32.mrf.mxu0  ;;  %v932_v56 = vadd.f32 %v931_v52, %v903_v4  ;;  %v960_v1 = vpop.f32.mrf.mxu3  ;;  %v10514_v52 = vld [vmem:[#allocation98_spill] sm:$0xff]  ;;  %v10517_v4 = vld [vmem:[#allocation100_spill] sm:$0xff]  ;;  %4353 = vmatmul.msk.f32.gmra.mxu1 %vm1020_vm3, %v10496_v41 }
 0x2b7   : > { %v6909_v35 = vadd.f32 %v980_v20, %v952_v42  ;;  %v10497_v42 = vld [vmem:[#allocation203_spill] sm:$0xff]  ;;  %4520 = vmatpush.msrb.mxu3 %v4969_v3 }
 0x2b8   : > { %v961_v19 = vadd.f32 %v960_v1, %v932_v56  ;;  %4350 = vmatmul.msk.f32.vlgmr.msra.gmra.mxu0 %vm1020_vm3, %v10497_v42  ;;  %4354 = vmatmul.msk.f32.vlgmr.msrb.gmra.mxu2 %vm1020_vm3, %v10497_v42  ;;  %v10499_v20 = vld [vmem:[#allocation119_spill] sm:$0xff]  ;;  %v10518_v56 = vld [vmem:[#allocation93_spill] sm:$0xff]  ;;  %v10519_v1 = vld [vmem:[#allocation94_spill] sm:$0xff] }
 0x2b9   : > { %996 = vrot.lane.b32.xlu0 %v6909_v35, %s4988_s10  ;;  %1785 = vmatpush.msra.mxu0 %v10498_v18  ;;  %v10516_v3 = vld [vmem:[#allocation107_spill] sm:$0xff]  ;;  %v10520_v18 = vld [vmem:[#allocation102_spill] sm:$0xff]  ;;  %v1031_v37 = vrot.slane %v6909_v35, 7 }
 0x2ba   : > { %1814 = vmatpush.msrb.mxu1 %v10499_v20  ;;  %1843 = vmatpush.msrb.mxu2 %v10500_v38  ;;  %v1027_v20 = vrot.slane %v6909_v35, 3  ;;  %v10521_v38 = vld [vmem:[#allocation89_spill] sm:$0xff] }
 0x2bb   : > { %1786 = vmatpush.msra.mxu0 %v10501_v34  ;;  %4358 = vmatmul.msk.f32.vlgmr.msra.gmra.mxu3 %vm1020_vm3, %v10497_v42  ;;  %v1028_v34 = vrot.slane %v6909_v35, 4 }
 0x2bc   : > { %1815 = vmatpush.msrb.mxu1 %v10502_v49  ;;  %1844 = vmatpush.msrb.mxu2 %v10503_v2  ;;  %v1029_v49 = vrot.slane %v6909_v35, 5  ;;  %v1030_v2 = vrot.slane %v6909_v35, 6 }
 0x2bd   : > { %1756 = vmatpush.msra.mxu3 %v10509_v51 }
 0x2be   : > { %v983_v54 = vpop.f32.mrf.mxu0  ;;  %1845 = vmatpush.msrb.mxu2 %v10506_v32  ;;  %v10523_v32 = vld [vmem:[#allocation88_spill] sm:$0xff]  ;;  %4366 = vmatmul.msk.f32.vlgmr.msra.gmra.mxu1 %vm1020_vm3, %v10497_v42 }
 0x2bf   : > { %v6912_v59 = vadd.f32 %v983_v54, %v955_v0  ;;  %v10504_v0 = vld [vmem:[#allocation108_spill] sm:$0xff]  ;;  %v10505_v54 = vld [vmem:[#allocation109_spill] sm:$0xff]  ;;  %1757 = vmatpush.msra.mxu3 %v10512_v50 }
 0x2c0   : > { %1787 = vmatpush.msra.mxu0 %v10504_v0  ;;  %1816 = vmatpush.msrb.mxu1 %v10505_v54  ;;  %v1085_v0 = vperm.slane %v6909_v35, 0  ;;  %v10522_v54 = vld [vmem:[#allocation97_spill] sm:$0xff] }
 0x2c1   : > { %1010 = vrot.lane.b32.xlu2 %v6912_v59, %s4989_s28  ;;  %998 = vrot.lane.b32.xlu1 %v6912_v59, %s4988_s10  ;;  %v1036_v29 = vrot.slane %v6912_v59, 5 }
 0x2c2   : > { %1008 = vrot.lane.b32.xlu0 %v6909_v35, %s4989_s28  ;;  %4355 = vmatmul.msk.f32.gmra.mxu2 %vm1020_vm3, %v10495_v55 }
 0x2c3   : > { %4362 = vmatmul.msk.f32.vlgmr.msrb.gmra.mxu0 %vm1020_vm3, %v10497_v42  ;;  %1817 = vmatpush.msrb.mxu1 %v10511_v17  ;;  %v10525_v17 = vld [vmem:[#allocation95_spill] sm:$0xff] }
 0x2c4   : > { %1788 = vmatpush.msra.mxu0 %v10510_v53  ;;  %1758 = vmatpush.msra.mxu3 %v10516_v3  ;;  %v10524_v53 = vld [vmem:[#allocation84_spill] sm:$0xff]  ;;  %v1088_v3 = vperm.slane %v1027_v20, 0  ;;  %v1033_v20 = vrot.slane %v6912_v59, 2  ;;  %v10547_v42 = vld [vmem:[#allocation143_spill] sm:$0xff] }
 0x2c5   : > { %4359 = vmatmul.msk.f32.gmra.mxu3 %vm1020_vm3, %v10495_v55 }
 0x2c6   : > { %v986_v33 = vpop.f32.mrf.mxu0  ;;  %1789 = vmatpush.msra.mxu0 %v10514_v52  ;;  %1759 = vmatpush.msra.mxu3 %v10520_v18  ;;  %v10527_v52 = vld [vmem:[#allocation83_spill] sm:$0xff]  ;;  %v1091_v18 = vperm.slane %v1030_v2, 0  ;;  %v7023_v46 = vmul.f32 %v1088_v3, %v10547_v42 }
 0x2c7   : > { %v6917_v16 = vadd.f32 %v986_v33, %v958_v40  ;;  %v10513_v40 = vld [vmem:[#allocation105_spill] sm:$0xff]  ;;  %v10515_v33 = vld [vmem:[#allocation99_spill] sm:$0xff]  ;;  %4367 = vmatmul.msk.f32.gmra.mxu1 %vm1020_vm3, %v10495_v55 }
 0x2c8   : > { %1846 = vmatpush.msrb.mxu2 %v10513_v40  ;;  %1818 = vmatpush.msrb.mxu1 %v10515_v33  ;;  %v10526_v40 = vld [vmem:[#allocation92_spill] sm:$0xff]  ;;  %v1032_v33 = vrot.slane %v6912_v59, 1  ;;  %v10537_v2 = vld [vmem:[#allocation139_spill] sm:$0xff]  ;;  %10548 = vst [vmem:[#allocation215_spill] sm:$0xff] %v7023_v46 }
 0x2c9   : > { %1012 = vrot.lane.b32.xlu2 %v6917_v16, %s4989_s28  ;;  %1000 = vrot.lane.b32.xlu1 %v6917_v16, %s4988_s10  ;;  %v10538_v61 = vmov %v10537_v2  ;;  %v1043_v13 = vrot.slane %v6917_v16, 5 }
 0x2ca   : > { %1847 = vmatpush.msrb.mxu2 %v10517_v4  ;;  %1790 = vmatpush.msra.mxu0 %v10518_v56  ;;  %v10528_v4 = vld [vmem:[#allocation90_spill] sm:$0xff]  ;;  %v1089_v56 = vperm.slane %v1028_v34, 0  ;;  %v1034_v34 = vrot.slane %v6912_v59, 3 }
 0x2cb   : > { %1819 = vmatpush.msrb.mxu1 %v10519_v1  ;;  %4356 = vmatmul.msk.f32.gmra.mxu2 %vm1020_vm3, %v10508_v57  ;;  %v1090_v1 = vperm.slane %v1029_v49, 0  ;;  %v1093_v49 = vperm.slane %v6912_v59, 0  ;;  %v1106_v46 = vperm.slane %v1043_v13, 0 }
 0x2cc   : > { %4363 = vmatmul.msk.f32.gmra.mxu0 %vm1020_vm3, %v10495_v55  ;;  %1760 = vmatpush.msra.mxu3 %v10522_v54  ;;  %v1092_v54 = vperm.slane %v1031_v37, 0  ;;  %v10539_v37 = vld [vmem:[#allocation82_spill] sm:$0xff]  ;;  %v7026_v47 = vmul.f32 %v1089_v56, %v10549_v63  ;;  %v1096_v25 = vperm.slane %v1034_v34, 0  ;;  %v1035_v34 = vrot.slane %v6912_v59, 4 }
 0x2cd   : > { %1820 = vmatpush.msrb.mxu1 %v10521_v38  ;;  %1791 = vmatpush.msra.mxu0 %v10523_v32  ;;  %v10529_v38 = vld [vmem:[#allocation135_spill] sm:$0xff]  ;;  %v10531_v32 = vld [vmem:[#allocation136_spill] sm:$0xff]  ;;  %v7050_v26 = vmul.f32 %v1093_v49, %v10569_v9 }
 0x2ce   : > { %v989_v58 = vpop.f32.mrf.mxu0  ;;  %1848 = vmatpush.msrb.mxu2 %v10525_v17  ;;  %1761 = vmatpush.msra.mxu3 %v10526_v40  ;;  %v10532_v43 = vmov %v10531_v32  ;;  %10550 = vst [vmem:[#allocation216_spill] sm:$0xff] %v7026_v47  ;;  %v7047_v8 = vmul.f32 %v1092_v54, %v10567_v24  ;;  %v1097_v47 = vperm.slane %v1035_v34, 0 }
 0x2cf   : > { %v6921_v39 = vadd.f32 %v989_v58, %v961_v19  ;;  %v1025_v19 = vrot.slane %v6909_v35, 1  ;;  %v1026_v58 = vrot.slane %v6909_v35, 2  ;;  %1821 = vmatpush.msrb.mxu1 %v10524_v53  ;;  %1792 = vmatpush.msra.mxu0 %v10527_v52  ;;  %v6992_v35 = vmul.f32 %v1085_v0, %v10529_v38  ;;  %v10533_v53 = vld [vmem:[#allocation137_spill] sm:$0xff]  ;;  %v10535_v52 = vld [vmem:[#allocation138_spill] sm:$0xff] }
 0x2d0   : > { %1849 = vmatpush.msrb.mxu2 %v10528_v4  ;;  %v10534_v40 = vmov %v10533_v53  ;;  %v10536_v60 = vmov %v10535_v52  ;;  %4360 = vmatmul.msk.f32.gmra.mxu3 %vm1020_vm3, %v10508_v57  ;;  %v10540_v4 = vld [vmem:[#allocation85_spill] sm:$0xff]  ;;  %10568 = vst [vmem:[#allocation223_spill] sm:$0xff] %v7047_v8  ;;  %v7082_v8 = vmul.f32 %v1096_v25, %v10579_v15 }
 0x2d1   : > { %1014 = vrot.lane.b32.xlu1 %v6921_v39, %s4989_s28  ;;  %1002 = vrot.lane.b32.xlu0 %v6921_v39, %s4988_s10  ;;  %v1086_v51 = vperm.slane %v1025_v19, 0  ;;  %v1087_v50 = vperm.slane %v1026_v58, 0  ;;  %v10530_v19 = vld [vmem:[#allocation87_spill] sm:$0xff]  ;;  %v6996_v58 = vmul.f32 %v1085_v0, %v10531_v32 }
 0x2d2   : > { %1762 = vmatpush.msra.mxu3 %v10530_v19  ;;  %1850 = vmatpush.msrb.mxu2 %v10540_v4  ;;  %v10541_v19 = vld [vmem:[#allocation140_spill] sm:$0xff]  ;;  %v10555_v4 = vld [vmem:[#allocation147_spill] sm:$0xff] }
 0x2d3   : > { %v6999_v17 = vmul.f32 %v1086_v51, %v10533_v53  ;;  %v7002_v44 = vmul.f32 %v1086_v51, %v10535_v52  ;;  %v7012_v0 = vmul.f32 %v1087_v50, %v10537_v2  ;;  %v1094_v51 = vperm.slane %v1032_v33, 0  ;;  %v10544_v53 = vld [vmem:[#allocation142_spill] sm:$0xff]  ;;  %4368 = vmatmul.msk.f32.gmra.mxu1 %vm1020_vm3, %v10508_v57 }
 0x2d4   : > { %1763 = vmatpush.msra.mxu3 %v10539_v37  ;;  %v10542_v45 = vmov %v10541_v19  ;;  %v7017_v32 = vmul.f32 %v1087_v50, %v10541_v19  ;;  %v10545_v62 = vmov %v10544_v53  ;;  %v7020_v52 = vmul.f32 %v1088_v3, %v10544_v53  ;;  %v10558_v50 = vld [vmem:[#allocation148_spill] sm:$0xff]  ;;  %v10561_v53 = vld [vmem:[#allocation149_spill] sm:$0xff]  ;;  %v10564_v3 = vld [vmem:[#allocation150_spill] sm:$0xff] }
 0x2d5   : > { %v7029_v2 = vmul.f32 %v1089_v56, %v10551_v36  ;;  %v7032_v37 = vmul.f32 %v1090_v1, %v10553_v48  ;;  %v10556_v21 = vmov %v10555_v4  ;;  %v7035_v33 = vmul.f32 %v1090_v1, %v10555_v4  ;;  %v10570_v4 = vld [vmem:[#allocation153_spill] sm:$0xff] }
 0x2d6   : > { %10543 = vst [vmem:[#allocation213_spill] sm:$0xff] %v7017_v32  ;;  %v10559_v5 = vmov %v10558_v50  ;;  %v7038_v19 = vmul.f32 %v1091_v18, %v10558_v50  ;;  %v10562_v22 = vmov %v10561_v53  ;;  %v7041_v6 = vmul.f32 %v1091_v18, %v10561_v53  ;;  %v10572_v50 = vld [vmem:[#allocation154_spill] sm:$0xff]  ;;  %v10574_v18 = vld [vmem:[#allocation155_spill] sm:$0xff] }
 0x2d7   : > { %10546 = vst [vmem:[#allocation214_spill] sm:$0xff] %v7020_v52  ;;  %v10565_v23 = vmov %v10564_v3  ;;  %v7044_v7 = vmul.f32 %v1092_v54, %v10564_v3  ;;  %v1095_v56 = vperm.slane %v1033_v20, 0  ;;  %v1039_v1 = vrot.slane %v6917_v16, 1 }
 0x2d8   : > { %10552 = vst [vmem:[#allocation217_spill] sm:$0xff] %v7029_v2  ;;  %v10571_v10 = vmov %v10570_v4  ;;  %v7054_v27 = vmul.f32 %v1093_v49, %v10570_v4  ;;  %v10573_v11 = vmov %v10572_v50  ;;  %v7057_v28 = vmul.f32 %v1094_v51, %v10572_v50  ;;  %4361 = vmatmul.msk.f32.gmra.mxu3 %vm1020_vm3, %v10496_v41 }
 0x2d9   : > { %10554 = vst [vmem:[#allocation218_spill] sm:$0xff] %v7032_v37  ;;  %v10575_v12 = vmov %v10574_v18  ;;  %v7060_v53 = vmul.f32 %v1094_v51, %v10574_v18  ;;  %v1040_v3 = vrot.slane %v6917_v16, 2  ;;  %v1041_v54 = vrot.slane %v6917_v16, 3  ;;  %v10576_v51 = vld [vmem:[#allocation156_spill] sm:$0xff] }
 0x2da   : > { %10557 = vst [vmem:[#allocation219_spill] sm:$0xff] %v7035_v33  ;;  %v1042_v20 = vrot.slane %v6917_v16, 4  ;;  %v1044_v49 = vrot.slane %v6917_v16, 6  ;;  %v1045_v4 = vrot.slane %v6917_v16, 7  ;;  %v1101_v50 = vperm.slane %v6917_v16, 0 }
 0x2db   : > { %10560 = vst [vmem:[#allocation220_spill] sm:$0xff] %v7038_v19  ;;  %v10577_v30 = vmov %v10576_v51  ;;  %v7076_v18 = vmul.f32 %v1095_v56, %v10576_v51  ;;  %v7079_v31 = vmul.f32 %v1095_v56, %v10578_v14  ;;  %v1103_v16 = vperm.slane %v1040_v3, 0  ;;  %4369 = vmatmul.msk.f32.gmra.mxu1 %vm1020_vm3, %v10496_v41 }
 0x2dc   : > { %10563 = vst [vmem:[#allocation221_spill] sm:$0xff] %v7041_v6  ;;  %v10580_v6 = vld [vmem:[#allocation159_spill] sm:$0xff]  ;;  %v1037_v33 = vrot.slane %v6912_v59, 6  ;;  %v1038_v37 = vrot.slane %v6912_v59, 7  ;;  %v1104_v2 = vperm.slane %v1041_v54, 0  ;;  %v1105_v55 = vperm.slane %v1042_v20, 0 }
 0x2dd   : > { %10566 = vst [vmem:[#allocation222_spill] sm:$0xff] %v7044_v7  ;;  %v1102_v7 = vperm.slane %v1039_v1, 0  ;;  %v7085_v19 = vmul.f32 %v1096_v25, %v10580_v6  ;;  %v1098_v51 = vperm.slane %v1036_v29, 0  ;;  %v1107_v52 = vperm.slane %v1044_v49, 0 }
 0x2de   : > { %v1108_v56 = vperm.slane %v1045_v4, 0  ;;  %v7090_v32 = vmul.f32 %v1101_v50, %v10529_v38  ;;  %v7093_v1 = vmul.f32 %v1101_v50, %v10532_v43  ;;  %v1046_v59 = vrot.slane %v6921_v39, 1 }
 0x2df   : > { %v7096_v25 = vmul.f32 %v1102_v7, %v10534_v40  ;;  %v7099_v3 = vmul.f32 %v1102_v7, %v10536_v60  ;;  %v7103_v54 = vmul.f32 %v1103_v16, %v10538_v61  ;;  %v7106_v13 = vmul.f32 %v1103_v16, %v10542_v45 }
 0x2e0   : > { %v1047_v29 = vrot.slane %v6921_v39, 2  ;;  %v1048_v20 = vrot.slane %v6921_v39, 3  ;;  %v7111_v34 = vmul.f32 %v1104_v2, %v10545_v62  ;;  %v7114_v49 = vmul.f32 %v1104_v2, %v10547_v42  ;;  %4364 = vmatmul.msk.f32.vlgmr.msrb.gmra.mxu3 %vm1020_vm3, %v10508_v57  ;;  %v10586_v57 = vld [vmem:[#allocation163_spill] sm:$0xff]  ;;  %v10594_v62 = vld [vmem:[#allocation168_spill] sm:$0xff] }
 0x2e1   : > { %v7117_v7 = vmul.f32 %v1105_v55, %v10549_v63  ;;  %v7120_v4 = vmul.f32 %v1105_v55, %v10551_v36  ;;  %v7123_v50 = vmul.f32 %v1106_v46, %v10553_v48  ;;  %v7126_v16 = vmul.f32 %v1106_v46, %v10556_v21  ;;  %v10584_v48 = vld [vmem:[#allocation161_spill] sm:$0xff] }
 0x2e2   : > { %v7129_v38 = vmul.f32 %v1107_v52, %v10559_v5  ;;  %v1109_v40 = vperm.slane %v6921_v39, 0  ;;  %v7137_v55 = vmul.f32 %v1107_v52, %v10562_v22  ;;  %v1110_v2 = vperm.slane %v1046_v59, 0 }
 0x2e3   : > { %v1099_v36 = vperm.slane %v1037_v33, 0  ;;  %v1100_v42 = vperm.slane %v1038_v37, 0  ;;  %v7140_v46 = vmul.f32 %v1108_v56, %v10565_v23  ;;  %v1111_v21 = vperm.slane %v1047_v29, 0  ;;  %v10592_v23 = vld [vmem:[#allocation165_spill] sm:$0xff] }
 0x2e4   : > { %10581 = vst [vmem:[#allocation224_spill] sm:$0xff] %v7137_v55  ;;  %v1112_v5 = vperm.slane %v1048_v20, 0  ;;  %v1049_v43 = vrot.slane %v6921_v39, 4  ;;  %v7144_v45 = vmul.f32 %v1108_v56, %v10567_v24  ;;  %v7147_v60 = vmul.f32 %v1097_v47, %v10584_v48 }
 0x2e5   : > { %10582 = vst [vmem:[#allocation225_spill] sm:$0xff] %v7140_v46  ;;  %v7150_v61 = vmul.f32 %v1098_v51, %v10586_v57  ;;  %v1050_v52 = vrot.slane %v6921_v39, 5  ;;  %v7154_v37 = vmul.f32 %v1109_v40, %v10569_v9  ;;  %v7157_v33 = vmul.f32 %v1109_v40, %v10571_v10 }
 0x2e6   : > { %10583 = vst [vmem:[#allocation226_spill] sm:$0xff] %v7144_v45  ;;  %v1051_v59 = vrot.slane %v6921_v39, 6  ;;  %v1052_v29 = vrot.slane %v6921_v39, 7  ;;  %v7162_v20 = vmul.f32 %v1110_v2, %v10573_v11  ;;  %v7165_v22 = vmul.f32 %v1110_v2, %v10575_v12  ;;  %v10600_v12 = vld [vmem:[#allocation162_spill] sm:$0xff]  ;;  %v10667_v45 = vld [vmem:[#allocation216_spill] sm:$0xff] }
 0x2e7   : > { %10585 = vst [vmem:[#allocation227_spill] sm:$0xff] %v7147_v60  ;;  %v7168_v24 = vmul.f32 %v1099_v36, %v10592_v23  ;;  %v7171_v9 = vmul.f32 %v1100_v42, %v10594_v62  ;;  %v7174_v40 = vmul.f32 %v1111_v21, %v10577_v30  ;;  %v7177_v10 = vmul.f32 %v1111_v21, %v10578_v14  ;;  %v10602_v60 = vld [vmem:[#allocation164_spill] sm:$0xff]  ;;  %v10604_v21 = vld [vmem:[#allocation166_spill] sm:$0xff] }
 0x2e8   : > { %10587 = vst [vmem:[#allocation228_spill] sm:$0xff] %v7150_v61  ;;  %v7180_v39 = vmul.f32 %v1112_v5, %v10579_v15  ;;  %v1113_v11 = vperm.slane %v1049_v43, 0  ;;  %v7183_v2 = vmul.f32 %v1112_v5, %v10580_v6  ;;  %v1114_v30 = vperm.slane %v1050_v52, 0  ;;  %4365 = vmatmul.msk.f32.gmra.mxu3 %vm1020_vm3, %v10496_v41 }
 0x2e9   : > { %10588 = vst [vmem:[#allocation229_spill] sm:$0xff] %v7154_v37  ;;  %v7197_v43 = vmul.f32 %v1099_v36, %v10604_v21  ;;  %v1115_v5 = vperm.slane %v1051_v59, 0  ;;  %v7199_v6 = vperm.slane %v1052_v29, 0  ;;  %v10661_v37 = vld [vmem:[#allocation184_spill] sm:$0xff] }
 0x2ea   : > { %10589 = vst [vmem:[#allocation230_spill] sm:$0xff] %v7157_v33  ;;  %v7208_v36 = vmul.f32 %v1114_v30, %v10586_v57 }
 0x2eb   : > { %10590 = vst [vmem:[#allocation231_spill] sm:$0xff] %v7162_v20 }
 0x2ec   : > { %10591 = vst [vmem:[#allocation232_spill] sm:$0xff] %v7165_v22  ;;  %v10626_v22 = vld [vmem:[#allocation195_spill] sm:$0xff] }
 0x2ed   : > { %10593 = vst [vmem:[#allocation233_spill] sm:$0xff] %v7168_v24  ;;  %v7186_v24 = vmul.f32 %v1097_v47, %v10600_v12 }
 0x2ee   : > { %10595 = vst [vmem:[#allocation234_spill] sm:$0xff] %v7171_v9  ;;  %v7189_v9 = vmul.f32 %v1098_v51, %v10602_v60 }
 0x2ef   : > { %10596 = vst [vmem:[#allocation235_spill] sm:$0xff] %v7174_v40 }
 0x2f0   : > { %10597 = vst [vmem:[#allocation236_spill] sm:$0xff] %v7177_v10  ;;  %v7215_v10 = vmul.f32 %v7199_v6, %v10594_v62 }
 0x2f1   : > { %10598 = vst [vmem:[#allocation237_spill] sm:$0xff] %v7180_v39 }
 0x2f2   : > { %10599 = vst [vmem:[#allocation238_spill] sm:$0xff] %v7183_v2 }
 0x2f3   : > { %10601 = vst [vmem:[#allocation239_spill] sm:$0xff] %v7186_v24  ;;  %v10607_v24 = vld [vmem:[#allocation169_spill] sm:$0xff] }
 0x2f4   : > { %10603 = vst [vmem:[#allocation240_spill] sm:$0xff] %v7189_v9 }
 0x2f5   : > { %10605 = vst [vmem:[#allocation241_spill] sm:$0xff] %v7197_v43  ;;  %v7211_v43 = vmul.f32 %v1115_v5, %v10592_v23  ;;  %v7227_v23 = vmul.f32 %v1115_v5, %v10604_v21  ;;  %v10628_v5 = vld [vmem:[#allocation196_spill] sm:$0xff] }
 0x2f6   : > { %10606 = vst [vmem:[#allocation242_spill] sm:$0xff] %v7199_v6  ;;  %v10622_v6 = vld [vmem:[#allocation191_spill] sm:$0xff] }
 0x2f7   : > { %10610 = vst [vmem:[#allocation245_spill] sm:$0xff] %v7208_v36  ;;  %v10616_v36 = vld [vmem:[#allocation188_spill] sm:$0xff] }
 0x2f8   : > { %10611 = vst [vmem:[#allocation246_spill] sm:$0xff] %v7211_v43 }
 0x2f9   : > { %10612 = vst [vmem:[#allocation247_spill] sm:$0xff] %v7215_v10  ;;  %v10624_v10 = vld [vmem:[#allocation193_spill] sm:$0xff] }
 0x2fa   : > { %10618 = vst [vmem:[#allocation250_spill] sm:$0xff] %v7227_v23 }
 0x31b   : > { %v1011_v63 = vpop.permute.xlu2 %1010 }
 0x32b   : > { %v997_v56 = vpop.permute.xlu0 %996 }
 0x333   : > { %v999_v61 = vpop.permute.xlu1 %998 }
 0x334   : > { %v1022_v40 = vsel %vm1020_vm3, %v999_v61, %v1011_v63  ;;  %v7202_v61 = vmul.f32 %v1100_v42, %v10607_v24  ;;  %v7205_v63 = vmul.f32 %v1113_v11, %v10584_v48  ;;  %v7218_v48 = vmul.f32 %v1113_v11, %v10600_v12  ;;  %v1009_v12 = vpop.permute.xlu0 %1008 }
 0x335   : > { %v1064_v47 = vrot.slane %v1022_v40, 1  ;;  %v1065_v14 = vrot.slane %v1022_v40, 2  ;;  %v1066_v15 = vrot.slane %v1022_v40, 3  ;;  %v1067_v51 = vrot.slane %v1022_v40, 4 }
 0x336   : > { %v1068_v9 = vrot.slane %v1022_v40, 5  ;;  %v1221_v52 = vperm.slane %v1022_v40, 0  ;;  %10608 = vst [vmem:[#allocation243_spill] sm:$0xff] %v7202_v61  ;;  %v1069_v2 = vrot.slane %v1022_v40, 6  ;;  %v1070_v41 = vrot.slane %v1022_v40, 7 }
 0x337   : > { %10609 = vst [vmem:[#allocation244_spill] sm:$0xff] %v7205_v63  ;;  %v1222_v39 = vperm.slane %v1064_v47, 0  ;;  %v1223_v59 = vperm.slane %v1065_v14, 0  ;;  %v1224_v29 = vperm.slane %v1066_v15, 0  ;;  %v1225_v42 = vperm.slane %v1067_v51, 0  ;;  %v10615_v47 = vld [vmem:[#allocation187_spill] sm:$0xff] }
 0x338   : > { %v1226_v24 = vperm.slane %v1068_v9, 0  ;;  %10613 = vst [vmem:[#allocation248_spill] sm:$0xff] %v7218_v48  ;;  %v7221_v40 = vmul.f32 %v1114_v30, %v10602_v60  ;;  %v1293_v57 = vmul.f32 %v1221_v52, %v10615_v47  ;;  %v1294_v14 = vmul.f32 %v1221_v52, %v10616_v36  ;;  %v10617_v15 = vld [vmem:[#allocation189_spill] sm:$0xff]  ;;  %v10621_v9 = vld [vmem:[#allocation190_spill] sm:$0xff]  ;;  %v10623_v60 = vld [vmem:[#allocation192_spill] sm:$0xff] }
 0x339   : > { %v1295_v63 = vmul.f32 %v1222_v39, %v10617_v15  ;;  %v7229_v62 = vperm.slane %v1069_v2, 0  ;;  %v7231_v51 = vperm.slane %v1070_v41, 0  ;;  %v1296_v11 = vmul.f32 %v1222_v39, %v10621_v9  ;;  %v10625_v52 = vld [vmem:[#allocation194_spill] sm:$0xff]  ;;  %v10630_v2 = vld [vmem:[#allocation197_spill] sm:$0xff]  ;;  %v10666_v47 = vld [vmem:[#allocation215_spill] sm:$0xff] }
 0x33a   : > { %10614 = vst [vmem:[#allocation249_spill] sm:$0xff] %v7221_v40  ;;  %v1297_v30 = vmul.f32 %v1223_v59, %v10622_v6  ;;  %v1298_v40 = vmul.f32 %v1223_v59, %v10623_v60  ;;  %v1299_v48 = vmul.f32 %v1224_v29, %v10624_v10  ;;  %v1300_v61 = vmul.f32 %v1224_v29, %v10625_v52  ;;  %v10660_v60 = vld [vmem:[#allocation183_spill] sm:$0xff]  ;;  %v10663_v15 = vld [vmem:[#allocation185_spill] sm:$0xff] }
 0x33b   : > { %10619 = vst [vmem:[#allocation251_spill] sm:$0xff] %v7229_v62  ;;  %v7239_v20 = vmul.f32 %v1225_v42, %v10626_v22  ;;  %v7242_v21 = vmul.f32 %v1225_v42, %v10628_v5  ;;  %v7245_v41 = vmul.f32 %v1226_v24, %v10630_v2  ;;  %v1357_v33 = vadd.f32 %v1293_v57, %v7050_v26 }
 0x33c   : > { %10620 = vst [vmem:[#allocation252_spill] sm:$0xff] %v7231_v51  ;;  %v10632_v51 = vld [vmem:[#allocation198_spill] sm:$0xff]  ;;  %v1358_v59 = vadd.f32 %v1294_v14, %v7054_v27  ;;  %v1359_v10 = vadd.f32 %v1295_v63, %v7057_v28  ;;  %v1021_v29 = vsel %vm1020_vm3, %v997_v56, %v1009_v12  ;;  %v1360_v42 = vadd.f32 %v1296_v11, %v7060_v53  ;;  %v10640_v11 = vld [vmem:[#allocation172_spill] sm:$0xff] }
 0x33d   : > { %10627 = vst [vmem:[#allocation253_spill] sm:$0xff] %v7239_v20  ;;  %v7248_v39 = vmul.f32 %v1226_v24, %v10632_v51  ;;  %v1057_v52 = vrot.slane %v1021_v29, 1  ;;  %v1058_v22 = vrot.slane %v1021_v29, 2  ;;  %v1059_v20 = vrot.slane %v1021_v29, 3  ;;  %v10639_v14 = vld [vmem:[#allocation170_spill] sm:$0xff] }
 0x33e   : > { %10629 = vst [vmem:[#allocation254_spill] sm:$0xff] %v7242_v21  ;;  %v1060_v43 = vrot.slane %v1021_v29, 4  ;;  %v1061_v21 = vrot.slane %v1021_v29, 5  ;;  %v1062_v2 = vrot.slane %v1021_v29, 6  ;;  %v7256_v24 = vadd.f32 %v1297_v30, %v7076_v18 }
 0x33f   : > { %10631 = vst [vmem:[#allocation255_spill] sm:$0xff] %v7245_v41  ;;  %v1213_v41 = vperm.slane %v1021_v29, 0  ;;  %v1063_v51 = vrot.slane %v1021_v29, 7  ;;  %v1214_v26 = vperm.slane %v1057_v52, 0  ;;  %v1215_v57 = vperm.slane %v1058_v22, 0 }
 0x340   : > { %10633 = vst [vmem:[#allocation256_spill] sm:$0xff] %v7248_v39  ;;  %v7259_v27 = vadd.f32 %v1298_v40, %v7079_v31  ;;  %v7262_v12 = vadd.f32 %v1299_v48, %v7082_v8  ;;  %v7265_v28 = vadd.f32 %v1300_v61, %v7085_v19  ;;  %v1216_v56 = vperm.slane %v1059_v20, 0  ;;  %v10643_v19 = vld [vmem:[#allocation171_spill] sm:$0xff]  ;;  %v10645_v20 = vld [vmem:[#allocation173_spill] sm:$0xff] }
 0x341   : > { %10634 = vst [vmem:[#allocation257_spill] sm:$0xff] %v7256_v24  ;;  %v7268_v53 = vsel %vm1405_vm4, %v1357_v33, 0.0  ;;  %v1217_v63 = vperm.slane %v1060_v43, 0  ;;  %v1277_v18 = vmul.f32 %v1213_v41, %v10639_v14  ;;  %v1279_v30 = vmul.f32 %v1214_v26, %v10640_v11  ;;  %v10647_v33 = vld [vmem:[#allocation174_spill] sm:$0xff] }
 0x342   : > { %10635 = vst [vmem:[#allocation258_spill] sm:$0xff] %v7259_v27  ;;  %v7273_v22 = vsel %vm1405_vm4, %v1359_v10, 0.0  ;;  %v7276_v31 = vsel %vm1405_vm4, %v1358_v59, 0.0  ;;  %v1218_v8 = vperm.slane %v1061_v21, 0  ;;  %v1219_v48 = vperm.slane %v1062_v2, 0  ;;  %v10654_v59 = vld [vmem:[#allocation178_spill] sm:$0xff] }
 0x343   : > { %10636 = vst [vmem:[#allocation259_spill] sm:$0xff] %v7262_v12  ;;  %v1220_v40 = vperm.slane %v1063_v51, 0  ;;  %v10644_v61 = vmov %v10643_v19  ;;  %v1278_v29 = vmul.f32 %v1213_v41, %v10643_v19  ;;  %v1280_v52 = vmul.f32 %v1214_v26, %v10645_v20  ;;  %v10650_v12 = vld [vmem:[#allocation175_spill] sm:$0xff]  ;;  %v10656_v26 = vld [vmem:[#allocation180_spill] sm:$0xff] }
 0x344   : > { %10637 = vst [vmem:[#allocation260_spill] sm:$0xff] %v7265_v28  ;;  %v10646_v28 = vmov %v10645_v20  ;;  %v10648_v27 = vmov %v10647_v33  ;;  %v1281_v39 = vmul.f32 %v1215_v57, %v10647_v33  ;;  %v7282_v43 = vsel %vm1405_vm4, %v1360_v42, 0.0  ;;  %v10655_v21 = vld [vmem:[#allocation179_spill] sm:$0xff]  ;;  %v10657_v20 = vld [vmem:[#allocation181_spill] sm:$0xff]  ;;  %v10659_v42 = vld [vmem:[#allocation182_spill] sm:$0xff] }
 0x345   : > { %10638 = vst [vmem:[#allocation261_spill] sm:$0xff] %v7268_v53  ;;  %v1282_v24 = vmul.f32 %v1215_v57, %v10650_v12  ;;  %v10651_v53 = vld [vmem:[#allocation176_spill] sm:$0xff]  ;;  %v1286_v2 = vmul.f32 %v1217_v63, %v10655_v21  ;;  %v1341_v51 = vadd.f32 %v1277_v18, %v6992_v35  ;;  %v1343_v41 = vadd.f32 %v1279_v30, %v6999_v17  ;;  %v10664_v18 = vld [vmem:[#allocation213_spill] sm:$0xff]  ;;  %v10665_v30 = vld [vmem:[#allocation214_spill] sm:$0xff] }
 0x346   : > { %10641 = vst [vmem:[#allocation262_spill] sm:$0xff] %v7273_v22  ;;  %v10652_v62 = vmov %v10651_v53  ;;  %v1283_v10 = vmul.f32 %v1216_v56, %v10651_v53  ;;  %v10653_v22 = vld [vmem:[#allocation177_spill] sm:$0xff]  ;;  %v1287_v19 = vmul.f32 %v1218_v8, %v10656_v26  ;;  %v10658_v5 = vmov %v10657_v20 }
 0x347   : > { %10642 = vst [vmem:[#allocation263_spill] sm:$0xff] %v7276_v31  ;;  %v1284_v23 = vmul.f32 %v1216_v56, %v10653_v22  ;;  %v1285_v31 = vmul.f32 %v1217_v63, %v10654_v59  ;;  %v1288_v33 = vmul.f32 %v1218_v8, %v10657_v20  ;;  %v1290_v57 = vmul.f32 %v1219_v48, %v10660_v60  ;;  %v1001_v20 = vpop.permute.xlu1 %1000 }
 0x348   : > { %10649 = vst [vmem:[#allocation264_spill] sm:$0xff] %v7282_v43  ;;  %v1289_v43 = vmul.f32 %v1219_v48, %v10659_v42  ;;  %v10662_v6 = vmov %v10661_v37  ;;  %v1291_v53 = vmul.f32 %v1220_v40, %v10661_v37  ;;  %v1342_v56 = vadd.f32 %v1278_v29, %v6996_v58  ;;  %v10668_v48 = vld [vmem:[#allocation217_spill] sm:$0xff] }
 0x349   : > { %v1344_v9 = vadd.f32 %v1280_v52, %v7002_v44  ;;  %v1345_v63 = vadd.f32 %v1281_v39, %v7012_v0  ;;  %v1292_v35 = vmul.f32 %v1220_v40, %v10663_v15  ;;  %v1346_v17 = vadd.f32 %v1282_v24, %v10664_v18  ;;  %v10669_v44 = vld [vmem:[#allocation218_spill] sm:$0xff]  ;;  %v10670_v0 = vld [vmem:[#allocation219_spill] sm:$0xff]  ;;  %v10671_v40 = vld [vmem:[#allocation220_spill] sm:$0xff] }
 0x34a   : > { %v1347_v36 = vadd.f32 %v1283_v10, %v10665_v30  ;;  %v1348_v8 = vadd.f32 %v1284_v23, %v10666_v47  ;;  %v1349_v46 = vadd.f32 %v1285_v31, %v10667_v45  ;;  %v1350_v55 = vadd.f32 %v1286_v2, %v10668_v48  ;;  %v10672_v18 = vld [vmem:[#allocation221_spill] sm:$0xff]  ;;  %v1013_v31 = vpop.permute.xlu2 %1012  ;;  %v10673_v2 = vld [vmem:[#allocation222_spill] sm:$0xff]  ;;  %v10674_v30 = vld [vmem:[#allocation223_spill] sm:$0xff] }
 0x34b   : > { %v1406_v37 = vsel %vm1405_vm4, %v1341_v51, 0.0  ;;  %v1407_v58 = vsel %vm1405_vm4, %v1343_v41, 0.0  ;;  %v1351_v29 = vadd.f32 %v1287_v19, %v10669_v44  ;;  %v1352_v39 = vadd.f32 %v1288_v33, %v10670_v0 }
 0x34c   : > { %v1353_v52 = vadd.f32 %v1289_v43, %v10671_v40  ;;  %v1408_v24 = vadd.f32 %v1407_v58, %v1406_v37  ;;  %v1354_v10 = vadd.f32 %v1290_v57, %v10672_v18  ;;  %v1409_v23 = vsel %vm1405_vm4, %v1345_v63, 0.0 }
 0x34d   : > { %v1437_v47 = vsel %vm1405_vm4, %v1342_v56, 0.0  ;;  %v1438_v45 = vsel %vm1405_vm4, %v1344_v9, 0.0  ;;  %v1355_v51 = vadd.f32 %v1291_v53, %v10673_v2  ;;  %v1356_v41 = vadd.f32 %v1292_v35, %v10674_v30 }
 0x34e   : > { %v1410_v48 = vadd.f32 %v1409_v23, %v1408_v24  ;;  %v1439_v19 = vadd.f32 %v1438_v45, %v1437_v47  ;;  %v1411_v33 = vsel %vm1405_vm4, %v1347_v36, 0.0  ;;  %v1413_v43 = vsel %vm1405_vm4, %v1349_v46, 0.0 }
 0x34f   : > { %v1440_v37 = vsel %vm1405_vm4, %v1346_v17, 0.0  ;;  %v1023_v57 = vsel %vm1020_vm3, %v1001_v20, %v1013_v31  ;;  %v1415_v9 = vsel %vm1405_vm4, %v1351_v29, 0.0  ;;  %v1417_v53 = vsel %vm1405_vm4, %v1353_v52, 0.0  ;;  %v1015_v30 = vpop.permute.xlu1 %1014  ;;  %v1003_v29 = vpop.permute.xlu0 %1002 }
 0x350   : > { %v1412_v63 = vadd.f32 %v1411_v33, %v1410_v48  ;;  %v1441_v58 = vadd.f32 %v1440_v37, %v1439_v19  ;;  %v1071_v56 = vrot.slane %v1023_v57, 1  ;;  %v1072_v44 = vrot.slane %v1023_v57, 2 }
 0x351   : > { %v1442_v35 = vsel %vm1405_vm4, %v1348_v8, 0.0  ;;  %v1073_v0 = vrot.slane %v1023_v57, 3  ;;  %v1074_v36 = vrot.slane %v1023_v57, 4  ;;  %v1229_v18 = vperm.slane %v1023_v57, 0 }
 0x352   : > { %v1414_v40 = vadd.f32 %v1413_v43, %v1412_v63  ;;  %v1443_v24 = vadd.f32 %v1442_v35, %v1441_v58  ;;  %v1444_v46 = vsel %vm1405_vm4, %v1350_v55, 0.0  ;;  %v1075_v17 = vrot.slane %v1023_v57, 5 }
 0x353   : > { %v1076_v23 = vrot.slane %v1023_v57, 6  ;;  %v1230_v20 = vperm.slane %v1071_v56, 0  ;;  %v1077_v31 = vrot.slane %v1023_v57, 7  ;;  %v1231_v2 = vperm.slane %v1072_v44, 0 }
 0x354   : > { %v1416_v47 = vadd.f32 %v1415_v9, %v1414_v40  ;;  %v1445_v45 = vadd.f32 %v1444_v46, %v1443_v24  ;;  %v1419_v52 = vsel %vm1405_vm4, %v1355_v51, 0.0  ;;  %v1446_v8 = vsel %vm1405_vm4, %v1352_v39, 0.0 }
 0x355   : > { %v1448_v48 = vsel %vm1405_vm4, %v1354_v10, 0.0  ;;  %v1232_v19 = vperm.slane %v1073_v0, 0  ;;  %v1233_v37 = vperm.slane %v1074_v36, 0  ;;  %v1309_v55 = vmul.f32 %v1229_v18, %v10639_v14  ;;  %v10809_v14 = vld [vmem:[#allocation28_spill] sm:$0xff] (%p7758_p0) }
 0x356   : > { %v1418_v33 = vadd.f32 %v1417_v53, %v1416_v47  ;;  %v1447_v43 = vadd.f32 %v1446_v8, %v1445_v45  ;;  %v1450_v63 = vsel %vm1405_vm4, %v1356_v41, 0.0  ;;  %v1234_v58 = vperm.slane %v1075_v17, 0 }
 0x357   : > { %v1311_v57 = vmul.f32 %v1230_v20, %v10640_v11  ;;  %v7331_v56 = vsel %vm1020_vm3, %v1003_v29, %v1015_v30  ;;  %v1235_v44 = vperm.slane %v1076_v23, 0  ;;  %v1236_v51 = vperm.slane %v1077_v31, 0  ;;  %v10810_v11 = vld [vmem:[#allocation11_spill] sm:$0xff] (%p7758_p0) }
 0x358   : > { %v1310_v39 = vmul.f32 %v1229_v18, %v10644_v61  ;;  %v1313_v10 = vmul.f32 %v1231_v2, %v10648_v27  ;;  %v1449_v9 = vadd.f32 %v1448_v48, %v1447_v43  ;;  %v1312_v53 = vmul.f32 %v1230_v20, %v10646_v28  ;;  %v10806_v27 = vld [vmem:[#allocation29_spill] sm:$0xff] (%p7758_p0)  ;;  %v10808_v28 = vld [vmem:[#allocation12_spill] sm:$0xff] (%p7758_p0)  ;;  %v10812_v61 = vld [vmem:[#allocation10_spill] sm:$0xff] (%p7758_p0) }
 0x359   : > { %v1314_v35 = vmul.f32 %v1231_v2, %v10650_v12  ;;  %v1315_v0 = vmul.f32 %v1232_v19, %v10652_v62  ;;  %v7338_v41 = vadd.f32 %v1419_v52, %v1418_v33  ;;  %v1316_v40 = vmul.f32 %v1232_v19, %v10653_v22  ;;  %v10804_v62 = vld [vmem:[#allocation30_spill] sm:$0xff] (%p7758_p0)  ;;  %v10811_v22 = vld [vmem:[#allocation27_spill] sm:$0xff] (%p7758_p0) }
 0x35a   : > { %v1317_v24 = vmul.f32 %v1233_v37, %v10654_v59  ;;  %v1373_v36 = vadd.f32 %v1309_v55, %v7090_v32  ;;  %v1318_v46 = vmul.f32 %v1233_v37, %v10655_v21  ;;  %v1319_v18 = vmul.f32 %v1234_v58, %v10656_v26  ;;  %v10813_v59 = vld [vmem:[#allocation26_spill] sm:$0xff] (%p7758_p0)  ;;  %v10814_v21 = vld [vmem:[#allocation116_spill] sm:$0xff] (%p7758_p0)  ;;  %v10815_v26 = vld [vmem:[#allocation9_spill] sm:$0xff] (%p7758_p0) }
 0x35b   : > { %v1320_v17 = vmul.f32 %v1234_v58, %v10658_v5  ;;  %v1375_v23 = vadd.f32 %v1311_v57, %v7096_v25  ;;  %v1321_v20 = vmul.f32 %v1235_v44, %v10659_v42  ;;  %v1322_v47 = vmul.f32 %v1235_v44, %v10660_v60  ;;  %v10676_v57 = vld [vmem:[#allocation225_spill] sm:$0xff]  ;;  %v10677_v44 = vld [vmem:[#allocation226_spill] sm:$0xff] }
 0x35c   : > { %v1323_v45 = vmul.f32 %v1236_v51, %v10662_v6  ;;  %v1377_v31 = vadd.f32 %v1313_v10, %v7103_v54  ;;  %v7351_v2 = vadd.f32 %v1450_v63, %v1449_v9  ;;  %v1324_v32 = vmul.f32 %v1236_v51, %v10663_v15  ;;  %v10803_v60 = vld [vmem:[#allocation14_spill] sm:$0xff] (%p7758_p0)  ;;  %v10805_v15 = vld [vmem:[#allocation13_spill] sm:$0xff] (%p7758_p0) }
 0x35d   : > { %v1374_v30 = vadd.f32 %v1310_v39, %v7093_v1  ;;  %v1376_v29 = vadd.f32 %v1312_v53, %v7099_v3  ;;  %v1378_v52 = vadd.f32 %v1314_v35, %v7106_v13  ;;  %v1379_v25 = vadd.f32 %v1315_v0, %v7111_v34  ;;  %v10675_v34 = vld [vmem:[#allocation224_spill] sm:$0xff]  ;;  %v10816_v42 = vld [vmem:[#allocation25_spill] sm:$0xff] (%p7758_p0) }
 0x35e   : > { %v1468_v8 = vsel %vm1405_vm4, %v1373_v36, 0.0  ;;  %v1469_v48 = vsel %vm1405_vm4, %v1375_v23, 0.0  ;;  %v1380_v19 = vadd.f32 %v1316_v40, %v7114_v49  ;;  %v1381_v54 = vadd.f32 %v1317_v24, %v7117_v7 }
 0x35f   : > { %v1382_v33 = vadd.f32 %v1318_v46, %v7120_v4  ;;  %v1470_v43 = vadd.f32 %v1469_v48, %v1468_v8  ;;  %v1383_v37 = vadd.f32 %v1319_v18, %v7123_v50  ;;  %v1384_v1 = vadd.f32 %v1320_v17, %v7126_v16  ;;  %v10679_v8 = vld [vmem:[#allocation188_spill] sm:$0xff] }
 0x360   : > { %v1385_v3 = vadd.f32 %v1321_v20, %v7129_v38  ;;  %v1471_v13 = vsel %vm1405_vm4, %v1377_v31, 0.0  ;;  %v1386_v55 = vadd.f32 %v1322_v47, %v10675_v34  ;;  %v1499_v58 = vsel %vm1405_vm4, %v1374_v30, 0.0 }
 0x361   : > { %v1472_v63 = vadd.f32 %v1471_v13, %v1470_v43  ;;  %v1500_v49 = vsel %vm1405_vm4, %v1376_v29, 0.0  ;;  %v1387_v7 = vadd.f32 %v1323_v45, %v10676_v57  ;;  %v1388_v4 = vadd.f32 %v1324_v32, %v10677_v44  ;;  %v10681_v57 = vld [vmem:[#allocation190_spill] sm:$0xff] }
 0x362   : > { %v1473_v51 = vsel %vm1405_vm4, %v1379_v25, 0.0  ;;  %v1501_v50 = vadd.f32 %v1500_v49, %v1499_v58  ;;  %v1475_v16 = vsel %vm1405_vm4, %v1381_v54, 0.0  ;;  %v1502_v38 = vsel %vm1405_vm4, %v1378_v52, 0.0  ;;  %v10678_v52 = vld [vmem:[#allocation187_spill] sm:$0xff]  ;;  %v10680_v58 = vld [vmem:[#allocation189_spill] sm:$0xff] }
 0x363   : > { %v1474_v39 = vadd.f32 %v1473_v51, %v1472_v63  ;;  %v1078_v10 = vrot.slane %v7331_v56, 1  ;;  %v1477_v9 = vsel %vm1405_vm4, %v1383_v37, 0.0  ;;  %v1504_v35 = vsel %vm1405_vm4, %v1380_v19, 0.0  ;;  %v10682_v51 = vld [vmem:[#allocation191_spill] sm:$0xff] }
 0x364   : > { %v1503_v53 = vadd.f32 %v1502_v38, %v1501_v50  ;;  %v1079_v0 = vrot.slane %v7331_v56, 2  ;;  %v1080_v24 = vrot.slane %v7331_v56, 3  ;;  %v1081_v36 = vrot.slane %v7331_v56, 4 }
 0x365   : > { %v1476_v40 = vadd.f32 %v1475_v16, %v1474_v39  ;;  %v1237_v46 = vperm.slane %v7331_v56, 0  ;;  %v1479_v18 = vsel %vm1405_vm4, %v1385_v3, 0.0  ;;  %v1481_v17 = vsel %vm1405_vm4, %v1387_v7, 0.0  ;;  %v10683_v39 = vld [vmem:[#allocation229_spill] sm:$0xff]  ;;  %v10684_v16 = vld [vmem:[#allocation230_spill] sm:$0xff] }
 0x366   : > { %v1505_v23 = vadd.f32 %v1504_v35, %v1503_v53  ;;  %v1082_v20 = vrot.slane %v7331_v56, 5  ;;  %v1506_v45 = vsel %vm1405_vm4, %v1382_v33, 0.0  ;;  %v1508_v31 = vsel %vm1405_vm4, %v1384_v1, 0.0  ;;  %v10687_v35 = vld [vmem:[#allocation194_spill] sm:$0xff] }
 0x367   : > { %v1478_v47 = vadd.f32 %v1477_v9, %v1476_v40  ;;  %v1238_v32 = vperm.slane %v1078_v10, 0  ;;  %v1239_v29 = vperm.slane %v1079_v0, 0  ;;  %v1325_v25 = vmul.f32 %v1237_v46, %v10678_v52  ;;  %v10685_v10 = vld [vmem:[#allocation192_spill] sm:$0xff]  ;;  %v10688_v40 = vld [vmem:[#allocation195_spill] sm:$0xff] }
 0x368   : > { %v1507_v30 = vadd.f32 %v1506_v45, %v1505_v23  ;;  %v1326_v48 = vmul.f32 %v1237_v46, %v10679_v8  ;;  %v1510_v54 = vsel %vm1405_vm4, %v1386_v55, 0.0  ;;  %v1240_v43 = vperm.slane %v1080_v24, 0  ;;  %v10692_v45 = vld [vmem:[#allocation231_spill] sm:$0xff] }
 0x369   : > { %v1480_v19 = vadd.f32 %v1479_v18, %v1478_v47  ;;  %v1241_v37 = vperm.slane %v1081_v36, 0  ;;  %v1512_v13 = vsel %vm1405_vm4, %v1388_v4, 0.0  ;;  %v1083_v34 = vrot.slane %v7331_v56, 6  ;;  %v10686_v4 = vld [vmem:[#allocation193_spill] sm:$0xff]  ;;  %v10689_v36 = vld [vmem:[#allocation196_spill] sm:$0xff]  ;;  %v10693_v52 = vld [vmem:[#allocation199_spill] sm:$0xff] }
 0x36a   : > { %v1509_v3 = vadd.f32 %v1508_v31, %v1507_v30  ;;  %v1242_v33 = vperm.slane %v1082_v20, 0  ;;  %v1084_v1 = vrot.slane %v7331_v56, 7  ;;  %v1327_v49 = vmul.f32 %v1238_v32, %v10680_v58  ;;  %v10690_v18 = vld [vmem:[#allocation197_spill] sm:$0xff]  ;;  %v10691_v20 = vld [vmem:[#allocation198_spill] sm:$0xff]  ;;  %v10695_v8 = vld [vmem:[#allocation251_spill] sm:$0xff] }
 0x36b   : > { %v1482_v63 = vadd.f32 %v1481_v17, %v1480_v19  ;;  %v1328_v7 = vmul.f32 %v1238_v32, %v10681_v57  ;;  %v1329_v50 = vmul.f32 %v1239_v29, %v10682_v51  ;;  %v1389_v55 = vadd.f32 %v1325_v25, %v10683_v39  ;;  %v10696_v19 = vld [vmem:[#allocation201_spill] sm:$0xff]  ;;  %v10700_v57 = vld [vmem:[#allocation235_spill] sm:$0xff]  ;;  %v10702_v39 = vld [vmem:[#allocation236_spill] sm:$0xff] }
 0x36c   : > { %v1511_v44 = vadd.f32 %v1510_v54, %v1509_v3  ;;  %v1390_v38 = vadd.f32 %v1326_v48, %v10684_v16  ;;  %v1330_v9 = vmul.f32 %v1239_v29, %v10685_v10  ;;  %v1331_v53 = vmul.f32 %v1240_v43, %v10686_v4  ;;  %v10703_v16 = vld [vmem:[#allocation208_spill] sm:$0xff]  ;;  %v10705_v10 = vld [vmem:[#allocation253_spill] sm:$0xff] }
 0x36d   : > { %v1332_v0 = vmul.f32 %v1240_v43, %v10687_v35  ;;  %v1333_v24 = vmul.f32 %v1241_v37, %v10688_v40  ;;  %v7403_v46 = vmul.f32 %v1241_v37, %v10689_v36  ;;  %v1335_v17 = vmul.f32 %v1242_v33, %v10690_v18  ;;  %v10698_v43 = vld [vmem:[#allocation252_spill] sm:$0xff]  ;;  %v10707_v35 = vld [vmem:[#allocation255_spill] sm:$0xff]  ;;  %v10708_v40 = vld [vmem:[#allocation209_spill] sm:$0xff] }
 0x36e   : > { %v1513_v56 = vadd.f32 %v1512_v13, %v1511_v44  ;;  %v1483_v23 = vsel %vm1405_vm4, %v1389_v55, 0.0  ;;  %v7408_v47 = vmul.f32 %v1242_v33, %v10691_v20  ;;  %v1391_v31 = vadd.f32 %v1327_v49, %v10692_v45  ;;  %v10699_v13 = vld [vmem:[#allocation232_spill] sm:$0xff]  ;;  %v10710_v36 = vld [vmem:[#allocation238_spill] sm:$0xff] }
 0x36f   : > { %v1484_v32 = vadd.f32 %v1483_v23, %v1482_v63  ;;  %v1514_v30 = vsel %vm1405_vm4, %v1390_v38, 0.0  ;;  %v10694_v25 = vmov %v10693_v52  ;;  %v1305_v48 = vmul.f32 %v10695_v8, %v10693_v52  ;;  %v10701_v63 = vld [vmem:[#allocation261_spill] sm:$0xff]  ;;  %v10704_v38 = vld [vmem:[#allocation227_spill] sm:$0xff]  ;;  %v10712_v23 = vld [vmem:[#allocation262_spill] sm:$0xff] }
 0x370   : > { %v7412_v29 = vadd.f32 %v1514_v30, %v1513_v56  ;;  %v10697_v54 = vmov %v10696_v19  ;;  %v1307_v37 = vmul.f32 %v10698_v43, %v10696_v19  ;;  %v1243_v3 = vperm.slane %v1083_v34, 0  ;;  %v10706_v34 = vld [vmem:[#allocation228_spill] sm:$0xff]  ;;  %v10714_v30 = vld [vmem:[#allocation257_spill] sm:$0xff] }
 0x371   : > { %v1392_v58 = vadd.f32 %v1328_v7, %v10699_v13  ;;  %v1393_v44 = vadd.f32 %v1329_v50, %v10700_v57  ;;  %v4990_v33 = vmov 0   ;;  %v1422_v49 = vadd.f32 %v10701_v63, %v7338_v41  ;;  %v10709_v50 = vld [vmem:[#allocation237_spill] sm:$0xff]  ;;  %v10715_v19 = vld [vmem:[#allocation200_spill] sm:$0xff]  ;;  %v10717_v63 = vld [vmem:[#allocation202_spill] sm:$0xff] }
 0x372   : > { %4710 = vset.pattern.permute.xlu0 %v4990_v33  ;;  %4711 = vset.pattern.permute.xlu1 %v4990_v33  ;;  %v7422_v51 = vperm.slane %v1084_v1, 0  ;;  %v1394_v55 = vadd.f32 %v1330_v9, %v10702_v39  ;;  %v1365_v4 = vadd.f32 %v10705_v10, %v10704_v38  ;;  %v1367_v7 = vadd.f32 %v10707_v35, %v10706_v34  ;;  %v10711_v41 = vld [vmem:[#allocation233_spill] sm:$0xff]  ;;  %v10713_v9 = vld [vmem:[#allocation234_spill] sm:$0xff]  ;;  %v10721_v34 = vld [vmem:[#allocation239_spill] sm:$0xff] }
 0x373   : > { %1537 = vperm.xlu0 %4710, %v10703_v16   ;;  %1542 = vperm.xlu1 %4711, %v10708_v40   ;;  %v1395_v56 = vadd.f32 %v1331_v53, %v10709_v50  ;;  %v7433_v18 = vadd.f32 %v1332_v0, %v10710_v36  ;;  %v1369_v1 = vadd.f32 %v1305_v48, %v10711_v41  ;;  %v1425_v52 = vsel %vm1405_vm4, %v10714_v30, 0.0  ;;  %v10718_v53 = vld [vmem:[#allocation207_spill] sm:$0xff]  ;;  %v10722_v35 = vld [vmem:[#allocation254_spill] sm:$0xff]  ;;  %v10724_v36 = vld [vmem:[#allocation256_spill] sm:$0xff] }
 0x374   : > { %v1424_v20 = vadd.f32 %v10712_v23, %v1422_v49  ;;  %4709 = vset.pattern.permute.xlu2 %v4990_v33  ;;  %v1371_v45 = vadd.f32 %v1307_v37, %v10713_v9  ;;  %v10716_v13 = vmov %v10715_v19  ;;  %v1306_v57 = vmul.f32 %v10695_v8, %v10715_v19  ;;  %v10719_v33 = vld [vmem:[#allocation263_spill] sm:$0xff]  ;;  %v10725_v41 = vld [vmem:[#allocation264_spill] sm:$0xff] }
 0x375   : > { %v1308_v39 = vmul.f32 %v10698_v43, %v10717_v63  ;;  %1532 = vperm.xlu2 %4709, %v10718_v53   ;;  %v1485_v0 = vsel %vm1405_vm4, %v1391_v31, 0.0  ;;  %v1516_v48 = vsel %vm1405_vm4, %v1392_v58, 0.0  ;;  %v1453_v49 = vadd.f32 %v10719_v33, %v7351_v2  ;;  %v10720_v37 = vld [vmem:[#allocation259_spill] sm:$0xff]  ;;  %v10723_v31 = vld [vmem:[#allocation240_spill] sm:$0xff] }
 0x376   : > { %v1426_v16 = vadd.f32 %v1425_v52, %v1424_v20  ;;  %v1427_v38 = vsel %vm1405_vm4, %v10720_v37, 0.0  ;;  %v1429_v10 = vsel %vm1405_vm4, %v1365_v4, 0.0  ;;  %v1431_v8 = vsel %vm1405_vm4, %v1367_v7, 0.0  ;;  %v10726_v20 = vld [vmem:[#allocation241_spill] sm:$0xff]  ;;  %v10727_v30 = vld [vmem:[#allocation243_spill] sm:$0xff]  ;;  %v10728_v4 = vld [vmem:[#allocation258_spill] sm:$0xff] }
 0x377   : > { %v1366_v43 = vadd.f32 %v10722_v35, %v10721_v34  ;;  %v1433_v50 = vsel %vm1405_vm4, %v1369_v1, 0.0  ;;  %v1368_v58 = vadd.f32 %v10724_v36, %v10723_v31  ;;  %v1455_v23 = vadd.f32 %v10725_v41, %v1453_v49  ;;  %v10729_v1 = vld [vmem:[#allocation260_spill] sm:$0xff]  ;;  %v10732_v41 = vld [vmem:[#allocation210_spill] sm:$0xff] }
 0x378   : > { %v1428_v40 = vadd.f32 %v1427_v38, %v1426_v16  ;;  %v1435_v2 = vsel %vm1405_vm4, %v1371_v45, 0.0  ;;  %v1370_v9 = vadd.f32 %v1306_v57, %v10726_v20  ;;  %v1372_v52 = vadd.f32 %v1308_v39, %v10727_v30  ;;  %v10730_v49 = vld [vmem:[#allocation244_spill] sm:$0xff] }
 0x379   : > { %v1456_v7 = vsel %vm1405_vm4, %v10728_v4, 0.0  ;;  %v1337_v16 = vmul.f32 %v1243_v3, %v10694_v25  ;;  %v1486_v33 = vadd.f32 %v1485_v0, %v1484_v32  ;;  %v1458_v37 = vsel %vm1405_vm4, %v10729_v1, 0.0  ;;  %v10731_v32 = vld [vmem:[#allocation245_spill] sm:$0xff]  ;;  %v10734_v30 = vld [vmem:[#allocation248_spill] sm:$0xff]  ;;  %v10817_v25 = vld [vmem:[#allocation111_spill] sm:$0xff] (%p7758_p0) }
 0x37a   : > { %v1430_v19 = vadd.f32 %v1429_v10, %v1428_v40  ;;  %v1457_v53 = vadd.f32 %v1456_v7, %v1455_v23  ;;  %v1460_v38 = vsel %vm1405_vm4, %v1366_v43, 0.0  ;;  %v1397_v34 = vadd.f32 %v1333_v24, %v10730_v49  ;;  %v10733_v23 = vld [vmem:[#allocation246_spill] sm:$0xff] }
 0x37b   : > { %v1487_v45 = vsel %vm1405_vm4, %v1393_v44, 0.0  ;;  %v1462_v39 = vsel %vm1405_vm4, %v1368_v58, 0.0  ;;  %v1464_v10 = vsel %vm1405_vm4, %v1370_v9, 0.0  ;;  %v1339_v40 = vmul.f32 %v7422_v51, %v10697_v54  ;;  %v10818_v54 = vld [vmem:[#allocation8_spill] sm:$0xff] (%p7758_p0) }
 0x37c   : > { %v1432_v57 = vadd.f32 %v1431_v8, %v1430_v19  ;;  %v1459_v35 = vadd.f32 %v1458_v37, %v1457_v53  ;;  %v1488_v31 = vadd.f32 %v1487_v45, %v1486_v33  ;;  %v1399_v0 = vadd.f32 %v1335_v17, %v10731_v32  ;;  %v10735_v53 = vld [vmem:[#allocation247_spill] sm:$0xff]  ;;  %v10737_v37 = vld [vmem:[#allocation169_spill] sm:$0xff] }
 0x37d   : > { %v1489_v36 = vsel %vm1405_vm4, %v1395_v56, 0.0  ;;  %1547 = vperm.xlu2 %4709, %v10732_v41   ;;  %v1401_v44 = vadd.f32 %v1337_v16, %v10733_v23  ;;  %v1491_v20 = vsel %vm1405_vm4, %v1397_v34, 0.0  ;;  %v1338_v58 = vmul.f32 %v1243_v3, %v10716_v13  ;;  %v1617_v23 = vpop.f32.mrf.mxu3  ;;  %v10819_v13 = vld [vmem:[#allocation24_spill] sm:$0xff] (%p7758_p0) }
 0x37e   : > { %v1434_v43 = vadd.f32 %v1433_v50, %v1432_v57  ;;  %v1461_v24 = vadd.f32 %v1460_v38, %v1459_v35  ;;  %v1490_v8 = vadd.f32 %v1489_v36, %v1488_v31  ;;  %v1398_v9 = vadd.f32 %v7403_v46, %v10734_v30  ;;  %v10738_v38 = vld [vmem:[#allocation242_spill] sm:$0xff] }
 0x37f   : > { %v1517_v4 = vadd.f32 %v1516_v48, %v7412_v29  ;;  %v1518_v56 = vsel %vm1405_vm4, %v1394_v55, 0.0  ;;  %v1403_v50 = vadd.f32 %v1339_v40, %v10735_v53  ;;  %v1493_v33 = vsel %vm1405_vm4, %v1399_v0, 0.0  ;;  %v10736_v29 = vld [vmem:[#allocation249_spill] sm:$0xff]  ;;  %v10739_v35 = vld [vmem:[#allocation250_spill] sm:$0xff] }
 0x380   : > { %v1436_v7 = vadd.f32 %v1435_v2, %v1434_v43  ;;  %v1463_v17 = vadd.f32 %v1462_v39, %v1461_v24  ;;  %v1492_v19 = vadd.f32 %v1491_v20, %v1490_v8  ;;  %v1340_v16 = vmul.f32 %v7422_v51, %v10717_v63  ;;  %v1582_v24 = vpop.f32.mrf.mxu1  ;;  %v10820_v63 = vld [vmem:[#allocation106_spill] sm:$0xff] (%p7758_p0) }
 0x381   : > { %v1519_v1 = vadd.f32 %v1518_v56, %v1517_v4  ;;  %v1400_v48 = vadd.f32 %v7408_v47, %v10736_v29  ;;  %v1520_v55 = vsel %vm1405_vm4, %v7433_v18, 0.0  ;;  %v1466_v2 = vsel %vm1405_vm4, %v1372_v52, 0.0  ;;  %v1579_v4 = vpop.f32.mrf.mxu0 }
 0x382   : > { %4370 = vmatmul.msk.f32.vlgmr.msra.gmra.mxu2 %vm1405_vm4, %v1436_v7  ;;  %4374 = vmatmul.msk.f32.vlgmr.msra.gmra.mxu3 %vm1405_vm4, %v1436_v7  ;;  %v1465_v46 = vadd.f32 %v1464_v10, %v1463_v17  ;;  %v1494_v3 = vadd.f32 %v1493_v33, %v1492_v19  ;;  %v1495_v51 = vsel %vm1405_vm4, %v1401_v44, 0.0  ;;  %v1212_v49 = vmul.f32 %v10738_v38, %v10737_v37  ;;  %v1608_v17 = vpop.f32.mrf.mxu2 }
 0x383   : > { %4378 = vmatmul.msk.f32.vlgmr.msra.gmra.mxu0 %vm1405_vm4, %v1436_v7  ;;  %4382 = vmatmul.msk.f32.vlgmr.msrb.gmra.mxu1 %vm1405_vm4, %v1436_v7  ;;  %v1521_v34 = vadd.f32 %v1520_v55, %v1519_v1  ;;  %v1402_v39 = vadd.f32 %v1338_v58, %v10739_v35  ;;  %v1522_v47 = vsel %vm1405_vm4, %v1398_v9, 0.0  ;;  %v1497_v18 = vsel %vm1405_vm4, %v1403_v50, 0.0 }
 0x384   : > { %v1467_v45 = vadd.f32 %v1466_v2, %v1465_v46  ;;  %v1496_v57 = vadd.f32 %v1495_v51, %v1494_v3  ;;  %v1404_v40 = vadd.f32 %v1340_v16, %v1212_v49  ;;  %v1524_v32 = vsel %vm1405_vm4, %v1400_v48, 0.0 }
 0x385   : > { %v1523_v31 = vadd.f32 %v1522_v47, %v1521_v34  ;;  %v1526_v0 = vsel %vm1405_vm4, %v1402_v39, 0.0  ;;  %v1637_v8 = vpop.f32.mrf.mxu3  ;;  %v10740_v34 = vld [vmem:[#allocation130_spill] sm:$0xff]  ;;  %v10807_v12 = vmov (%p7758_p0), 0  }
 0x386   : > { %v1498_v10 = vadd.f32 %v1497_v18, %v1496_v57  ;;  %v1528_v41 = vsel %vm1405_vm4, %v1404_v40, 0.0  ;;  %v10741_v57 = vld [vmem:[#allocation129_spill] sm:$0xff]  ;;  %4754 = vset.pattern.permute.xlu1 (%p7758_p0), %v10807_v12  ;;  %4753 = vset.pattern.permute.xlu0 (%p7758_p0), %v10807_v12 }
 0x387   : > { %v1525_v52 = vadd.f32 %v1524_v32, %v1523_v31  ;;  %4752 = vset.pattern.permute.xlu2 (%p7758_p0), %v10807_v12  ;;  %v10851_v12 = vld [vmem:[#allocation59_spill] sm:$0xff] (%p7758_p0) }
 0x388   : > { %v7522_v44 = vpop.f32.mrf.mxu1 }
 0x389   : > { %v1527_v36 = vadd.f32 %v1526_v0, %v1525_v52  ;;  %v1666_v56 = vpop.f32.mrf.mxu0 }
 0x38a   : > { %4371 = vmatmul.msk.f32.gmra.mxu2 %vm1405_vm4, %v1467_v45  ;;  %4375 = vmatmul.msk.f32.gmra.mxu3 %vm1405_vm4, %v1467_v45  ;;  %v1611_v50 = vpop.f32.mrf.mxu2 }
 0x38b   : > { %4379 = vmatmul.msk.f32.gmra.mxu0 %vm1405_vm4, %v1467_v45  ;;  %4383 = vmatmul.msk.f32.gmra.mxu1 %vm1405_vm4, %v1467_v45  ;;  %v1529_v43 = vadd.f32 %v1528_v41, %v1527_v36 }
 0x38d   : > { %v1640_v58 = vpop.f32.mrf.mxu3 }
 0x390   : > { %v7524_v20 = vpop.f32.mrf.mxu1 }
 0x391   : > { %v1669_v16 = vpop.f32.mrf.mxu0 }
 0x392   : > { %4372 = vmatmul.msk.f32.gmra.mxu2 %vm1405_vm4, %v1498_v10  ;;  %4376 = vmatmul.msk.f32.gmra.mxu3 %vm1405_vm4, %v1498_v10  ;;  %v1614_v3 = vpop.f32.mrf.mxu2 }
 0x393   : > { %4380 = vmatmul.msk.f32.gmra.mxu0 %vm1405_vm4, %v1498_v10  ;;  %4384 = vmatmul.msk.f32.gmra.mxu1 %vm1405_vm4, %v1498_v10 }
 0x395   : > { %v7528_v9 = vpop.f32.mrf.mxu3 }
 0x398   : > { %v7526_v30 = vpop.f32.mrf.mxu1 }
 0x39a   : > { %4373 = vmatmul.msk.f32.gmra.mxu2 %vm1405_vm4, %v1529_v43  ;;  %4377 = vmatmul.msk.f32.gmra.mxu3 %vm1405_vm4, %v1529_v43 }
 0x39b   : > { %4381 = vmatmul.msk.f32.gmra.mxu0 %vm1405_vm4, %v1529_v43  ;;  %4385 = vmatmul.msk.f32.gmra.mxu1 %vm1405_vm4, %v1529_v43 }
 0x39d   : > { %v1646_v19 = vpop.f32.mrf.mxu3 }
 0x3a2   : > { %4386 = vmatmul.msk.f32.vlgmr.msrb.gmra.mxu2 %vm1405_vm4, %v1436_v7  ;;  %v7530_v7 = vpop.f32.mrf.mxu1 }
 0x3a5   : > { %v1672_v33 = vpop.f32.mrf.mxu3 }
 0x3aa   : > { %4387 = vmatmul.msk.f32.gmra.mxu2 %vm1405_vm4, %v1467_v45  ;;  %v7532_v53 = vpop.f32.mrf.mxu1 }
 0x3ad   : > { %v1675_v29 = vpop.f32.mrf.mxu3 }
 0x3b2   : > { %4388 = vmatmul.msk.f32.gmra.mxu2 %vm1405_vm4, %v1498_v10  ;;  %v7534_v1 = vpop.f32.mrf.mxu1 }
 0x3ba   : > { %4389 = vmatmul.msk.f32.gmra.mxu2 %vm1405_vm4, %v1529_v43 }
 0x3cf   : > { %v7536_v46 = vpop.permute.xlu2 %1532 }
 0x3d0   : > { %v1667_v48 = vadd.f32 %v1666_v56, %v7536_v46  ;;  %v1638_v55 = vadd.f32 %v1637_v8, %v7536_v46  ;;  %v1580_v49 = vadd.f32 %v1579_v4, %v7536_v46  ;;  %v1609_v47 = vadd.f32 %v1608_v17, %v7536_v46 }
 0x3d7   : > { %v7547_v39 = vpop.permute.xlu2 %1547 }
 0x3d8   : > { %v7556_v0 = vadd.f32 %v1646_v19, %v7547_v39  ;;  %v7559_v43 = vadd.f32 %v1675_v29, %v7547_v39 }
 0x3e5   : > { %v7550_v18 = vpop.permute.xlu0 %1537  ;;  %v7572_v29 = vpop.permute.xlu1 %1542 }
 0x3e6   : > { %v1670_v31 = vadd.f32 %v1669_v16, %v7550_v18  ;;  %v1641_v17 = vadd.f32 %v1640_v58, %v7550_v18  ;;  %v1612_v56 = vadd.f32 %v1611_v50, %v7550_v18  ;;  %v10742_v16 = vld [vmem:[#allocation122_spill] sm:$0xff]  ;;  %v7577_v50 = vadd.f32 %v1614_v3, %v7572_v29 }
 0x3e7   : > { %v7592_v3 = vadd.f32 %v7522_v44, %v7572_v29 }
 0x400   : > { %v1794_v2 = vpop.f32.mrf.mxu0  ;;  %v1823_v51 = vpop.f32.mrf.mxu1 }
 0x401   : > { %v1795_v37 = vadd.f32 %v1794_v2, %v1638_v55  ;;  %v1824_v38 = vadd.f32 %v1823_v51, %v1667_v48  ;;  %v10743_v55 = vld [vmem:[#allocation121_spill] sm:$0xff] }
 0x403   : > { %v7542_v45 = vadd.f32 %v1795_v37, %v10740_v34  ;;  %v7545_v35 = vadd.f32 %v1824_v38, %v10741_v57  ;;  %v7570_v37 = vadd.f32 %v1617_v23, %v7547_v39 }
 0x405   : > { %v1906_v10 = vmul.f32 0.044715, %v7542_v45  ;;  %v1907_v40 = vmul.f32 0.044715, %v7545_v35  ;;  %v1736_v32 = vpop.f32.mrf.mxu2  ;;  %v1765_v52 = vpop.f32.mrf.mxu3 }
 0x406   : > { %v1737_v36 = vadd.f32 %v1736_v32, %v1580_v49  ;;  %v1766_v41 = vadd.f32 %v1765_v52, %v1609_v47  ;;  %v10744_v32 = vld [vmem:[#allocation132_spill] sm:$0xff] }
 0x407   : > { %v1926_v8 = vmul.f32 %v1906_v10, %v7542_v45  ;;  %v1927_v4 = vmul.f32 %v1907_v40, %v7545_v35  ;;  %v1583_v10 = vadd.f32 %v1582_v24, %v7550_v18  ;;  %v7596_v24 = vadd.f32 %v7524_v20, %v7547_v39 }
 0x408   : > { %v1864_v48 = vadd.f32 %v1737_v36, %v10742_v16  ;;  %v7567_v2 = vadd.f32 %v1766_v41, %v10743_v55  ;;  %v1797_v19 = vpop.f32.mrf.mxu0  ;;  %v1826_v51 = vpop.f32.mrf.mxu1  ;;  %v10745_v36 = vld [vmem:[#allocation131_spill] sm:$0xff] }
 0x409   : > { %v1946_v38 = vmul.f32 %v1926_v8, %v7542_v45  ;;  %v1947_v49 = vmul.f32 %v1927_v4, %v7545_v35  ;;  %v1798_v34 = vadd.f32 %v1797_v19, %v1641_v17  ;;  %v1827_v58 = vadd.f32 %v1826_v51, %v1670_v31 }
 0x40a   : > { %v1904_v57 = vmul.f32 0.044715, %v1864_v48  ;;  %v1905_v47 = vmul.f32 0.044715, %v7567_v2  ;;  %v1644_v19 = vadd.f32 %v7528_v9, %v7572_v29  ;;  %v1673_v51 = vadd.f32 %v1672_v33, %v7572_v29 }
 0x40b   : > { %v1966_v40 = vadd.f32 %v1946_v38, %v7542_v45  ;;  %v1967_v23 = vadd.f32 %v1947_v49, %v7545_v35  ;;  %v7584_v52 = vadd.f32 %v1798_v34, %v10744_v32  ;;  %v7587_v41 = vadd.f32 %v1827_v58, %v10745_v36  ;;  %v10746_v36 = vld [vmem:[#allocation124_spill] sm:$0xff] }
 0x40c   : > { %v1924_v8 = vmul.f32 %v1904_v57, %v1864_v48  ;;  %v1925_v31 = vmul.f32 %v1905_v47, %v7567_v2  ;;  %v7606_v57 = vadd.f32 %v7526_v30, %v7536_v46 }
 0x40d   : > { %v1986_v4 = vmul.f32 0.7978846, %v1966_v40  ;;  %v1987_v17 = vmul.f32 0.7978846, %v1967_v23  ;;  %v1739_v16 = vpop.f32.mrf.mxu2  ;;  %v1768_v55 = vpop.f32.mrf.mxu3  ;;  %v1911_v34 = vmul.f32 0.044715, %v7584_v52 }
 0x40e   : > { %v1944_v38 = vmul.f32 %v1924_v8, %v1864_v48  ;;  %v1945_v49 = vmul.f32 %v1925_v31, %v7567_v2  ;;  %v1912_v44 = vmul.f32 0.044715, %v7587_v41  ;;  %v1740_v58 = vadd.f32 %v1739_v16, %v1583_v10  ;;  %v10747_v31 = vld [vmem:[#allocation123_spill] sm:$0xff] }
 0x40f   : > { %4712 = vtanh.f32 %v1986_v4  ;;  %v1769_v20 = vadd.f32 %v1768_v55, %v1612_v56  ;;  %v1931_v33 = vmul.f32 %v1911_v34, %v7584_v52  ;;  %v1886_v16 = vmul.f32 0.5, %v7542_v45 }
 0x410   : > { %4714 = vtanh.f32 %v1987_v17  ;;  %v1964_v47 = vadd.f32 %v1944_v38, %v1864_v48  ;;  %v1965_v9 = vadd.f32 %v1945_v49, %v7567_v2  ;;  %v1800_v40 = vpop.f32.mrf.mxu0  ;;  %v1829_v23 = vpop.f32.mrf.mxu1  ;;  %v1932_v32 = vmul.f32 %v1912_v44, %v7587_v41 }
 0x411   : > { %v7612_v8 = vadd.f32 %v1740_v58, %v10746_v36  ;;  %v7615_v10 = vadd.f32 %v1769_v20, %v10747_v31  ;;  %v1801_v56 = vadd.f32 %v1800_v40, %v1644_v19  ;;  %v1951_v46 = vmul.f32 %v1931_v33, %v7584_v52  ;;  %v10748_v58 = vld [vmem:[#allocation134_spill] sm:$0xff] }
 0x412   : > { %v1984_v4 = vmul.f32 0.7978846, %v1964_v47  ;;  %v1985_v30 = vmul.f32 0.7978846, %v1965_v9  ;;  %v1830_v17 = vadd.f32 %v1829_v23, %v1673_v51  ;;  %v1887_v55 = vmul.f32 0.5, %v7545_v35 }
 0x413   : > { %v1952_v38 = vmul.f32 %v1932_v32, %v7587_v41  ;;  %v1909_v49 = vmul.f32 0.044715, %v7612_v8  ;;  %v1971_v34 = vadd.f32 %v1951_v46, %v7584_v52  ;;  %v1910_v44 = vmul.f32 0.044715, %v7615_v10  ;;  %v10749_v32 = vld [vmem:[#allocation133_spill] sm:$0xff] }
 0x414   : > { %4716 = vtanh.f32 %v1984_v4  ;;  %v7625_v19 = vadd.f32 %v1801_v56, %v10748_v58  ;;  %v1884_v47 = vmul.f32 0.5, %v1864_v48  ;;  %v7631_v36 = vadd.f32 %v1830_v17, %v10749_v32 }
 0x415   : > { %v4713_v20 = vpop.eup %4712  ;;  %4718 = vtanh.f32 %v1985_v30  ;;  %v1972_v51 = vadd.f32 %v1952_v38, %v7587_v41  ;;  %v1929_v45 = vmul.f32 %v1909_v49, %v7612_v8  ;;  %v1742_v35 = vpop.f32.mrf.mxu2  ;;  %v1991_v40 = vmul.f32 0.7978846, %v1971_v34 }
 0x416   : > { %v4715_v9 = vpop.eup %4714  ;;  %v2026_v33 = vadd.f32 1.0, %v4713_v20  ;;  %v1930_v23 = vmul.f32 %v1910_v44, %v7615_v10  ;;  %v1916_v48 = vmul.f32 0.044715, %v7625_v19  ;;  %v1771_v30 = vpop.f32.mrf.mxu3  ;;  %v1885_v38 = vmul.f32 0.5, %v7567_v2 }
 0x417   : > { %v2027_v31 = vadd.f32 1.0, %v4715_v9  ;;  %v1992_v4 = vmul.f32 0.7978846, %v1972_v51  ;;  %v1949_v56 = vmul.f32 %v1929_v45, %v7612_v8  ;;  %4720 = vtanh.f32 %v1991_v40 }
 0x418   : > { %v7635_v46 = vmul.f32 %v2026_v33, %v1886_v16   ;;  %v1950_v49 = vmul.f32 %v1930_v23, %v7615_v10  ;;  %v1803_v34 = vpop.f32.mrf.mxu0  ;;  %v1936_v44 = vmul.f32 %v1916_v48, %v7625_v19  ;;  %v1917_v45 = vmul.f32 0.044715, %v7631_v36 }
 0x419   : > { %v7639_v58 = vmul.f32 %v2027_v31, %v1887_v55   ;;  %4722 = vtanh.f32 %v1992_v4  ;;  %v1969_v17 = vadd.f32 %v1949_v56, %v7612_v8  ;;  %v1743_v16 = vadd.f32 %v1742_v35, %v7592_v3  ;;  %v10750_v56 = vld [vmem:[#allocation126_spill] sm:$0xff] }
 0x41a   : > { %v4717_v20 = vpop.eup %4716  ;;  %v1970_v51 = vadd.f32 %v1950_v49, %v7615_v10  ;;  %v1772_v2 = vadd.f32 %v1771_v30, %v7577_v50  ;;  %v1956_v55 = vmul.f32 %v1936_v44, %v7625_v19  ;;  %v1804_v23 = vadd.f32 %v1803_v34, %v7556_v0  ;;  %v10752_v50 = vld [vmem:[#allocation125_spill] sm:$0xff] }
 0x41b   : > { %v4719_v9 = vpop.eup %4718  ;;  %v2024_v33 = vadd.f32 1.0, %v4717_v20  ;;  %v1989_v40 = vmul.f32 0.7978846, %v1969_v17  ;;  %v1937_v4 = vmul.f32 %v1917_v45, %v7631_v36  ;;  %v7651_v48 = vadd.f32 %v1743_v16, %v10750_v56 }
 0x41c   : > { %v2025_v32 = vadd.f32 1.0, %v4719_v9  ;;  %v1990_v31 = vmul.f32 0.7978846, %v1970_v51  ;;  %v1976_v3 = vadd.f32 %v1956_v55, %v7625_v19  ;;  %v7657_v35 = vadd.f32 %v1772_v2, %v10752_v50  ;;  %v1832_v51 = vpop.f32.mrf.mxu1 }
 0x41d   : > { %v7653_v49 = vmul.f32 %v2024_v33, %v1884_v47   ;;  %4724 = vtanh.f32 %v1989_v40  ;;  %v1745_v30 = vpop.f32.mrf.mxu2  ;;  %v4721_v17 = vpop.eup %4720  ;;  %v1891_v0 = vmul.f32 0.5, %v7584_v52  ;;  %v1957_v34 = vmul.f32 %v1937_v4, %v7631_v36 }
 0x41e   : > { %v7659_v20 = vmul.f32 %v2025_v32, %v1885_v38   ;;  %4726 = vtanh.f32 %v1990_v31  ;;  %v2031_v16 = vadd.f32 1.0, %v4721_v17  ;;  %v1892_v47 = vmul.f32 0.5, %v7587_v41  ;;  %v10754_v38 = vld [vmem:[#allocation160_spill] sm:$0xff]  ;;  %v1774_v4 = vpop.f32.mrf.mxu3 }
 0x41f   : > { %v10751_v5 = vmov %v7653_v49  ;;  %v4723_v45 = vpop.eup %4722  ;;  %v1996_v9 = vmul.f32 0.7978846, %v1976_v3  ;;  %v1914_v33 = vmul.f32 0.044715, %v7651_v48  ;;  %v1977_v2 = vadd.f32 %v1957_v34, %v7631_v36  ;;  %v10757_v34 = vld [vmem:[#allocation141_spill] sm:$0xff] }
 0x420   : > { %v10753_v44 = vmov %v7659_v20  ;;  %v2032_v40 = vadd.f32 1.0, %v4723_v45  ;;  %v1915_v55 = vmul.f32 0.044715, %v7657_v35  ;;  %v7668_v20 = vadd.f32 %v1804_v23, %v10754_v38 }
 0x421   : > { %v7670_v0 = vmul.f32 %v2031_v16, %v1891_v0   ;;  %4728 = vtanh.f32 %v1996_v9  ;;  %v1934_v52 = vmul.f32 %v1914_v33, %v7651_v48  ;;  %v1833_v32 = vadd.f32 %v1832_v51, %v7559_v43 }
 0x422   : > { %v7674_v51 = vmul.f32 %v2032_v40, %v1892_v47   ;;  %v1889_v56 = vmul.f32 0.5, %v7612_v8  ;;  %v1997_v49 = vmul.f32 0.7978846, %v1977_v2  ;;  %v1935_v3 = vmul.f32 %v1915_v55, %v7657_v35 }
 0x423   : > { %v10755_v31 = vmov %v7670_v0  ;;  %v4725_v50 = vpop.eup %4724  ;;  %v1954_v17 = vmul.f32 %v1934_v52, %v7651_v48  ;;  %v1921_v23 = vmul.f32 0.044715, %v7668_v20  ;;  %v7681_v0 = vadd.f32 %v1833_v32, %v10757_v34 }
 0x424   : > { %v10756_v41 = vmov %v7674_v51  ;;  %v1746_v45 = vadd.f32 %v1745_v30, %v7596_v24  ;;  %v4727_v16 = vpop.eup %4726  ;;  %v2029_v43 = vadd.f32 1.0, %v4725_v50  ;;  %4730 = vtanh.f32 %v1997_v49  ;;  %v10758_v30 = vld [vmem:[#allocation128_spill] sm:$0xff] }
 0x425   : > { %v1955_v51 = vmul.f32 %v1935_v3, %v7657_v35  ;;  %v1775_v8 = vadd.f32 %v1774_v4, %v7570_v37  ;;  %v1890_v47 = vmul.f32 0.5, %v7615_v10  ;;  %v2030_v9 = vadd.f32 1.0, %v4727_v16  ;;  %v1852_v2 = vpop.f32.mrf.mxu2  ;;  %v10760_v4 = vld [vmem:[#allocation127_spill] sm:$0xff] }
 0x426   : > { %v1974_v33 = vadd.f32 %v1954_v17, %v7651_v48  ;;  %v1941_v40 = vmul.f32 %v1921_v23, %v7668_v20  ;;  %v7689_v55 = vmul.f32 %v2029_v43, %v1889_v56   ;;  %v1922_v24 = vmul.f32 0.044715, %v7681_v0 }
 0x427   : > { %v1975_v38 = vadd.f32 %v1955_v51, %v7657_v35  ;;  %v7694_v52 = vadd.f32 %v1746_v45, %v10758_v30  ;;  %v4729_v32 = vpop.eup %4728  ;;  %v7696_v49 = vmul.f32 %v2030_v9, %v1890_v47   ;;  %v7700_v3 = vadd.f32 %v1775_v8, %v10760_v4 }
 0x428   : > { %v1994_v37 = vmul.f32 0.7978846, %v1974_v33  ;;  %v1961_v10 = vmul.f32 %v1941_v40, %v7668_v20  ;;  %v1896_v50 = vmul.f32 0.5, %v7625_v19  ;;  %v2036_v56 = vadd.f32 1.0, %v4729_v32 }
 0x429   : > { %v10759_v6 = vmov %v7696_v49  ;;  %v1995_v17 = vmul.f32 0.7978846, %v1975_v38  ;;  %v1942_v23 = vmul.f32 %v1922_v24, %v7681_v0  ;;  %v1897_v34 = vmul.f32 0.5, %v7631_v36 }
 0x42a   : > { %4732 = vtanh.f32 %v1994_v37  ;;  %v1981_v45 = vadd.f32 %v1961_v10, %v7668_v20  ;;  %v1919_v16 = vmul.f32 0.044715, %v7694_v52  ;;  %v4731_v43 = vpop.eup %4730  ;;  %v7707_v51 = vmul.f32 %v2036_v56, %v1896_v50   ;;  %v10763_v37 = vld [vmem:[#allocation167_spill] sm:$0xff] }
 0x42b   : > { %4734 = vtanh.f32 %v1995_v17  ;;  %v1962_v8 = vmul.f32 %v1942_v23, %v7681_v0  ;;  %v1920_v9 = vmul.f32 0.044715, %v7700_v3  ;;  %v2037_v19 = vadd.f32 1.0, %v4731_v43 }
 0x42c   : > { %v10761_v47 = vmov %v7707_v51  ;;  %v2001_v33 = vmul.f32 0.7978846, %v1981_v45  ;;  %v1939_v40 = vmul.f32 %v1919_v16, %v7694_v52  ;;  %v1853_v38 = vadd.f32 %v1852_v2, %v7606_v57 }
 0x42d   : > { %v1982_v36 = vadd.f32 %v1962_v8, %v7681_v0  ;;  %v1940_v24 = vmul.f32 %v1920_v9, %v7700_v3  ;;  %v1699_v30 = vadd.f32 %v7530_v7, %v7550_v18  ;;  %v7717_v32 = vmul.f32 %v2037_v19, %v1897_v34   ;;  %v1855_v50 = vpop.f32.mrf.mxu2  ;;  %v10764_v34 = vld [vmem:[#allocation186_spill] sm:$0xff] }
 0x42e   : > { %4736 = vtanh.f32 %v2001_v33  ;;  %v1959_v49 = vmul.f32 %v1939_v40, %v7694_v52  ;;  %v1868_v4 = vadd.f32 %v1853_v38, %v10763_v37  ;;  %v1894_v2 = vmul.f32 0.5, %v7651_v48 }
 0x42f   : > { %v10762_v10 = vmov %v7717_v32  ;;  %v2002_v56 = vmul.f32 0.7978846, %v1982_v36  ;;  %v1960_v17 = vmul.f32 %v1940_v24, %v7700_v3  ;;  %v1856_v23 = vadd.f32 %v1855_v50, %v1699_v30 }
 0x430   : > { %v4733_v57 = vpop.eup %4732  ;;  %v1979_v45 = vadd.f32 %v1959_v49, %v7694_v52  ;;  %v1908_v16 = vmul.f32 0.044715, %v1868_v4  ;;  %v1895_v8 = vmul.f32 0.5, %v7657_v35  ;;  %v1702_v32 = vadd.f32 %v7532_v53, %v7572_v29 }
 0x431   : > { %v4735_v43 = vpop.eup %4734  ;;  %v2034_v7 = vadd.f32 1.0, %v4733_v57  ;;  %4738 = vtanh.f32 %v2002_v56  ;;  %v1980_v18 = vadd.f32 %v1960_v17, %v7700_v3  ;;  %v1873_v51 = vadd.f32 %v1856_v23, %v10764_v34 }
 0x432   : > { %v2035_v9 = vadd.f32 1.0, %v4735_v43  ;;  %v1999_v19 = vmul.f32 0.7978846, %v1979_v45  ;;  %v1928_v33 = vmul.f32 %v1908_v16, %v1868_v4  ;;  %v1901_v49 = vmul.f32 0.5, %v7668_v20 }
 0x433   : > { %v7727_v16 = vmul.f32 %v2034_v7, %v1894_v2   ;;  %v2000_v38 = vmul.f32 0.7978846, %v1980_v18  ;;  %v1913_v36 = vmul.f32 0.044715, %v1873_v51  ;;  %v10767_v18 = vld [vmem:[#allocation211_spill] sm:$0xff] }
 0x434   : > { %v4737_v48 = vpop.eup %4736  ;;  %v7729_v2 = vmul.f32 %v2035_v9, %v1895_v8   ;;  %4740 = vtanh.f32 %v1999_v19  ;;  %v1948_v30 = vmul.f32 %v1928_v33, %v1868_v4  ;;  %v1899_v8 = vmul.f32 0.5, %v7694_v52 }
 0x435   : > { %v10765_v40 = vmov %v7727_v16  ;;  %v2041_v37 = vadd.f32 1.0, %v4737_v48  ;;  %4742 = vtanh.f32 %v2000_v38  ;;  %v1933_v35 = vmul.f32 %v1913_v36, %v1873_v51  ;;  %v1858_v56 = vpop.f32.mrf.mxu2 }
 0x436   : > { %v10766_v24 = vmov %v7729_v2  ;;  %v1968_v50 = vadd.f32 %v1948_v30, %v1868_v4  ;;  %v1859_v45 = vadd.f32 %v1858_v56, %v1702_v32  ;;  %v1902_v16 = vmul.f32 0.5, %v7681_v0 }
 0x437   : > { %v4739_v17 = vpop.eup %4738  ;;  %v7734_v23 = vmul.f32 %v2041_v37, %v1901_v49   ;;  %v1953_v57 = vmul.f32 %v1933_v35, %v1873_v51  ;;  %v1900_v38 = vmul.f32 0.5, %v7700_v3  ;;  %v1705_v0 = vadd.f32 %v7534_v1, %v7547_v39 }
 0x438   : > { %v2042_v2 = vadd.f32 1.0, %v4739_v17  ;;  %v1988_v43 = vmul.f32 0.7978846, %v1968_v50  ;;  %v1878_v34 = vadd.f32 %v1859_v45, %v10767_v18  ;;  %v1888_v50 = vmul.f32 0.5, %v1868_v4 }
 0x439   : > { %v1973_v7 = vadd.f32 %v1953_v57, %v1873_v51  ;;  %v1893_v39 = vmul.f32 0.5, %v1873_v51  ;;  %v10788_v51 = vmov %v10756_v41 }
 0x43a   : > { %v4741_v53 = vpop.eup %4740  ;;  %v7738_v32 = vmul.f32 %v2042_v2, %v1902_v16   ;;  %4744 = vtanh.f32 %v1988_v43  ;;  %v1918_v33 = vmul.f32 0.044715, %v1878_v34  ;;  %v10771_v16 = vld [vmem:[#allocation212_spill] sm:$0xff]  ;;  %v1898_v4 = vmul.f32 0.5, %v1878_v34  ;;  %v10821_v51 = vld [vmem:[#allocation7_spill] sm:$0xff] (%p7758_p0) }
 0x43b   : > { %v4743_v20 = vpop.eup %4742  ;;  %v2039_v9 = vadd.f32 1.0, %v4741_v53  ;;  %v1993_v19 = vmul.f32 0.7978846, %v1973_v7 }
 0x43c   : > { %v10768_v29 = vmov %v7738_v32  ;;  %v2040_v36 = vadd.f32 1.0, %v4743_v20  ;;  %v1938_v30 = vmul.f32 %v1918_v33, %v1878_v34 }
 0x43d   : > { %v7744_v52 = vmul.f32 %v2039_v9, %v1899_v8   ;;  %4746 = vtanh.f32 %v1993_v19  ;;  %v1861_v32 = vpop.f32.mrf.mxu2 }
 0x43e   : > { %v7746_v17 = vmul.f32 %v2040_v36, %v1900_v38   ;;  %v1958_v49 = vmul.f32 %v1938_v30, %v1878_v34  ;;  %v1862_v37 = vadd.f32 %v1861_v32, %v1705_v0  ;;  %v10778_v32 = vmov %v10768_v29 }
 0x43f   : > { %v10769_v48 = vmov %v7744_v52  ;;  %v10824_v32 = vld [vmem:[#allocation6_spill] sm:$0xff] (%p7758_p0) }
 0x440   : > { %v10770_v56 = vmov %v7746_v17  ;;  %v4745_v35 = vpop.eup %4744  ;;  %v1978_v45 = vadd.f32 %v1958_v49, %v1878_v34  ;;  %v1883_v2 = vadd.f32 %v1862_v37, %v10771_v16  ;;  %v10786_v16 = vmov %v10765_v40  ;;  %4521 = vmatpush.msra.mxu1 (%p7758_p0), %v10769_v48 }
 0x441   : > { %v2028_v57 = vadd.f32 1.0, %v4745_v35  ;;  %v10784_v35 = vmov %v10761_v47  ;;  %v10794_v37 = vmov %v7635_v46  ;;  %2909 = vmatpush.msra.mxu2 (%p7758_p0), %v10770_v56  ;;  %v10829_v16 = vld [vmem:[#allocation91_spill] sm:$0xff] (%p7758_p0) }
 0x442   : > { %v1998_v7 = vmul.f32 0.7978846, %v1978_v45  ;;  %v1923_v1 = vmul.f32 0.044715, %v1883_v2  ;;  %v1903_v30 = vmul.f32 0.5, %v1883_v2  ;;  %v10797_v45 = vld [vmem:[#allocation17_spill] sm:$0xff] (%p7758_p0)  ;;  %4522 = vmatpush.msra.mxu1 (%p7758_p0), %v10765_v40 }
 0x443   : > { %v4747_v3 = vpop.eup %4746  ;;  %v7749_v33 = vmul.f32 %v2028_v57, %v1888_v50   ;;  %v10779_v50 = vmov %v7734_v23  ;;  %2145 = vmatpush.msra.mxu0 (%p7758_p0), %v10797_v45  ;;  %2910 = vmatpush.msra.mxu2 (%p7758_p0), %v10766_v24  ;;  %v10826_v37 = vld [vmem:[#allocation96_spill] sm:$0xff] (%p7758_p0)  ;;  %v10827_v35 = vld [vmem:[#allocation5_spill] sm:$0xff] (%p7758_p0) }
 0x444   : > { %v2033_v52 = vadd.f32 1.0, %v4747_v3  ;;  %4748 = vtanh.f32 %v1998_v7  ;;  %v1943_v18 = vmul.f32 %v1923_v1, %v1883_v2  ;;  %v10791_v1 = vmov %v7689_v55  ;;  %v10798_v7 = vld [vmem:[#allocation33_spill] sm:$0xff] (%p7758_p0)  ;;  %4523 = vmatpush.msra.mxu1 (%p7758_p0), %v7689_v55  ;;  %v10841_v45 = vld [vmem:[#allocation64_spill] sm:$0xff] (%p7758_p0) }
 0x445   : > { %v10772_v43 = vmov %v7749_v33  ;;  %v10793_v3 = vmov %v7639_v58  ;;  %2174 = vmatpush.msra.mxu3 (%p7758_p0), %v10798_v7  ;;  %2911 = vmatpush.msra.mxu2 (%p7758_p0), %v10759_v6  ;;  %v10828_v50 = vld [vmem:[#allocation21_spill] sm:$0xff] (%p7758_p0)  ;;  %v10832_v1 = vld [vmem:[#allocation86_spill] sm:$0xff] (%p7758_p0)  ;;  %v10842_v7 = vld [vmem:[#allocation47_spill] sm:$0xff] (%p7758_p0) }
 0x446   : > { %v7751_v19 = vmul.f32 %v2033_v52, %v1893_v39   ;;  %v1963_v17 = vmul.f32 %v1943_v18, %v1883_v2  ;;  %v10781_v52 = vmov %v10769_v48  ;;  %v10790_v18 = vmov %v10759_v6  ;;  %v10799_v39 = vld [vmem:[#allocation16_spill] sm:$0xff] (%p7758_p0)  ;;  %4524 = vmatpush.msra.mxu1 (%p7758_p0), %v10751_v5 }
 0x447   :  { %2146 = vmatpush.msra.mxu0 (%p7758_p0), %v10799_v39  ;;  %2912 = vmatpush.msra.mxu2 (%p7758_p0), %v10753_v44  ;;  %v10831_v3 = vld [vmem:[#allocation20_spill] sm:$0xff] (%p7758_p0)  ;;  %v10833_v52 = vld [vmem:[#allocation3_spill] sm:$0xff] (%p7758_p0) }
 0x448   : > { %v10773_v8 = vmov %v7751_v19  ;;  %v1983_v53 = vadd.f32 %v1963_v17, %v1883_v2  ;;  %v10780_v17 = vmov %v10770_v56  ;;  %v10785_v2 = vmov %v10766_v24  ;;  %v10834_v18 = vld [vmem:[#allocation19_spill] sm:$0xff] (%p7758_p0) }
 0x449   : > { %v10787_v19 = vmov %v10773_v8  ;;  %3033 = vmatpush.msrb.mxu2 (%p7758_p0), %v10814_v21  ;;  %v10830_v2 = vld [vmem:[#allocation4_spill] sm:$0xff] (%p7758_p0)  ;;  %v10835_v17 = vld [vmem:[#allocation81_spill] sm:$0xff] (%p7758_p0)  ;;  %v10843_v39 = vld [vmem:[#allocation63_spill] sm:$0xff] (%p7758_p0) }
 0x44a   : > { %v4749_v20 = vpop.eup %4748  ;;  %v2003_v9 = vmul.f32 0.7978846, %v1983_v53  ;;  %v10783_v53 = vmov %v10762_v10  ;;  %v10823_v19 = vld [vmem:[#allocation101_spill] sm:$0xff] (%p7758_p0)  ;;  %v10858_v21 = vld [vmem:[#allocation39_spill] sm:$0xff] (%p7758_p0) }
 0x44b   : > { %v2038_v38 = vadd.f32 1.0, %v4749_v20  ;;  %v10795_v20 = vmov %v10753_v44  ;;  %3034 = vmatpush.msrb.mxu2 (%p7758_p0), %v10817_v25  ;;  %v10836_v53 = vld [vmem:[#allocation2_spill] sm:$0xff] (%p7758_p0) }
 0x44c   : > { %4750 = vtanh.f32 %v2003_v9  ;;  %v10800_v9 = vld [vmem:[#allocation32_spill] sm:$0xff] (%p7758_p0)  ;;  %v10837_v20 = vld [vmem:[#allocation18_spill] sm:$0xff] (%p7758_p0) }
 0x44d   : > { %v7753_v34 = vmul.f32 %v2038_v38, %v1898_v4   ;;  %v10796_v4 = vmov %v10751_v5  ;;  %2175 = vmatpush.msra.mxu3 (%p7758_p0), %v10800_v9  ;;  %v10802_v38 = vld [vmem:[#allocation31_spill] sm:$0xff] (%p7758_p0)  ;;  %3035 = vmatpush.msrb.mxu2 (%p7758_p0), %v10820_v63  ;;  %v10844_v9 = vld [vmem:[#allocation46_spill] sm:$0xff] (%p7758_p0)  ;;  %v10864_v63 = vld [vmem:[#allocation36_spill] sm:$0xff] (%p7758_p0) }
 0x44e   :  { %v10801_v4 = vld [vmem:[#allocation15_spill] sm:$0xff] (%p7758_p0)  ;;  %v10861_v25 = vld [vmem:[#allocation54_spill] sm:$0xff] (%p7758_p0) }
 0x44f   : > { %v10774_v36 = vmov %v7753_v34  ;;  %2147 = vmatpush.msra.mxu0 (%p7758_p0), %v10801_v4  ;;  %2176 = vmatpush.msra.mxu3 (%p7758_p0), %v10802_v38  ;;  %v10845_v4 = vld [vmem:[#allocation62_spill] sm:$0xff] (%p7758_p0)  ;;  %v10846_v38 = vld [vmem:[#allocation45_spill] sm:$0xff] (%p7758_p0) }
 0x450   : > { %v10782_v34 = vmov %v10774_v36  ;;  %3036 = vmatpush.msrb.mxu2 (%p7758_p0), %v10823_v19  ;;  %v10867_v19 = vld [vmem:[#allocation51_spill] sm:$0xff] (%p7758_p0) }
 0x451   :  { %2148 = vmatpush.msra.mxu0 (%p7758_p0), %v10803_v60  ;;  %2177 = vmatpush.msra.mxu3 (%p7758_p0), %v10804_v62  ;;  %v10822_v34 = vld [vmem:[#allocation23_spill] sm:$0xff] (%p7758_p0)  ;;  %v10847_v60 = vld [vmem:[#allocation61_spill] sm:$0xff] (%p7758_p0)  ;;  %v10848_v62 = vld [vmem:[#allocation44_spill] sm:$0xff] (%p7758_p0) }
 0x452   : > { %v4751_v0 = vpop.eup %4750  ;;  %3037 = vmatpush.msrb.mxu2 (%p7758_p0), %v10826_v37  ;;  %v10870_v37 = vld [vmem:[#allocation80_spill] sm:$0xff] (%p7758_p0) }
 0x453   : > { %v2043_v33 = vadd.f32 1.0, %v4751_v0  ;;  %v10789_v0 = vmov %v10755_v31  ;;  %2149 = vmatpush.msra.mxu0 (%p7758_p0), %v10805_v15  ;;  %2178 = vmatpush.msra.mxu3 (%p7758_p0), %v10806_v27  ;;  %v10849_v15 = vld [vmem:[#allocation60_spill] sm:$0xff] (%p7758_p0)  ;;  %v10850_v27 = vld [vmem:[#allocation43_spill] sm:$0xff] (%p7758_p0) }
 0x454   :  { %808 = sbr.rel (!%p7758_p0) target bundleno = 502 (0x1f6), region = 103  ;;  %3038 = vmatpush.msrb.mxu2 (%p7758_p0), %v10829_v16  ;;  %v10838_v0 = vld [vmem:[#allocation49_spill] sm:$0xff] (%p7758_p0) }
 0x455   : > { %v7755_v49 = vmul.f32 %v2043_v33, %v1903_v30   ;;  %v10792_v33 = vmov %v10772_v43  ;;  %2150 = vmatpush.msra.mxu0 (%p7758_p0), %v10808_v28  ;;  %2179 = vmatpush.msra.mxu3 (%p7758_p0), %v10809_v14  ;;  %v10839_v30 = vld [vmem:[#allocation65_spill] sm:$0xff] (%p7758_p0)  ;;  %v10852_v28 = vld [vmem:[#allocation42_spill] sm:$0xff] (%p7758_p0) }
 0x456   :  { %3039 = vmatpush.msrb.mxu2 (%p7758_p0), %v10832_v1  ;;  %v10840_v33 = vld [vmem:[#allocation48_spill] sm:$0xff] (%p7758_p0)  ;;  %v10853_v14 = vld [vmem:[#allocation58_spill] sm:$0xff] (%p7758_p0)  ;;  %v10873_v16 = vld [vmem:[#allocation77_spill] sm:$0xff] (%p7758_p0) }
 0x457   : > { %v10775_v57 = vmov %v7755_v49  ;;  %2151 = vmatpush.msra.mxu0 (%p7758_p0), %v10810_v11  ;;  %2180 = vmatpush.msra.mxu3 (%p7758_p0), %v10811_v22  ;;  %v10854_v11 = vld [vmem:[#allocation41_spill] sm:$0xff] (%p7758_p0)  ;;  %v10880_v1 = vld [vmem:[#allocation70_spill] sm:$0xff] (%p7758_p0) }
 0x458   : > { %v10777_v49 = vmov %v10775_v57  ;;  %2996 = vmatpush.msrb.mxu1 (%p7758_p0), %v10775_v57  ;;  %3040 = vmatpush.msrb.mxu2 (%p7758_p0), %v10835_v17  ;;  %v10855_v22 = vld [vmem:[#allocation57_spill] sm:$0xff] (%p7758_p0) }
 0x459   :  { %2152 = vmatpush.msra.mxu0 %v10812_v61  ;;  %2181 = vmatpush.msra.mxu3 %v10813_v59  ;;  %v10825_v49 = vld [vmem:[#allocation22_spill] sm:$0xff]  ;;  %v10856_v61 = vld [vmem:[#allocation40_spill] sm:$0xff] }
 0x45a   :  { %2997 = vmatpush.msrb.mxu1 %v10774_v36  ;;  %v10857_v59 = vld [vmem:[#allocation56_spill] sm:$0xff] }
 0x45b   :  { %2153 = vmatpush.msra.mxu0 %v10815_v26  ;;  %2182 = vmatpush.msra.mxu3 %v10816_v42  ;;  %v10859_v26 = vld [vmem:[#allocation55_spill] sm:$0xff]  ;;  %v10860_v42 = vld [vmem:[#allocation38_spill] sm:$0xff] }
 0x45c   :  { %2998 = vmatpush.msrb.mxu1 %v10773_v8 }
 0x45d   :  { %2154 = vmatpush.msra.mxu0 %v10818_v54  ;;  %2183 = vmatpush.msra.mxu3 %v10819_v13  ;;  %v10862_v54 = vld [vmem:[#allocation37_spill] sm:$0xff] }
 0x45e   :  { %2999 = vmatpush.msrb.mxu1 %v10772_v43  ;;  %v10863_v13 = vld [vmem:[#allocation53_spill] sm:$0xff] }
 0x45f   :  { %2155 = vmatpush.msra.mxu0 %v10821_v51  ;;  %2184 = vmatpush.msra.mxu3 %v10822_v34  ;;  %v10865_v51 = vld [vmem:[#allocation52_spill] sm:$0xff]  ;;  %v10866_v34 = vld [vmem:[#allocation35_spill] sm:$0xff] }
 0x461   :  { %2156 = vmatpush.msra.mxu0 %v10824_v32  ;;  %2185 = vmatpush.msra.mxu3 %v10825_v49  ;;  %v10868_v32 = vld [vmem:[#allocation34_spill] sm:$0xff] }
 0x462   :  { %v10869_v49 = vld [vmem:[#allocation50_spill] sm:$0xff] }
 0x463   :  { %2157 = vmatpush.msra.mxu0 %v10827_v35  ;;  %2186 = vmatpush.msra.mxu3 %v10828_v50  ;;  %v10871_v35 = vld [vmem:[#allocation79_spill] sm:$0xff]  ;;  %v10872_v50 = vld [vmem:[#allocation78_spill] sm:$0xff] }
 0x465   :  { %2158 = vmatpush.msra.mxu0 %v10830_v2  ;;  %2187 = vmatpush.msra.mxu3 %v10831_v3  ;;  %v10874_v2 = vld [vmem:[#allocation76_spill] sm:$0xff]  ;;  %v10879_v3 = vld [vmem:[#allocation71_spill] sm:$0xff] }
 0x467   :  { %2159 = vmatpush.msra.mxu0 %v10833_v52  ;;  %2188 = vmatpush.msra.mxu3 %v10834_v18  ;;  %v10881_v52 = vld [vmem:[#allocation69_spill] sm:$0xff]  ;;  %v10883_v18 = vld [vmem:[#allocation67_spill] sm:$0xff] }
 0x469   :  { %2160 = vmatpush.msra.mxu0 %v10836_v53  ;;  %2189 = vmatpush.msra.mxu3 %v10837_v20 }
 0x46a   :  { %2161 = vmatmul.f32.vlgmr.msra.gmra.mxu0 %v10751_v5  ;;  %2190 = vmatmul.f32.vlgmr.msra.gmra.mxu3 %v10753_v44 }
 0x46b   :  { %2203 = vmatpush.msrb.mxu0 %v10838_v0  ;;  %2232 = vmatpush.msrb.mxu3 %v10839_v30 }
 0x46d   :  { %2204 = vmatpush.msrb.mxu0 %v10840_v33  ;;  %2233 = vmatpush.msrb.mxu3 %v10841_v45 }
 0x46f   :  { %2205 = vmatpush.msrb.mxu0 %v10842_v7  ;;  %2234 = vmatpush.msrb.mxu3 %v10843_v39 }
 0x471   :  { %2206 = vmatpush.msrb.mxu0 %v10844_v9  ;;  %2235 = vmatpush.msrb.mxu3 %v10845_v4 }
 0x472   :  { %2164 = vmatmul.f32.gmra.mxu0 %v7689_v55  ;;  %2193 = vmatmul.f32.gmra.mxu3 %v10759_v6 }
 0x473   :  { %2207 = vmatpush.msrb.mxu0 %v10846_v38  ;;  %2236 = vmatpush.msrb.mxu3 %v10847_v60 }
 0x475   :  { %2208 = vmatpush.msrb.mxu0 %v10848_v62  ;;  %2237 = vmatpush.msrb.mxu3 %v10849_v15 }
 0x477   :  { %2209 = vmatpush.msrb.mxu0 %v10850_v27  ;;  %2238 = vmatpush.msrb.mxu3 %v10851_v12 }
 0x479   :  { %2210 = vmatpush.msrb.mxu0 %v10852_v28  ;;  %2239 = vmatpush.msrb.mxu3 %v10853_v14 }
 0x47a   :  { %2167 = vmatmul.f32.gmra.mxu0 %v10765_v40  ;;  %2196 = vmatmul.f32.gmra.mxu3 %v10766_v24 }
 0x47b   :  { %2211 = vmatpush.msrb.mxu0 %v10854_v11  ;;  %2240 = vmatpush.msrb.mxu3 %v10855_v22 }
 0x47d   :  { %2212 = vmatpush.msrb.mxu0 %v10856_v61  ;;  %2241 = vmatpush.msrb.mxu3 %v10857_v59 }
 0x47f   :  { %2213 = vmatpush.msrb.mxu0 %v10858_v21  ;;  %2242 = vmatpush.msrb.mxu3 %v10859_v26 }
 0x481   :  { %2214 = vmatpush.msrb.mxu0 %v10860_v42  ;;  %2243 = vmatpush.msrb.mxu3 %v10861_v25  ;;  %v7988_v25 = vld [vmem:[%s10042_s13 + $0x8] sm:$0xff] }
 0x482   :  { %2170 = vmatmul.f32.gmra.mxu0 %v10769_v48  ;;  %2199 = vmatmul.f32.gmra.mxu3 %v10770_v56 }
 0x483   :  { %2215 = vmatpush.msrb.mxu0 %v10862_v54  ;;  %2244 = vmatpush.msrb.mxu3 %v10863_v13  ;;  %v7993_v54 = vld [vmem:[%s10042_s13 + $0x18] sm:$0xff]  ;;  %v10885_v13 = vld [vmem:[#allocation119_spill] sm:$0xff] }
 0x484   :  { %4396 = vmatmul.msk.f32.vlgmr.msra.gmra.mxu1 %vm1020_vm3, %v7988_v25 }
 0x485   :  { %2216 = vmatpush.msrb.mxu0 %v10864_v63  ;;  %2245 = vmatpush.msrb.mxu3 %v10865_v51  ;;  %v10886_v63 = vld [vmem:[#allocation114_spill] sm:$0xff]  ;;  %v10887_v51 = vld [vmem:[#allocation109_spill] sm:$0xff] }
 0x486   :  { %3120 = vmatpush.msra.mxu1 %v10885_v13 }
 0x487   :  { %2217 = vmatpush.msrb.mxu0 %v10866_v34  ;;  %2246 = vmatpush.msrb.mxu3 %v10867_v19  ;;  %v8008_v34 = vld [vmem:[%s10042_s13 + $0x10] sm:$0xff]  ;;  %v8013_v19 = vld [vmem:[%s10042_s13] sm:$0xff] }
 0x488   :  { %3121 = vmatpush.msra.mxu1 %v10886_v63  ;;  %4399 = vmatmul.msk.f32.vlgmr.msra.gmra.mxu2 %vm1020_vm3, %v8013_v19 }
 0x489   :  { %2218 = vmatpush.msrb.mxu0 %v10868_v32  ;;  %2247 = vmatpush.msrb.mxu3 %v10869_v49  ;;  %v10891_v32 = vld [vmem:[#allocation99_spill] sm:$0xff]  ;;  %v10893_v49 = vld [vmem:[#allocation112_spill] sm:$0xff] }
 0x48a   :  { %2219 = vmatmul.f32.vlgmr.msrb.gmra.mxu0 %v7635_v46  ;;  %2248 = vmatmul.f32.vlgmr.msrb.gmra.mxu3 %v7639_v58 }
 0x48b   :  { %4390 = vmatpush.msk.msra.mxu0 %vm843_vm1, %v10870_v37  ;;  %4525 = vmatpush.msra.mxu3 %v10770_v56  ;;  %v10875_v56 = vld [vmem:[#allocation75_spill] sm:$0xff]  ;;  %v10894_v37 = vld [vmem:[#allocation113_spill] sm:$0xff] }
 0x48c   :  { %3122 = vmatpush.msra.mxu1 %v10887_v51 }
 0x48d   :  { %2263 = vmatpush.msra.mxu0 %v10871_v35  ;;  %4526 = vmatpush.msra.mxu3 %v10766_v24  ;;  %v10876_v24 = vld [vmem:[#allocation74_spill] sm:$0xff] }
 0x48e   :  { %4397 = vmatmul.msk.f32.gmra.mxu1 %vm1020_vm3, %v8008_v34  ;;  %v10895_v35 = vld [vmem:[#allocation94_spill] sm:$0xff] }
 0x48f   :  { %2264 = vmatpush.msra.mxu0 %v10872_v50  ;;  %4527 = vmatpush.msra.mxu3 %v10759_v6  ;;  %v10877_v6 = vld [vmem:[#allocation73_spill] sm:$0xff]  ;;  %v10896_v50 = vld [vmem:[#allocation115_spill] sm:$0xff] }
 0x490   :  { %4400 = vmatmul.msk.f32.gmra.mxu2 %vm1020_vm3, %v7988_v25 }
 0x491   :  { %2265 = vmatpush.msra.mxu0 %v10873_v16  ;;  %4528 = vmatpush.msra.mxu3 %v10753_v44  ;;  %v10878_v44 = vld [vmem:[#allocation72_spill] sm:$0xff]  ;;  %v10897_v16 = vld [vmem:[#allocation107_spill] sm:$0xff] }
 0x492   :  { %2222 = vmatmul.f32.gmra.mxu0 %v10755_v31  ;;  %2251 = vmatmul.f32.gmra.mxu3 %v10756_v41 }
 0x493   :  { %2266 = vmatpush.msra.mxu0 %v10874_v2  ;;  %2938 = vmatpush.msrb.mxu3 %v7734_v23  ;;  %v10898_v2 = vld [vmem:[#allocation108_spill] sm:$0xff] }
 0x495   :  { %2267 = vmatpush.msra.mxu0 %v10875_v56  ;;  %2939 = vmatpush.msrb.mxu3 %v10761_v47  ;;  %v10899_v56 = vld [vmem:[#allocation89_spill] sm:$0xff] }
 0x496   :  { %4398 = vmatmul.msk.f32.gmra.mxu1 %vm1020_vm3, %v7993_v54 }
 0x497   :  { %2268 = vmatpush.msra.mxu0 %v10876_v24  ;;  %2940 = vmatpush.msrb.mxu3 %v10755_v31  ;;  %v10882_v31 = vld [vmem:[#allocation68_spill] sm:$0xff]  ;;  %v10900_v24 = vld [vmem:[#allocation110_spill] sm:$0xff] }
 0x498   :  { %4401 = vmatmul.msk.f32.gmra.mxu2 %vm1020_vm3, %v8008_v34 }
 0x499   :  { %2269 = vmatpush.msra.mxu0 %v10877_v6  ;;  %2941 = vmatpush.msrb.mxu3 %v7635_v46  ;;  %v10884_v46 = vld [vmem:[#allocation66_spill] sm:$0xff] }
 0x49a   :  { %2225 = vmatmul.f32.gmra.mxu0 %v10761_v47  ;;  %2254 = vmatmul.f32.gmra.mxu3 %v10762_v10 }
 0x49b   :  { %2270 = vmatpush.msra.mxu0 %v10878_v44 }
 0x49d   :  { %2271 = vmatpush.msra.mxu0 %v10879_v3 }
 0x49e   :  { %4411 = vmatmul.msk.f32.vlgmr.msrb.gmra.mxu1 %vm1020_vm3, %v8013_v19 }
 0x49f   :  { %2272 = vmatpush.msra.mxu0 %v10880_v1 }
 0x4a1   :  { %2273 = vmatpush.msra.mxu0 %v10881_v52  ;;  %v10901_v52 = vld [vmem:[#allocation102_spill] sm:$0xff] }
 0x4a2   :  { %2228 = vmatmul.f32.gmra.mxu0 %v7734_v23  ;;  %2257 = vmatmul.f32.gmra.mxu3 %v10768_v29 }
 0x4a3   :  { %2274 = vmatpush.msra.mxu0 %v10882_v31  ;;  %v10902_v31 = vld [vmem:[#allocation103_spill] sm:$0xff] }
 0x4a5   :  { %2275 = vmatpush.msra.mxu0 %v10883_v18 }
 0x4a6   :  { %4412 = vmatmul.msk.f32.gmra.mxu1 %vm1020_vm3, %v7988_v25 }
 0x4a7   :  { %2276 = vmatpush.msra.mxu0 %v10884_v46 }
 0x4a9   :  { %2880 = vmatpush.msrb.mxu0 %v10769_v48 }
 0x4aa   :  { %4391 = vmatmul.msk.f32.vlgmr.msra.gmra.mxu0 %vm830_vm2, %v10772_v43  ;;  %4402 = vmatmul.msk.f32.vlgmr.msra.gmra.mxu3 %vm1020_vm3, %v7993_v54 }
 0x4ab   :  { %2881 = vmatpush.msrb.mxu0 %v10765_v40  ;;  %4529 = vmatpush.msra.mxu3 %v10768_v29 }
 0x4ad   :  { %2882 = vmatpush.msrb.mxu0 %v7689_v55  ;;  %4530 = vmatpush.msra.mxu3 %v10762_v10 }
 0x4ae   :  { %4413 = vmatmul.msk.f32.gmra.mxu1 %vm1020_vm3, %v8008_v34 }
 0x4af   :  { %2883 = vmatpush.msrb.mxu0 %v10751_v5  ;;  %4531 = vmatpush.msra.mxu3 %v10756_v41 }
 0x4b1   :  { %2967 = vmatpush.msra.mxu0 %v10768_v29  ;;  %4532 = vmatpush.msra.mxu3 %v7639_v58  ;;  %v10888_v29 = vld [vmem:[#allocation104_spill] sm:$0xff] }
 0x4b2   :  { %4392 = vmatmul.msk.f32.gmra.mxu0 %vm830_vm2, %v10773_v8  ;;  %3123 = vmatpush.msra.mxu1 %v10888_v29 }
 0x4b3   :  { %2968 = vmatpush.msra.mxu0 %v10762_v10  ;;  %4403 = vmatmul.msk.f32.vlgmr.msrb.gmra.mxu3 %vm1020_vm3, %v8013_v19  ;;  %v10890_v10 = vld [vmem:[#allocation118_spill] sm:$0xff] }
 0x4b4   :  { %3124 = vmatpush.msra.mxu1 %v10891_v32  ;;  %v8156_v32 = vld [vmem:[%s10905_s7 + $0x70] sm:$0xff] }
 0x4b5   :  { %2969 = vmatpush.msra.mxu0 %v10756_v41  ;;  %v10889_v41 = vld [vmem:[#allocation117_spill] sm:$0xff] }
 0x4b6   :  { %3062 = vmatpush.msrb.mxu3 %v10889_v41  ;;  %3125 = vmatpush.msra.mxu1 %v10895_v35  ;;  %v8181_v35 = vld [vmem:[%s10905_s7 + $0x88] sm:$0xff] }
 0x4b7   :  { %2970 = vmatpush.msra.mxu0 %v7639_v58  ;;  %v10892_v58 = vld [vmem:[#allocation120_spill] sm:$0xff]  ;;  %4414 = vmatmul.msk.f32.gmra.mxu1 %vm1020_vm3, %v7993_v54 }
 0x4b8   :  { %3149 = vmatpush.msra.mxu2 %v10892_v58  ;;  %3063 = vmatpush.msrb.mxu3 %v10893_v49  ;;  %v8161_v58 = vld [vmem:[%s10905_s7 + $0x78] sm:$0xff] }
 0x4b9   :  { %3126 = vmatpush.msra.mxu1 %v10899_v56 }
 0x4ba   :  { %4393 = vmatmul.msk.f32.gmra.mxu0 %vm830_vm2, %v10774_v36  ;;  %3150 = vmatpush.msra.mxu2 %v10896_v50 }
 0x4bb   :  { %3064 = vmatpush.msrb.mxu3 %v10897_v16 }
 0x4bc   :  { %3151 = vmatpush.msra.mxu2 %v10900_v24  ;;  %4404 = vmatmul.msk.f32.gmra.mxu3 %vm1020_vm3, %v7988_v25  ;;  %v10917_v24 = vld [vmem:[#allocation87_spill] sm:$0xff] }
 0x4bd   :  { %3065 = vmatpush.msrb.mxu3 %v10901_v52 }
 0x4c2   :  { %4394 = vmatmul.msk.f32.gmra.mxu0 %vm830_vm2, %v10775_v57 }
 0x4c4   :  { %4405 = vmatmul.msk.f32.gmra.mxu3 %vm1020_vm3, %v8008_v34 }
 0x4ca   :  { %4395 = vmatmul.msk.f32.vlgmr.msrb.gmra.mxu0 %vm1020_vm3, %v8013_v19 }
 0x4cb   :  { %3091 = vmatpush.msrb.mxu0 %v10890_v10  ;;  %v8151_v10 = vld [vmem:[%s10905_s7 + $0x68] sm:$0xff] }
 0x4cc   :  { %4406 = vmatmul.msk.f32.gmra.mxu3 %vm1020_vm3, %v7993_v54 }
 0x4cd   :  { %3092 = vmatpush.msrb.mxu0 %v10894_v37  ;;  %v8176_v37 = vld [vmem:[%s10905_s7 + $0x80] sm:$0xff] }
 0x4cf   :  { %3093 = vmatpush.msrb.mxu0 %v10898_v2 }
 0x4d1   :  { %3094 = vmatpush.msrb.mxu0 %v10902_v31 }
 0x4d2   :  { %4407 = vmatmul.msk.f32.vlgmr.msra.gmra.mxu0 %vm1020_vm3, %v8013_v19 }
 0x4d4   :  { %4409 = vmatmul.msk.f32.vlgmr.msra.gmra.mxu3 %vm1020_vm3, %v8008_v34  ;;  %v2092_v34 = vld [vmem:[%s10905_s7 + $0xe0] sm:$0xff] }
 0x4da   :  { %4408 = vmatmul.msk.f32.gmra.mxu0 %vm1020_vm3, %v7988_v25 }
 0x4dc   :  { %4410 = vmatmul.msk.f32.gmra.mxu3 %vm1020_vm3, %v7993_v54  ;;  %v8442_v54 = vld [vmem:[%s10955_s6 + $0x88] sm:$0xff] }
 0x4dd   :  { %10957 = vst [vmem:[#allocation158_spill] sm:$0xff] %v8442_v54 }
 0x4e7   :  { %v2162_v55 = vpop.f32.mrf.mxu0 }
 0x4ed   :  { %v2191_v5 = vpop.f32.mrf.mxu3 }
 0x4ee   :  { %v2192_v33 = vadd.f32 %v2191_v5, %v2162_v55  ;;  %v10903_v5 = vld [vmem:[#allocation84_spill] sm:$0xff] }
 0x4ef   :  { %v2165_v47 = vpop.f32.mrf.mxu0  ;;  %3127 = vmatpush.msra.mxu1 %v10903_v5 }
 0x4f5   :  { %v2194_v23 = vpop.f32.mrf.mxu3 }
 0x4f6   :  { %v2195_v57 = vadd.f32 %v2194_v23, %v2165_v47  ;;  %v8060_v23 = vld [vmem:[%s10905_s7] sm:$0xff] }
 0x4f7   :  { %v2168_v40 = vpop.f32.mrf.mxu0 }
 0x4fd   :  { %v2197_v8 = vpop.f32.mrf.mxu3 }
 0x4fe   :  { %v2198_v27 = vadd.f32 %v2197_v8, %v2168_v40  ;;  %v10904_v40 = vld [vmem:[#allocation105_spill] sm:$0xff]  ;;  %v10907_v8 = vld [vmem:[#allocation98_spill] sm:$0xff] }
 0x4ff   :  { %v2171_v48 = vpop.f32.mrf.mxu0  ;;  %3152 = vmatpush.msra.mxu2 %v10904_v40  ;;  %3095 = vmatpush.msrb.mxu0 %v10907_v8  ;;  %v8231_v8 = vld [vmem:[%s10905_s7 + $0xa0] sm:$0xff] }
 0x505   :  { %v2200_v53 = vpop.f32.mrf.mxu3 }
 0x506   :  { %v2201_v22 = vadd.f32 %v2200_v53, %v2171_v48  ;;  %v8072_v53 = vld [vmem:[%s10905_s7 + $0x10] sm:$0xff] }
 0x507   :  { %v2220_v43 = vpop.f32.mrf.mxu0 }
 0x508   :  { %v2221_v45 = vadd.f32 %v2220_v43, %v2192_v33  ;;  %v10906_v43 = vld [vmem:[#allocation97_spill] sm:$0xff] }
 0x509   :  { %3066 = vmatpush.msrb.mxu3 %v10906_v43  ;;  %v10928_v43 = vld [vmem:[#allocation83_spill] sm:$0xff] }
 0x50d   :  { %v2249_v0 = vpop.f32.mrf.mxu3 }
 0x50e   :  { %v2250_v7 = vadd.f32 %v2249_v0, %v2221_v45  ;;  %v8084_v45 = vld [vmem:[%s10905_s7 + $0x20] sm:$0xff] }
 0x50f   :  { %v2223_v17 = vpop.f32.mrf.mxu0 }
 0x510   :  { %v2224_v4 = vadd.f32 %v2223_v17, %v2195_v57  ;;  %v8067_v17 = vld [vmem:[%s10905_s7 + $0x8] sm:$0xff]  ;;  %v10909_v57 = vld [vmem:[#allocation92_spill] sm:$0xff] }
 0x511   :  { %3067 = vmatpush.msrb.mxu3 %v10909_v57  ;;  %v8244_v57 = vld [vmem:[%s10905_s7 + $0xa8] sm:$0xff] }
 0x513   :  { %3068 = vmatpush.msrb.mxu3 %v10917_v24 }
 0x515   :  { %v2252_v36 = vpop.f32.mrf.mxu3 }
 0x516   :  { %v2253_v38 = vadd.f32 %v2252_v36, %v2224_v4  ;;  %v8094_v36 = vld [vmem:[%s10905_s7 + $0x30] sm:$0xff]  ;;  %v10910_v4 = vld [vmem:[#allocation93_spill] sm:$0xff] }
 0x517   :  { %v2226_v20 = vpop.f32.mrf.mxu0  ;;  %3096 = vmatpush.msrb.mxu0 %v10910_v4  ;;  %v8249_v4 = vld [vmem:[%s10905_s7 + $0xb0] sm:$0xff] }
 0x518   :  { %v2227_v12 = vadd.f32 %v2226_v20, %v2198_v27  ;;  %v8077_v20 = vld [vmem:[%s10905_s7 + $0x18] sm:$0xff] }
 0x51d   :  { %v2255_v15 = vpop.f32.mrf.mxu3 }
 0x51e   :  { %v2256_v28 = vadd.f32 %v2255_v15, %v2227_v12  ;;  %v8111_v15 = vld [vmem:[%s10905_s7 + $0x48] sm:$0xff] }
 0x51f   :  { %v2229_v30 = vpop.f32.mrf.mxu0 }
 0x520   :  { %v2230_v59 = vadd.f32 %v2229_v30, %v2201_v22  ;;  %v10908_v30 = vld [vmem:[#allocation100_spill] sm:$0xff]  ;;  %v10911_v22 = vld [vmem:[#allocation95_spill] sm:$0xff] }
 0x521   :  { %3153 = vmatpush.msra.mxu2 %v10908_v30 }
 0x523   :  { %3154 = vmatpush.msra.mxu2 %v10911_v22 }
 0x525   :  { %v2258_v61 = vpop.f32.mrf.mxu3 }
 0x526   :  { %v2259_v21 = vadd.f32 %v2258_v61, %v2230_v59  ;;  %v8121_v59 = vld [vmem:[%s10905_s7 + $0x50] sm:$0xff] }
 0x527   :  { %v2278_v39 = vpop.f32.mrf.mxu0 }
 0x528   :  { %v7969_v9 = vadd.f32 %v2278_v39, %v2250_v7  ;;  %v8089_v7 = vld [vmem:[%s10905_s7 + $0x28] sm:$0xff] }
 0x52a   :  { %2294 = vrot.lane.b32.xlu0 %v7969_v9, %s4991_s29  ;;  %v2323_v6 = vrot.slane %v7969_v9, 1  ;;  %v2324_v44 = vrot.slane %v7969_v9, 2  ;;  %v2325_v3 = vrot.slane %v7969_v9, 3  ;;  %v2326_v1 = vrot.slane %v7969_v9, 4 }
 0x52b   :  { %v2327_v18 = vrot.slane %v7969_v9, 5  ;;  %v2328_v46 = vrot.slane %v7969_v9, 6  ;;  %v2329_v55 = vrot.slane %v7969_v9, 7  ;;  %v2383_v47 = vperm.slane %v7969_v9, 0 }
 0x52c   :  { %v2384_v48 = vperm.slane %v2323_v6, 0  ;;  %v2385_v0 = vperm.slane %v2324_v44, 0  ;;  %v2386_v39 = vperm.slane %v2325_v3, 0  ;;  %v10918_v6 = vld [vmem:[#allocation88_spill] sm:$0xff]  ;;  %v8202_v3 = vld [vmem:[%s10905_s7 + $0x98] sm:$0xff] }
 0x52d   :  { %v2388_v27 = vperm.slane %v2327_v18, 0  ;;  %v2389_v12 = vperm.slane %v2328_v46, 0  ;;  %v8134_v13 = vmul.f32 %v2383_v47, %v8067_v17  ;;  %3097 = vmatpush.msrb.mxu0 %v10918_v6  ;;  %v8197_v44 = vld [vmem:[%s10905_s7 + $0x90] sm:$0xff]  ;;  %v10923_v46 = vld [vmem:[#allocation90_spill] sm:$0xff] }
 0x52e   :  { %v8137_v63 = vmul.f32 %v2384_v48, %v8072_v53  ;;  %v8140_v51 = vmul.f32 %v2384_v48, %v8077_v20  ;;  %v8164_v19 = vmul.f32 %v2385_v0, %v8084_v45  ;;  %v8167_v49 = vmul.f32 %v2385_v0, %v8089_v7  ;;  %3155 = vmatpush.msra.mxu2 %v10923_v46  ;;  %v10927_v48 = vld [vmem:[#allocation82_spill] sm:$0xff] }
 0x52f   :  { %v2281_v60 = vpop.f32.mrf.mxu0  ;;  %v8184_v16 = vmul.f32 %v2386_v39, %v8094_v36  ;;  %v8208_v52 = vmul.f32 %v2388_v27, %v8121_v59  ;;  %3069 = vmatpush.msrb.mxu3 %v10927_v48  ;;  %3098 = vmatpush.msrb.mxu0 %v10928_v43 }
 0x530   :  { %v7972_v62 = vadd.f32 %v2281_v60, %v2253_v38  ;;  %v8101_v38 = vld [vmem:[%s10905_s7 + $0x38] sm:$0xff]  ;;  %v8106_v60 = vld [vmem:[%s10905_s7 + $0x40] sm:$0xff]  ;;  %10912 = vst [vmem:[#allocation17_spill] sm:$0xff] %v8164_v19 }
 0x531   :  { %10913 = vst [vmem:[#allocation121_spill] sm:$0xff] %v8167_v49  ;;  %v8187_v2 = vmul.f32 %v2386_v39, %v8101_v38 }
 0x532   :  { %2308 = vrot.lane.b32.xlu2 %v7972_v62, %s4992_s4  ;;  %2296 = vrot.lane.b32.xlu1 %v7972_v62, %s4991_s29  ;;  %v2330_v33 = vrot.slane %v7972_v62, 1  ;;  %v2331_v61 = vrot.slane %v7972_v62, 2  ;;  %v2332_v29 = vrot.slane %v7972_v62, 3  ;;  %v2391_v41 = vperm.slane %v7972_v62, 0  ;;  %10914 = vst [vmem:[#allocation122_spill] sm:$0xff] %v8184_v16 }
 0x533   :  { %2306 = vrot.lane.b32.xlu0 %v7969_v9, %s4992_s4  ;;  %v2387_v9 = vperm.slane %v2326_v1, 0  ;;  %10915 = vst [vmem:[#allocation123_spill] sm:$0xff] %v8187_v2  ;;  %v2333_v24 = vrot.slane %v7972_v62, 4  ;;  %v2334_v6 = vrot.slane %v7972_v62, 5 }
 0x534   :  { %v2392_v50 = vperm.slane %v2330_v33, 0  ;;  %10920 = vst [vmem:[#allocation126_spill] sm:$0xff] %v8208_v52  ;;  %v2394_v0 = vperm.slane %v2332_v29, 0  ;;  %v8234_v30 = vmul.f32 %v2391_v41, %v8176_v37  ;;  %v8237_v33 = vmul.f32 %v2391_v41, %v8181_v35 }
 0x535   :  { %v8190_v56 = vmul.f32 %v2387_v9, %v8106_v60  ;;  %v8205_v1 = vmul.f32 %v2387_v9, %v8111_v15  ;;  %v10929_v9 = vld [vmem:[#allocation85_spill] sm:$0xff]  ;;  %v2336_v52 = vrot.slane %v7972_v62, 7  ;;  %v2395_v2 = vperm.slane %v2333_v24, 0 }
 0x536   :  { %3156 = vmatpush.msra.mxu2 %v10929_v9  ;;  %v2396_v25 = vperm.slane %v2334_v6, 0 }
 0x537   :  { %v2284_v14 = vpop.f32.mrf.mxu0  ;;  %10916 = vst [vmem:[#allocation124_spill] sm:$0xff] %v8190_v56 }
 0x538   :  { %v7977_v11 = vadd.f32 %v2284_v14, %v2256_v28  ;;  %v2390_v28 = vperm.slane %v2329_v55, 0  ;;  %v8114_v14 = vmul.f32 %v2383_v47, %v8060_v23  ;;  %10919 = vst [vmem:[#allocation125_spill] sm:$0xff] %v8205_v1  ;;  %v2393_v55 = vperm.slane %v2331_v61, 0 }
 0x539   :  { %v8218_v47 = vmul.f32 %v2389_v12, %v8151_v10 }
 0x53a   :  { %2310 = vrot.lane.b32.xlu2 %v7977_v11, %s4992_s4  ;;  %2298 = vrot.lane.b32.xlu1 %v7977_v11, %s4991_s29  ;;  %v8221_v5 = vmul.f32 %v2390_v28, %v8156_v32  ;;  %v8224_v40 = vmul.f32 %v2390_v28, %v8161_v58  ;;  %v2337_v39 = vrot.slane %v7977_v11, 1  ;;  %v8260_v28 = vmul.f32 %v2392_v50, %v8202_v3 }
 0x53b   :  { %10924 = vst [vmem:[#allocation129_spill] sm:$0xff] %v8218_v47  ;;  %v2338_v22 = vrot.slane %v7977_v11, 2  ;;  %v2339_v61 = vrot.slane %v7977_v11, 3  ;;  %v2340_v29 = vrot.slane %v7977_v11, 4  ;;  %v2341_v41 = vrot.slane %v7977_v11, 5 }
 0x53c   :  { %10925 = vst [vmem:[#allocation130_spill] sm:$0xff] %v8221_v5  ;;  %v8269_v46 = vmul.f32 %v2393_v55, %v8231_v8  ;;  %v2342_v48 = vrot.slane %v7977_v11, 6  ;;  %v2399_v43 = vperm.slane %v7977_v11, 0  ;;  %v8279_v9 = vmul.f32 %v2393_v55, %v8244_v57 }
 0x53d   :  { %10926 = vst [vmem:[#allocation131_spill] sm:$0xff] %v8224_v40  ;;  %v8282_v40 = vmul.f32 %v2394_v0, %v8249_v4  ;;  %v2400_v47 = vperm.slane %v2337_v39, 0  ;;  %v2403_v1 = vperm.slane %v2340_v29, 0  ;;  %v2404_v56 = vperm.slane %v2341_v41, 0 }
 0x53e   :  { %v2405_v16 = vperm.slane %v2342_v48, 0  ;;  %v8290_v49 = vmul.f32 %v2399_v43, %v8060_v23  ;;  %v8293_v19 = vmul.f32 %v2399_v43, %v8067_v17 }
 0x53f   :  { %v2287_v26 = vpop.f32.mrf.mxu0  ;;  %v8299_v39 = vmul.f32 %v2400_v47, %v8077_v20  ;;  %v8317_v20 = vmul.f32 %v2403_v1, %v8106_v60  ;;  %v2090_v60 = vld [vmem:[%s10905_s7 + $0xd0] sm:$0xff] }
 0x540   :  { %v7981_v42 = vadd.f32 %v2287_v26, %v2259_v21  ;;  %v8126_v21 = vld [vmem:[%s10905_s7 + $0x58] sm:$0xff]  ;;  %v8131_v26 = vld [vmem:[%s10905_s7 + $0x60] sm:$0xff]  ;;  %v8363_v6 = vmul.f32 %v2396_v25, %v2090_v60 }
 0x541   :  { %v8211_v31 = vmul.f32 %v2388_v27, %v8126_v21  ;;  %v8214_v18 = vmul.f32 %v2389_v12, %v8131_v26  ;;  %v8254_v27 = vld [vmem:[%s10905_s7 + $0xb8] sm:$0xff]  ;;  %v8257_v12 = vmul.f32 %v2392_v50, %v8197_v44  ;;  %v2343_v50 = vrot.slane %v7977_v11, 7 }
 0x542   :  { %2312 = vrot.lane.b32.xlu1 %v7981_v42, %s4992_s4  ;;  %2300 = vrot.lane.b32.xlu0 %v7981_v42, %s4991_s29  ;;  %v8285_v5 = vmul.f32 %v2394_v0, %v8254_v27  ;;  %v2335_v11 = vrot.slane %v7972_v62, 6  ;;  %v8296_v0 = vmul.f32 %v2400_v47, %v8072_v53  ;;  %v2344_v62 = vrot.slane %v7981_v42, 1  ;;  %10938 = vst [vmem:[#allocation140_spill] sm:$0xff] %v8363_v6 }
 0x543   :  { %10921 = vst [vmem:[#allocation127_spill] sm:$0xff] %v8211_v31  ;;  %v2401_v31 = vperm.slane %v2338_v22, 0  ;;  %v2406_v55 = vperm.slane %v2343_v50, 0  ;;  %v2345_v22 = vrot.slane %v7981_v42, 2  ;;  %v2346_v17 = vrot.slane %v7981_v42, 3 }
 0x544   :  { %10922 = vst [vmem:[#allocation128_spill] sm:$0xff] %v8214_v18  ;;  %v2402_v18 = vperm.slane %v2339_v61, 0  ;;  %v8320_v47 = vmul.f32 %v2403_v1, %v8111_v15  ;;  %v2397_v15 = vperm.slane %v2335_v11, 0  ;;  %v2408_v1 = vperm.slane %v2344_v62, 0  ;;  %v2089_v11 = vld [vmem:[%s10905_s7 + $0xc8] sm:$0xff] }
 0x545   :  { %v8304_v61 = vmul.f32 %v2401_v31, %v8084_v45  ;;  %v8307_v29 = vmul.f32 %v2401_v31, %v8089_v7  ;;  %v8323_v45 = vmul.f32 %v2404_v56, %v8121_v59  ;;  %v8326_v7 = vmul.f32 %v2404_v56, %v8126_v21 }
 0x546   :  { %v8310_v23 = vmul.f32 %v2402_v18, %v8094_v36  ;;  %v8314_v53 = vmul.f32 %v2402_v18, %v8101_v38  ;;  %10931 = vst [vmem:[#allocation133_spill] sm:$0xff] %v8320_v47  ;;  %v2407_v36 = vperm.slane %v7981_v42, 0  ;;  %v2088_v38 = vld [vmem:[%s10905_s7 + $0xc0] sm:$0xff]  ;;  %v2398_v59 = vperm.slane %v2336_v52, 0  ;;  %v8351_v18 = vld [vmem:[%s10905_s7 + $0xf0] sm:$0xff] }
 0x547   :  { %10932 = vst [vmem:[#allocation134_spill] sm:$0xff] %v8326_v7  ;;  %v8340_v21 = vmul.f32 %v2405_v16, %v8131_v26  ;;  %v8343_v56 = vmul.f32 %v2405_v16, %v8151_v10  ;;  %v2409_v31 = vperm.slane %v2345_v22, 0  ;;  %v8354_v41 = vmul.f32 %v2406_v55, %v8156_v32  ;;  %v10994_v7 = vld [vmem:[#allocation125_spill] sm:$0xff] }
 0x548   :  { %10930 = vst [vmem:[#allocation132_spill] sm:$0xff] %v8314_v53  ;;  %v2410_v52 = vperm.slane %v2346_v17, 0  ;;  %v2347_v26 = vrot.slane %v7981_v42, 4  ;;  %v2348_v10 = vrot.slane %v7981_v42, 5  ;;  %v8359_v16 = vmul.f32 %v2406_v55, %v8161_v58  ;;  %v8380_v58 = vld [vmem:[%s10905_s7 + $0xd8] sm:$0xff] }
 0x549   :  { %10933 = vst [vmem:[#allocation135_spill] sm:$0xff] %v8340_v21  ;;  %v8361_v24 = vmul.f32 %v2395_v2, %v2088_v38  ;;  %v2349_v48 = vrot.slane %v7981_v42, 6  ;;  %v8367_v50 = vmul.f32 %v2407_v36, %v8176_v37  ;;  %v8369_v43 = vmul.f32 %v2397_v15, %v2092_v34  ;;  %v10995_v21 = vld [vmem:[#allocation126_spill] sm:$0xff] }
 0x54a   :  { %10934 = vst [vmem:[#allocation136_spill] sm:$0xff] %v8343_v56  ;;  %v8372_v32 = vmul.f32 %v2398_v59, %v8351_v18  ;;  %v2350_v55 = vrot.slane %v7981_v42, 7  ;;  %v8384_v62 = vmul.f32 %v2407_v36, %v8181_v35  ;;  %v8387_v37 = vmul.f32 %v2408_v1, %v8197_v44  ;;  %v8403_v42 = vld [vmem:[%s10905_s7 + $0xf8] sm:$0xff]  ;;  %v10991_v56 = vld [vmem:[#allocation122_spill] sm:$0xff] }
 0x54b   :  { %10935 = vst [vmem:[#allocation137_spill] sm:$0xff] %v8354_v41  ;;  %v8390_v22 = vmul.f32 %v2408_v1, %v8202_v3  ;;  %v8393_v17 = vmul.f32 %v2409_v31, %v8231_v8  ;;  %v8408_v44 = vmul.f32 %v2409_v31, %v8244_v57  ;;  %v8411_v3 = vmul.f32 %v2410_v52, %v8249_v4  ;;  %v10996_v53 = vld [vmem:[#allocation128_spill] sm:$0xff] }
 0x54c   :  { %10936 = vst [vmem:[#allocation138_spill] sm:$0xff] %v8359_v16  ;;  %v2411_v8 = vperm.slane %v2347_v26, 0  ;;  %v2412_v36 = vperm.slane %v2348_v10, 0  ;;  %v8414_v6 = vmul.f32 %v2410_v52, %v8254_v27  ;;  %v8430_v4 = vmul.f32 %v2398_v59, %v8403_v42  ;;  %v8437_v27 = vld [vmem:[%s10955_s6 + $0x80] sm:$0xff]  ;;  %v10990_v16 = vld [vmem:[#allocation121_spill] sm:$0xff] }
 0x54d   :  { %10937 = vst [vmem:[#allocation139_spill] sm:$0xff] %v8361_v24  ;;  %v8416_v24 = vmul.f32 %v2395_v2, %v2089_v11  ;;  %v8432_v2 = vperm.slane %v2350_v55, 0  ;;  %v8456_v55 = vld [vmem:[%s10955_s6 + $0x98] sm:$0xff] }
 0x54e   :  { %10939 = vst [vmem:[#allocation141_spill] sm:$0xff] %v8367_v50 }
 0x54f   :  { %10940 = vst [vmem:[#allocation142_spill] sm:$0xff] %v8369_v43 }
 0x550   :  { %10941 = vst [vmem:[#allocation143_spill] sm:$0xff] %v8372_v32  ;;  %v8398_v32 = vld [vmem:[%s10905_s7 + $0xe8] sm:$0xff] }
 0x551   :  { %10942 = vst [vmem:[#allocation144_spill] sm:$0xff] %v8384_v62  ;;  %v8427_v57 = vmul.f32 %v2397_v15, %v8398_v32  ;;  %v8447_v15 = vld [vmem:[%s10955_s6 + $0x90] sm:$0xff] }
 0x552   :  { %10943 = vst [vmem:[#allocation145_spill] sm:$0xff] %v8387_v37 }
 0x553   :  { %10944 = vst [vmem:[#allocation146_spill] sm:$0xff] %v8390_v22  ;;  %v2413_v22 = vperm.slane %v2349_v48, 0  ;;  %v8449_v48 = vmul.f32 %v2411_v8, %v2088_v38 }
 0x554   :  { %10945 = vst [vmem:[#allocation147_spill] sm:$0xff] %v8393_v17  ;;  %v8419_v17 = vmul.f32 %v2396_v25, %v8380_v58 }
 0x555   :  { %10946 = vst [vmem:[#allocation148_spill] sm:$0xff] %v8403_v42  ;;  %v8466_v42 = vld [vmem:[%s10955_s6 + $0xa8] sm:$0xff] }
 0x556   :  { %10947 = vst [vmem:[#allocation149_spill] sm:$0xff] %v8408_v44  ;;  %v8516_v44 = vmul.f32 %v2412_v36, %v8380_v58 }
 0x557   :  { %10948 = vst [vmem:[#allocation150_spill] sm:$0xff] %v8411_v3 }
 0x558   :  { %10949 = vst [vmem:[#allocation151_spill] sm:$0xff] %v8414_v6 }
 0x559   :  { %10950 = vst [vmem:[#allocation152_spill] sm:$0xff] %v8416_v24 }
 0x55a   :  { %10951 = vst [vmem:[#allocation153_spill] sm:$0xff] %v8419_v17 }
 0x55b   :  { %10952 = vst [vmem:[#allocation154_spill] sm:$0xff] %v8427_v57  ;;  %v8478_v57 = vld [vmem:[%s10955_s6 + $0xb8] sm:$0xff] }
 0x55c   :  { %10953 = vst [vmem:[#allocation155_spill] sm:$0xff] %v8430_v4 }
 0x55d   :  { %10954 = vst [vmem:[#allocation156_spill] sm:$0xff] %v8432_v2 }
 0x55e   :  { %10956 = vst [vmem:[#allocation157_spill] sm:$0xff] %v8437_v27 }
 0x55f   :  { %10958 = vst [vmem:[#allocation159_spill] sm:$0xff] %v8447_v15 }
 0x560   :  { %10959 = vst [vmem:[#allocation160_spill] sm:$0xff] %v8449_v48 }
 0x561   :  { %10961 = vst [vmem:[#allocation162_spill] sm:$0xff] %v8456_v55 }
 0x562   :  { %10963 = vst [vmem:[#allocation164_spill] sm:$0xff] %v8466_v42 }
 0x563   :  { %10966 = vst [vmem:[#allocation167_spill] sm:$0xff] %v8478_v57 }
 0x564   :  { %10973 = vst [vmem:[#allocation174_spill] sm:$0xff] %v8516_v44  ;;  %v8587_v44 = vld [vmem:[%s10955_s6 + $0xe0] sm:$0xff] }
 0x565   :  { %10985 = vst [vmem:[#allocation186_spill] sm:$0xff] %v8587_v44 }
 0x58c   :  { %v2309_v1 = vpop.permute.xlu2 %2308 }
 0x59c   :  { %v8405_v35 = vpop.permute.xlu0 %2294 }
 0x5a4   :  { %v2297_v43 = vpop.permute.xlu1 %2296 }
 0x5a5   :  { %v2320_v37 = vsel %vm1020_vm3, %v2297_v43, %v2309_v1  ;;  %v8451_v43 = vmul.f32 %v2412_v36, %v2090_v60  ;;  %v8461_v1 = vld [vmem:[%s10955_s6 + $0xa0] sm:$0xff]  ;;  %v8468_v60 = vmul.f32 %v2413_v22, %v2092_v34 }
 0x5a6   :  { %v2362_v25 = vrot.slane %v2320_v37, 1  ;;  %v2363_v31 = vrot.slane %v2320_v37, 2  ;;  %v2364_v52 = vrot.slane %v2320_v37, 3  ;;  %v2365_v26 = vrot.slane %v2320_v37, 4  ;;  %10962 = vst [vmem:[#allocation163_spill] sm:$0xff] %v8461_v1  ;;  %v8484_v34 = vld [vmem:[%s10955_s6 + $0xc0] sm:$0xff] }
 0x5a7   :  { %v2366_v59 = vrot.slane %v2320_v37, 5  ;;  %v2519_v10 = vperm.slane %v2320_v37, 0  ;;  %10960 = vst [vmem:[#allocation161_spill] sm:$0xff] %v8451_v43  ;;  %v8473_v43 = vld [vmem:[%s10955_s6 + $0xb0] sm:$0xff]  ;;  %v2367_v17 = vrot.slane %v2320_v37, 6  ;;  %v2368_v24 = vrot.slane %v2320_v37, 7 }
 0x5a8   :  { %v2520_v4 = vperm.slane %v2362_v25, 0  ;;  %v2521_v38 = vperm.slane %v2363_v31, 0  ;;  %v2522_v48 = vperm.slane %v2364_v52, 0  ;;  %10964 = vst [vmem:[#allocation165_spill] sm:$0xff] %v8468_v60  ;;  %v2523_v6 = vperm.slane %v2365_v26, 0  ;;  %v8496_v37 = vld [vmem:[%s10955_s6 + $0xc8] sm:$0xff] }
 0x5a9   :  { %10965 = vst [vmem:[#allocation166_spill] sm:$0xff] %v8473_v43  ;;  %v2591_v3 = vmul.f32 %v2519_v10, %v8437_v27  ;;  %v2524_v25 = vperm.slane %v2366_v59, 0  ;;  %v2592_v31 = vmul.f32 %v2519_v10, %v8442_v54  ;;  %v8489_v52 = vmul.f32 %v8432_v2, %v8351_v18  ;;  %v8501_v26 = vld [vmem:[%s10955_s6 + $0xd0] sm:$0xff]  ;;  %v8506_v59 = vld [vmem:[%s10955_s6 + $0xd8] sm:$0xff] }
 0x5aa   :  { %10967 = vst [vmem:[#allocation168_spill] sm:$0xff] %v8484_v34  ;;  %v8491_v60 = vmul.f32 %v2411_v8, %v2089_v11  ;;  %v2593_v18 = vmul.f32 %v2520_v4, %v8447_v15  ;;  %v2594_v11 = vmul.f32 %v2520_v4, %v8456_v55  ;;  %v2595_v8 = vmul.f32 %v2521_v38, %v8461_v1  ;;  %v2307_v4 = vpop.permute.xlu0 %2306  ;;  %v10989_v54 = vld [vmem:[#allocation17_spill] sm:$0xff] }
 0x5ab   :  { %10968 = vst [vmem:[#allocation169_spill] sm:$0xff] %v8489_v52  ;;  %v2596_v10 = vmul.f32 %v2521_v38, %v8466_v42  ;;  %v2597_v2 = vmul.f32 %v2522_v48, %v8473_v43  ;;  %v2598_v52 = vmul.f32 %v2522_v48, %v8478_v57  ;;  %v8518_v62 = vperm.slane %v2367_v17, 0 }
 0x5ac   :  { %10969 = vst [vmem:[#allocation170_spill] sm:$0xff] %v8491_v60  ;;  %v2655_v60 = vadd.f32 %v2591_v3, %v8234_v30  ;;  %v8520_v50 = vperm.slane %v2368_v24, 0  ;;  %v8523_v15 = vmul.f32 %v2523_v6, %v8484_v34  ;;  %v8526_v1 = vmul.f32 %v2413_v22, %v8398_v32 }
 0x5ad   :  { %10970 = vst [vmem:[#allocation171_spill] sm:$0xff] %v8496_v37  ;;  %v8529_v38 = vmul.f32 %v2523_v6, %v8496_v37  ;;  %v8532_v48 = vmul.f32 %v2524_v25, %v8501_v26  ;;  %v8535_v30 = vmul.f32 %v2524_v25, %v8506_v59  ;;  %v2656_v58 = vadd.f32 %v2592_v31, %v8237_v33 }
 0x5ae   :  { %10971 = vst [vmem:[#allocation172_spill] sm:$0xff] %v8501_v26  ;;  %v2657_v24 = vadd.f32 %v2593_v18, %v8257_v12  ;;  %v2658_v17 = vadd.f32 %v2594_v11, %v8260_v28  ;;  %v2659_v3 = vadd.f32 %v2595_v8, %v8269_v46  ;;  %v2660_v32 = vadd.f32 %v2596_v10, %v8279_v9  ;;  %v8556_v12 = vld [vmem:[%s10955_s6] sm:$0xff] }
 0x5af   :  { %10972 = vst [vmem:[#allocation173_spill] sm:$0xff] %v8506_v59  ;;  %v8543_v22 = vadd.f32 %v2597_v2, %v8282_v40  ;;  %v8546_v6 = vadd.f32 %v2598_v52, %v8285_v5  ;;  %v8549_v36 = vsel %vm1405_vm4, %v2655_v60, 0.0  ;;  %v2319_v33 = vsel %vm1020_vm3, %v8405_v35, %v2307_v4  ;;  %v8561_v5 = vld [vmem:[%s10955_s6 + $0x8] sm:$0xff]  ;;  %v8566_v40 = vld [vmem:[%s10955_s6 + $0x10] sm:$0xff]  ;;  %v8571_v35 = vld [vmem:[%s10955_s6 + $0x18] sm:$0xff] }
 0x5b0   :  { %10974 = vst [vmem:[#allocation175_spill] sm:$0xff] %v8518_v62  ;;  %v2355_v28 = vrot.slane %v2319_v33, 1  ;;  %v2356_v46 = vrot.slane %v2319_v33, 2  ;;  %v2357_v9 = vrot.slane %v2319_v33, 3  ;;  %v2358_v25 = vrot.slane %v2319_v33, 4  ;;  %v8582_v8 = vld [vmem:[%s10955_s6 + $0x20] sm:$0xff] }
 0x5b1   :  { %10975 = vst [vmem:[#allocation176_spill] sm:$0xff] %v8520_v50  ;;  %v2359_v2 = vrot.slane %v2319_v33, 5  ;;  %v2360_v60 = vrot.slane %v2319_v33, 6  ;;  %v2361_v31 = vrot.slane %v2319_v33, 7  ;;  %v2511_v52 = vperm.slane %v2319_v33, 0  ;;  %v8628_v59 = vld [vmem:[%s10955_s6 + $0x50] sm:$0xff] }
 0x5b2   :  { %10976 = vst [vmem:[#allocation177_spill] sm:$0xff] %v8523_v15  ;;  %v8574_v18 = vsel %vm1405_vm4, %v2657_v24, 0.0  ;;  %v8577_v11 = vsel %vm1405_vm4, %v2659_v3, 0.0  ;;  %v2512_v10 = vperm.slane %v2355_v28, 0  ;;  %v2513_v4 = vperm.slane %v2356_v46, 0  ;;  %v8598_v3 = vld [vmem:[%s10955_s6 + $0x28] sm:$0xff] }
 0x5b3   :  { %10977 = vst [vmem:[#allocation178_spill] sm:$0xff] %v8526_v1  ;;  %v2299_v1 = vpop.permute.xlu1 %2298  ;;  %v8590_v33 = vsel %vm1405_vm4, %v2656_v58, 0.0  ;;  %v8593_v24 = vsel %vm1405_vm4, %v2658_v17, 0.0  ;;  %v8603_v28 = vld [vmem:[%s10955_s6 + $0x30] sm:$0xff]  ;;  %v2514_v46 = vperm.slane %v2357_v9, 0  ;;  %v8608_v58 = vld [vmem:[%s10955_s6 + $0x38] sm:$0xff]  ;;  %v2575_v9 = vmul.f32 %v2511_v52, %v8556_v12 }
 0x5b4   :  { %10978 = vst [vmem:[#allocation179_spill] sm:$0xff] %v8529_v38  ;;  %v8613_v17 = vld [vmem:[%s10955_s6 + $0x40] sm:$0xff]  ;;  %v2516_v38 = vperm.slane %v2359_v2, 0  ;;  %v8655_v15 = vld [vmem:[%s10955_s6 + $0x70] sm:$0xff] }
 0x5b5   :  { %10979 = vst [vmem:[#allocation180_spill] sm:$0xff] %v8532_v48  ;;  %v8638_v2 = vld [vmem:[%s10955_s6 + $0x60] sm:$0xff]  ;;  %v2582_v26 = vmul.f32 %v2514_v46, %v8608_v58 }
 0x5b6   :  { %10980 = vst [vmem:[#allocation181_spill] sm:$0xff] %v8535_v30  ;;  %v2311_v30 = vpop.permute.xlu2 %2310  ;;  %v2585_v57 = vmul.f32 %v2516_v38, %v8628_v59 }
 0x5b7   :  { %10981 = vst [vmem:[#allocation182_spill] sm:$0xff] %v8543_v22  ;;  %v2517_v22 = vperm.slane %v2360_v60, 0  ;;  %v2518_v60 = vperm.slane %v2361_v31, 0  ;;  %v8641_v48 = vsel %vm1020_vm3, %v2299_v1, %v2311_v30  ;;  %v8660_v31 = vld [vmem:[%s10955_s6 + $0x78] sm:$0xff]  ;;  %v2576_v1 = vmul.f32 %v2511_v52, %v8561_v5 }
 0x5b8   :  { %10982 = vst [vmem:[#allocation183_spill] sm:$0xff] %v8546_v6  ;;  %v2515_v6 = vperm.slane %v2358_v25, 0  ;;  %v2577_v25 = vmul.f32 %v2512_v10, %v8566_v40  ;;  %v2578_v30 = vmul.f32 %v2512_v10, %v8571_v35  ;;  %v2639_v52 = vadd.f32 %v2575_v9, %v8114_v14  ;;  %v10992_v9 = vld [vmem:[#allocation123_spill] sm:$0xff] }
 0x5b9   :  { %10983 = vst [vmem:[#allocation184_spill] sm:$0xff] %v8574_v18  ;;  %v8633_v18 = vld [vmem:[%s10955_s6 + $0x58] sm:$0xff]  ;;  %v2587_v43 = vmul.f32 %v2517_v22, %v8638_v2  ;;  %v2589_v50 = vmul.f32 %v2518_v60, %v8655_v15  ;;  %v2640_v55 = vadd.f32 %v2576_v1, %v8134_v13  ;;  %v2649_v47 = vadd.f32 %v2585_v57, %v10995_v21  ;;  %v10997_v1 = vld [vmem:[#allocation127_spill] sm:$0xff] }
 0x5ba   :  { %10984 = vst [vmem:[#allocation185_spill] sm:$0xff] %v8577_v11  ;;  %v8623_v11 = vsel %vm1405_vm4, %v2660_v32, 0.0  ;;  %v8645_v32 = vmul.f32 %v8518_v62, %v8587_v44  ;;  %v2579_v44 = vmul.f32 %v2513_v4, %v8582_v8  ;;  %v2580_v62 = vmul.f32 %v2513_v4, %v8598_v3 }
 0x5bb   :  { %10986 = vst [vmem:[#allocation187_spill] sm:$0xff] %v8593_v24  ;;  %v8618_v24 = vld [vmem:[%s10955_s6 + $0x48] sm:$0xff]  ;;  %v2583_v37 = vmul.f32 %v2515_v6, %v8613_v17  ;;  %v2641_v10 = vadd.f32 %v2577_v25, %v8137_v63  ;;  %v2586_v42 = vmul.f32 %v2516_v38, %v8633_v18  ;;  %v2646_v63 = vadd.f32 %v2582_v26, %v10992_v9  ;;  %v10993_v25 = vld [vmem:[#allocation124_spill] sm:$0xff] }
 0x5bc   :  { %10987 = vst [vmem:[#allocation188_spill] sm:$0xff] %v8623_v11  ;;  %v8650_v11 = vld [vmem:[%s10955_s6 + $0x68] sm:$0xff]  ;;  %v2584_v34 = vmul.f32 %v2515_v6, %v8618_v24  ;;  %v2642_v6 = vadd.f32 %v2578_v30, %v8140_v51  ;;  %v2643_v27 = vadd.f32 %v2579_v44, %v10989_v54  ;;  %v2644_v41 = vadd.f32 %v2580_v62, %v10990_v16  ;;  %v10998_v54 = vld [vmem:[#allocation129_spill] sm:$0xff]  ;;  %v10999_v62 = vld [vmem:[#allocation130_spill] sm:$0xff] }
 0x5bd   :  { %10988 = vst [vmem:[#allocation189_spill] sm:$0xff] %v8645_v32  ;;  %v2581_v32 = vmul.f32 %v2514_v46, %v8603_v28  ;;  %v2588_v4 = vmul.f32 %v2517_v22, %v8650_v11  ;;  %v2590_v46 = vmul.f32 %v2518_v60, %v8660_v31  ;;  %v2647_v38 = vadd.f32 %v2583_v37, %v10993_v25  ;;  %v11000_v26 = vld [vmem:[#allocation131_spill] sm:$0xff] }
 0x5be   :  { %v2648_v22 = vadd.f32 %v2584_v34, %v10994_v7  ;;  %v2651_v60 = vadd.f32 %v2587_v43, %v10996_v53  ;;  %v2704_v13 = vsel %vm1405_vm4, %v2639_v52, 0.0  ;;  %v2705_v51 = vsel %vm1405_vm4, %v2641_v10, 0.0 }
 0x5bf   :  { %v2645_v14 = vadd.f32 %v2581_v32, %v10991_v56  ;;  %v2650_v44 = vadd.f32 %v2586_v42, %v10997_v1  ;;  %v2652_v16 = vadd.f32 %v2588_v4, %v10998_v54  ;;  %v2653_v56 = vadd.f32 %v2589_v50, %v10999_v62  ;;  %v2832_v42 = vld [vmem:[%s10043_s14] sm:$0xff]  ;;  %v2834_v50 = vld [vmem:[%s10043_s14 + $0x10] sm:$0xff] }
 0x5c0   :  { %v2706_v32 = vadd.f32 %v2705_v51, %v2704_v13  ;;  %v2654_v30 = vadd.f32 %v2590_v46, %v11000_v26  ;;  %v2707_v37 = vsel %vm1405_vm4, %v2643_v27, 0.0  ;;  %v2735_v7 = vsel %vm1405_vm4, %v2640_v55, 0.0  ;;  %v2833_v27 = vld [vmem:[%s10043_s14 + $0x8] sm:$0xff]  ;;  %2838 = vperm.xlu2 %4752, %v2832_v42   ;;  %2848 = vperm.xlu1 %4754, %v2834_v50  }
 0x5c1   :  { %v2736_v21 = vsel %vm1405_vm4, %v2642_v6, 0.0  ;;  %v2709_v57 = vsel %vm1405_vm4, %v2645_v14, 0.0  ;;  %v2711_v43 = vsel %vm1405_vm4, %v2647_v38, 0.0  ;;  %v2713_v55 = vsel %vm1405_vm4, %v2649_v47, 0.0  ;;  %2843 = vperm.xlu0 %4753, %v2833_v27   ;;  %v3665_v50 = vld [vmem:[%s10045_s16 + $0x68] sm:$0xff] }
 0x5c2   :  { %v2708_v53 = vadd.f32 %v2707_v37, %v2706_v32  ;;  %v2737_v34 = vadd.f32 %v2736_v21, %v2735_v7  ;;  %v2715_v52 = vsel %vm1405_vm4, %v2651_v60, 0.0  ;;  %v2738_v10 = vsel %vm1405_vm4, %v2644_v41, 0.0  ;;  %v2835_v21 = vld [vmem:[%s10043_s14 + $0x18] sm:$0xff] }
 0x5c3   :  { %v2369_v4 = vrot.slane %v8641_v48, 1  ;;  %v2717_v6 = vsel %vm1405_vm4, %v2653_v56, 0.0  ;;  %v2370_v9 = vrot.slane %v8641_v48, 2  ;;  %v2740_v25 = vsel %vm1405_vm4, %v2646_v63, 0.0 }
 0x5c4   :  { %v2710_v46 = vadd.f32 %v2709_v57, %v2708_v53  ;;  %v2739_v14 = vadd.f32 %v2738_v10, %v2737_v34  ;;  %v2371_v38 = vrot.slane %v8641_v48, 3  ;;  %v2372_v47 = vrot.slane %v8641_v48, 4 }
 0x5c5   :  { %v2373_v60 = vrot.slane %v8641_v48, 5  ;;  %v2527_v51 = vperm.slane %v8641_v48, 0  ;;  %v2528_v1 = vperm.slane %v2369_v4, 0  ;;  %v2742_v54 = vsel %vm1405_vm4, %v2648_v22, 0.0 }
 0x5c6   :  { %v2712_v41 = vadd.f32 %v2711_v43, %v2710_v46  ;;  %v2741_v13 = vadd.f32 %v2740_v25, %v2739_v14  ;;  %v2744_v62 = vsel %vm1405_vm4, %v2650_v44, 0.0  ;;  %v2374_v56 = vrot.slane %v8641_v48, 6  ;;  %v3667_v44 = vld [vmem:[%s10045_s16 + $0x78] sm:$0xff] }
 0x5c7   :  { %v2375_v32 = vrot.slane %v8641_v48, 7  ;;  %v2746_v37 = vsel %vm1405_vm4, %v2652_v16, 0.0  ;;  %v2529_v7 = vperm.slane %v2370_v9, 0  ;;  %v2748_v53 = vsel %vm1405_vm4, %v2654_v30, 0.0 }
 0x5c8   :  { %v2714_v63 = vadd.f32 %v2713_v55, %v2712_v41  ;;  %v2743_v26 = vadd.f32 %v2742_v54, %v2741_v13  ;;  %v2530_v57 = vperm.slane %v2371_v38, 0  ;;  %v2531_v43 = vperm.slane %v2372_v47, 0  ;;  %2853 = vperm.xlu2 %4752, %v2835_v21   ;;  %3745 = vperm.xlu1 %4754, %v3667_v44   ;;  %v11003_v41 = vld [vmem:[#allocation135_spill] sm:$0xff]  ;;  %v11005_v54 = vld [vmem:[#allocation136_spill] sm:$0xff] }
 0x5c9   :  { %v2532_v22 = vperm.slane %v2373_v60, 0  ;;  %v2607_v42 = vmul.f32 %v2527_v51, %v8556_v12  ;;  %v2609_v16 = vmul.f32 %v2528_v1, %v8566_v40  ;;  %v2533_v27 = vperm.slane %v2374_v56, 0  ;;  %3735 = vperm.xlu0 %4753, %v3665_v50   ;;  %v11002_v60 = vld [vmem:[#allocation133_spill] sm:$0xff] }
 0x5ca   :  { %v2716_v34 = vadd.f32 %v2715_v52, %v2714_v63  ;;  %v2745_v48 = vadd.f32 %v2744_v62, %v2743_v26  ;;  %v2534_v55 = vperm.slane %v2375_v32, 0  ;;  %v2608_v30 = vmul.f32 %v2527_v51, %v8561_v5  ;;  %v11006_v62 = vld [vmem:[#allocation137_spill] sm:$0xff]  ;;  %v2313_v63 = vpop.permute.xlu1 %2312  ;;  %v2301_v26 = vpop.permute.xlu0 %2300 }
 0x5cb   :  { %v2610_v10 = vmul.f32 %v2528_v1, %v8571_v35  ;;  %v2611_v52 = vmul.f32 %v2529_v7, %v8582_v8  ;;  %v2612_v14 = vmul.f32 %v2529_v7, %v8598_v3  ;;  %v2613_v12 = vmul.f32 %v2530_v57, %v8603_v28  ;;  %v11004_v1 = vld [vmem:[#allocation134_spill] sm:$0xff] }
 0x5cc   :  { %v2718_v4 = vadd.f32 %v2717_v6, %v2716_v34  ;;  %v2747_v46 = vadd.f32 %v2746_v37, %v2745_v48  ;;  %v2614_v40 = vmul.f32 %v2530_v57, %v8608_v58  ;;  %v2615_v9 = vmul.f32 %v2531_v43, %v8613_v17  ;;  %v11007_v37 = vld [vmem:[#allocation138_spill] sm:$0xff] }
 0x5cd   :  { %v2617_v25 = vmul.f32 %v2532_v22, %v8628_v59  ;;  %v2671_v6 = vadd.f32 %v2607_v42, %v8290_v49  ;;  %v2673_v8 = vadd.f32 %v2609_v16, %v8296_v0  ;;  %v2616_v3 = vmul.f32 %v2531_v43, %v8618_v24  ;;  %v3666_v49 = vld [vmem:[%s10045_s16 + $0x70] sm:$0xff] }
 0x5ce   :  { %v8745_v5 = vadd.f32 %v8549_v36, %v2718_v4  ;;  %v2749_v35 = vadd.f32 %v2748_v53, %v2747_v46  ;;  %v2618_v38 = vmul.f32 %v2532_v22, %v8633_v18  ;;  %v2619_v28 = vmul.f32 %v2533_v27, %v8638_v2  ;;  %v3663_v4 = vld [vmem:[%s10045_s16 + $0x58] sm:$0xff] }
 0x5cf   :  { %v2620_v58 = vmul.f32 %v2533_v27, %v8650_v11  ;;  %v2621_v59 = vmul.f32 %v2534_v55, %v8655_v15  ;;  %v2622_v36 = vmul.f32 %v2534_v55, %v8660_v31  ;;  %v2675_v47 = vadd.f32 %v2611_v52, %v8304_v61  ;;  %v3664_v15 = vld [vmem:[%s10045_s16 + $0x60] sm:$0xff] }
 0x5d0   :  { %v8754_v17 = vadd.f32 %v8590_v33, %v2749_v35  ;;  %v2672_v0 = vadd.f32 %v2608_v30, %v8293_v19  ;;  %v2674_v18 = vadd.f32 %v2610_v10, %v8299_v39  ;;  %v2676_v24 = vadd.f32 %v2612_v14, %v8307_v29  ;;  %v3662_v19 = vld [vmem:[%s10045_s16 + $0x50] sm:$0xff]  ;;  %3740 = vperm.xlu2 %4752, %v3666_v49  }
 0x5d1   :  { %v2677_v11 = vadd.f32 %v2613_v12, %v8310_v23  ;;  %v2679_v33 = vadd.f32 %v2615_v9, %v8317_v20  ;;  %v2681_v61 = vadd.f32 %v2617_v25, %v8323_v45  ;;  %v2766_v2 = vsel %vm1405_vm4, %v2671_v6, 0.0  ;;  %v11001_v39 = vld [vmem:[#allocation132_spill] sm:$0xff]  ;;  %3730 = vperm.xlu1 %4754, %v3664_v15   ;;  %3720 = vperm.xlu0 %4753, %v3662_v19   ;;  %v11009_v15 = vld [vmem:[#allocation158_spill] sm:$0xff] }
 0x5d2   :  { %v2767_v31 = vsel %vm1405_vm4, %v2673_v8, 0.0  ;;  %v2678_v29 = vadd.f32 %v2614_v40, %v11001_v39  ;;  %v2680_v23 = vadd.f32 %v2616_v3, %v11002_v60  ;;  %v2683_v13 = vadd.f32 %v2619_v28, %v11003_v41  ;;  %v3661_v40 = vld [vmem:[%s10045_s16 + $0x48] sm:$0xff]  ;;  %v3659_v8 = vld [vmem:[%s10045_s16 + $0x38] sm:$0xff] }
 0x5d3   :  { %v2768_v51 = vadd.f32 %v2767_v31, %v2766_v2  ;;  %v2682_v20 = vadd.f32 %v2618_v38, %v11004_v1  ;;  %v2684_v45 = vadd.f32 %v2620_v58, %v11005_v54  ;;  %v2685_v56 = vadd.f32 %v2621_v59, %v11006_v62 }
 0x5d4   :  { %v2769_v32 = vsel %vm1405_vm4, %v2675_v47, 0.0  ;;  %v2686_v7 = vadd.f32 %v2622_v36, %v11007_v37  ;;  %v2797_v53 = vsel %vm1405_vm4, %v2672_v0, 0.0  ;;  %v2798_v57 = vsel %vm1405_vm4, %v2674_v18, 0.0  ;;  %v8810_v0 = vld [vmem:[%s10955_s6 + $0xf0] sm:$0xff] }
 0x5d5   :  { %v2770_v21 = vadd.f32 %v2769_v32, %v2768_v51  ;;  %v2771_v43 = vsel %vm1405_vm4, %v2677_v11, 0.0  ;;  %v2773_v22 = vsel %vm1405_vm4, %v2679_v33, 0.0  ;;  %v2775_v44 = vsel %vm1405_vm4, %v2681_v61, 0.0  ;;  %v11010_v61 = vld [vmem:[#allocation159_spill] sm:$0xff]  ;;  %v11012_v51 = vld [vmem:[#allocation176_spill] sm:$0xff] }
 0x5d6   :  { %v2799_v34 = vadd.f32 %v2798_v57, %v2797_v53  ;;  %v2777_v42 = vsel %vm1405_vm4, %v2683_v13, 0.0  ;;  %v2800_v16 = vsel %vm1405_vm4, %v2676_v24, 0.0  ;;  %v2322_v50 = vsel %vm1020_vm3, %v2301_v26, %v2313_v63  ;;  %v11008_v24 = vld [vmem:[#allocation157_spill] sm:$0xff]  ;;  %v3660_v63 = vld [vmem:[%s10045_s16 + $0x40] sm:$0xff] }
 0x5d7   :  { %v2772_v48 = vadd.f32 %v2771_v43, %v2770_v21  ;;  %v2779_v27 = vsel %vm1405_vm4, %v2685_v56, 0.0  ;;  %v2376_v30 = vrot.slane %v2322_v50, 1  ;;  %v2377_v10 = vrot.slane %v2322_v50, 2  ;;  %v11014_v56 = vld [vmem:[#allocation164_spill] sm:$0xff]  ;;  %v11015_v26 = vld [vmem:[#allocation141_spill] sm:$0xff]  ;;  %v11018_v43 = vld [vmem:[#allocation146_spill] sm:$0xff] }
 0x5d8   :  { %v2801_v55 = vadd.f32 %v2800_v16, %v2799_v34  ;;  %v2802_v52 = vsel %vm1405_vm4, %v2678_v29, 0.0  ;;  %v2804_v14 = vsel %vm1405_vm4, %v2680_v23, 0.0  ;;  %v2806_v12 = vsel %vm1405_vm4, %v2682_v20, 0.0  ;;  %3725 = vperm.xlu2 %4752, %v3663_v4   ;;  %v11011_v29 = vld [vmem:[#allocation162_spill] sm:$0xff]  ;;  %v11017_v53 = vld [vmem:[#allocation145_spill] sm:$0xff]  ;;  %v11022_v4 = vld [vmem:[#allocation171_spill] sm:$0xff] }
 0x5d9   :  { %v2774_v46 = vadd.f32 %v2773_v22, %v2772_v48  ;;  %v2378_v25 = vrot.slane %v2322_v50, 3  ;;  %v2535_v35 = vperm.slane %v2322_v50, 0  ;;  %v2536_v6 = vperm.slane %v2376_v30, 0  ;;  %3715 = vperm.xlu1 %4754, %v3661_v40   ;;  %3705 = vperm.xlu0 %4753, %v3659_v8   ;;  %v11021_v30 = vld [vmem:[#allocation168_spill] sm:$0xff]  ;;  %v11025_v8 = vld [vmem:[#allocation149_spill] sm:$0xff] }
 0x5da   :  { %v2803_v9 = vadd.f32 %v2802_v52, %v2801_v55  ;;  %v2379_v38 = vrot.slane %v2322_v50, 4  ;;  %v2380_v28 = vrot.slane %v2322_v50, 5  ;;  %v2381_v58 = vrot.slane %v2322_v50, 6  ;;  %v3656_v55 = vld [vmem:[%s10045_s16 + $0x20] sm:$0xff] }
 0x5db   :  { %v2776_v3 = vadd.f32 %v2775_v44, %v2774_v46  ;;  %v2808_v36 = vsel %vm1405_vm4, %v2684_v45, 0.0  ;;  %v2810_v47 = vsel %vm1405_vm4, %v2686_v7, 0.0  ;;  %v2537_v49 = vperm.slane %v2377_v10, 0  ;;  %v11013_v45 = vld [vmem:[#allocation163_spill] sm:$0xff]  ;;  %v11016_v7 = vld [vmem:[#allocation144_spill] sm:$0xff] }
 0x5dc   :  { %v2805_v59 = vadd.f32 %v2804_v14, %v2803_v9  ;;  %v2623_v11 = vmul.f32 %v2535_v35, %v11008_v24  ;;  %v2624_v33 = vmul.f32 %v2535_v35, %v11009_v15  ;;  %v2625_v2 = vmul.f32 %v2536_v6, %v11010_v61  ;;  %v3658_v44 = vld [vmem:[%s10045_s16 + $0x30] sm:$0xff]  ;;  %v11024_v9 = vld [vmem:[#allocation147_spill] sm:$0xff] }
 0x5dd   :  { %v2778_v18 = vadd.f32 %v2777_v42, %v2776_v3  ;;  %v2382_v19 = vrot.slane %v2322_v50, 7  ;;  %v2538_v39 = vperm.slane %v2378_v25, 0  ;;  %v2626_v60 = vmul.f32 %v2536_v6, %v11011_v29  ;;  %v11019_v42 = vld [vmem:[#allocation166_spill] sm:$0xff]  ;;  %v11020_v50 = vld [vmem:[#allocation167_spill] sm:$0xff]  ;;  %v11028_v24 = vld [vmem:[#allocation140_spill] sm:$0xff] }
 0x5de   :  { %v2807_v31 = vadd.f32 %v2806_v12, %v2805_v59  ;;  %v2539_v23 = vperm.slane %v2379_v38, 0  ;;  %v2540_v41 = vperm.slane %v2380_v28, 0  ;;  %v8816_v13 = vperm.slane %v2381_v58, 0  ;;  %v11023_v12 = vld [vmem:[#allocation172_spill] sm:$0xff]  ;;  %v11026_v58 = vld [vmem:[#allocation139_spill] sm:$0xff]  ;;  %v11027_v59 = vld [vmem:[#allocation177_spill] sm:$0xff] }
 0x5df   :  { %v2605_v1 = vmul.f32 %v11012_v51, %v8810_v0  ;;  %v2780_v20 = vadd.f32 %v2779_v27, %v2778_v18  ;;  %v2627_v62 = vmul.f32 %v2537_v49, %v11013_v45  ;;  %v2628_v32 = vmul.f32 %v2537_v49, %v11014_v56  ;;  %v11036_v56 = vld [vmem:[#allocation143_spill] sm:$0xff] }
 0x5e0   :  { %v2809_v54 = vadd.f32 %v2808_v36, %v2807_v31  ;;  %v2687_v37 = vadd.f32 %v2623_v11, %v11015_v26  ;;  %v2688_v21 = vadd.f32 %v2624_v33, %v11016_v7  ;;  %v2689_v57 = vadd.f32 %v2625_v2, %v11017_v53  ;;  %3710 = vperm.xlu2 %4752, %v3660_v63   ;;  %v11029_v11 = vld [vmem:[#allocation180_spill] sm:$0xff]  ;;  %v2127_v2 = vld [vmem:[%s10955_s6 + $0xf8] sm:$0xff]  ;;  %v3657_v7 = vld [vmem:[%s10045_s16 + $0x28] sm:$0xff] }
 0x5e1   :  { %v2690_v22 = vadd.f32 %v2626_v60, %v11018_v43  ;;  %v8832_v48 = vperm.slane %v2382_v19, 0  ;;  %v2629_v16 = vmul.f32 %v2538_v39, %v11019_v42  ;;  %v2630_v27 = vmul.f32 %v2538_v39, %v11020_v50  ;;  %3700 = vperm.xlu1 %4754, %v3658_v44   ;;  %3690 = vperm.xlu0 %4753, %v3656_v55   ;;  %v11030_v33 = vld [vmem:[#allocation184_spill] sm:$0xff]  ;;  %v11031_v31 = vld [vmem:[#allocation173_spill] sm:$0xff]  ;;  %v11032_v39 = vld [vmem:[#allocation150_spill] sm:$0xff] }
 0x5e2   :  { %v2811_v34 = vadd.f32 %v2810_v47, %v2809_v54  ;;  %v2631_v10 = vmul.f32 %v2539_v23, %v11021_v30  ;;  %v8841_v46 = vmul.f32 %v2539_v23, %v11022_v4  ;;  %v2781_v52 = vsel %vm1405_vm4, %v2687_v37, 0.0  ;;  %v2125_v47 = vld [vmem:[%s10955_s6 + $0xe8] sm:$0xff]  ;;  %v11035_v54 = vld [vmem:[#allocation189_spill] sm:$0xff] }
 0x5e3   :  { %v2812_v14 = vsel %vm1405_vm4, %v2688_v21, 0.0  ;;  %v2633_v40 = vmul.f32 %v2540_v41, %v11023_v12  ;;  %v2691_v25 = vadd.f32 %v2627_v62, %v11024_v9  ;;  %v2782_v35 = vadd.f32 %v2781_v52, %v2780_v20  ;;  %v11033_v60 = vld [vmem:[#allocation151_spill] sm:$0xff]  ;;  %v11034_v20 = vld [vmem:[#allocation142_spill] sm:$0xff]  ;;  %v11037_v63 = vld [vmem:[#allocation185_spill] sm:$0xff] }
 0x5e4   :  { %v2813_v6 = vadd.f32 %v2812_v14, %v2811_v34  ;;  %v2692_v3 = vadd.f32 %v2628_v32, %v11025_v8  ;;  %v2783_v38 = vsel %vm1405_vm4, %v2689_v57, 0.0  ;;  %v2814_v28 = vsel %vm1405_vm4, %v2690_v22, 0.0  ;;  %v11040_v57 = vld [vmem:[#allocation152_spill] sm:$0xff]  ;;  %v11041_v43 = vld [vmem:[#allocation179_spill] sm:$0xff]  ;;  %v11043_v30 = vld [vmem:[#allocation153_spill] sm:$0xff] }
 0x5e5   :  { %v2663_v36 = vadd.f32 %v11027_v59, %v11026_v58  ;;  %v2784_v49 = vadd.f32 %v2783_v38, %v2782_v35  ;;  %v2665_v15 = vadd.f32 %v11029_v11, %v11028_v24  ;;  %v2722_v61 = vadd.f32 %v11030_v33, %v8745_v5  ;;  %v11038_v5 = vld [vmem:[#allocation175_spill] sm:$0xff]  ;;  %v11044_v4 = vld [vmem:[#allocation181_spill] sm:$0xff]  ;;  %v11045_v52 = vld [vmem:[#allocation154_spill] sm:$0xff] }
 0x5e6   :  { %v2815_v18 = vadd.f32 %v2814_v28, %v2813_v6  ;;  %v2634_v19 = vmul.f32 %v2540_v41, %v11031_v31  ;;  %v2693_v29 = vadd.f32 %v2629_v16, %v11032_v39  ;;  %v2694_v23 = vadd.f32 %v2630_v27, %v11033_v60  ;;  %v11039_v41 = vld [vmem:[#allocation182_spill] sm:$0xff]  ;;  %v11042_v44 = vld [vmem:[#allocation187_spill] sm:$0xff]  ;;  %v11046_v12 = vld [vmem:[#allocation188_spill] sm:$0xff] }
 0x5e7   :  { %v2667_v45 = vadd.f32 %v11035_v54, %v11034_v20  ;;  %v2785_v62 = vsel %vm1405_vm4, %v2691_v25, 0.0  ;;  %v2669_v32 = vadd.f32 %v2605_v1, %v11036_v56  ;;  %v2724_v26 = vadd.f32 %v11037_v63, %v2722_v61  ;;  %v3655_v1 = vld [vmem:[%s10045_s16 + $0x18] sm:$0xff]  ;;  %v11047_v35 = vld [vmem:[#allocation183_spill] sm:$0xff]  ;;  %v11048_v8 = vld [vmem:[#allocation186_spill] sm:$0xff] }
 0x5e8   :  { %v2604_v37 = vmul.f32 %v11038_v5, %v2125_v47  ;;  %v2725_v21 = vsel %vm1405_vm4, %v11039_v41, 0.0  ;;  %v2606_v53 = vmul.f32 %v11012_v51, %v2127_v2  ;;  %v2664_v22 = vadd.f32 %v11041_v43, %v11040_v57  ;;  %v3653_v51 = vld [vmem:[%s10045_s16 + $0x8] sm:$0xff]  ;;  %3695 = vperm.xlu2 %4752, %v3657_v7   ;;  %v11049_v38 = vld [vmem:[#allocation160_spill] sm:$0xff]  ;;  %v11051_v61 = vld [vmem:[#allocation161_spill] sm:$0xff] }
 0x5e9   :  { %v2753_v34 = vadd.f32 %v11042_v44, %v8754_v17  ;;  %v2816_v42 = vsel %vm1405_vm4, %v2692_v3, 0.0  ;;  %v2726_v16 = vadd.f32 %v2725_v21, %v2724_v26  ;;  %v2727_v50 = vsel %vm1405_vm4, %v2663_v36, 0.0  ;;  %3685 = vperm.xlu1 %4754, %v3655_v1   ;;  %v11050_v59 = vld [vmem:[#allocation155_spill] sm:$0xff]  ;;  %3675 = vperm.xlu0 %4753, %v3653_v51   ;;  %v11052_v56 = vld [vmem:[#allocation165_spill] sm:$0xff]  ;;  %v11057_v1 = vld [vmem:[#allocation156_spill] sm:$0xff] }
 0x5ea   :  { %v2729_v27 = vsel %vm1405_vm4, %v2665_v15, 0.0  ;;  %v2731_v55 = vsel %vm1405_vm4, %v2667_v45, 0.0  ;;  %v2666_v17 = vadd.f32 %v11044_v4, %v11043_v30  ;;  %v2668_v14 = vadd.f32 %v2604_v37, %v11045_v52  ;;  %v11054_v41 = vld [vmem:[#allocation169_spill] sm:$0xff] }
 0x5eb   :  { %v2755_v9 = vadd.f32 %v11046_v12, %v2753_v34  ;;  %v2728_v25 = vadd.f32 %v2727_v50, %v2726_v16  ;;  %v2756_v6 = vsel %vm1405_vm4, %v11047_v35, 0.0  ;;  %v2635_v3 = vmul.f32 %v8816_v13, %v11048_v8  ;;  %v3296_v8 = vld [vmem:[%s11059_s22 + $0x3f0] sm:$0xff] }
 0x5ec   :  { %v2695_v28 = vadd.f32 %v2631_v10, %v11049_v38  ;;  %v2733_v58 = vsel %vm1405_vm4, %v2669_v32, 0.0  ;;  %v2670_v36 = vadd.f32 %v2606_v53, %v11050_v59  ;;  %v2758_v11 = vsel %vm1405_vm4, %v2664_v22, 0.0  ;;  %v11055_v22 = vld [vmem:[#allocation174_spill] sm:$0xff]  ;;  %v3292_v59 = vld [vmem:[%s11059_s22 + $0x3d0] sm:$0xff] }
 0x5ed   :  { %v2757_v24 = vadd.f32 %v2756_v6, %v2755_v9  ;;  %v2730_v15 = vadd.f32 %v2729_v27, %v2728_v25  ;;  %v2637_v33 = vmul.f32 %v8832_v48, %v8810_v0  ;;  %v2697_v31 = vadd.f32 %v2633_v40, %v11051_v61  ;;  %v3654_v0 = vld [vmem:[%s10045_s16 + $0x10] sm:$0xff]  ;;  %v3294_v38 = vld [vmem:[%s11059_s22 + $0x3e0] sm:$0xff] }
 0x5ee   :  { %v2786_v39 = vadd.f32 %v2785_v62, %v2784_v49  ;;  %v2760_v20 = vsel %vm1405_vm4, %v2666_v17, 0.0  ;;  %v2762_v10 = vsel %vm1405_vm4, %v2668_v14, 0.0  ;;  %v2787_v54 = vsel %vm1405_vm4, %v2693_v29, 0.0  ;;  %v11053_v49 = vld [vmem:[#allocation170_spill] sm:$0xff]  ;;  %v3264_v6 = vld [vmem:[%s11059_s22 + $0x2f0] sm:$0xff] }
 0x5ef   :  { %v2759_v60 = vadd.f32 %v2758_v11, %v2757_v24  ;;  %v2732_v45 = vadd.f32 %v2731_v55, %v2730_v15  ;;  %v2699_v32 = vadd.f32 %v2635_v3, %v11052_v56  ;;  %v2789_v26 = vsel %vm1405_vm4, %v2695_v28, 0.0  ;;  %v4215_v14 = vld [vmem:[%s10047_s18] sm:$0x3]  ;;  %3404 = vmatpush.msrb.mxu1 %v3264_v6  ;;  %v3260_v28 = vld [vmem:[%s11059_s22 + $0x2d0] sm:$0xff] }
 0x5f0   :  { %v2788_v63 = vadd.f32 %v2787_v54, %v2786_v39  ;;  %v2636_v40 = vmul.f32 %v8816_v13, %v2125_v47  ;;  %v2696_v62 = vadd.f32 %v8841_v46, %v11053_v49  ;;  %v2817_v37 = vadd.f32 %v2816_v42, %v2815_v18  ;;  %3680 = vperm.xlu2 %4752, %v3654_v0   ;;  %v3652_v13 = vld [vmem:[%s10045_s16] sm:$0xff]  ;;  %v11056_v18 = vld [vmem:[#allocation148_spill] sm:$0xff] }
 0x5f1   :  { %v2761_v5 = vadd.f32 %v2760_v20, %v2759_v60  ;;  %v2734_v7 = vadd.f32 %v2733_v58, %v2732_v45  ;;  %v2701_v29 = vadd.f32 %v2637_v33, %v11054_v41  ;;  %v2791_v53 = vsel %vm1405_vm4, %v2697_v31, 0.0  ;;  %3670 = vperm.xlu1 %4754, %v3652_v13   ;;  %v3262_v3 = vld [vmem:[%s11059_s22 + $0x2e0] sm:$0xff]  ;;  %v3200_v58 = vld [vmem:[%s11059_s22 + $0xf0] sm:$0xff] }
 0x5f2   :  { %v2790_v21 = vadd.f32 %v2789_v26, %v2788_v63  ;;  %v2638_v43 = vmul.f32 %v8832_v48, %v2127_v2  ;;  %v2698_v44 = vadd.f32 %v2634_v19, %v11055_v22  ;;  %v2818_v34 = vsel %vm1405_vm4, %v2694_v23, 0.0  ;;  %v11058_v23 = vld [vmem:[#allocation178_spill] sm:$0xff]  ;;  %3405 = vmatpush.msrb.mxu1 %v3262_v3  ;;  %3346 = vmatpush.msra.mxu3 %v3200_v58  ;;  %v3256_v61 = vld [vmem:[%s11059_s22 + $0x2b0] sm:$0xff] }
 0x5f3   :  { %v2763_v57 = vadd.f32 %v2762_v10, %v2761_v5  ;;  %4415 = vmatmul.msk.f32.vlgmr.msrb.gmra.mxu2 %vm1405_vm4, %v2734_v7  ;;  %4419 = vmatmul.msk.f32.vlgmr.msrb.gmra.mxu3 %vm1405_vm4, %v2734_v7  ;;  %v2764_v46 = vsel %vm1405_vm4, %v2670_v36, 0.0  ;;  %v2510_v42 = vmul.f32 %v11057_v1, %v11056_v18  ;;  %v2819_v48 = vadd.f32 %v2818_v34, %v2817_v37  ;;  %v3232_v36 = vld [vmem:[%s11059_s22 + $0x1f0] sm:$0xff]  ;;  %v3258_v24 = vld [vmem:[%s11059_s22 + $0x2c0] sm:$0xff] }
 0x5f4   :  { %v2792_v47 = vadd.f32 %v2791_v53, %v2790_v21  ;;  %4423 = vmatmul.msk.f32.vlgmr.msrb.gmra.mxu0 %vm1405_vm4, %v2734_v7  ;;  %4427 = vmatmul.msk.f32.vlgmr.msra.gmra.mxu1 %vm1405_vm4, %v2734_v7  ;;  %v2793_v19 = vsel %vm1405_vm4, %v2699_v32, 0.0  ;;  %v2700_v16 = vadd.f32 %v2636_v40, %v11058_v23  ;;  %v2820_v50 = vsel %vm1405_vm4, %v2696_v62, 0.0  ;;  %v3198_v11 = vld [vmem:[%s11059_s22 + $0xe0] sm:$0xff]  ;;  %v3288_v31 = vld [vmem:[%s11059_s22 + $0x3b0] sm:$0xff] }
 0x5f5   :  { %v2765_v2 = vadd.f32 %v2764_v46, %v2763_v57  ;;  %v2821_v51 = vadd.f32 %v2820_v50, %v2819_v48  ;;  %v2795_v55 = vsel %vm1405_vm4, %v2701_v29, 0.0  ;;  %v2702_v30 = vadd.f32 %v2638_v43, %v2510_v42  ;;  %3433 = vmatpush.msrb.mxu2 %v3296_v8  ;;  %3406 = vmatpush.msrb.mxu1 %v3260_v28  ;;  %v3230_v15 = vld [vmem:[%s11059_s22 + $0x1e0] sm:$0xff]  ;;  %v3196_v39 = vld [vmem:[%s11059_s22 + $0xd0] sm:$0xff]  ;;  %v9095_v46 = vpop.f32.mrf.mxu1  ;;  %v9124_v50 = vpop.f32.mrf.mxu3 }
 0x5f6   :  { %v2794_v27 = vadd.f32 %v2793_v19, %v2792_v47  ;;  %v2822_v4 = vsel %vm1405_vm4, %v2698_v44, 0.0  ;;  %v2824_v12 = vsel %vm1405_vm4, %v2700_v16, 0.0  ;;  %3375 = vmatpush.msra.mxu0 %v3232_v36  ;;  %v3290_v33 = vld [vmem:[%s11059_s22 + $0x3c0] sm:$0xff]  ;;  %3347 = vmatpush.msra.mxu3 %v3198_v11  ;;  %v3228_v60 = vld [vmem:[%s11059_s22 + $0x1d0] sm:$0xff]  ;;  %v3265_v36 = vld [vmem:[%s11059_s22 + $0x2f8] sm:$0xff] }
 0x5f7   :  { %v2823_v52 = vadd.f32 %v2822_v4, %v2821_v51  ;;  %v2826_v25 = vsel %vm1405_vm4, %v2702_v30, 0.0  ;;  %3434 = vmatpush.msrb.mxu2 %v3294_v38  ;;  %3407 = vmatpush.msrb.mxu1 %v3258_v24  ;;  %v3254_v20 = vld [vmem:[%s11059_s22 + $0x2a0] sm:$0xff]  ;;  %v3252_v56 = vld [vmem:[%s11059_s22 + $0x290] sm:$0xff] }
 0x5f8   :  { %v8937_v17 = vadd.f32 %v2795_v55, %v2794_v27  ;;  %4218 = vperm.xlu2 %4752, %v4215_v14   ;;  %3376 = vmatpush.msra.mxu0 %v3230_v15  ;;  %v3286_v10 = vld [vmem:[%s11059_s22 + $0x3a0] sm:$0xff]  ;;  %v3284_v32 = vld [vmem:[%s11059_s22 + $0x390] sm:$0xff]  ;;  %v3231_v15 = vld [vmem:[%s11059_s22 + $0x1e8] sm:$0xff] }
 0x5f9   :  { %v2825_v9 = vadd.f32 %v2824_v12, %v2823_v52  ;;  %3435 = vmatpush.msrb.mxu2 %v3292_v59  ;;  %3408 = vmatpush.msrb.mxu1 %v3256_v61  ;;  %v3194_v54 = vld [vmem:[%s11059_s22 + $0xc0] sm:$0xff]  ;;  %v3192_v63 = vld [vmem:[%s11059_s22 + $0xb0] sm:$0xff]  ;;  %v3233_v59 = vld [vmem:[%s11059_s22 + $0x1f8] sm:$0xff] }
 0x5fa   :  { %3348 = vmatpush.msra.mxu3 %v3196_v39  ;;  %3377 = vmatpush.msra.mxu0 %v3228_v60  ;;  %v3226_v45 = vld [vmem:[%s11059_s22 + $0x1c0] sm:$0xff]  ;;  %v3224_v26 = vld [vmem:[%s11059_s22 + $0x1b0] sm:$0xff] }
 0x5fb   :  { %4416 = vmatmul.msk.f32.gmra.mxu2 %vm1405_vm4, %v2765_v2  ;;  %4420 = vmatmul.msk.f32.gmra.mxu3 %vm1405_vm4, %v2765_v2  ;;  %v8946_v35 = vadd.f32 %v2826_v25, %v2825_v9  ;;  %v3250_v0 = vld [vmem:[%s11059_s22 + $0x280] sm:$0xff]  ;;  %v3248_v62 = vld [vmem:[%s11059_s22 + $0x270] sm:$0xff]  ;;  %v9147_v9 = vpop.f32.mrf.mxu0 }
 0x5fc   :  { %4424 = vmatmul.msk.f32.gmra.mxu0 %vm1405_vm4, %v2765_v2  ;;  %4428 = vmatmul.msk.f32.gmra.mxu1 %vm1405_vm4, %v2765_v2  ;;  %v3190_v5 = vld [vmem:[%s11059_s22 + $0xa0] sm:$0xff]  ;;  %v3280_v37 = vld [vmem:[%s11059_s22 + $0x370] sm:$0xff] }
 0x5fd   :  { %3436 = vmatpush.msrb.mxu2 %v3290_v33  ;;  %3409 = vmatpush.msrb.mxu1 %v3254_v20  ;;  %v3282_v40 = vld [vmem:[%s11059_s22 + $0x380] sm:$0xff]  ;;  %v3220_v41 = vld [vmem:[%s11059_s22 + $0x190] sm:$0xff]  ;;  %v9126_v27 = vpop.f32.mrf.mxu1  ;;  %v9128_v51 = vpop.f32.mrf.mxu3  ;;  %v3229_v20 = vld [vmem:[%s11059_s22 + $0x1d8] sm:$0xff] }
 0x5fe   :  { %3349 = vmatpush.msra.mxu3 %v3194_v54  ;;  %3378 = vmatpush.msra.mxu0 %v3226_v45  ;;  %v3222_v49 = vld [vmem:[%s11059_s22 + $0x1a0] sm:$0xff]  ;;  %v3244_v43 = vld [vmem:[%s11059_s22 + $0x250] sm:$0xff]  ;;  %v9187_v33 = vpop.f32.mrf.mxu2  ;;  %v3201_v54 = vld [vmem:[%s11059_s22 + $0xf8] sm:$0xff] }
 0x5ff   :  { %3437 = vmatpush.msrb.mxu2 %v3288_v31  ;;  %3410 = vmatpush.msrb.mxu1 %v3252_v56  ;;  %v3246_v29 = vld [vmem:[%s11059_s22 + $0x260] sm:$0xff]  ;;  %v3276_v22 = vld [vmem:[%s11059_s22 + $0x350] sm:$0xff]  ;;  %v3263_v31 = vld [vmem:[%s11059_s22 + $0x2e8] sm:$0xff] }
 0x600   :  { %3350 = vmatpush.msra.mxu3 %v3192_v63  ;;  %3379 = vmatpush.msra.mxu0 %v3224_v26  ;;  %v3278_v21 = vld [vmem:[%s11059_s22 + $0x360] sm:$0xff]  ;;  %v3184_v44 = vld [vmem:[%s11059_s22 + $0x70] sm:$0xff]  ;;  %v3227_v45 = vld [vmem:[%s11059_s22 + $0x1c8] sm:$0xff] }
 0x601   :  { %3438 = vmatpush.msrb.mxu2 %v3286_v10  ;;  %3411 = vmatpush.msrb.mxu1 %v3250_v0  ;;  %v3186_v53 = vld [vmem:[%s11059_s22 + $0x80] sm:$0xff]  ;;  %v3216_v34 = vld [vmem:[%s11059_s22 + $0x170] sm:$0xff]  ;;  %v3261_v10 = vld [vmem:[%s11059_s22 + $0x2d8] sm:$0xff] }
 0x602   :  { %3351 = vmatpush.msra.mxu3 %v3190_v5  ;;  %3380 = vmatpush.msra.mxu0 %v3222_v49  ;;  %v3218_v57 = vld [vmem:[%s11059_s22 + $0x180] sm:$0xff]  ;;  %v3240_v42 = vld [vmem:[%s11059_s22 + $0x230] sm:$0xff]  ;;  %v3259_v56 = vld [vmem:[%s11059_s22 + $0x2c8] sm:$0xff] }
 0x603   :  { %4417 = vmatmul.msk.f32.gmra.mxu2 %vm1405_vm4, %v8937_v17  ;;  %4421 = vmatmul.msk.f32.gmra.mxu3 %vm1405_vm4, %v8937_v17  ;;  %v3242_v13 = vld [vmem:[%s11059_s22 + $0x240] sm:$0xff]  ;;  %v3272_v48 = vld [vmem:[%s11059_s22 + $0x330] sm:$0xff]  ;;  %v3199_v63 = vld [vmem:[%s11059_s22 + $0xe8] sm:$0xff]  ;;  %v9221_v26 = vpop.f32.mrf.mxu0 }
 0x604   :  { %4425 = vmatmul.msk.f32.gmra.mxu0 %vm1405_vm4, %v8937_v17  ;;  %4429 = vmatmul.msk.f32.gmra.mxu1 %vm1405_vm4, %v8937_v17  ;;  %v3274_v47 = vld [vmem:[%s11059_s22 + $0x340] sm:$0xff]  ;;  %v3212_v19 = vld [vmem:[%s11059_s22 + $0x150] sm:$0xff]  ;;  %v3225_v5 = vld [vmem:[%s11059_s22 + $0x1b8] sm:$0xff] }
 0x605   :  { %3439 = vmatpush.msrb.mxu2 %v3284_v32  ;;  %3412 = vmatpush.msrb.mxu1 %v3248_v62  ;;  %v3182_v18 = vld [vmem:[%s11059_s22 + $0x60] sm:$0xff]  ;;  %v9130_v55 = vpop.f32.mrf.mxu1  ;;  %v9132_v30 = vpop.f32.mrf.mxu3  ;;  %v3236_v12 = vld [vmem:[%s11059_s22 + $0x210] sm:$0xff]  ;;  %v3197_v62 = vld [vmem:[%s11059_s22 + $0xd8] sm:$0xff] }
 0x606   :  { %3381 = vmatpush.msra.mxu0 %v3220_v41  ;;  %v3214_v1 = vld [vmem:[%s11059_s22 + $0x160] sm:$0xff]  ;;  %v3176_v6 = vld [vmem:[%s11059_s22 + $0x30] sm:$0xff]  ;;  %v9244_v41 = vpop.f32.mrf.mxu2 }
 0x607   :  { %3440 = vmatpush.msrb.mxu2 %v3282_v40  ;;  %3413 = vmatpush.msrb.mxu1 %v3246_v29  ;;  %v3238_v23 = vld [vmem:[%s11059_s22 + $0x220] sm:$0xff]  ;;  %v3208_v8 = vld [vmem:[%s11059_s22 + $0x130] sm:$0xff]  ;;  %v3257_v40 = vld [vmem:[%s11059_s22 + $0x2b8] sm:$0xff] }
 0x608   :  { %3382 = vmatpush.msra.mxu0 %v3218_v57  ;;  %v3270_v16 = vld [vmem:[%s11059_s22 + $0x320] sm:$0xff]  ;;  %v3172_v24 = vld [vmem:[%s11059_s22 + $0x10] sm:$0xff]  ;;  %v3221_v57 = vld [vmem:[%s11059_s22 + $0x198] sm:$0xff] }
 0x609   :  { %3441 = vmatpush.msrb.mxu2 %v3280_v37  ;;  %3414 = vmatpush.msrb.mxu1 %v3244_v43  ;;  %v3178_v52 = vld [vmem:[%s11059_s22 + $0x40] sm:$0xff]  ;;  %v3204_v11 = vld [vmem:[%s11059_s22 + $0x110] sm:$0xff]  ;;  %v3223_v37 = vld [vmem:[%s11059_s22 + $0x1a8] sm:$0xff] }
 0x60a   :  { %3383 = vmatpush.msra.mxu0 %v3216_v34  ;;  %v3210_v14 = vld [vmem:[%s11059_s22 + $0x140] sm:$0xff]  ;;  %v3324_v49 = vld [vmem:[%s11059_s22 + $0x4d0] sm:$0xff]  ;;  %v3253_v43 = vld [vmem:[%s11059_s22 + $0x298] sm:$0xff] }
 0x60b   :  { %4418 = vmatmul.msk.f32.gmra.mxu2 %vm1405_vm4, %v8946_v35  ;;  %4422 = vmatmul.msk.f32.gmra.mxu3 %vm1405_vm4, %v8946_v35  ;;  %v3234_v3 = vld [vmem:[%s11059_s22 + $0x200] sm:$0xff]  ;;  %v3219_v34 = vld [vmem:[%s11059_s22 + $0x188] sm:$0xff] }
 0x60c   :  { %4426 = vmatmul.msk.f32.gmra.mxu0 %vm1405_vm4, %v8946_v35  ;;  %4430 = vmatmul.msk.f32.gmra.mxu1 %vm1405_vm4, %v8946_v35  ;;  %v3266_v38 = vld [vmem:[%s11059_s22 + $0x300] sm:$0xff] }
 0x60d   :  { %3442 = vmatpush.msrb.mxu2 %v3278_v21  ;;  %3415 = vmatpush.msrb.mxu1 %v3242_v13  ;;  %v9134_v4 = vpop.f32.mrf.mxu1  ;;  %v3174_v28 = vld [vmem:[%s11059_s22 + $0x20] sm:$0xff]  ;;  %v3251_v13 = vld [vmem:[%s11059_s22 + $0x288] sm:$0xff] }
 0x60e   :  { %3384 = vmatpush.msra.mxu0 %v3214_v1  ;;  %v3206_v58 = vld [vmem:[%s11059_s22 + $0x120] sm:$0xff]  ;;  %v3217_v1 = vld [vmem:[%s11059_s22 + $0x178] sm:$0xff] }
 0x60f   :  { %3443 = vmatpush.msrb.mxu2 %v3276_v22  ;;  %3416 = vmatpush.msrb.mxu1 %v3240_v42  ;;  %v3170_v39 = vld [vmem:[%s11059_s22] sm:$0xff]  ;;  %v3320_v22 = vld [vmem:[%s11059_s22 + $0x4b0] sm:$0xff]  ;;  %v3249_v42 = vld [vmem:[%s11059_s22 + $0x278] sm:$0xff] }
 0x610   :  { %3385 = vmatpush.msra.mxu0 %v3212_v19  ;;  %v3202_v60 = vld [vmem:[%s11059_s22 + $0x100] sm:$0xff]  ;;  %v3316_v19 = vld [vmem:[%s11059_s22 + $0x490] sm:$0xff] }
 0x611   :  { %3444 = vmatpush.msrb.mxu2 %v3274_v47  ;;  %3417 = vmatpush.msrb.mxu1 %v3238_v23  ;;  %v3326_v32 = vld [vmem:[%s11059_s22 + $0x4e0] sm:$0x1]  ;;  %v3189_v23 = vld [vmem:[%s11059_s22 + $0x98] sm:$0xff] }
 0x612   :  { %3386 = vmatpush.msra.mxu0 %v3210_v14  ;;  %v3322_v21 = vld [vmem:[%s11059_s22 + $0x4c0] sm:$0xff] }
 0x613   :  { %4431 = vmatmul.msk.f32.vlgmr.msra.gmra.mxu2 %vm1405_vm4, %v2734_v7  ;;  %v3188_v7 = vld [vmem:[%s11059_s22 + $0x90] sm:$0xff]  ;;  %3418 = vmatpush.msrb.mxu1 %v3236_v12  ;;  %v3318_v47 = vld [vmem:[%s11059_s22 + $0x4a0] sm:$0xff]  ;;  %v3187_v12 = vld [vmem:[%s11059_s22 + $0x88] sm:$0xff] }
 0x614   :  { %3352 = vmatpush.msra.mxu3 %v3188_v7  ;;  %3445 = vmatpush.msrb.mxu2 %v3272_v48  ;;  %v3255_v7 = vld [vmem:[%s11059_s22 + $0x2a8] sm:$0xff]  ;;  %v9284_v48 = vpop.f32.mrf.mxu0  ;;  %v3314_v14 = vld [vmem:[%s11059_s22 + $0x480] sm:$0xff] }
 0x615   :  { %v9149_v25 = vpop.f32.mrf.mxu1  ;;  %3387 = vmatpush.msra.mxu0 %v3208_v8  ;;  %3419 = vmatpush.msrb.mxu1 %v3234_v3  ;;  %v3312_v8 = vld [vmem:[%s11059_s22 + $0x470] sm:$0xff]  ;;  %v3185_v3 = vld [vmem:[%s11059_s22 + $0x78] sm:$0xff] }
 0x616   :  { %3353 = vmatpush.msra.mxu3 %v3186_v53  ;;  %3446 = vmatpush.msrb.mxu2 %v3270_v16  ;;  %v3195_v53 = vld [vmem:[%s11059_s22 + $0xc8] sm:$0xff] }
 0x617   :  { %3388 = vmatpush.msra.mxu0 %v3206_v58  ;;  %3520 = vmatpush.msra.mxu1 %v3233_v59  ;;  %v3215_v16 = vld [vmem:[%s11059_s22 + $0x168] sm:$0xff] }
 0x618   :  { %3354 = vmatpush.msra.mxu3 %v3184_v44  ;;  %v3193_v44 = vld [vmem:[%s11059_s22 + $0xb8] sm:$0xff]  ;;  %v3211_v58 = vld [vmem:[%s11059_s22 + $0x148] sm:$0xff] }
 0x619   :  { %3389 = vmatpush.msra.mxu0 %v3204_v11  ;;  %3521 = vmatpush.msra.mxu1 %v3231_v15  ;;  %v3243_v59 = vld [vmem:[%s11059_s22 + $0x248] sm:$0xff]  ;;  %v3209_v15 = vld [vmem:[%s11059_s22 + $0x138] sm:$0xff] }
 0x61a   :  { %3355 = vmatpush.msra.mxu3 %v3182_v18  ;;  %v3191_v18 = vld [vmem:[%s11059_s22 + $0xa8] sm:$0xff] }
 0x61b   :  { %4432 = vmatmul.msk.f32.gmra.mxu2 %vm1405_vm4, %v2765_v2  ;;  %v3180_v2 = vld [vmem:[%s11059_s22 + $0x50] sm:$0xff]  ;;  %3390 = vmatpush.msra.mxu0 %v3202_v60  ;;  %v3183_v11 = vld [vmem:[%s11059_s22 + $0x68] sm:$0xff] }
 0x61c   :  { %3356 = vmatpush.msra.mxu3 %v3180_v2  ;;  %3522 = vmatpush.msra.mxu1 %v3229_v20  ;;  %v3308_v60 = vld [vmem:[%s11059_s22 + $0x450] sm:$0xff]  ;;  %v3181_v20 = vld [vmem:[%s11059_s22 + $0x58] sm:$0xff] }
 0x61d   :  { %v9223_v0 = vpop.f32.mrf.mxu1  ;;  %3491 = vmatpush.msrb.mxu0 %v3201_v54 }
 0x61e   :  { %3357 = vmatpush.msra.mxu3 %v3178_v52  ;;  %3523 = vmatpush.msra.mxu1 %v3227_v45  ;;  %v3247_v52 = vld [vmem:[%s11059_s22 + $0x268] sm:$0xff] }
 0x61f   :  { %3492 = vmatpush.msrb.mxu0 %v3199_v63  ;;  %v3239_v45 = vld [vmem:[%s11059_s22 + $0x228] sm:$0xff] }
 0x620   :  { %3358 = vmatpush.msra.mxu3 %v3176_v6  ;;  %3524 = vmatpush.msra.mxu1 %v3225_v5  ;;  %v3245_v6 = vld [vmem:[%s11059_s22 + $0x258] sm:$0xff] }
 0x621   :  { %3493 = vmatpush.msrb.mxu0 %v3197_v62 }
 0x622   :  { %3359 = vmatpush.msra.mxu3 %v3174_v28  ;;  %3525 = vmatpush.msra.mxu1 %v3223_v37  ;;  %v3304_v37 = vld [vmem:[%s11059_s22 + $0x430] sm:$0xff] }
 0x623   :  { %4433 = vmatmul.msk.f32.gmra.mxu2 %vm1405_vm4, %v8937_v17  ;;  %v9136_v17 = vpop.f32.mrf.mxu3  ;;  %3494 = vmatpush.msrb.mxu0 %v3195_v53 }
 0x624   :  { %3360 = vmatpush.msra.mxu3 %v3172_v24  ;;  %3526 = vmatpush.msra.mxu1 %v3221_v57  ;;  %v9331_v24 = vpop.permute.xlu2 %2838 }
 0x625   :  { %3495 = vmatpush.msrb.mxu0 %v3193_v44  ;;  %v9286_v2 = vpop.f32.mrf.mxu1  ;;  %v2944_v54 = vadd.f32 %v9128_v51, %v9331_v24  ;;  %v2886_v62 = vadd.f32 %v9147_v9, %v9331_v24  ;;  %v3235_v9 = vld [vmem:[%s11059_s22 + $0x208] sm:$0xff]  ;;  %v2915_v57 = vadd.f32 %v9187_v33, %v9331_v24 }
 0x626   :  { %3361 = vmatpush.msra.mxu3 %v3170_v39  ;;  %3527 = vmatpush.msra.mxu1 %v3219_v34  ;;  %v2973_v39 = vadd.f32 %v9221_v26, %v9331_v24 }
 0x627   :  { %3496 = vmatpush.msrb.mxu0 %v3191_v18  ;;  %v3300_v18 = vld [vmem:[%s11059_s22 + $0x410] sm:$0xff] }
 0x628   :  { %4435 = vmatpush.msk.msrb.mxu3 %vm843_vm1, %v3326_v32  ;;  %3528 = vmatpush.msra.mxu1 %v3217_v1  ;;  %v3179_v32 = vld [vmem:[%s11059_s22 + $0x48] sm:$0xff]  ;;  %v3173_v1 = vld [vmem:[%s11059_s22 + $0x18] sm:$0xff] }
 0x629   :  { %3497 = vmatpush.msrb.mxu0 %v3189_v23 }
 0x62a   :  { %3464 = vmatpush.msrb.mxu3 %v3324_v49  ;;  %3529 = vmatpush.msra.mxu1 %v3215_v16  ;;  %v3237_v49 = vld [vmem:[%s11059_s22 + $0x218] sm:$0xff] }
 0x62b   :  { %4434 = vmatmul.msk.f32.gmra.mxu2 %vm1405_vm4, %v8946_v35  ;;  %v3268_v35 = vld [vmem:[%s11059_s22 + $0x310] sm:$0xff]  ;;  %v9189_v61 = vpop.f32.mrf.mxu3  ;;  %3498 = vmatpush.msrb.mxu0 %v3187_v12  ;;  %v3327_v12 = vld [vmem:[%s11059_s22 + $0x4e8] sm:$0x1] }
 0x62c   :  { %3447 = vmatpush.msrb.mxu2 %v3268_v35  ;;  %3465 = vmatpush.msrb.mxu3 %v3322_v21  ;;  %v3213_v35 = vld [vmem:[%s11059_s22 + $0x158] sm:$0xff]  ;;  %v3203_v21 = vld [vmem:[%s11059_s22 + $0x108] sm:$0xff] }
 0x62d   :  { %3530 = vmatpush.msra.mxu1 %v3213_v35  ;;  %3499 = vmatpush.msrb.mxu0 %v3185_v3 }
 0x62e   :  { %3448 = vmatpush.msrb.mxu2 %v3266_v38  ;;  %3466 = vmatpush.msrb.mxu3 %v3320_v22  ;;  %v9318_v38 = vpop.f32.mrf.mxu2  ;;  %v3175_v22 = vld [vmem:[%s11059_s22 + $0x28] sm:$0xff] }
 0x62f   :  { %3531 = vmatpush.msra.mxu1 %v3211_v58  ;;  %3500 = vmatpush.msrb.mxu0 %v3183_v11 }
 0x630   :  { %3549 = vmatpush.msra.mxu2 %v3265_v36  ;;  %3467 = vmatpush.msrb.mxu3 %v3318_v47  ;;  %v3310_v36 = vld [vmem:[%s11059_s22 + $0x460] sm:$0xff] }
 0x631   :  { %3532 = vmatpush.msra.mxu1 %v3209_v15  ;;  %3501 = vmatpush.msrb.mxu0 %v3181_v20 }
 0x632   :  { %3550 = vmatpush.msra.mxu2 %v3263_v31  ;;  %3468 = vmatpush.msrb.mxu3 %v3316_v19  ;;  %v3241_v31 = vld [vmem:[%s11059_s22 + $0x238] sm:$0xff] }
 0x633   :  { %v9246_v29 = vpop.f32.mrf.mxu3  ;;  %3502 = vmatpush.msrb.mxu0 %v3179_v32  ;;  %v9390_v53 = vpop.permute.xlu0 %2843 }
 0x634   :  { %3551 = vmatpush.msra.mxu2 %v3261_v10  ;;  %3469 = vmatpush.msrb.mxu3 %v3314_v14  ;;  %v3207_v10 = vld [vmem:[%s11059_s22 + $0x128] sm:$0xff]  ;;  %v2976_v44 = vadd.f32 %v9284_v48, %v9390_v53  ;;  %v3297_v14 = vld [vmem:[%s11059_s22 + $0x3f8] sm:$0xff]  ;;  %v2918_v35 = vadd.f32 %v9244_v41, %v9390_v53 }
 0x635   :  { %3533 = vmatpush.msra.mxu1 %v3207_v10  ;;  %v3325_v41 = vld [vmem:[%s11059_s22 + $0x4d8] sm:$0xff] }
 0x636   :  { %3552 = vmatpush.msra.mxu2 %v3259_v56  ;;  %3470 = vmatpush.msrb.mxu3 %v3312_v8  ;;  %v3306_v56 = vld [vmem:[%s11059_s22 + $0x440] sm:$0xff]  ;;  %v3295_v8 = vld [vmem:[%s11059_s22 + $0x3e8] sm:$0xff] }
 0x638   :  { %3553 = vmatpush.msra.mxu2 %v3257_v40  ;;  %3471 = vmatpush.msrb.mxu3 %v3310_v36  ;;  %v3205_v40 = vld [vmem:[%s11059_s22 + $0x118] sm:$0xff] }
 0x639   :  { %3534 = vmatpush.msra.mxu1 %v3205_v40 }
 0x63a   :  { %3554 = vmatpush.msra.mxu2 %v3255_v7  ;;  %3472 = vmatpush.msrb.mxu3 %v3308_v60  ;;  %v3177_v7 = vld [vmem:[%s11059_s22 + $0x38] sm:$0xff] }
 0x63b   :  { %v9320_v28 = vpop.f32.mrf.mxu3  ;;  %3503 = vmatpush.msrb.mxu0 %v3177_v7  ;;  %3535 = vmatpush.msra.mxu1 %v3203_v21  ;;  %v3287_v7 = vld [vmem:[%s11059_s22 + $0x3a8] sm:$0xff] }
 0x63c   :  { %3555 = vmatpush.msra.mxu2 %v3253_v43  ;;  %3473 = vmatpush.msrb.mxu3 %v3306_v56  ;;  %v3302_v43 = vld [vmem:[%s11059_s22 + $0x420] sm:$0xff]  ;;  %v3319_v56 = vld [vmem:[%s11059_s22 + $0x4a8] sm:$0xff] }
 0x63d   :  { %3504 = vmatpush.msrb.mxu0 %v3175_v22 }
 0x63e   :  { %3556 = vmatpush.msra.mxu2 %v3251_v13  ;;  %3474 = vmatpush.msrb.mxu3 %v3304_v37 }
 0x63f   :  { %3505 = vmatpush.msrb.mxu0 %v3173_v1 }
 0x640   :  { %3557 = vmatpush.msra.mxu2 %v3249_v42  ;;  %v2947_v42 = vadd.f32 %v9132_v30, %v9390_v53  ;;  %3475 = vmatpush.msrb.mxu3 %v3302_v43  ;;  %v3171_v30 = vld [vmem:[%s11059_s22 + $0x8] sm:$0xff] }
 0x641   :  { %3506 = vmatpush.msrb.mxu0 %v3171_v30  ;;  %v3311_v30 = vld [vmem:[%s11059_s22 + $0x468] sm:$0xff] }
 0x642   :  { %3558 = vmatpush.msra.mxu2 %v3247_v52  ;;  %3476 = vmatpush.msrb.mxu3 %v3300_v18  ;;  %v3298_v52 = vld [vmem:[%s11059_s22 + $0x400] sm:$0xff] }
 0x644   :  { %3559 = vmatpush.msra.mxu2 %v3245_v6  ;;  %v2889_v6 = vadd.f32 %v9095_v46, %v9390_v53  ;;  %3477 = vmatpush.msrb.mxu3 %v3298_v52  ;;  %v3293_v46 = vld [vmem:[%s11059_s22 + $0x3d8] sm:$0xff] }
 0x645   :  { %v3281_v52 = vld [vmem:[%s11059_s22 + $0x378] sm:$0xff] }
 0x646   :  { %3560 = vmatpush.msra.mxu2 %v3243_v59  ;;  %v9442_v59 = vpop.permute.xlu1 %2848 }
 0x647   :  { %v2950_v15 = vadd.f32 %v9136_v17, %v9442_v59  ;;  %v3291_v17 = vld [vmem:[%s11059_s22 + $0x3c8] sm:$0xff]  ;;  %v2921_v32 = vadd.f32 %v9318_v38, %v9442_v59 }
 0x648   :  { %3561 = vmatpush.msra.mxu2 %v3241_v31  ;;  %v2979_v31 = vadd.f32 %v9246_v29, %v9442_v59  ;;  %v3321_v29 = vld [vmem:[%s11059_s22 + $0x4b8] sm:$0xff] }
 0x64a   :  { %3562 = vmatpush.msra.mxu2 %v3239_v45  ;;  %v3289_v45 = vld [vmem:[%s11059_s22 + $0x3b8] sm:$0xff] }
 0x64c   :  { %3563 = vmatpush.msra.mxu2 %v3237_v49  ;;  %v9485_v49 = vpop.permute.xlu2 %2853 }
 0x64d   :  { %v2953_v38 = vadd.f32 %v9189_v61, %v9485_v49  ;;  %v2982_v21 = vadd.f32 %v9320_v28, %v9485_v49  ;;  %v3315_v61 = vld [vmem:[%s11059_s22 + $0x488] sm:$0xff]  ;;  %v2924_v18 = vadd.f32 %v9124_v50, %v9485_v49 }
 0x64e   :  { %3564 = vmatpush.msra.mxu2 %v3235_v9  ;;  %v3283_v28 = vld [vmem:[%s11059_s22 + $0x388] sm:$0xff] }
 0x64f   :  { %v3279_v50 = vld [vmem:[%s11059_s22 + $0x368] sm:$0xff] }
 0x671   :  { %v3100_v63 = vpop.f32.mrf.mxu0  ;;  %v3129_v26 = vpop.f32.mrf.mxu1 }
 0x672   :  { %v9364_v5 = vadd.f32 %v3100_v63, %v2944_v54  ;;  %v9366_v51 = vadd.f32 %v3129_v26, %v2973_v39  ;;  %v3323_v39 = vld [vmem:[%s11059_s22 + $0x4c8] sm:$0xff]  ;;  %v2892_v63 = vadd.f32 %v9126_v27, %v9442_v59  ;;  %v3317_v27 = vld [vmem:[%s11059_s22 + $0x498] sm:$0xff] }
 0x674   :  { %3420 = vmatmul.f32.vlgmr.msrb.gmra.mxu1 %v9364_v5  ;;  %3449 = vmatmul.f32.vlgmr.msrb.gmra.mxu2 %v9366_v51 }
 0x676   :  { %v3042_v34 = vpop.f32.mrf.mxu2  ;;  %v3071_v13 = vpop.f32.mrf.mxu3 }
 0x677   :  { %v9402_v47 = vadd.f32 %v3042_v34, %v2886_v62  ;;  %v9404_v33 = vadd.f32 %v3071_v13, %v2915_v57  ;;  %v3313_v34 = vld [vmem:[%s11059_s22 + $0x478] sm:$0xff]  ;;  %v2895_v13 = vadd.f32 %v9130_v55, %v9485_v49 }
 0x678   :  { %v3309_v55 = vld [vmem:[%s11059_s22 + $0x458] sm:$0xff] }
 0x679   :  { %v3103_v48 = vpop.f32.mrf.mxu0  ;;  %v3132_v19 = vpop.f32.mrf.mxu1  ;;  %3362 = vmatmul.f32.vlgmr.msra.gmra.mxu3 %v9402_v47  ;;  %3391 = vmatmul.f32.vlgmr.msra.gmra.mxu0 %v9404_v33 }
 0x67a   :  { %v9416_v23 = vadd.f32 %v3103_v48, %v2947_v42  ;;  %v9418_v16 = vadd.f32 %v3132_v19, %v2976_v44  ;;  %3578 = vmatpush.msra.mxu3 %v3297_v14  ;;  %4440 = vmatpush.msk.msra.mxu0 %vm843_vm1, %v3327_v12  ;;  %v3285_v44 = vld [vmem:[%s11059_s22 + $0x398] sm:$0xff]  ;;  %v3307_v12 = vld [vmem:[%s11059_s22 + $0x448] sm:$0xff] }
 0x67b   :  { %v3277_v14 = vld [vmem:[%s11059_s22 + $0x358] sm:$0xff] }
 0x67c   :  { %3423 = vmatmul.f32.gmra.mxu1 %v9416_v23  ;;  %3452 = vmatmul.f32.gmra.mxu2 %v9418_v16 }
 0x67d   :  { %3579 = vmatpush.msra.mxu3 %v3295_v8  ;;  %3609 = vmatpush.msra.mxu0 %v3325_v41 }
 0x67e   :  { %v3045_v3 = vpop.f32.mrf.mxu2  ;;  %v3074_v58 = vpop.f32.mrf.mxu3 }
 0x67f   :  { %v9444_v36 = vadd.f32 %v3074_v58, %v2918_v35  ;;  %v9446_v11 = vadd.f32 %v3045_v3, %v2889_v6  ;;  %3580 = vmatpush.msra.mxu3 %v3293_v46  ;;  %3610 = vmatpush.msra.mxu0 %v3323_v39  ;;  %v3002_v35 = vadd.f32 %v9134_v4, %v9331_v24  ;;  %v3273_v4 = vld [vmem:[%s11059_s22 + $0x338] sm:$0xff]  ;;  %v3303_v24 = vld [vmem:[%s11059_s22 + $0x428] sm:$0xff] }
 0x680   :  { %v3271_v3 = vld [vmem:[%s11059_s22 + $0x328] sm:$0xff]  ;;  %v3005_v58 = vadd.f32 %v9149_v25, %v9390_v53  ;;  %v3008_v53 = vadd.f32 %v9223_v0, %v9442_v59 }
 0x681   :  { %v3106_v60 = vpop.f32.mrf.mxu0  ;;  %v3135_v20 = vpop.f32.mrf.mxu1  ;;  %3365 = vmatmul.f32.gmra.mxu3 %v9446_v11  ;;  %3394 = vmatmul.f32.gmra.mxu0 %v9444_v36  ;;  %v3267_v25 = vld [vmem:[%s11059_s22 + $0x308] sm:$0xff] }
 0x682   :  { %v9463_v10 = vadd.f32 %v3106_v60, %v2950_v15  ;;  %v9465_v54 = vadd.f32 %v3135_v20, %v2979_v31  ;;  %3581 = vmatpush.msra.mxu3 %v3291_v17  ;;  %3611 = vmatpush.msra.mxu0 %v3321_v29 }
 0x684   :  { %3426 = vmatmul.f32.gmra.mxu1 %v9463_v10  ;;  %3455 = vmatmul.f32.gmra.mxu2 %v9465_v54 }
 0x685   :  { %3582 = vmatpush.msra.mxu3 %v3289_v45  ;;  %3612 = vmatpush.msra.mxu0 %v3319_v56 }
 0x686   :  { %v3048_v26 = vpop.f32.mrf.mxu2  ;;  %v3077_v40 = vpop.f32.mrf.mxu3 }
 0x687   :  { %v9487_v62 = vadd.f32 %v3077_v40, %v2921_v32  ;;  %v9489_v37 = vadd.f32 %v3048_v26, %v2892_v63  ;;  %3583 = vmatpush.msra.mxu3 %v3287_v7  ;;  %3613 = vmatpush.msra.mxu0 %v3317_v27 }
 0x689   :  { %v3109_v9 = vpop.f32.mrf.mxu0  ;;  %v3138_v57 = vpop.f32.mrf.mxu1  ;;  %3368 = vmatmul.f32.gmra.mxu3 %v9489_v37  ;;  %3397 = vmatmul.f32.gmra.mxu0 %v9487_v62 }
 0x68a   :  { %v9503_v43 = vadd.f32 %v3109_v9, %v2953_v38  ;;  %v9505_v22 = vadd.f32 %v3138_v57, %v2982_v21  ;;  %3584 = vmatpush.msra.mxu3 %v3285_v44  ;;  %3614 = vmatpush.msra.mxu0 %v3315_v61 }
 0x68c   :  { %3429 = vmatmul.f32.gmra.mxu1 %v9503_v43  ;;  %3458 = vmatmul.f32.gmra.mxu2 %v9505_v22 }
 0x68d   :  { %3585 = vmatpush.msra.mxu3 %v3283_v28  ;;  %3615 = vmatpush.msra.mxu0 %v3313_v34 }
 0x68e   :  { %v3051_v1 = vpop.f32.mrf.mxu2  ;;  %v3080_v42 = vpop.f32.mrf.mxu3 }
 0x68f   :  { %v3081_v48 = vadd.f32 %v3080_v42, %v2924_v18  ;;  %v3052_v19 = vadd.f32 %v3051_v1, %v2895_v13  ;;  %3586 = vmatpush.msra.mxu3 %v3281_v52  ;;  %3616 = vmatpush.msra.mxu0 %v3311_v30 }
 0x691   :  { %3371 = vmatmul.f32.gmra.mxu3 %v3052_v19  ;;  %3400 = vmatmul.f32.gmra.mxu0 %v3081_v48 }
 0x692   :  { %3587 = vmatpush.msra.mxu3 %v3279_v50  ;;  %3617 = vmatpush.msra.mxu0 %v3309_v55 }
 0x694   :  { %3536 = vmatmul.f32.vlgmr.msra.gmra.mxu1 %v9404_v33  ;;  %3565 = vmatmul.f32.vlgmr.msra.gmra.mxu2 %v9364_v5  ;;  %v3275_v5 = vld [vmem:[%s11059_s22 + $0x348] sm:$0xff]  ;;  %v3305_v33 = vld [vmem:[%s11059_s22 + $0x438] sm:$0xff] }
 0x695   :  { %3588 = vmatpush.msra.mxu3 %v3277_v14  ;;  %3618 = vmatpush.msra.mxu0 %v3307_v12 }
 0x696   :  { %v3158_v6 = vpop.f32.mrf.mxu2 }
 0x697   :  { %v3159_v8 = vadd.f32 %v3158_v6, %v3002_v35  ;;  %3589 = vmatpush.msra.mxu3 %v3275_v5  ;;  %3619 = vmatpush.msra.mxu0 %v3305_v33  ;;  %v3636_v6 = vld [vmem:[%s10044_s15] sm:$0xff] }
 0x699   :  { %4436 = vmatmul.msk.f32.vlgmr.msrb.gmra.mxu3 %vm830_vm2, %v3159_v8  ;;  %3507 = vmatmul.f32.vlgmr.msrb.gmra.mxu0 %v9402_v47  ;;  %v3301_v47 = vld [vmem:[%s11059_s22 + $0x418] sm:$0xff] }
 0x69a   :  { %3590 = vmatpush.msra.mxu3 %v3273_v4  ;;  %3620 = vmatpush.msra.mxu0 %v3303_v24  ;;  %v3637_v4 = vld [vmem:[%s10044_s15 + $0x8] sm:$0xff] }
 0x69c   :  { %3539 = vmatmul.f32.gmra.mxu1 %v9444_v36  ;;  %3568 = vmatmul.f32.gmra.mxu2 %v9416_v23  ;;  %v3269_v23 = vld [vmem:[%s11059_s22 + $0x318] sm:$0xff]  ;;  %v3299_v36 = vld [vmem:[%s11059_s22 + $0x408] sm:$0xff] }
 0x69d   :  { %3591 = vmatpush.msra.mxu3 %v3271_v3  ;;  %3621 = vmatpush.msra.mxu0 %v3301_v47 }
 0x69e   :  { %v3161_v46 = vpop.f32.mrf.mxu2 }
 0x69f   :  { %v3162_v41 = vadd.f32 %v3161_v46, %v3005_v58  ;;  %3592 = vmatpush.msra.mxu3 %v3269_v23  ;;  %3622 = vmatpush.msra.mxu0 %v3299_v36  ;;  %v3638_v58 = vld [vmem:[%s10044_s15 + $0x10] sm:$0xff] }
 0x6a1   :  { %4437 = vmatmul.msk.f32.gmra.mxu3 %vm830_vm2, %v3162_v41  ;;  %3510 = vmatmul.f32.gmra.mxu0 %v9446_v11  ;;  %v3011_v11 = vadd.f32 %v9286_v2, %v9485_v49 }
 0x6a2   :  { %3593 = vmatpush.msra.mxu3 %v3267_v25 }
 0x6a4   :  { %3542 = vmatmul.f32.gmra.mxu1 %v9487_v62  ;;  %3571 = vmatmul.f32.gmra.mxu2 %v9463_v10 }
 0x6a6   :  { %v3164_v15 = vpop.f32.mrf.mxu2 }
 0x6a7   :  { %v3165_v31 = vadd.f32 %v3164_v15, %v3008_v53 }
 0x6a9   :  { %4438 = vmatmul.msk.f32.gmra.mxu3 %vm830_vm2, %v3165_v31  ;;  %3513 = vmatmul.f32.gmra.mxu0 %v9489_v37 }
 0x6ac   :  { %3545 = vmatmul.f32.gmra.mxu1 %v3081_v48  ;;  %3574 = vmatmul.f32.gmra.mxu2 %v9503_v43 }
 0x6ae   :  { %v3167_v39 = vpop.f32.mrf.mxu2 }
 0x6af   :  { %v3168_v60 = vadd.f32 %v3167_v39, %v3011_v11 }
 0x6b1   :  { %4439 = vmatmul.msk.f32.gmra.mxu3 %vm830_vm2, %v3168_v60  ;;  %3516 = vmatmul.f32.gmra.mxu0 %v3052_v19 }
 0x6b9   :  { %3594 = vmatmul.f32.vlgmr.msra.gmra.mxu3 %v9366_v51  ;;  %4441 = vmatmul.msk.f32.vlgmr.msra.gmra.mxu0 %vm830_vm2, %v3159_v8 }
 0x6c1   :  { %3597 = vmatmul.f32.gmra.mxu3 %v9418_v16  ;;  %4442 = vmatmul.msk.f32.gmra.mxu0 %vm830_vm2, %v3162_v41 }
 0x6c9   :  { %3600 = vmatmul.f32.gmra.mxu3 %v9465_v54  ;;  %4443 = vmatmul.msk.f32.gmra.mxu0 %vm830_vm2, %v3165_v31 }
 0x6d1   :  { %3603 = vmatmul.f32.gmra.mxu3 %v9505_v22  ;;  %4444 = vmatmul.msk.f32.gmra.mxu0 %vm830_vm2, %v3168_v60  ;;  %v3639_v60 = vld [vmem:[%s10044_s15 + $0x18] sm:$0xff] }
 0x6f1   :  { %v3421_v51 = vpop.f32.mrf.mxu1 }
 0x6f6   :  { %v3392_v0 = vpop.f32.mrf.mxu0 }
 0x6f7   :  { %v3450_v17 = vpop.f32.mrf.mxu2 }
 0x6f9   :  { %v3424_v16 = vpop.f32.mrf.mxu1 }
 0x6fc   :  { %v3363_v2 = vpop.f32.mrf.mxu3 }
 0x6fd   :  { %v3393_v61 = vadd.f32 %v3392_v0, %v3363_v2 }
 0x6fe   :  { %v3395_v59 = vpop.f32.mrf.mxu0 }
 0x6ff   :  { %v3453_v32 = vpop.f32.mrf.mxu2  ;;  %v3422_v42 = vadd.f32 %v3421_v51, %v3393_v61 }
 0x701   :  { %v3427_v54 = vpop.f32.mrf.mxu1  ;;  %v3451_v55 = vadd.f32 %v3450_v17, %v3422_v42 }
 0x704   :  { %v3366_v20 = vpop.f32.mrf.mxu3 }
 0x705   :  { %v3396_v43 = vadd.f32 %v3395_v59, %v3366_v20 }
 0x706   :  { %v3398_v10 = vpop.f32.mrf.mxu0 }
 0x707   :  { %v3456_v49 = vpop.f32.mrf.mxu2  ;;  %v3425_v34 = vadd.f32 %v3424_v16, %v3396_v43 }
 0x709   :  { %v3430_v37 = vpop.f32.mrf.mxu1  ;;  %v3454_v52 = vadd.f32 %v3453_v32, %v3425_v34  ;;  %v3640_v32 = vld [vmem:[%s10044_s15 + $0x20] sm:$0xff] }
 0x70c   :  { %v3369_v29 = vpop.f32.mrf.mxu3 }
 0x70d   :  { %v3399_v9 = vadd.f32 %v3398_v10, %v3369_v29 }
 0x70e   :  { %v3401_v45 = vpop.f32.mrf.mxu0 }
 0x70f   :  { %v3459_v27 = vpop.f32.mrf.mxu2  ;;  %v3428_v28 = vadd.f32 %v3427_v54, %v3399_v9  ;;  %v3641_v54 = vld [vmem:[%s10044_s15 + $0x28] sm:$0xff]  ;;  %v3651_v9 = vld [vmem:[%s10044_s15 + $0x78] sm:$0xff] }
 0x711   :  { %v3537_v44 = vpop.f32.mrf.mxu1  ;;  %v3457_v48 = vadd.f32 %v3456_v49, %v3428_v28  ;;  %v3644_v49 = vld [vmem:[%s10044_s15 + $0x40] sm:$0xff] }
 0x714   :  { %v3372_v56 = vpop.f32.mrf.mxu3 }
 0x715   :  { %v3402_v38 = vadd.f32 %v3401_v45, %v3372_v56 }
 0x716   :  { %v3508_v63 = vpop.f32.mrf.mxu0 }
 0x717   :  { %v3431_v22 = vadd.f32 %v3430_v37, %v3402_v38  ;;  %v3566_v18 = vpop.f32.mrf.mxu2  ;;  %v3538_v31 = vadd.f32 %v3537_v44, %v3508_v63  ;;  %v3646_v37 = vld [vmem:[%s10044_s15 + $0x50] sm:$0xff]  ;;  %v3649_v38 = vld [vmem:[%s10044_s15 + $0x68] sm:$0xff] }
 0x719   :  { %v3460_v13 = vadd.f32 %v3459_v27, %v3431_v22  ;;  %v3540_v12 = vpop.f32.mrf.mxu1  ;;  %v3567_v51 = vadd.f32 %v3566_v18, %v3538_v31  ;;  %v3648_v27 = vld [vmem:[%s10044_s15 + $0x60] sm:$0xff] }
 0x71c   :  { %v3479_v26 = vpop.f32.mrf.mxu3 }
 0x71d   :  { %v3480_v35 = vadd.f32 %v3479_v26, %v3451_v55  ;;  %v3642_v26 = vld [vmem:[%s10044_s15 + $0x30] sm:$0xff] }
 0x71e   :  { %v3511_v40 = vpop.f32.mrf.mxu0 }
 0x71f   :  { %v3569_v5 = vpop.f32.mrf.mxu2  ;;  %v3541_v53 = vadd.f32 %v3540_v12, %v3511_v40  ;;  %v3643_v40 = vld [vmem:[%s10044_s15 + $0x38] sm:$0xff] }
 0x721   :  { %v3543_v24 = vpop.f32.mrf.mxu1  ;;  %v3570_v2 = vadd.f32 %v3569_v5, %v3541_v53 }
 0x724   :  { %v3482_v62 = vpop.f32.mrf.mxu3 }
 0x725   :  { %v3483_v14 = vadd.f32 %v3482_v62, %v3454_v52  ;;  %v3645_v62 = vld [vmem:[%s10044_s15 + $0x48] sm:$0xff] }
 0x726   :  { %v3514_v7 = vpop.f32.mrf.mxu0 }
 0x727   :  { %v3572_v47 = vpop.f32.mrf.mxu2  ;;  %v3544_v36 = vadd.f32 %v3543_v24, %v3514_v7  ;;  %v3647_v7 = vld [vmem:[%s10044_s15 + $0x58] sm:$0xff] }
 0x729   :  { %v3546_v23 = vpop.f32.mrf.mxu1  ;;  %v3573_v11 = vadd.f32 %v3572_v47, %v3544_v36 }
 0x72c   :  { %v3485_v21 = vpop.f32.mrf.mxu3 }
 0x72d   :  { %v3486_v30 = vadd.f32 %v3485_v21, %v3457_v48  ;;  %v3650_v21 = vld [vmem:[%s10044_s15 + $0x70] sm:$0xff]  ;;  %v9694_v48 = vpop.permute.xlu1 %3745 }
 0x72e   :  { %v3517_v57 = vpop.f32.mrf.mxu0 }
 0x72f   :  { %v3547_v25 = vadd.f32 %v3546_v23, %v3517_v57  ;;  %v3575_v15 = vpop.f32.mrf.mxu2 }
 0x731   :  { %v3576_v39 = vadd.f32 %v3575_v15, %v3547_v25 }
 0x734   :  { %v3488_v1 = vpop.f32.mrf.mxu3 }
 0x735   :  { %v3489_v19 = vadd.f32 %v3488_v1, %v3460_v13 }
 0x736   :  { %v3624_v50 = vpop.f32.mrf.mxu0 }
 0x737   :  { %3808 = vmatpush.msrb.mxu1 %v3489_v19 }
 0x739   :  { %3809 = vmatpush.msrb.mxu1 %v3486_v30  ;;  %v9698_v30 = vpop.permute.xlu1 %3730 }
 0x73b   :  { %3810 = vmatpush.msrb.mxu1 %v3483_v14  ;;  %v9702_v14 = vpop.permute.xlu0 %3735 }
 0x73c   :  { %v3595_v8 = vpop.f32.mrf.mxu3 }
 0x73d   :  { %3811 = vmatpush.msrb.mxu1 %v3480_v35  ;;  %v3596_v45 = vadd.f32 %v3595_v8, %v3567_v51  ;;  %v9708_v8 = vpop.permute.xlu2 %3740 }
 0x73e   :  { %4445 = vmatmul.msk.f32.vlgmr.msrb.gmra.mxu1 %vm1020_vm3, %v3636_v6  ;;  %v3627_v33 = vpop.f32.mrf.mxu0 }
 0x73f   :  { %v3625_v63 = vadd.f32 %v3624_v50, %v3596_v45 }
 0x741   :  { %v9704_v12 = vpop.permute.xlu1 %3715 }
 0x744   :  { %v3598_v3 = vpop.f32.mrf.mxu3 }
 0x745   :  { %v3599_v17 = vadd.f32 %v3598_v3, %v3570_v2 }
 0x746   :  { %4446 = vmatmul.msk.f32.gmra.mxu1 %vm1020_vm3, %v3637_v4  ;;  %v3630_v46 = vpop.f32.mrf.mxu0 }
 0x747   :  { %v3628_v56 = vadd.f32 %v3627_v33, %v3599_v17 }
 0x749   :  { %v9714_v24 = vpop.permute.xlu1 %3700 }
 0x74c   :  { %v3601_v41 = vpop.f32.mrf.mxu3 }
 0x74d   :  { %v3602_v59 = vadd.f32 %v3601_v41, %v3573_v11 }
 0x74e   :  { %4447 = vmatmul.msk.f32.gmra.mxu1 %vm1020_vm3, %v3638_v58  ;;  %v3633_v10 = vpop.f32.mrf.mxu0 }
 0x74f   :  { %v3631_v16 = vadd.f32 %v3630_v46, %v3602_v59 }
 0x751   :  { %v9722_v41 = vpop.permute.xlu1 %3685 }
 0x754   :  { %v3604_v0 = vpop.f32.mrf.mxu3 }
 0x755   :  { %v3605_v20 = vadd.f32 %v3604_v0, %v3576_v39 }
 0x756   :  { %4448 = vmatmul.msk.f32.gmra.mxu1 %vm1020_vm3, %v3639_v60 }
 0x757   :  { %v3634_v29 = vadd.f32 %v3633_v10, %v3605_v20 }
 0x759   :  { %3873 = vmatpush.msrb.mxu2 %v3634_v29  ;;  %v9733_v31 = vpop.permute.xlu1 %3670 }
 0x75a   :  { %11064 = vst [vmem:[#allocation194_spill] sm:$0xff] %v9733_v31 }
 0x75b   :  { %3874 = vmatpush.msrb.mxu2 %v3631_v16 }
 0x75d   :  { %3875 = vmatpush.msrb.mxu2 %v3628_v56 }
 0x75e   :  { %4449 = vmatmul.msk.f32.gmra.mxu1 %vm1020_vm3, %v3640_v32 }
 0x75f   :  { %3876 = vmatpush.msrb.mxu2 %v3625_v63 }
 0x760   :  { %4461 = vmatmul.msk.f32.vlgmr.msrb.gmra.mxu2 %vm1020_vm3, %v3636_v6 }
 0x766   :  { %4450 = vmatmul.msk.f32.gmra.mxu1 %vm1020_vm3, %v3641_v54 }
 0x768   :  { %4462 = vmatmul.msk.f32.gmra.mxu2 %vm1020_vm3, %v3637_v4  ;;  %v9712_v4 = vpop.permute.xlu0 %3720 }
 0x76e   :  { %4451 = vmatmul.msk.f32.gmra.mxu1 %vm1020_vm3, %v3642_v26 }
 0x770   :  { %4463 = vmatmul.msk.f32.gmra.mxu2 %vm1020_vm3, %v3638_v58  ;;  %v9718_v58 = vpop.permute.xlu2 %3725  ;;  %v9720_v46 = vpop.permute.xlu0 %3705 }
 0x776   :  { %4452 = vmatmul.msk.f32.gmra.mxu1 %vm1020_vm3, %v3643_v40 }
 0x778   :  { %4464 = vmatmul.msk.f32.gmra.mxu2 %vm1020_vm3, %v3639_v60  ;;  %v9726_v25 = vpop.permute.xlu2 %3710  ;;  %v9731_v15 = vpop.permute.xlu0 %3690 }
 0x77e   :  { %4453 = vmatmul.msk.f32.gmra.mxu1 %vm1020_vm3, %v3644_v49 }
 0x780   :  { %4465 = vmatmul.msk.f32.gmra.mxu2 %vm1020_vm3, %v3640_v32 }
 0x786   :  { %4454 = vmatmul.msk.f32.gmra.mxu1 %vm1020_vm3, %v3645_v62 }
 0x788   :  { %4466 = vmatmul.msk.f32.gmra.mxu2 %vm1020_vm3, %v3641_v54 }
 0x78e   :  { %4455 = vmatmul.msk.f32.gmra.mxu1 %vm1020_vm3, %v3646_v37 }
 0x790   :  { %4467 = vmatmul.msk.f32.gmra.mxu2 %vm1020_vm3, %v3642_v26  ;;  %v9766_v26 = vpop.permute.xlu2 %3695 }
 0x796   :  { %4456 = vmatmul.msk.f32.gmra.mxu1 %vm1020_vm3, %v3647_v7 }
 0x798   :  { %4468 = vmatmul.msk.f32.gmra.mxu2 %vm1020_vm3, %v3643_v40  ;;  %v9768_v40 = vpop.permute.xlu0 %3675 }
 0x799   :  { %11065 = vst [vmem:[#allocation195_spill] sm:$0xff] %v9768_v40 }
 0x79e   :  { %4457 = vmatmul.msk.f32.gmra.mxu1 %vm1020_vm3, %v3648_v27 }
 0x7a0   :  { %4469 = vmatmul.msk.f32.gmra.mxu2 %vm1020_vm3, %v3644_v49 }
 0x7a6   :  { %4458 = vmatmul.msk.f32.gmra.mxu1 %vm1020_vm3, %v3649_v38 }
 0x7a8   :  { %4470 = vmatmul.msk.f32.gmra.mxu2 %vm1020_vm3, %v3645_v62 }
 0x7ae   :  { %4459 = vmatmul.msk.f32.gmra.mxu1 %vm1020_vm3, %v3650_v21 }
 0x7b0   :  { %4471 = vmatmul.msk.f32.gmra.mxu2 %vm1020_vm3, %v3646_v37 }
 0x7b6   :  { %4460 = vmatmul.msk.f32.gmra.mxu1 %vm1020_vm3, %v3651_v9 }
 0x7b8   :  { %4472 = vmatmul.msk.f32.gmra.mxu2 %vm1020_vm3, %v3647_v7 }
 0x7bb   :  { %v3813_v57 = vpop.f32.mrf.mxu1 }
 0x7bc   :  { %v9736_v11 = vadd.f32 %v3813_v57, %v9733_v31 }
 0x7be   :  { %v3958_v10 = vmul.f32 0.044715, %v9736_v11 }
 0x7c0   :  { %4473 = vmatmul.msk.f32.gmra.mxu2 %vm1020_vm3, %v3648_v27  ;;  %v3990_v54 = vmul.f32 %v3958_v10, %v9736_v11 }
 0x7c3   :  { %v3816_v43 = vpop.f32.mrf.mxu1 }
 0x7c4   :  { %v9774_v7 = vadd.f32 %v3816_v43, %v9768_v40 }
 0x7c8   :  { %4474 = vmatmul.msk.f32.gmra.mxu2 %vm1020_vm3, %v3649_v38 }
 0x7cb   :  { %v9678_v22 = vpop.f32.mrf.mxu1 }
 0x7d0   :  { %4475 = vmatmul.msk.f32.gmra.mxu2 %vm1020_vm3, %v3650_v21 }
 0x7d3   :  { %v9681_v44 = vpop.f32.mrf.mxu1 }
 0x7d8   :  { %4476 = vmatmul.msk.f32.gmra.mxu2 %vm1020_vm3, %v3651_v9 }
 0x7db   :  { %v9684_v61 = vpop.f32.mrf.mxu1 }
 0x7e3   :  { %v9686_v28 = vpop.f32.mrf.mxu1  ;;  %v9688_v34 = vpop.f32.mrf.mxu2 }
 0x7e4   :  { %11060 = vst [vmem:[#allocation190_spill] sm:$0xff] %v9688_v34  ;;  %v9799_v10 = vadd.f32 %v9686_v28, %v9766_v26  ;;  %v9824_v34 = vpop.permute.xlu2 %3680 }
 0x7e5   :  { %11066 = vst [vmem:[#allocation196_spill] sm:$0xff] %v9824_v34 }
 0x7eb   :  { %v3831_v13 = vpop.f32.mrf.mxu1  ;;  %v9690_v18 = vpop.f32.mrf.mxu2 }
 0x7ec   :  { %11061 = vst [vmem:[#allocation191_spill] sm:$0xff] %v9690_v18 }
 0x7f3   :  { %v3834_v1 = vpop.f32.mrf.mxu1  ;;  %v9692_v42 = vpop.f32.mrf.mxu2 }
 0x7f4   :  { %11062 = vst [vmem:[#allocation192_spill] sm:$0xff] %v9692_v42  ;;  %v9780_v9 = vadd.f32 %v3834_v1, %v9720_v46 }
 0x7fb   :  { %v3837_v19 = vpop.f32.mrf.mxu1  ;;  %v9696_v52 = vpop.f32.mrf.mxu2 }
 0x7fc   :  { %11063 = vst [vmem:[#allocation193_spill] sm:$0xff] %v9696_v52  ;;  %v9763_v63 = vadd.f32 %v3837_v19, %v9726_v25 }
 0x7fe   :  { %v3974_v43 = vmul.f32 0.044715, %v9763_v63 }
 0x803   :  { %v3840_v50 = vpop.f32.mrf.mxu1  ;;  %v9700_v55 = vpop.f32.mrf.mxu2 }
 0x804   :  { %v9758_v16 = vadd.f32 %v3840_v50, %v9704_v12 }
 0x806   :  { %v3976_v57 = vmul.f32 0.044715, %v9758_v16 }
 0x80b   :  { %v3843_v35 = vpop.f32.mrf.mxu1  ;;  %v9706_v6 = vpop.f32.mrf.mxu2 }
 0x80c   :  { %v9752_v51 = vadd.f32 %v3843_v35, %v9712_v4  ;;  %v9788_v35 = vadd.f32 %v3831_v13, %v9714_v24 }
 0x80e   :  { %v3978_v49 = vmul.f32 0.044715, %v9752_v51 }
 0x813   :  { %v3846_v5 = vpop.f32.mrf.mxu1  ;;  %v9710_v33 = vpop.f32.mrf.mxu2 }
 0x814   :  { %v9745_v59 = vadd.f32 %v3846_v5, %v9718_v58  ;;  %v4022_v5 = vmul.f32 %v3990_v54, %v9736_v11  ;;  %v3970_v54 = vmul.f32 0.044715, %v9788_v35 }
 0x816   :  { %v3980_v56 = vmul.f32 0.044715, %v9745_v59  ;;  %v4054_v28 = vadd.f32 %v4022_v5, %v9736_v11 }
 0x818   :  { %v4012_v50 = vmul.f32 %v3980_v56, %v9745_v59  ;;  %v4008_v56 = vmul.f32 %v3976_v57, %v9758_v16  ;;  %v9818_v57 = vadd.f32 %v9681_v44, %v9722_v41  ;;  %v9832_v44 = vadd.f32 %v9678_v22, %v9824_v34 }
 0x81b   :  { %v3849_v3 = vpop.f32.mrf.mxu1  ;;  %v9716_v47 = vpop.f32.mrf.mxu2 }
 0x81c   :  { %v9739_v39 = vadd.f32 %v3849_v3, %v9698_v30 }
 0x81e   :  { %v3982_v17 = vmul.f32 0.044715, %v9739_v39 }
 0x820   :  { %v4014_v37 = vmul.f32 %v3982_v17, %v9739_v39  ;;  %v3972_v17 = vmul.f32 0.044715, %v9780_v9 }
 0x822   :  { %v4046_v1 = vmul.f32 %v4014_v37, %v9739_v39 }
 0x823   :  { %v3852_v23 = vpop.f32.mrf.mxu1  ;;  %v9724_v36 = vpop.f32.mrf.mxu2 }
 0x824   :  { %v9729_v53 = vadd.f32 %v3852_v23, %v9702_v14 }
 0x826   :  { %v3984_v60 = vmul.f32 0.044715, %v9729_v53 }
 0x828   :  { %v4016_v45 = vmul.f32 %v3984_v60, %v9729_v53  ;;  %v4010_v60 = vmul.f32 %v3978_v49, %v9752_v51  ;;  %v4006_v49 = vmul.f32 %v3974_v43, %v9763_v63 }
 0x82a   :  { %v4048_v21 = vmul.f32 %v4016_v45, %v9729_v53  ;;  %v4044_v45 = vmul.f32 %v4012_v50, %v9745_v59 }
 0x82b   :  { %v3855_v0 = vpop.f32.mrf.mxu1  ;;  %v9742_v2 = vpop.f32.mrf.mxu2 }
 0x82c   :  { %v9748_v20 = vadd.f32 %v3855_v0, %v9708_v8  ;;  %v3960_v0 = vmul.f32 0.044715, %v9774_v7  ;;  %v4080_v13 = vadd.f32 %v4048_v21, %v9729_v53  ;;  %v4042_v21 = vmul.f32 %v4010_v60, %v9752_v51 }
 0x82d   :  { %v4004_v60 = vmul.f32 %v3972_v17, %v9780_v9 }
 0x82e   :  { %v3986_v29 = vmul.f32 0.044715, %v9748_v20  ;;  %v3992_v43 = vmul.f32 %v3960_v0, %v9774_v7  ;;  %v4002_v0 = vmul.f32 %v3970_v54, %v9788_v35  ;;  %v3962_v54 = vmul.f32 0.044715, %v9832_v44 }
 0x830   :  { %v4018_v32 = vmul.f32 %v3986_v29, %v9748_v20 }
 0x832   :  { %v4050_v62 = vmul.f32 %v4018_v32, %v9748_v20  ;;  %v9808_v32 = vadd.f32 %v9684_v61, %v9731_v15  ;;  %v3968_v61 = vmul.f32 0.044715, %v9799_v10 }
 0x833   :  { %v3858_v27 = vpop.f32.mrf.mxu1  ;;  %v9776_v38 = vpop.f32.mrf.mxu2 }
 0x834   :  { %v9784_v19 = vadd.f32 %v3858_v27, %v9694_v48  ;;  %v4082_v23 = vadd.f32 %v4050_v62, %v9748_v20  ;;  %v4078_v27 = vadd.f32 %v4046_v1, %v9739_v39  ;;  %v4040_v1 = vmul.f32 %v4008_v56, %v9758_v16 }
 0x835   :  { %v4000_v17 = vmul.f32 %v3968_v61, %v9799_v10  ;;  %v4024_v56 = vmul.f32 %v3992_v43, %v9774_v7 }
 0x836   :  { %v3988_v3 = vmul.f32 0.044715, %v9784_v19  ;;  %v4114_v37 = vmul.f32 0.7978846, %v4082_v23  ;;  %v4076_v23 = vadd.f32 %v4044_v45, %v9745_v59  ;;  %v4110_v18 = vmul.f32 0.7978846, %v4078_v27 }
 0x837   :  { %v3964_v45 = vmul.f32 0.044715, %v9818_v57  ;;  %v4072_v40 = vadd.f32 %v4040_v1, %v9758_v16  ;;  %v4086_v27 = vmul.f32 0.7978846, %v4054_v28  ;;  %v4056_v43 = vadd.f32 %v4024_v56, %v9774_v7 }
 0x838   :  { %v4020_v29 = vmul.f32 %v3988_v3, %v9784_v19  ;;  %v4112_v3 = vmul.f32 0.7978846, %v4080_v13  ;;  %v4038_v13 = vmul.f32 %v4006_v49, %v9763_v63  ;;  %4755 = vtanh.f32 %v4114_v37 }
 0x839   :  { %v4108_v22 = vmul.f32 0.7978846, %v4076_v23  ;;  %v4036_v49 = vmul.f32 %v4004_v60, %v9780_v9  ;;  %v4104_v1 = vmul.f32 0.7978846, %v4072_v40  ;;  %v3956_v56 = vmul.f32 0.5, %v9784_v19 }
 0x83a   :  { %v4052_v62 = vmul.f32 %v4020_v29, %v9784_v19  ;;  %v3966_v29 = vmul.f32 0.044715, %v9808_v32  ;;  %4757 = vtanh.f32 %v4112_v3  ;;  %v4034_v3 = vmul.f32 %v4002_v0, %v9788_v35 }
 0x83b   :  { %v9821_v50 = vpop.f32.mrf.mxu2  ;;  %v4068_v60 = vadd.f32 %v4036_v49, %v9780_v9  ;;  %v4088_v40 = vmul.f32 0.7978846, %v4056_v43 }
 0x83c   :  { %v4084_v5 = vadd.f32 %v4052_v62, %v9784_v19  ;;  %v4074_v62 = vadd.f32 %v4042_v21, %v9752_v51  ;;  %v3998_v37 = vmul.f32 %v3966_v29, %v9808_v32  ;;  %v4032_v29 = vmul.f32 %v4000_v17, %v9799_v10 }
 0x83d   :  { %v4100_v49 = vmul.f32 0.7978846, %v4068_v60  ;;  %v3952_v60 = vmul.f32 0.5, %v9729_v53 }
 0x83e   :  { %v4116_v31 = vmul.f32 0.7978846, %v4084_v5  ;;  %v4106_v21 = vmul.f32 0.7978846, %v4074_v62  ;;  %v4070_v5 = vadd.f32 %v4038_v13, %v9763_v63  ;;  %v4756_v23 = vpop.eup %4755  ;;  %v4066_v62 = vadd.f32 %v4034_v3, %v9788_v35 }
 0x83f   :  { %v4064_v17 = vadd.f32 %v4032_v29, %v9799_v10 }
 0x840   :  { %4759 = vtanh.f32 %v4116_v31  ;;  %v3996_v31 = vmul.f32 %v3964_v45, %v9818_v57  ;;  %v4758_v28 = vpop.eup %4757  ;;  %v4102_v0 = vmul.f32 0.7978846, %v4070_v5  ;;  %v4030_v45 = vmul.f32 %v3998_v37, %v9808_v32 }
 0x841   :  { %4761 = vtanh.f32 %v4110_v18  ;;  %v3994_v18 = vmul.f32 %v3962_v54, %v9832_v44  ;;  %v4176_v5 = vadd.f32 1.0, %v4758_v28  ;;  %v4098_v3 = vmul.f32 0.7978846, %v4066_v62 }
 0x842   :  { %4763 = vtanh.f32 %v4108_v22  ;;  %v4178_v22 = vadd.f32 1.0, %v4756_v23  ;;  %v4028_v54 = vmul.f32 %v3996_v31, %v9818_v57  ;;  %v4062_v37 = vadd.f32 %v4030_v45, %v9808_v32 }
 0x843   :  { %v9847_v61 = vpop.f32.mrf.mxu2  ;;  %4765 = vtanh.f32 %v4086_v27  ;;  %v4026_v19 = vmul.f32 %v3994_v18, %v9832_v44  ;;  %v4208_v28 = vmul.f32 %v4176_v5, %v3952_v60 }
 0x844   :  { %4767 = vtanh.f32 %v4106_v21  ;;  %v3954_v21 = vmul.f32 0.5, %v9748_v20  ;;  %v4060_v20 = vadd.f32 %v4028_v54, %v9818_v57  ;;  %v4094_v18 = vmul.f32 0.7978846, %v4062_v37 }
 0x845   :  { %4769 = vtanh.f32 %v4104_v1  ;;  %v4058_v45 = vadd.f32 %v4026_v19, %v9832_v44 }
 0x846   :  { %v4760_v13 = vpop.eup %4759  ;;  %4771 = vtanh.f32 %v4102_v0  ;;  %v4210_v1 = vmul.f32 %v4178_v22, %v3954_v21  ;;  %v3948_v22 = vmul.f32 0.5, %v9745_v59  ;;  %v3946_v21 = vmul.f32 0.5, %v9752_v51 }
 0x847   :  { %v4180_v42 = vadd.f32 1.0, %v4760_v13  ;;  %v4762_v34 = vpop.eup %4761  ;;  %4773 = vtanh.f32 %v4088_v40  ;;  %v3950_v13 = vmul.f32 0.5, %v9739_v39  ;;  %v3928_v39 = vmul.f32 0.5, %v9774_v7 }
 0x848   :  { %v4764_v52 = vpop.eup %4763  ;;  %v4174_v29 = vadd.f32 1.0, %v4762_v34  ;;  %4775 = vtanh.f32 %v4100_v49  ;;  %v9878_v59 = vadd.f32 %v9847_v61, %v9698_v30  ;;  %v4090_v37 = vmul.f32 0.7978846, %v4058_v45 }
 0x849   :  { %v4212_v27 = vmul.f32 %v4180_v42, %v3956_v56  ;;  %v4766_v23 = vpop.eup %4765  ;;  %v4096_v42 = vmul.f32 0.7978846, %v4064_v17  ;;  %v4172_v0 = vadd.f32 1.0, %v4764_v52  ;;  %4777 = vtanh.f32 %v4098_v3 }
 0x84a   :  { %v4768_v31 = vpop.eup %4767  ;;  %v4150_v56 = vadd.f32 1.0, %v4766_v23  ;;  %v4206_v34 = vmul.f32 %v4174_v29, %v3950_v13  ;;  %v4092_v17 = vmul.f32 0.7978846, %v4060_v20  ;;  %v3926_v52 = vmul.f32 0.5, %v9736_v11 }
 0x84b   :  { %v3917_v43 = vpop.f32.mrf.mxu2  ;;  %4221 = vmatpush.msrb.mxu3 %v4212_v27  ;;  %v4770_v62 = vpop.eup %4769  ;;  %v4170_v40 = vadd.f32 1.0, %v4768_v31  ;;  %4779 = vtanh.f32 %v4096_v42  ;;  %v4204_v27 = vmul.f32 %v4172_v0, %v3948_v22  ;;  %v3944_v51 = vmul.f32 0.5, %v9758_v16 }
 0x84c   :  { %v9867_v53 = vadd.f32 %v3917_v43, %v9702_v14  ;;  %v4772_v49 = vpop.eup %4771  ;;  %v4168_v5 = vadd.f32 1.0, %v4770_v62  ;;  %v9874_v14 = vmul.f32 0.5, %v9832_v44  ;;  %4781 = vtanh.f32 %v4094_v18 }
 0x84d   :  { %4222 = vmatpush.msrb.mxu3 %v4210_v1  ;;  %v4774_v54 = vpop.eup %4773  ;;  %v9880_v19 = vmul.f32 %v4150_v56, %v3926_v52  ;;  %v4202_v23 = vmul.f32 %v4170_v40, %v3946_v21  ;;  %v4166_v43 = vadd.f32 1.0, %v4772_v49  ;;  %v9886_v44 = vadd.f32 %v9821_v50, %v9718_v58 }
 0x84e   :  { %v4776_v3 = vpop.eup %4775  ;;  %v3985_v11 = vmul.f32 0.044715, %v9867_v53  ;;  %4783 = vtanh.f32 %v4092_v17  ;;  %v4152_v61 = vadd.f32 1.0, %v4774_v54  ;;  %v4200_v60 = vmul.f32 %v4168_v5, %v3944_v51 }
 0x84f   :  { %4223 = vmatpush.msrb.mxu3 %v4208_v28  ;;  %v4778_v1 = vpop.eup %4777  ;;  %v3942_v29 = vmul.f32 0.5, %v9763_v63  ;;  %v4164_v31 = vadd.f32 1.0, %v4776_v3  ;;  %v3932_v42 = vmul.f32 0.5, %v9818_v57  ;;  %v9895_v16 = vadd.f32 %v9776_v38, %v9712_v4 }
 0x850   :  { %v3983_v58 = vmul.f32 0.044715, %v9878_v59  ;;  %4785 = vtanh.f32 %v4090_v37  ;;  %v3940_v28 = vmul.f32 0.5, %v9780_v9  ;;  %v4162_v13 = vadd.f32 1.0, %v4778_v1 }
 0x851   :  { %4224 = vmatpush.msrb.mxu3 %v4206_v34  ;;  %v4780_v20 = vpop.eup %4779  ;;  %v4017_v63 = vmul.f32 %v3985_v11, %v9867_v53  ;;  %v9903_v57 = vadd.f32 %v9742_v2, %v9704_v12  ;;  %v3981_v4 = vmul.f32 0.044715, %v9886_v44  ;;  %v9906_v38 = vmul.f32 %v4152_v61, %v3928_v39 }
 0x852   :  { %v4782_v0 = vpop.eup %4781  ;;  %v9911_v18 = vadd.f32 %v9724_v36, %v9726_v25  ;;  %v4196_v9 = vmul.f32 %v4164_v31, %v3940_v28  ;;  %v3938_v45 = vmul.f32 0.5, %v9788_v35  ;;  %v4160_v56 = vadd.f32 1.0, %v4780_v20 }
 0x853   :  { %v3920_v7 = vpop.f32.mrf.mxu2  ;;  %4225 = vmatpush.msrb.mxu3 %v4204_v27  ;;  %v3979_v22 = vmul.f32 0.044715, %v9895_v16  ;;  %v3934_v12 = vmul.f32 0.5, %v9808_v32  ;;  %v4015_v40 = vmul.f32 %v3983_v58, %v9878_v59  ;;  %v3936_v36 = vmul.f32 0.5, %v9799_v10 }
 0x854   :  { %v9889_v30 = vadd.f32 %v3920_v7, %v9708_v8  ;;  %v4198_v8 = vmul.f32 %v4166_v43, %v3942_v29  ;;  %v4784_v34 = vpop.eup %4783  ;;  %v4194_v17 = vmul.f32 %v4162_v13, %v3938_v45  ;;  %v4158_v25 = vadd.f32 1.0, %v4782_v0 }
 0x855   :  { %4226 = vmatpush.msrb.mxu3 %v4202_v23  ;;  %v4049_v39 = vmul.f32 %v4017_v63, %v9867_v53  ;;  %v9922_v35 = vadd.f32 %v9716_v47, %v9720_v46  ;;  %v3977_v54 = vmul.f32 0.044715, %v9903_v57  ;;  %v4013_v27 = vmul.f32 %v3981_v4, %v9886_v44  ;;  %v11068_v4 = vld [vmem:[#allocation196_spill] sm:$0xff] }
 0x856   :  { %v3987_v50 = vmul.f32 0.044715, %v9889_v30  ;;  %v4786_v52 = vpop.eup %4785  ;;  %v9931_v21 = vadd.f32 %v9710_v33, %v9714_v24  ;;  %v3975_v10 = vmul.f32 0.044715, %v9911_v18  ;;  %v4192_v5 = vmul.f32 %v4160_v56, %v3936_v36 }
 0x857   :  { %4227 = vmatpush.msrb.mxu3 %v4200_v60  ;;  %v4156_v3 = vadd.f32 1.0, %v4784_v34  ;;  %v4047_v46 = vmul.f32 %v4015_v40, %v9878_v59  ;;  %v9940_v11 = vadd.f32 %v9706_v6, %v9766_v26  ;;  %v4190_v33 = vmul.f32 %v4158_v25, %v3934_v12  ;;  %v11070_v12 = vld [vmem:[#allocation195_spill] sm:$0xff] }
 0x858   :  { %v4019_v62 = vmul.f32 %v3987_v50, %v9889_v30  ;;  %v4154_v24 = vadd.f32 1.0, %v4786_v52  ;;  %v4081_v7 = vadd.f32 %v4049_v39, %v9867_v53  ;;  %v3973_v23 = vmul.f32 0.044715, %v9922_v35  ;;  %v11067_v50 = vld [vmem:[#allocation193_spill] sm:$0xff] }
 0x859   :  { %4228 = vmatpush.msrb.mxu3 %v4198_v8  ;;  %v4045_v43 = vmul.f32 %v4013_v27, %v9886_v44  ;;  %v4009_v1 = vmul.f32 %v3977_v54, %v9903_v57  ;;  %v9949_v61 = vadd.f32 %v9700_v55, %v9731_v15  ;;  %v3971_v6 = vmul.f32 0.044715, %v9931_v21  ;;  %v11072_v54 = vld [vmem:[#allocation194_spill] sm:$0xff] }
 0x85a   :  { %v4051_v2 = vmul.f32 %v4019_v62, %v9889_v30  ;;  %v4188_v26 = vmul.f32 %v4156_v3, %v3932_v42  ;;  %v4007_v60 = vmul.f32 %v3975_v10, %v9911_v18  ;;  %v4079_v20 = vadd.f32 %v4047_v46, %v9878_v59  ;;  %v11069_v62 = vld [vmem:[#allocation192_spill] sm:$0xff]  ;;  %v11073_v27 = vld [vmem:[#allocation190_spill] sm:$0xff] }
 0x85b   :  { %v3923_v49 = vpop.f32.mrf.mxu2  ;;  %4229 = vmatpush.msrb.mxu3 %v4196_v9  ;;  %v9958_v8 = vadd.f32 %v11067_v50, %v9722_v41  ;;  %v3969_v55 = vmul.f32 0.044715, %v9940_v11  ;;  %v4186_v15 = vmul.f32 %v4154_v24, %v9874_v14  ;;  %v4113_v28 = vmul.f32 0.7978846, %v4081_v7 }
 0x85c   :  { %v9926_v32 = vadd.f32 %v3923_v49, %v9694_v48  ;;  %v4083_v47 = vadd.f32 %v4051_v2, %v9889_v30  ;;  %v4011_v48 = vmul.f32 %v3979_v22, %v9895_v16  ;;  %v4077_v13 = vadd.f32 %v4045_v43, %v9886_v44  ;;  %v11071_v2 = vld [vmem:[#allocation191_spill] sm:$0xff] }
 0x85d   :  { %4230 = vmatpush.msrb.mxu3 %v4194_v17  ;;  %v4041_v63 = vmul.f32 %v4009_v1, %v9903_v57  ;;  %v4005_v0 = vmul.f32 %v3973_v23, %v9922_v35  ;;  %v9968_v9 = vadd.f32 %v11069_v62, %v11068_v4  ;;  %v3967_v41 = vmul.f32 0.044715, %v9949_v61  ;;  %v9983_v17 = vld [vmem:[%s10046_s17] sm:$0x3] }
 0x85e   :  { %v3989_v37 = vmul.f32 0.044715, %v9926_v32  ;;  %v4115_v31 = vmul.f32 0.7978846, %v4083_v47  ;;  %v4043_v58 = vmul.f32 %v4011_v48, %v9895_v16  ;;  %v4039_v45 = vmul.f32 %v4007_v60, %v9911_v18 }
 0x85f   :  { %4231 = vmatpush.msrb.mxu3 %v4192_v5  ;;  %v4003_v14 = vmul.f32 %v3971_v6, %v9931_v21  ;;  %v4111_v34 = vmul.f32 0.7978846, %v4079_v20  ;;  %v9976_v40 = vadd.f32 %v11071_v2, %v11070_v12  ;;  %v3965_v49 = vmul.f32 0.044715, %v9958_v8 }
 0x860   :  { %v4021_v51 = vmul.f32 %v3989_v37, %v9926_v32  ;;  %4787 = vtanh.f32 %v4115_v31  ;;  %v4075_v22 = vadd.f32 %v4043_v58, %v9895_v16  ;;  %v4001_v36 = vmul.f32 %v3969_v55, %v9940_v11 }
 0x861   :  { %4232 = vmatpush.msrb.mxu3 %v4190_v33  ;;  %4789 = vtanh.f32 %v4113_v28  ;;  %v4109_v25 = vmul.f32 0.7978846, %v4077_v13  ;;  %v4073_v39 = vadd.f32 %v4041_v63, %v9903_v57  ;;  %v4037_v52 = vmul.f32 %v4005_v0, %v9922_v35 }
 0x862   :  { %v4053_v29 = vmul.f32 %v4021_v51, %v9926_v32  ;;  %v9990_v10 = vadd.f32 %v11073_v27, %v11072_v54  ;;  %v3999_v5 = vmul.f32 %v3967_v41, %v9949_v61  ;;  %v4107_v3 = vmul.f32 0.7978846, %v4075_v22 }
 0x863   :  { %4233 = vmatpush.msrb.mxu3 %v4188_v26  ;;  %v4071_v37 = vadd.f32 %v4039_v45, %v9911_v18  ;;  %v4035_v47 = vmul.f32 %v4003_v14, %v9931_v21  ;;  %v3961_v46 = vmul.f32 0.044715, %v9976_v40  ;;  %v3997_v48 = vmul.f32 %v3965_v49, %v9958_v8 }
 0x864   :  { %v4085_v42 = vadd.f32 %v4053_v29, %v9926_v32  ;;  %v4105_v24 = vmul.f32 0.7978846, %v4073_v39  ;;  %v4069_v7 = vadd.f32 %v4037_v52, %v9922_v35  ;;  %v3959_v51 = vmul.f32 0.044715, %v9990_v10 }
 0x865   :  { %4234 = vmatpush.msrb.mxu3 %v4186_v15  ;;  %v4103_v6 = vmul.f32 0.7978846, %v4071_v37  ;;  %v4067_v26 = vadd.f32 %v4035_v47, %v9931_v21  ;;  %v4031_v60 = vmul.f32 %v3999_v5, %v9949_v61  ;;  %v3957_v29 = vmul.f32 0.5, %v9926_v32 }
 0x866   :  { %v4117_v56 = vmul.f32 0.7978846, %v4085_v42  ;;  %v4788_v33 = vpop.eup %4787  ;;  %v3993_v58 = vmul.f32 %v3961_v46, %v9976_v40  ;;  %v4101_v55 = vmul.f32 0.7978846, %v4069_v7  ;;  %v4029_v28 = vmul.f32 %v3997_v48, %v9958_v8 }
 0x867   :  { %4235 = vmatpush.msrb.mxu3 %v9906_v38  ;;  %v3963_v38 = vmul.f32 0.044715, %v9968_v9  ;;  %v4790_v23 = vpop.eup %4789  ;;  %v4179_v20 = vadd.f32 1.0, %v4788_v33  ;;  %v3955_v13 = vmul.f32 0.5, %v9889_v30  ;;  %v3991_v0 = vmul.f32 %v3959_v51, %v9990_v10 }
 0x868   :  { %4791 = vtanh.f32 %v4117_v56  ;;  %v4177_v63 = vadd.f32 1.0, %v4790_v23  ;;  %v4099_v32 = vmul.f32 0.7978846, %v4067_v26  ;;  %v4063_v62 = vadd.f32 %v4031_v60, %v9949_v61 }
 0x869   :  { %4236 = vmatpush.msrb.mxu3 %v9880_v19  ;;  %4793 = vtanh.f32 %v4111_v34  ;;  %v4033_v19 = vmul.f32 %v4001_v36, %v9940_v11  ;;  %v3995_v43 = vmul.f32 %v3963_v38, %v9968_v9  ;;  %v4211_v45 = vmul.f32 %v4179_v20, %v3955_v13 }
 0x86a   :  { %4237 = vmatmul.f32.vlgmr.msrb.gmra.mxu3 %v9983_v17  ;;  %4795 = vtanh.f32 %v4109_v25  ;;  %v3953_v14 = vmul.f32 0.5, %v9867_v53  ;;  %v4061_v30 = vadd.f32 %v4029_v28, %v9958_v8  ;;  %v4025_v12 = vmul.f32 %v3993_v58, %v9976_v40 }
 0x86b   :  { %4797 = vtanh.f32 %v4107_v3  ;;  %v4065_v15 = vadd.f32 %v4033_v19, %v9940_v11  ;;  %v4027_v41 = vmul.f32 %v3995_v43, %v9968_v9  ;;  %v3951_v49 = vmul.f32 0.5, %v9878_v59 }
 0x86c   :  { %4799 = vtanh.f32 %v4105_v24  ;;  %v4209_v2 = vmul.f32 %v4177_v63, %v3953_v14  ;;  %v4095_v39 = vmul.f32 0.7978846, %v4063_v62  ;;  %v4023_v53 = vmul.f32 %v3991_v0, %v9990_v10 }
 0x86d   :  { %4801 = vtanh.f32 %v4103_v6  ;;  %v4097_v22 = vmul.f32 0.7978846, %v4065_v15  ;;  %v4059_v52 = vadd.f32 %v4027_v41, %v9968_v9  ;;  %v3949_v27 = vmul.f32 0.5, %v9886_v44 }
 0x86e   :  { %v4792_v1 = vpop.eup %4791  ;;  %4803 = vtanh.f32 %v4101_v55  ;;  %v4093_v3 = vmul.f32 0.7978846, %v4061_v30  ;;  %v4057_v37 = vadd.f32 %v4025_v12, %v9976_v40  ;;  %v3947_v47 = vmul.f32 0.5, %v9895_v16 }
 0x86f   :  { %v4181_v31 = vadd.f32 1.0, %v4792_v1  ;;  %v4794_v50 = vpop.eup %4793  ;;  %4805 = vtanh.f32 %v4099_v32  ;;  %v4091_v33 = vmul.f32 0.7978846, %v4059_v52  ;;  %v4055_v24 = vadd.f32 %v4023_v53, %v9990_v10 }
 0x870   :  { %v4796_v4 = vpop.eup %4795  ;;  %v4175_v56 = vadd.f32 1.0, %v4794_v50  ;;  %4807 = vtanh.f32 %v4097_v22  ;;  %v3945_v44 = vmul.f32 0.5, %v9903_v57  ;;  %v4089_v51 = vmul.f32 0.7978846, %v4057_v37 }
 0x871   :  { %v4213_v42 = vmul.f32 %v4181_v31, %v3957_v29  ;;  %v4798_v34 = vpop.eup %4797  ;;  %v4173_v36 = vadd.f32 1.0, %v4796_v4  ;;  %4809 = vtanh.f32 %v4095_v39  ;;  %v3943_v1 = vmul.f32 0.5, %v9911_v18 }
 0x872   :  { %v4800_v25 = vpop.eup %4799  ;;  %v4207_v54 = vmul.f32 %v4175_v56, %v3951_v49  ;;  %v4171_v38 = vadd.f32 1.0, %v4798_v34  ;;  %4811 = vtanh.f32 %v4093_v3  ;;  %v4087_v26 = vmul.f32 0.7978846, %v4055_v24 }
 0x873   :  { %4241 = vmatpush.msrb.mxu0 %v4213_v42  ;;  %v4802_v5 = vpop.eup %4801  ;;  %v4205_v59 = vmul.f32 %v4173_v36, %v3949_v27  ;;  %v4169_v46 = vadd.f32 1.0, %v4800_v25  ;;  %4813 = vtanh.f32 %v4091_v33  ;;  %v3941_v29 = vmul.f32 0.5, %v9922_v35 }
 0x874   :  { %v4804_v48 = vpop.eup %4803  ;;  %v4203_v7 = vmul.f32 %v4171_v38, %v3947_v47  ;;  %v4167_v19 = vadd.f32 1.0, %v4802_v5  ;;  %4815 = vtanh.f32 %v4089_v51  ;;  %v3939_v58 = vmul.f32 0.5, %v9931_v21 }
 0x875   :  { %4242 = vmatpush.msrb.mxu0 %v4211_v45  ;;  %v4806_v23 = vpop.eup %4805  ;;  %v4201_v43 = vmul.f32 %v4169_v46, %v3945_v44  ;;  %v4165_v6 = vadd.f32 1.0, %v4804_v48  ;;  %4817 = vtanh.f32 %v4087_v26  ;;  %v3937_v15 = vmul.f32 0.5, %v9940_v11 }
 0x876   :  { %v4808_v16 = vpop.eup %4807  ;;  %v4199_v60 = vmul.f32 %v4167_v19, %v3943_v1  ;;  %v4163_v31 = vadd.f32 1.0, %v4806_v23  ;;  %v3935_v35 = vmul.f32 0.5, %v9949_v61  ;;  %v3933_v32 = vmul.f32 0.5, %v9958_v8  ;;  %v4219_v8 = vpop.permute.xlu2 %4218 }
 0x877   :  { %4243 = vmatpush.msrb.mxu0 %v4209_v2  ;;  %v4810_v20 = vpop.eup %4809  ;;  %v4197_v57 = vmul.f32 %v4165_v6, %v3941_v29  ;;  %v4161_v50 = vadd.f32 1.0, %v4808_v16  ;;  %v3931_v45 = vmul.f32 0.5, %v9968_v9  ;;  %v3929_v56 = vmul.f32 0.5, %v9976_v40 }
 0x878   :  { %v4812_v55 = vpop.eup %4811  ;;  %v4195_v18 = vmul.f32 %v4163_v31, %v3939_v58  ;;  %v4159_v28 = vadd.f32 1.0, %v4810_v20  ;;  %v3927_v22 = vmul.f32 0.5, %v9990_v10 }
 0x879   :  { %4244 = vmatpush.msrb.mxu0 %v4207_v54  ;;  %v4814_v42 = vpop.eup %4813  ;;  %v4193_v13 = vmul.f32 %v4161_v50, %v3937_v15  ;;  %v4157_v63 = vadd.f32 1.0, %v4812_v55 }
 0x87a   :  { %v4816_v0 = vpop.eup %4815  ;;  %v4191_v4 = vmul.f32 %v4159_v28, %v3935_v35  ;;  %v4155_v21 = vadd.f32 1.0, %v4814_v42 }
 0x87b   :  { %4245 = vmatpush.msrb.mxu0 %v4205_v59  ;;  %v4818_v62 = vpop.eup %4817  ;;  %v4189_v41 = vmul.f32 %v4157_v63, %v3933_v32  ;;  %v4153_v14 = vadd.f32 1.0, %v4816_v0 }
 0x87c   :  { %v4187_v11 = vmul.f32 %v4155_v21, %v3931_v45  ;;  %v4151_v34 = vadd.f32 1.0, %v4818_v62 }
 0x87d   :  { %4246 = vmatpush.msrb.mxu0 %v4203_v7  ;;  %v4185_v61 = vmul.f32 %v4153_v14, %v3929_v56 }
 0x87e   :  { %v4183_v30 = vmul.f32 %v4151_v34, %v3927_v22 }
 0x87f   :  { %4247 = vmatpush.msrb.mxu0 %v4201_v43 }
 0x881   :  { %4248 = vmatpush.msrb.mxu0 %v4199_v60 }
 0x883   :  { %4249 = vmatpush.msrb.mxu0 %v4197_v57 }
 0x885   :  { %4250 = vmatpush.msrb.mxu0 %v4195_v18 }
 0x887   :  { %4251 = vmatpush.msrb.mxu0 %v4193_v13 }
 0x889   :  { %4252 = vmatpush.msrb.mxu0 %v4191_v4 }
 0x88b   :  { %4253 = vmatpush.msrb.mxu0 %v4189_v41 }
 0x88d   :  { %4254 = vmatpush.msrb.mxu0 %v4187_v11 }
 0x88f   :  { %4255 = vmatpush.msrb.mxu0 %v4185_v61 }
 0x891   :  { %4256 = vmatpush.msrb.mxu0 %v4183_v30 }
 0x892   :  { %4257 = vmatmul.f32.vlgmr.msrb.gmra.mxu0 %v9983_v17 }
 0x8ed   :  { %v4238_v12 = vpop.f32.mrf.mxu3 }
 0x8ee   :  { %v4239_v9 = vadd.f32 %v4238_v12, %v4219_v8 }
 0x90f   :  { %v4258_v2 = vpop.f32.mrf.mxu0 }
 0x910   :  { %v4259_v49 = vadd.f32 %v4258_v2, %v4219_v8 }
 0x912   :  { %v4263_v36 = vrot.slane %v4259_v49, 6 }
 0x914   :  { %v4265_v25 = vsel %vm4264_vm5, %v4239_v9, %v4263_v36 }
 0x915   :  { %4267 = vst [vmem:[%s10048_s19] sm:$0xf] %v4265_v25 }

</bundles_post_ra>
